<compile_context>
chip_gen: v7x
topology: tpu7x:2x2x1
jax: 0.10.0
libtpu: 0.0.40
codegen_flags: <defaults>
</compile_context>

<pallas_src>
import jax
import jax.numpy as jnp
from jax.experimental import pallas as pl
from jax.experimental.pallas import tpu as pltpu

IN_CHANNELS = 4
FEAT_BACKBONE = 2048        # xception feature dim
HID1 = 512                  # mlp1 hidden
EMB = 128                   # mutual-vector dim
INTER = EMB * EMB           # 16384
HID2 = 512                  # mlp2 hidden 1
HID3 = 256                  # mlp2 hidden 2
NUM_CLASSES = 2
BN_EPS = 1e-5               # nn.BatchNorm1d default
L2_EPS = 1e-12              # F.normalize default
FK = 1024                   # K-tile for the 2048-wide mlp1 matmul (2 steps)
TK = 4096                   # K-tile for the 16384-wide mlp2 matmul (4 steps)


# --------------------------------------------------------------------------
# Kernel 1: mlp1 (Linear 2048->512 [bf16 W], ReLU, Linear 512->128 [bf16 W])
#           + L2 normalize, for both inputs of the pair, fused with
#           combine_mlp (Linear 256->128, ReLU, folded BatchNorm1d) and the
#           per-sample outer product  mv mv^T  -> (B, 128, 128).
# The 2048-wide contraction is tiled over the grid so the W1 stream pipelines;
# the rest of the (tiny) computation runs on the last grid step.
# --------------------------------------------------------------------------
def _pair_head_kernel(x1_ref, x2_ref, w1_ref, b1_ref, w2_ref, b2_ref,
                      wc_ref, bc_ref, scc_ref, shc_ref,
                      f1_ref, f2_ref, mv_ref, inter_ref,
                      acc1_ref, acc2_ref):
    k = pl.program_id(0)

    @pl.when(k == 0)
    def _():
        acc1_ref[...] = jnp.zeros_like(acc1_ref)
        acc2_ref[...] = jnp.zeros_like(acc2_ref)

    acc1_ref[...] += jnp.dot(x1_ref[...].astype(jnp.bfloat16), w1_ref[...],
                             preferred_element_type=jnp.float32)
    acc2_ref[...] += jnp.dot(x2_ref[...].astype(jnp.bfloat16), w1_ref[...],
                             preferred_element_type=jnp.float32)

    @pl.when(k == pl.num_programs(0) - 1)
    def _():
        def head(acc):
            h = jnp.maximum(acc + b1_ref[...], 0.0)                   # ReLU
            f = jnp.dot(h.astype(jnp.bfloat16), w2_ref[...],
                        preferred_element_type=jnp.float32) + b2_ref[...]
            # F.normalize(p=2, dim=1): v / max(||v||, eps) == v * rsqrt(max(||v||^2, eps^2))
            ss = jnp.sum(f * f, axis=1, keepdims=True)
            return f * jax.lax.rsqrt(jnp.maximum(ss, L2_EPS * L2_EPS))

        f1 = head(acc1_ref[...])
        f2 = head(acc2_ref[...])
        f1_ref[...] = f1
        f2_ref[...] = f2

        # cat([f1, f2], dim=1) @ Wc  ==  f1 @ Wc[:128] + f2 @ Wc[128:]
        hc = (jnp.dot(f1, wc_ref[0:EMB, :], preferred_element_type=jnp.float32)
              + jnp.dot(f2, wc_ref[EMB:2 * EMB, :], preferred_element_type=jnp.float32)
              + bc_ref[...])
        hc = jnp.maximum(hc, 0.0)                                     # ReLU
        mv = hc * scc_ref[...] + shc_ref[...]                         # folded BN (eval)
        mv_ref[...] = mv
        # per-sample outer product -> (B, 128, 128)
        inter_ref[...] = mv[:, :, None] * mv[:, None, :]


def pair_head(xf1, xf2, w1, b1, w2, b2, wc, bc, sc_c, sh_c):
    b = xf1.shape[0]
    vec = lambda k: (0, 0)
    return pl.pallas_call(
        _pair_head_kernel,
        out_shape=(jax.ShapeDtypeStruct((b, EMB), jnp.float32),       # feat1 (normalized)
                   jax.ShapeDtypeStruct((b, EMB), jnp.float32),       # feat2 (normalized)
                   jax.ShapeDtypeStruct((b, EMB), jnp.float32),       # mutual_vector
                   jax.ShapeDtypeStruct((b, EMB, EMB), jnp.float32)), # interactions
        grid=(FEAT_BACKBONE // FK,),
        in_specs=[
            pl.BlockSpec((b, FK), lambda k: (0, k)),                  # x1 features tile
            pl.BlockSpec((b, FK), lambda k: (0, k)),                  # x2 features tile
            pl.BlockSpec((FK, HID1), lambda k: (k, 0)),               # W1 tile (bf16)
            pl.BlockSpec((1, HID1), vec),                             # b1
            pl.BlockSpec((HID1, EMB), vec),                           # W2 (bf16)
            pl.BlockSpec((1, EMB), vec),                              # b2
            pl.BlockSpec((2 * EMB, EMB), vec),                        # Wc
            pl.BlockSpec((1, EMB), vec),                              # bc
            pl.BlockSpec((1, EMB), vec),                              # BN scale (folded)
            pl.BlockSpec((1, EMB), vec),                              # BN shift (folded)
        ],
        out_specs=(pl.BlockSpec((b, EMB), vec),
                   pl.BlockSpec((b, EMB), vec),
                   pl.BlockSpec((b, EMB), vec),
                   pl.BlockSpec((b, EMB, EMB), lambda k: (0, 0, 0))),
        scratch_shapes=[pltpu.VMEM((b, HID1), jnp.float32),
                        pltpu.VMEM((b, HID1), jnp.float32)],
        compiler_params=pltpu.CompilerParams(dimension_semantics=("arbitrary",)),
    )(xf1, xf2, w1, b1, w2, b2, wc, bc, sc_c, sh_c)


# --------------------------------------------------------------------------
# Kernel 2: mlp2 (Linear 16384->512 [bf16 W], ReLU, folded BN, Dropout[eval=id],
#                 Linear 512->256 [bf16 W], ReLU, folded BN)
#           + classifier Linear 256->C.
# The 16384-wide contraction is tiled over the grid (TK=4096, bf16 W3 stream)
# and accumulated in a float32 VMEM scratch; the tail runs on the last step.
# --------------------------------------------------------------------------
def _mlp2_kernel(x_ref, w3_ref, b3_ref, sc3_ref, sh3_ref,
                 w4_ref, b4_ref, sc4_ref, sh4_ref, w5_ref, b5_ref,
                 logits_ref, acc_ref):
    k = pl.program_id(0)

    @pl.when(k == 0)
    def _():
        acc_ref[...] = jnp.zeros_like(acc_ref)

    acc_ref[...] += jnp.dot(x_ref[...].astype(jnp.bfloat16), w3_ref[...],
                            preferred_element_type=jnp.float32)

    @pl.when(k == pl.num_programs(0) - 1)
    def _():
        h = jnp.maximum(acc_ref[...] + b3_ref[...], 0.0)              # ReLU
        h = h * sc3_ref[...] + sh3_ref[...]                           # folded BN (eval)
        # Dropout(0.5) -> identity in inference mode.
        h2 = jnp.dot(h.astype(jnp.bfloat16), w4_ref[...],
                     preferred_element_type=jnp.float32) + b4_ref[...]
        h2 = jnp.maximum(h2, 0.0)                                     # ReLU
        h2 = h2 * sc4_ref[...] + sh4_ref[...]                         # folded BN (eval)
        logits_ref[...] = (jnp.dot(h2, w5_ref[...],
                                   preferred_element_type=jnp.float32)
                           + b5_ref[...])


def mlp2_classifier(x, w3, b3, sc3, sh3, w4, b4, sc4, sh4, w5, b5):
    b = x.shape[0]
    full = lambda k: (0, 0)
    return pl.pallas_call(
        _mlp2_kernel,
        out_shape=jax.ShapeDtypeStruct((b, NUM_CLASSES), jnp.float32),
        grid=(INTER // TK,),
        in_specs=[
            pl.BlockSpec((b, TK), lambda k: (0, k)),                  # interactions tile
            pl.BlockSpec((TK, HID2), lambda k: (k, 0)),               # W3 tile (bf16)
            pl.BlockSpec((1, HID2), full),                            # b3
            pl.BlockSpec((1, HID2), full),                            # BN3 scale
            pl.BlockSpec((1, HID2), full),                            # BN3 shift
            pl.BlockSpec((HID2, HID3), full),                         # W4 (bf16)
            pl.BlockSpec((1, HID3), full),                            # b4
            pl.BlockSpec((1, HID3), full),                            # BN4 scale
            pl.BlockSpec((1, HID3), full),                            # BN4 shift
            pl.BlockSpec((HID3, NUM_CLASSES), full),                  # W5
            pl.BlockSpec((1, NUM_CLASSES), full),                     # b5
        ],
        out_specs=pl.BlockSpec((b, NUM_CLASSES), full),
        scratch_shapes=[pltpu.VMEM((b, HID2), jnp.float32)],
        compiler_params=pltpu.CompilerParams(
            dimension_semantics=("arbitrary",),
            vmem_limit_bytes=32 * 1024 * 1024),
    )(x, w3, b3, sc3, sh3, w4, b4, sc4, sh4, w5, b5)


# --------------------------------------------------------------------------
# Parameters (deterministic synthetic init, BN pre-folded for inference)
# and full forward pass.
# --------------------------------------------------------------------------
def init_params(key):
    keys = iter(jax.random.split(key, 32))

    def linear(fan_in, fan_out, dtype=jnp.float32):
        w = jax.random.normal(next(keys), (fan_in, fan_out), jnp.float32) / jnp.sqrt(fan_in)
        b = 0.01 * jax.random.normal(next(keys), (1, fan_out), jnp.float32)
        return w.astype(dtype), b

    def bn_folded(n):
        # inference BatchNorm1d with synthetic running stats, folded to scale/shift
        gamma = 1.0 + 0.1 * jax.random.normal(next(keys), (1, n), jnp.float32)
        beta = 0.1 * jax.random.normal(next(keys), (1, n), jnp.float32)
        mean = 0.1 * jax.random.normal(next(keys), (1, n), jnp.float32)
        var = 0.8 + 0.4 * jax.random.uniform(next(keys), (1, n), jnp.float32)
        scale = gamma * jax.lax.rsqrt(var + BN_EPS)
        shift = beta - mean * scale
        return scale, shift

    p = {}
    p["wb"], p["bb"] = linear(IN_CHANNELS, FEAT_BACKBONE)             # backbone stand-in
    p["w1"], p["b1"] = linear(FEAT_BACKBONE, HID1, jnp.bfloat16)      # mlp1[0]
    p["w2"], p["b2"] = linear(HID1, EMB, jnp.bfloat16)                # mlp1[2]
    p["wc"], p["bc"] = linear(2 * EMB, EMB)                           # combine_mlp[0]
    p["sc_c"], p["sh_c"] = bn_folded(EMB)                             # combine_mlp[2]
    p["w3"], p["b3"] = linear(INTER, HID2, jnp.bfloat16)              # mlp2[0]
    p["sc3"], p["sh3"] = bn_folded(HID2)                              # mlp2[2]
    p["w4"], p["b4"] = linear(HID2, HID3, jnp.bfloat16)               # mlp2[4]
    p["sc4"], p["sh4"] = bn_folded(HID3)                              # mlp2[6]
    p["w5"], p["b5"] = linear(HID3, NUM_CLASSES)                      # classifier
    return p


def pairwise_forward(x1, x2, p):
    # TODO(synk): pretrained timm 'xception' backbone cannot be reproduced
    # in-script; replaced by a deterministic pooled-linear stand-in that emits
    # the (B, 2048) feature vector the rest of the network consumes.
    def backbone(x):                                                  # x: (B, C, H, W)
        pooled = jnp.mean(x, axis=(2, 3))                             # global avg pool
        return pooled @ p["wb"] + p["bb"]                             # (B, 2048)

    b = x1.shape[0]
    feat1, feat2, mutual_vector, inter = pair_head(
        backbone(x1), backbone(x2),
        p["w1"], p["b1"], p["w2"], p["b2"],
        p["wc"], p["bc"], p["sc_c"], p["sh_c"])

    inter_flat = inter.reshape(b, INTER)                              # free bitcast view

    logits = mlp2_classifier(
        inter_flat,
        p["w3"], p["b3"], p["sc3"], p["sh3"],
        p["w4"], p["b4"], p["sc4"], p["sh4"],
        p["w5"], p["b5"])
    return logits, mutual_vector, feat1, feat2


if __name__ == "__main__":
    key = jax.random.PRNGKey(0)
    kx1, kx2, kp = jax.random.split(key, 3)
    x1 = jax.random.normal(kx1, (2, IN_CHANNELS, 16, 16), jnp.float32)
    x2 = jax.random.normal(kx2, (2, IN_CHANNELS, 16, 16), jnp.float32)
    params = init_params(kp)

    logits, mv, f1, f2 = jax.jit(pairwise_forward)(x1, x2, params)
    jax.block_until_ready((logits, mv, f1, f2))

    assert logits.shape == (2, NUM_CLASSES)
    assert mv.shape == (2, EMB)
    assert f1.shape == (2, EMB) and f2.shape == (2, EMB)
    assert bool(jnp.all(jnp.isfinite(logits)))
    print("KERNEL_OK")
</pallas_src>

<mosaic_0001>
module attributes {stable_mosaic.version = 11 : i64} {
  func.func @_pair_head_kernel(%arg0: i32, %arg1: memref<2x1024xf32, #tpu.memory_space<vmem>>, %arg2: memref<2x1024xf32, #tpu.memory_space<vmem>>, %arg3: memref<1024x512xbf16, #tpu.memory_space<vmem>>, %arg4: memref<1x512xf32, #tpu.memory_space<vmem>>, %arg5: memref<512x128xbf16, #tpu.memory_space<vmem>>, %arg6: memref<1x128xf32, #tpu.memory_space<vmem>>, %arg7: memref<256x128xf32, #tpu.memory_space<vmem>>, %arg8: memref<1x128xf32, #tpu.memory_space<vmem>>, %arg9: memref<1x128xf32, #tpu.memory_space<vmem>>, %arg10: memref<1x128xf32, #tpu.memory_space<vmem>>, %arg11: memref<2x128xf32, #tpu.memory_space<vmem>>, %arg12: memref<2x128xf32, #tpu.memory_space<vmem>>, %arg13: memref<2x128xf32, #tpu.memory_space<vmem>>, %arg14: memref<2x128x128xf32, #tpu.memory_space<vmem>>, %arg15: memref<2x512xf32, #tpu.memory_space<vmem>>, %arg16: memref<2x512xf32, #tpu.memory_space<vmem>>) attributes {dimension_semantics = [#tpu.dimension_semantics<arbitrary>], iteration_bounds = array<i64: 2>, scalar_prefetch = 0 : i64, scratch_operands = 2 : i64, tpu.core_type = #tpu.core_type<tc>, window_params = [{transform_indices = @transform_0, window_bounds = array<i64: 2, 1024>}, {transform_indices = @transform_1, window_bounds = array<i64: 2, 1024>}, {transform_indices = @transform_2, window_bounds = array<i64: 1024, 512>}, {pipeline_mode = #tpu.pipeline_mode<synchronous>, transform_indices = @transform_3, window_bounds = array<i64: 1, 512>}, {pipeline_mode = #tpu.pipeline_mode<synchronous>, transform_indices = @transform_4, window_bounds = array<i64: 512, 128>}, {pipeline_mode = #tpu.pipeline_mode<synchronous>, transform_indices = @transform_5, window_bounds = array<i64: 1, 128>}, {pipeline_mode = #tpu.pipeline_mode<synchronous>, transform_indices = @transform_6, window_bounds = array<i64: 256, 128>}, {pipeline_mode = #tpu.pipeline_mode<synchronous>, transform_indices = @transform_7, window_bounds = array<i64: 1, 128>}, {pipeline_mode = #tpu.pipeline_mode<synchronous>, transform_indices = @transform_8, window_bounds = array<i64: 1, 128>}, {pipeline_mode = #tpu.pipeline_mode<synchronous>, transform_indices = @transform_9, window_bounds = array<i64: 1, 128>}, {pipeline_mode = #tpu.pipeline_mode<synchronous>, transform_indices = @transform_10, window_bounds = array<i64: 2, 128>}, {pipeline_mode = #tpu.pipeline_mode<synchronous>, transform_indices = @transform_11, window_bounds = array<i64: 2, 128>}, {pipeline_mode = #tpu.pipeline_mode<synchronous>, transform_indices = @transform_12, window_bounds = array<i64: 2, 128>}, {pipeline_mode = #tpu.pipeline_mode<synchronous>, transform_indices = @transform_13, window_bounds = array<i64: 2, 128, 128>}]} {
    %c0_i32 = arith.constant 0 : i32
    %0 = arith.cmpi eq, %arg0, %c0_i32 : i32
    %1 = arith.extui %0 : i1 to i32
    %c0_i32_0 = arith.constant 0 : i32
    %2 = arith.cmpi ne, %1, %c0_i32_0 : i32
    scf.if %2 {
      %cst_18 = arith.constant 0.000000e+00 : f32
      %20 = vector.broadcast %cst_18 : f32 to vector<2x512xf32>
      %c0_19 = arith.constant 0 : index
      %c0_20 = arith.constant 0 : index
      %21 = vector.load %arg15[%c0_19, %c0_20] : memref<2x512xf32, #tpu.memory_space<vmem>>, vector<2x512xf32>
      tpu.vector_store %arg15[%c0_19, %c0_20], %20 {strides = array<i32>} : memref<2x512xf32, #tpu.memory_space<vmem>>, vector<2x512xf32>,
      %cst_21 = arith.constant 0.000000e+00 : f32
      %22 = vector.broadcast %cst_21 : f32 to vector<2x512xf32>
      %c0_22 = arith.constant 0 : index
      %c0_23 = arith.constant 0 : index
      %23 = vector.load %arg16[%c0_22, %c0_23] : memref<2x512xf32, #tpu.memory_space<vmem>>, vector<2x512xf32>
      tpu.vector_store %arg16[%c0_22, %c0_23], %22 {strides = array<i32>} : memref<2x512xf32, #tpu.memory_space<vmem>>, vector<2x512xf32>,
    } else {
    }
    %c0 = arith.constant 0 : index
    %c0_1 = arith.constant 0 : index
    %3 = vector.load %arg15[%c0, %c0_1] : memref<2x512xf32, #tpu.memory_space<vmem>>, vector<2x512xf32>
    %c0_2 = arith.constant 0 : index
    %c0_3 = arith.constant 0 : index
    %4 = vector.load %arg1[%c0_2, %c0_3] : memref<2x1024xf32, #tpu.memory_space<vmem>>, vector<2x1024xf32>
    %5 = arith.truncf %4 : vector<2x1024xf32> to vector<2x1024xbf16>
    %c0_4 = arith.constant 0 : index
    %c0_5 = arith.constant 0 : index
    %6 = vector.load %arg3[%c0_4, %c0_5] : memref<1024x512xbf16, #tpu.memory_space<vmem>>, vector<1024x512xbf16>
    %cst = arith.constant dense<0.000000e+00> : vector<2x512xf32>
    %7 = tpu.matmul %5, %6, %cst {dimension_numbers = #tpu.dot_dimension_numbers<[1], [0], [0], [1], [0, 0, 1, 1], [], []>} : vector<2x1024xbf16>, vector<1024x512xbf16>, vector<2x512xf32> -> vector<2x512xf32>
    %8 = arith.addf %3, %7 : vector<2x512xf32>
    %c0_6 = arith.constant 0 : index
    %c0_7 = arith.constant 0 : index
    %9 = vector.load %arg15[%c0_6, %c0_7] : memref<2x512xf32, #tpu.memory_space<vmem>>, vector<2x512xf32>
    tpu.vector_store %arg15[%c0_6, %c0_7], %8 {strides = array<i32>} : memref<2x512xf32, #tpu.memory_space<vmem>>, vector<2x512xf32>,
    %c0_8 = arith.constant 0 : index
    %c0_9 = arith.constant 0 : index
    %10 = vector.load %arg16[%c0_8, %c0_9] : memref<2x512xf32, #tpu.memory_space<vmem>>, vector<2x512xf32>
    %c0_10 = arith.constant 0 : index
    %c0_11 = arith.constant 0 : index
    %11 = vector.load %arg2[%c0_10, %c0_11] : memref<2x1024xf32, #tpu.memory_space<vmem>>, vector<2x1024xf32>
    %12 = arith.truncf %11 : vector<2x1024xf32> to vector<2x1024xbf16>
    %c0_12 = arith.constant 0 : index
    %c0_13 = arith.constant 0 : index
    %13 = vector.load %arg3[%c0_12, %c0_13] : memref<1024x512xbf16, #tpu.memory_space<vmem>>, vector<1024x512xbf16>
    %cst_14 = arith.constant dense<0.000000e+00> : vector<2x512xf32>
    %14 = tpu.matmul %12, %13, %cst_14 {dimension_numbers = #tpu.dot_dimension_numbers<[1], [0], [0], [1], [0, 0, 1, 1], [], []>} : vector<2x1024xbf16>, vector<1024x512xbf16>, vector<2x512xf32> -> vector<2x512xf32>
    %15 = arith.addf %10, %14 : vector<2x512xf32>
    %c0_15 = arith.constant 0 : index
    %c0_16 = arith.constant 0 : index
    %16 = vector.load %arg16[%c0_15, %c0_16] : memref<2x512xf32, #tpu.memory_space<vmem>>, vector<2x512xf32>
    tpu.vector_store %arg16[%c0_15, %c0_16], %15 {strides = array<i32>} : memref<2x512xf32, #tpu.memory_space<vmem>>, vector<2x512xf32>,
    %c1_i32 = arith.constant 1 : i32
    %17 = arith.cmpi eq, %arg0, %c1_i32 : i32
    %18 = arith.extui %17 : i1 to i32
    %c0_i32_17 = arith.constant 0 : i32
    %19 = arith.cmpi ne, %18, %c0_i32_17 : i32
    scf.if %19 {
      %c0_18 = arith.constant 0 : index
      %c0_19 = arith.constant 0 : index
      %20 = vector.load %arg15[%c0_18, %c0_19] : memref<2x512xf32, #tpu.memory_space<vmem>>, vector<2x512xf32>
      %c0_20 = arith.constant 0 : index
      %c0_21 = arith.constant 0 : index
      %21 = vector.load %arg4[%c0_20, %c0_21] : memref<1x512xf32, #tpu.memory_space<vmem>>, vector<1x512xf32>
      %22 = vector.broadcast %21 : vector<1x512xf32> to vector<2x512xf32>
      %23 = arith.addf %20, %22 : vector<2x512xf32>
      %cst_22 = arith.constant 0.000000e+00 : f32
      %24 = vector.broadcast %cst_22 : f32 to vector<2x512xf32>
      %25 = arith.maximumf %23, %24 : vector<2x512xf32>
      %26 = arith.truncf %25 : vector<2x512xf32> to vector<2x512xbf16>
      %c0_23 = arith.constant 0 : index
      %c0_24 = arith.constant 0 : index
      %27 = vector.load %arg5[%c0_23, %c0_24] : memref<512x128xbf16, #tpu.memory_space<vmem>>, vector<512x128xbf16>
      %cst_25 = arith.constant dense<0.000000e+00> : vector<2x128xf32>
      %28 = tpu.matmul %26, %27, %cst_25 {dimension_numbers = #tpu.dot_dimension_numbers<[1], [0], [0], [1], [0, 0, 1, 1], [], []>} : vector<2x512xbf16>, vector<512x128xbf16>, vector<2x128xf32> -> vector<2x128xf32>
      %c0_26 = arith.constant 0 : index
      %c0_27 = arith.constant 0 : index
      %29 = vector.load %arg6[%c0_26, %c0_27] : memref<1x128xf32, #tpu.memory_space<vmem>>, vector<1x128xf32>
      %30 = vector.broadcast %29 : vector<1x128xf32> to vector<2x128xf32>
      %31 = arith.addf %28, %30 : vector<2x128xf32>
      %32 = arith.mulf %31, %31 : vector<2x128xf32>
      %cst_28 = arith.constant dense<0.000000e+00> : vector<2xf32>
      %33 = vector.multi_reduction <add>, %32, %cst_28 [1] : vector<2x128xf32> to vector<2xf32>
      %34 = vector.shape_cast %33 : vector<2xf32> to vector<2x1xf32>
      %cst_29 = arith.constant 1.000000e-24 : f32
      %35 = vector.broadcast %cst_29 : f32 to vector<2x1xf32>
      %36 = arith.maximumf %34, %35 : vector<2x1xf32>
      %37 = math.rsqrt %36 : vector<2x1xf32>
      %38 = vector.broadcast %37 : vector<2x1xf32> to vector<2x128xf32>
      %39 = arith.mulf %31, %38 : vector<2x128xf32>
      %c0_30 = arith.constant 0 : index
      %c0_31 = arith.constant 0 : index
      %40 = vector.load %arg16[%c0_30, %c0_31] : memref<2x512xf32, #tpu.memory_space<vmem>>, vector<2x512xf32>
      %c0_32 = arith.constant 0 : index
      %c0_33 = arith.constant 0 : index
      %41 = vector.load %arg4[%c0_32, %c0_33] : memref<1x512xf32, #tpu.memory_space<vmem>>, vector<1x512xf32>
      %42 = vector.broadcast %41 : vector<1x512xf32> to vector<2x512xf32>
      %43 = arith.addf %40, %42 : vector<2x512xf32>
      %cst_34 = arith.constant 0.000000e+00 : f32
      %44 = vector.broadcast %cst_34 : f32 to vector<2x512xf32>
      %45 = arith.maximumf %43, %44 : vector<2x512xf32>
      %46 = arith.truncf %45 : vector<2x512xf32> to vector<2x512xbf16>
      %c0_35 = arith.constant 0 : index
      %c0_36 = arith.constant 0 : index
      %47 = vector.load %arg5[%c0_35, %c0_36] : memref<512x128xbf16, #tpu.memory_space<vmem>>, vector<512x128xbf16>
      %cst_37 = arith.constant dense<0.000000e+00> : vector<2x128xf32>
      %48 = tpu.matmul %46, %47, %cst_37 {dimension_numbers = #tpu.dot_dimension_numbers<[1], [0], [0], [1], [0, 0, 1, 1], [], []>} : vector<2x512xbf16>, vector<512x128xbf16>, vector<2x128xf32> -> vector<2x128xf32>
      %c0_38 = arith.constant 0 : index
      %c0_39 = arith.constant 0 : index
      %49 = vector.load %arg6[%c0_38, %c0_39] : memref<1x128xf32, #tpu.memory_space<vmem>>, vector<1x128xf32>
      %50 = vector.broadcast %49 : vector<1x128xf32> to vector<2x128xf32>
      %51 = arith.addf %48, %50 : vector<2x128xf32>
      %52 = arith.mulf %51, %51 : vector<2x128xf32>
      %cst_40 = arith.constant dense<0.000000e+00> : vector<2xf32>
      %53 = vector.multi_reduction <add>, %52, %cst_40 [1] : vector<2x128xf32> to vector<2xf32>
      %54 = vector.shape_cast %53 : vector<2xf32> to vector<2x1xf32>
      %cst_41 = arith.constant 1.000000e-24 : f32
      %55 = vector.broadcast %cst_41 : f32 to vector<2x1xf32>
      %56 = arith.maximumf %54, %55 : vector<2x1xf32>
      %57 = math.rsqrt %56 : vector<2x1xf32>
      %58 = vector.broadcast %57 : vector<2x1xf32> to vector<2x128xf32>
      %59 = arith.mulf %51, %58 : vector<2x128xf32>
      %c0_42 = arith.constant 0 : index
      %c0_43 = arith.constant 0 : index
      %60 = vector.load %arg11[%c0_42, %c0_43] : memref<2x128xf32, #tpu.memory_space<vmem>>, vector<2x128xf32>
      tpu.vector_store %arg11[%c0_42, %c0_43], %39 {strides = array<i32>} : memref<2x128xf32, #tpu.memory_space<vmem>>, vector<2x128xf32>,
      %c0_44 = arith.constant 0 : index
      %c0_45 = arith.constant 0 : index
      %61 = vector.load %arg12[%c0_44, %c0_45] : memref<2x128xf32, #tpu.memory_space<vmem>>, vector<2x128xf32>
      tpu.vector_store %arg12[%c0_44, %c0_45], %59 {strides = array<i32>} : memref<2x128xf32, #tpu.memory_space<vmem>>, vector<2x128xf32>,
      %c0_46 = arith.constant 0 : index
      %c0_47 = arith.constant 0 : index
      %62 = vector.load %arg7[%c0_46, %c0_47] : memref<256x128xf32, #tpu.memory_space<vmem>>, vector<128x128xf32>
      %cst_48 = arith.constant dense<0.000000e+00> : vector<2x128xf32>
      %63 = tpu.matmul %39, %62, %cst_48 {dimension_numbers = #tpu.dot_dimension_numbers<[1], [0], [0], [1], [0, 0, 1, 1], [], []>} : vector<2x128xf32>, vector<128x128xf32>, vector<2x128xf32> -> vector<2x128xf32>
      %c128 = arith.constant 128 : index
      %c0_49 = arith.constant 0 : index
      %64 = vector.load %arg7[%c128, %c0_49] : memref<256x128xf32, #tpu.memory_space<vmem>>, vector<128x128xf32>
      %cst_50 = arith.constant dense<0.000000e+00> : vector<2x128xf32>
      %65 = tpu.matmul %59, %64, %cst_50 {dimension_numbers = #tpu.dot_dimension_numbers<[1], [0], [0], [1], [0, 0, 1, 1], [], []>} : vector<2x128xf32>, vector<128x128xf32>, vector<2x128xf32> -> vector<2x128xf32>
      %66 = arith.addf %63, %65 : vector<2x128xf32>
      %c0_51 = arith.constant 0 : index
      %c0_52 = arith.constant 0 : index
      %67 = vector.load %arg8[%c0_51, %c0_52] : memref<1x128xf32, #tpu.memory_space<vmem>>, vector<1x128xf32>
      %68 = vector.broadcast %67 : vector<1x128xf32> to vector<2x128xf32>
      %69 = arith.addf %66, %68 : vector<2x128xf32>
      %cst_53 = arith.constant 0.000000e+00 : f32
      %70 = vector.broadcast %cst_53 : f32 to vector<2x128xf32>
      %71 = arith.maximumf %69, %70 : vector<2x128xf32>
      %c0_54 = arith.constant 0 : index
      %c0_55 = arith.constant 0 : index
      %72 = vector.load %arg9[%c0_54, %c0_55] : memref<1x128xf32, #tpu.memory_space<vmem>>, vector<1x128xf32>
      %73 = vector.broadcast %72 : vector<1x128xf32> to vector<2x128xf32>
      %74 = arith.mulf %71, %73 : vector<2x128xf32>
      %c0_56 = arith.constant 0 : index
      %c0_57 = arith.constant 0 : index
      %75 = vector.load %arg10[%c0_56, %c0_57] : memref<1x128xf32, #tpu.memory_space<vmem>>, vector<1x128xf32>
      %76 = vector.broadcast %75 : vector<1x128xf32> to vector<2x128xf32>
      %77 = arith.addf %74, %76 : vector<2x128xf32>
      %c0_58 = arith.constant 0 : index
      %c0_59 = arith.constant 0 : index
      %78 = vector.load %arg13[%c0_58, %c0_59] : memref<2x128xf32, #tpu.memory_space<vmem>>, vector<2x128xf32>
      tpu.vector_store %arg13[%c0_58, %c0_59], %77 {strides = array<i32>} : memref<2x128xf32, #tpu.memory_space<vmem>>, vector<2x128xf32>,
      %79 = vector.shape_cast %77 : vector<2x128xf32> to vector<2x128x1xf32>
      %80 = vector.shape_cast %77 : vector<2x128xf32> to vector<2x1x128xf32>
      %81 = vector.broadcast %79 : vector<2x128x1xf32> to vector<2x128x128xf32>
      %82 = vector.broadcast %80 : vector<2x1x128xf32> to vector<2x128x128xf32>
      %83 = arith.mulf %81, %82 : vector<2x128x128xf32>
      %c0_60 = arith.constant 0 : index
      %c0_61 = arith.constant 0 : index
      %c0_62 = arith.constant 0 : index
      %84 = vector.load %arg14[%c0_60, %c0_61, %c0_62] : memref<2x128x128xf32, #tpu.memory_space<vmem>>, vector<2x128x128xf32>
      tpu.vector_store %arg14[%c0_60, %c0_61, %c0_62], %83 {strides = array<i32>} : memref<2x128x128xf32, #tpu.memory_space<vmem>>, vector<2x128x128xf32>,
    } else {
    }
    return
  }
  func.func @transform_0(%arg0: i32) -> (i32, i32) {
    %c0_i32 = arith.constant 0 : i32
    %c0_i32_0 = arith.constant 0 : i32
    return %c0_i32, %arg0 : i32, i32
  }
  func.func @transform_1(%arg0: i32) -> (i32, i32) {
    %c0_i32 = arith.constant 0 : i32
    %c0_i32_0 = arith.constant 0 : i32
    return %c0_i32, %arg0 : i32, i32
  }
  func.func @transform_2(%arg0: i32) -> (i32, i32) {
    %c0_i32 = arith.constant 0 : i32
    %c0_i32_0 = arith.constant 0 : i32
    return %arg0, %c0_i32 : i32, i32
  }
  func.func @transform_3(%arg0: i32) -> (i32, i32) {
    %c0_i32 = arith.constant 0 : i32
    %c0_i32_0 = arith.constant 0 : i32
    %c0_i32_1 = arith.constant 0 : i32
    return %c0_i32, %c0_i32_0 : i32, i32
  }
  func.func @transform_4(%arg0: i32) -> (i32, i32) {
    %c0_i32 = arith.constant 0 : i32
    %c0_i32_0 = arith.constant 0 : i32
    %c0_i32_1 = arith.constant 0 : i32
    return %c0_i32, %c0_i32_0 : i32, i32
  }
  func.func @transform_5(%arg0: i32) -> (i32, i32) {
    %c0_i32 = arith.constant 0 : i32
    %c0_i32_0 = arith.constant 0 : i32
    %c0_i32_1 = arith.constant 0 : i32
    return %c0_i32, %c0_i32_0 : i32, i32
  }
  func.func @transform_6(%arg0: i32) -> (i32, i32) {
    %c0_i32 = arith.constant 0 : i32
    %c0_i32_0 = arith.constant 0 : i32
    %c0_i32_1 = arith.constant 0 : i32
    return %c0_i32, %c0_i32_0 : i32, i32
  }
  func.func @transform_7(%arg0: i32) -> (i32, i32) {
    %c0_i32 = arith.constant 0 : i32
    %c0_i32_0 = arith.constant 0 : i32
    %c0_i32_1 = arith.constant 0 : i32
    return %c0_i32, %c0_i32_0 : i32, i32
  }
  func.func @transform_8(%arg0: i32) -> (i32, i32) {
    %c0_i32 = arith.constant 0 : i32
    %c0_i32_0 = arith.constant 0 : i32
    %c0_i32_1 = arith.constant 0 : i32
    return %c0_i32, %c0_i32_0 : i32, i32
  }
  func.func @transform_9(%arg0: i32) -> (i32, i32) {
    %c0_i32 = arith.constant 0 : i32
    %c0_i32_0 = arith.constant 0 : i32
    %c0_i32_1 = arith.constant 0 : i32
    return %c0_i32, %c0_i32_0 : i32, i32
  }
  func.func @transform_10(%arg0: i32) -> (i32, i32) {
    %c0_i32 = arith.constant 0 : i32
    %c0_i32_0 = arith.constant 0 : i32
    %c0_i32_1 = arith.constant 0 : i32
    return %c0_i32, %c0_i32_0 : i32, i32
  }
  func.func @transform_11(%arg0: i32) -> (i32, i32) {
    %c0_i32 = arith.constant 0 : i32
    %c0_i32_0 = arith.constant 0 : i32
    %c0_i32_1 = arith.constant 0 : i32
    return %c0_i32, %c0_i32_0 : i32, i32
  }
  func.func @transform_12(%arg0: i32) -> (i32, i32) {
    %c0_i32 = arith.constant 0 : i32
    %c0_i32_0 = arith.constant 0 : i32
    %c0_i32_1 = arith.constant 0 : i32
    return %c0_i32, %c0_i32_0 : i32, i32
  }
  func.func @transform_13(%arg0: i32) -> (i32, i32, i32) {
    %c0_i32 = arith.constant 0 : i32
    %c0_i32_0 = arith.constant 0 : i32
    %c0_i32_1 = arith.constant 0 : i32
    %c0_i32_2 = arith.constant 0 : i32
    return %c0_i32, %c0_i32_0, %c0_i32_1 : i32, i32, i32
  }
}

module attributes {stable_mosaic.version = 11 : i64} {
  func.func @_mlp2_kernel(%arg0: i32, %arg1: memref<2x4096xf32, #tpu.memory_space<vmem>>, %arg2: memref<4096x512xbf16, #tpu.memory_space<vmem>>, %arg3: memref<1x512xf32, #tpu.memory_space<vmem>>, %arg4: memref<1x512xf32, #tpu.memory_space<vmem>>, %arg5: memref<1x512xf32, #tpu.memory_space<vmem>>, %arg6: memref<512x256xbf16, #tpu.memory_space<vmem>>, %arg7: memref<1x256xf32, #tpu.memory_space<vmem>>, %arg8: memref<1x256xf32, #tpu.memory_space<vmem>>, %arg9: memref<1x256xf32, #tpu.memory_space<vmem>>, %arg10: memref<256x2xf32, #tpu.memory_space<vmem>>, %arg11: memref<1x2xf32, #tpu.memory_space<vmem>>, %arg12: memref<2x2xf32, #tpu.memory_space<vmem>>, %arg13: memref<2x512xf32, #tpu.memory_space<vmem>>) attributes {dimension_semantics = [#tpu.dimension_semantics<arbitrary>], iteration_bounds = array<i64: 4>, scalar_prefetch = 0 : i64, scratch_operands = 1 : i64, tpu.core_type = #tpu.core_type<tc>, window_params = [{transform_indices = @transform_0, window_bounds = array<i64: 2, 4096>}, {transform_indices = @transform_1, window_bounds = array<i64: 4096, 512>}, {pipeline_mode = #tpu.pipeline_mode<synchronous>, transform_indices = @transform_2, window_bounds = array<i64: 1, 512>}, {pipeline_mode = #tpu.pipeline_mode<synchronous>, transform_indices = @transform_3, window_bounds = array<i64: 1, 512>}, {pipeline_mode = #tpu.pipeline_mode<synchronous>, transform_indices = @transform_4, window_bounds = array<i64: 1, 512>}, {pipeline_mode = #tpu.pipeline_mode<synchronous>, transform_indices = @transform_5, window_bounds = array<i64: 512, 256>}, {pipeline_mode = #tpu.pipeline_mode<synchronous>, transform_indices = @transform_6, window_bounds = array<i64: 1, 256>}, {pipeline_mode = #tpu.pipeline_mode<synchronous>, transform_indices = @transform_7, window_bounds = array<i64: 1, 256>}, {pipeline_mode = #tpu.pipeline_mode<synchronous>, transform_indices = @transform_8, window_bounds = array<i64: 1, 256>}, {pipeline_mode = #tpu.pipeline_mode<synchronous>, transform_indices = @transform_9, window_bounds = array<i64: 256, 2>}, {pipeline_mode = #tpu.pipeline_mode<synchronous>, transform_indices = @transform_10, window_bounds = array<i64: 1, 2>}, {pipeline_mode = #tpu.pipeline_mode<synchronous>, transform_indices = @transform_11, window_bounds = array<i64: 2, 2>}]} {
    %c0_i32 = arith.constant 0 : i32
    %0 = arith.cmpi eq, %arg0, %c0_i32 : i32
    %1 = arith.extui %0 : i1 to i32
    %c0_i32_0 = arith.constant 0 : i32
    %2 = arith.cmpi ne, %1, %c0_i32_0 : i32
    scf.if %2 {
      %cst_9 = arith.constant 0.000000e+00 : f32
      %13 = vector.broadcast %cst_9 : f32 to vector<2x512xf32>
      %c0_10 = arith.constant 0 : index
      %c0_11 = arith.constant 0 : index
      %14 = vector.load %arg13[%c0_10, %c0_11] : memref<2x512xf32, #tpu.memory_space<vmem>>, vector<2x512xf32>
      tpu.vector_store %arg13[%c0_10, %c0_11], %13 {strides = array<i32>} : memref<2x512xf32, #tpu.memory_space<vmem>>, vector<2x512xf32>,
    } else {
    }
    %c0 = arith.constant 0 : index
    %c0_1 = arith.constant 0 : index
    %3 = vector.load %arg13[%c0, %c0_1] : memref<2x512xf32, #tpu.memory_space<vmem>>, vector<2x512xf32>
    %c0_2 = arith.constant 0 : index
    %c0_3 = arith.constant 0 : index
    %4 = vector.load %arg1[%c0_2, %c0_3] : memref<2x4096xf32, #tpu.memory_space<vmem>>, vector<2x4096xf32>
    %5 = arith.truncf %4 : vector<2x4096xf32> to vector<2x4096xbf16>
    %c0_4 = arith.constant 0 : index
    %c0_5 = arith.constant 0 : index
    %6 = vector.load %arg2[%c0_4, %c0_5] : memref<4096x512xbf16, #tpu.memory_space<vmem>>, vector<4096x512xbf16>
    %cst = arith.constant dense<0.000000e+00> : vector<2x512xf32>
    %7 = tpu.matmul %5, %6, %cst {dimension_numbers = #tpu.dot_dimension_numbers<[1], [0], [0], [1], [0, 0, 1, 1], [], []>} : vector<2x4096xbf16>, vector<4096x512xbf16>, vector<2x512xf32> -> vector<2x512xf32>
    %8 = arith.addf %3, %7 : vector<2x512xf32>
    %c0_6 = arith.constant 0 : index
    %c0_7 = arith.constant 0 : index
    %9 = vector.load %arg13[%c0_6, %c0_7] : memref<2x512xf32, #tpu.memory_space<vmem>>, vector<2x512xf32>
    tpu.vector_store %arg13[%c0_6, %c0_7], %8 {strides = array<i32>} : memref<2x512xf32, #tpu.memory_space<vmem>>, vector<2x512xf32>,
    %c3_i32 = arith.constant 3 : i32
    %10 = arith.cmpi eq, %arg0, %c3_i32 : i32
    %11 = arith.extui %10 : i1 to i32
    %c0_i32_8 = arith.constant 0 : i32
    %12 = arith.cmpi ne, %11, %c0_i32_8 : i32
    scf.if %12 {
      %c0_9 = arith.constant 0 : index
      %c0_10 = arith.constant 0 : index
      %13 = vector.load %arg13[%c0_9, %c0_10] : memref<2x512xf32, #tpu.memory_space<vmem>>, vector<2x512xf32>
      %c0_11 = arith.constant 0 : index
      %c0_12 = arith.constant 0 : index
      %14 = vector.load %arg3[%c0_11, %c0_12] : memref<1x512xf32, #tpu.memory_space<vmem>>, vector<1x512xf32>
      %15 = vector.broadcast %14 : vector<1x512xf32> to vector<2x512xf32>
      %16 = arith.addf %13, %15 : vector<2x512xf32>
      %cst_13 = arith.constant 0.000000e+00 : f32
      %17 = vector.broadcast %cst_13 : f32 to vector<2x512xf32>
      %18 = arith.maximumf %16, %17 : vector<2x512xf32>
      %c0_14 = arith.constant 0 : index
      %c0_15 = arith.constant 0 : index
      %19 = vector.load %arg4[%c0_14, %c0_15] : memref<1x512xf32, #tpu.memory_space<vmem>>, vector<1x512xf32>
      %20 = vector.broadcast %19 : vector<1x512xf32> to vector<2x512xf32>
      %21 = arith.mulf %18, %20 : vector<2x512xf32>
      %c0_16 = arith.constant 0 : index
      %c0_17 = arith.constant 0 : index
      %22 = vector.load %arg5[%c0_16, %c0_17] : memref<1x512xf32, #tpu.memory_space<vmem>>, vector<1x512xf32>
      %23 = vector.broadcast %22 : vector<1x512xf32> to vector<2x512xf32>
      %24 = arith.addf %21, %23 : vector<2x512xf32>
      %25 = arith.truncf %24 : vector<2x512xf32> to vector<2x512xbf16>
      %c0_18 = arith.constant 0 : index
      %c0_19 = arith.constant 0 : index
      %26 = vector.load %arg6[%c0_18, %c0_19] : memref<512x256xbf16, #tpu.memory_space<vmem>>, vector<512x256xbf16>
      %cst_20 = arith.constant dense<0.000000e+00> : vector<2x256xf32>
      %27 = tpu.matmul %25, %26, %cst_20 {dimension_numbers = #tpu.dot_dimension_numbers<[1], [0], [0], [1], [0, 0, 1, 1], [], []>} : vector<2x512xbf16>, vector<512x256xbf16>, vector<2x256xf32> -> vector<2x256xf32>
      %c0_21 = arith.constant 0 : index
      %c0_22 = arith.constant 0 : index
      %28 = vector.load %arg7[%c0_21, %c0_22] : memref<1x256xf32, #tpu.memory_space<vmem>>, vector<1x256xf32>
      %29 = vector.broadcast %28 : vector<1x256xf32> to vector<2x256xf32>
      %30 = arith.addf %27, %29 : vector<2x256xf32>
      %cst_23 = arith.constant 0.000000e+00 : f32
      %31 = vector.broadcast %cst_23 : f32 to vector<2x256xf32>
      %32 = arith.maximumf %30, %31 : vector<2x256xf32>
      %c0_24 = arith.constant 0 : index
      %c0_25 = arith.constant 0 : index
      %33 = vector.load %arg8[%c0_24, %c0_25] : memref<1x256xf32, #tpu.memory_space<vmem>>, vector<1x256xf32>
      %34 = vector.broadcast %33 : vector<1x256xf32> to vector<2x256xf32>
      %35 = arith.mulf %32, %34 : vector<2x256xf32>
      %c0_26 = arith.constant 0 : index
      %c0_27 = arith.constant 0 : index
      %36 = vector.load %arg9[%c0_26, %c0_27] : memref<1x256xf32, #tpu.memory_space<vmem>>, vector<1x256xf32>
      %37 = vector.broadcast %36 : vector<1x256xf32> to vector<2x256xf32>
      %38 = arith.addf %35, %37 : vector<2x256xf32>
      %c0_28 = arith.constant 0 : index
      %c0_29 = arith.constant 0 : index
      %39 = vector.load %arg10[%c0_28, %c0_29] : memref<256x2xf32, #tpu.memory_space<vmem>>, vector<256x2xf32>
      %cst_30 = arith.constant dense<0.000000e+00> : vector<2x2xf32>
      %40 = tpu.matmul %38, %39, %cst_30 {dimension_numbers = #tpu.dot_dimension_numbers<[1], [0], [0], [1], [0, 0, 1, 1], [], []>} : vector<2x256xf32>, vector<256x2xf32>, vector<2x2xf32> -> vector<2x2xf32>
      %c0_31 = arith.constant 0 : index
      %c0_32 = arith.constant 0 : index
      %41 = vector.load %arg11[%c0_31, %c0_32] : memref<1x2xf32, #tpu.memory_space<vmem>>, vector<1x2xf32>
      %42 = vector.broadcast %41 : vector<1x2xf32> to vector<2x2xf32>
      %43 = arith.addf %40, %42 : vector<2x2xf32>
      %c0_33 = arith.constant 0 : index
      %c0_34 = arith.constant 0 : index
      %44 = vector.load %arg12[%c0_33, %c0_34] : memref<2x2xf32, #tpu.memory_space<vmem>>, vector<2x2xf32>
      tpu.vector_store %arg12[%c0_33, %c0_34], %43 {strides = array<i32>} : memref<2x2xf32, #tpu.memory_space<vmem>>, vector<2x2xf32>,
    } else {
    }
    return
  }
  func.func @transform_0(%arg0: i32) -> (i32, i32) {
    %c0_i32 = arith.constant 0 : i32
    %c0_i32_0 = arith.constant 0 : i32
    return %c0_i32, %arg0 : i32, i32
  }
  func.func @transform_1(%arg0: i32) -> (i32, i32) {
    %c0_i32 = arith.constant 0 : i32
    %c0_i32_0 = arith.constant 0 : i32
    return %arg0, %c0_i32 : i32, i32
  }
  func.func @transform_2(%arg0: i32) -> (i32, i32) {
    %c0_i32 = arith.constant 0 : i32
    %c0_i32_0 = arith.constant 0 : i32
    %c0_i32_1 = arith.constant 0 : i32
    return %c0_i32, %c0_i32_0 : i32, i32
  }
  func.func @transform_3(%arg0: i32) -> (i32, i32) {
    %c0_i32 = arith.constant 0 : i32
    %c0_i32_0 = arith.constant 0 : i32
    %c0_i32_1 = arith.constant 0 : i32
    return %c0_i32, %c0_i32_0 : i32, i32
  }
  func.func @transform_4(%arg0: i32) -> (i32, i32) {
    %c0_i32 = arith.constant 0 : i32
    %c0_i32_0 = arith.constant 0 : i32
    %c0_i32_1 = arith.constant 0 : i32
    return %c0_i32, %c0_i32_0 : i32, i32
  }
  func.func @transform_5(%arg0: i32) -> (i32, i32) {
    %c0_i32 = arith.constant 0 : i32
    %c0_i32_0 = arith.constant 0 : i32
    %c0_i32_1 = arith.constant 0 : i32
    return %c0_i32, %c0_i32_0 : i32, i32
  }
  func.func @transform_6(%arg0: i32) -> (i32, i32) {
    %c0_i32 = arith.constant 0 : i32
    %c0_i32_0 = arith.constant 0 : i32
    %c0_i32_1 = arith.constant 0 : i32
    return %c0_i32, %c0_i32_0 : i32, i32
  }
  func.func @transform_7(%arg0: i32) -> (i32, i32) {
    %c0_i32 = arith.constant 0 : i32
    %c0_i32_0 = arith.constant 0 : i32
    %c0_i32_1 = arith.constant 0 : i32
    return %c0_i32, %c0_i32_0 : i32, i32
  }
  func.func @transform_8(%arg0: i32) -> (i32, i32) {
    %c0_i32 = arith.constant 0 : i32
    %c0_i32_0 = arith.constant 0 : i32
    %c0_i32_1 = arith.constant 0 : i32
    return %c0_i32, %c0_i32_0 : i32, i32
  }
  func.func @transform_9(%arg0: i32) -> (i32, i32) {
    %c0_i32 = arith.constant 0 : i32
    %c0_i32_0 = arith.constant 0 : i32
    %c0_i32_1 = arith.constant 0 : i32
    return %c0_i32, %c0_i32_0 : i32, i32
  }
  func.func @transform_10(%arg0: i32) -> (i32, i32) {
    %c0_i32 = arith.constant 0 : i32
    %c0_i32_0 = arith.constant 0 : i32
    %c0_i32_1 = arith.constant 0 : i32
    return %c0_i32, %c0_i32_0 : i32, i32
  }
  func.func @transform_11(%arg0: i32) -> (i32, i32) {
    %c0_i32 = arith.constant 0 : i32
    %c0_i32_0 = arith.constant 0 : i32
    %c0_i32_1 = arith.constant 0 : i32
    return %c0_i32, %c0_i32_0 : i32, i32
  }
}

</mosaic_0001>

<bundles_post_ra>
// kernel: pairwise_forward.2
= control target key start
LH: loop header
LB: loop body
LE: loop exit
PB: predicated region body
PF: predicated region fallthrough
CT: control target
= control target key end

     0   :  { %s9186_s0 = inlined_call_operand.vmem [shape: f32[2,2048], index: 0, kind: input, shape index: {}]   ;;  %s9187_s1 = inlined_call_operand.vmem [shape: f32[2,2048], index: 1, kind: input, shape index: {}]   ;;  %s9188_s2 = inlined_call_operand.hbm [shape: bf16[2048,512], index: 2, kind: input, shape index: {}]   ;;  %s9189_s3 = inlined_call_operand.hbm [shape: f32[1,512], index: 3, kind: input, shape index: {}]   ;;  %s9190_s4 = inlined_call_operand.hbm [shape: bf16[512,128], index: 4, kind: input, shape index: {}]   ;;  %s9191_s5 = inlined_call_operand.hbm [shape: f32[1,128], index: 5, kind: input, shape index: {}]   ;;  %s9192_s6 = inlined_call_operand.hbm [shape: f32[256,128], index: 6, kind: input, shape index: {}]   ;;  %s9193_s7 = inlined_call_operand.hbm [shape: f32[1,128], index: 7, kind: input, shape index: {}]   ;;  %s9194_s8 = inlined_call_operand.hbm [shape: f32[1,128], index: 8, kind: input, shape index: {}]   ;;  %s9195_s9 = inlined_call_operand.hbm [shape: f32[1,128], index: 9, kind: input, shape index: {}]   ;;  %s9196_s10 = inlined_call_operand.hbm [shape: f32[2,128], index: 10, kind: output, shape index: {0}]   ;;  %s9197_s11 = inlined_call_operand.hbm [shape: f32[2,128], index: 11, kind: output, shape index: {1}]   ;;  %s9198_s12 = inlined_call_operand.hbm [shape: f32[2,128], index: 12, kind: output, shape index: {2}]   ;;  %s9199_s13 = inlined_call_operand.vmem [shape: f32[2,128,128], index: 13, kind: output, shape index: {3}]  }
   0x1   :  { %9206 = sst [smem:[#allocation29_spill]] %s9189_s3 }
   0x2   :  { %9207 = sst [smem:[#allocation30_spill]] %s9190_s4 }
   0x3   :  { %9208 = sst [smem:[#allocation31_spill]] %s9191_s5 }
   0x4   :  { %9209 = sst [smem:[#allocation32_spill]] %s9196_s10 }
   0x5   :  { %9210 = sst [smem:[#allocation33_spill]] %s9197_s11 }
   0x6   :  { %9211 = sst [smem:[#allocation34_spill]] %s9198_s12 }
   0x7   :  { %9212 = sst [smem:[#allocation35_spill]] %s9199_s13 }
   0x8   :  { %19 = vsyncpa [#allocation5], 0 }
   0x9   :  { %21 = vsyncpa [#allocation5 + $0x1], 0 }
   0xa   :  { %22 = vsyncpa [#allocation8], 0 }
   0xb   :  { %23 = vsyncpa [#allocation11], 0 }
   0xc   :  { %24 = vsyncpa [#allocation14], 0 }
   0xd   :  { %25 = vsyncpa [#allocation17], 0 }
   0xe   :  { %26 = vsyncpa [#allocation6], 0 }
   0xf   :  { %27 = vsyncpa [#allocation20], 0  ;;  %s7918_s25 = smov 0   ;;  %s7920_s26 = smov 0  }
  0x10   :  { %s7922_s27 = smov 0   ;;  %s7924_s28 = smov 0  }
  0x11 LB: > { %s7825_s29 = smov [#allocation7]   ;;  %s7939_s14 = sadd.s32 4294967295, %s7823_s28   ;;  %s7823_s28 = sphi %s7924_s28, %s9239_s28   ;;  %s7819_s27 = sphi %s7922_s27, %s9238_s27   ;;  %s7815_s26 = sphi %s7920_s26, %s9237_s26   ;;  %s7811_s25 = sphi %s7918_s25, %s9236_s25  }
  0x12   : > { %s360_s30 = sshll.u32 %s7825_s29, 4  ;;  %p5636_p0 = scmp.ge.s32.totalorder %s7823_s28, 1  ;;  %s7945_s30 = int_to_ptr.vmem [resolvable:$true] %s360_s30 }
  0x13   : > { %p9204_p1 = scmp.eq.s32.totalorder %s7939_s14, 0  ;;  %p347_p2 = scmp.lt.s32.totalorder %s7823_s28, 3 }
  0x14   : > { %s7826_s16 = smov [#allocation10]   ;;  %s7827_s18 = smov [#allocation13]  }
  0x15   : > { %p7947_p4 = pnand %p5636_p0, %p347_p2  ;;  %s384_s17 = sshll.u32 %s7826_s16, 4  ;;  %s7953_s17 = int_to_ptr.vmem [resolvable:$true] %s384_s17 }
  0x16   : > { %s408_s19 = sshll.u32 %s7827_s18, 4  ;;  %s7828_s21 = smov [#allocation9]   ;;  %s7961_s19 = int_to_ptr.vmem [resolvable:$true] %s408_s19 }
  0x17   : > { %s9213_s15 = scalar_select %p7947_p4, 1, 0 }
  0x18   : > { %p6552_p5 = pneg %p7947_p4  ;;  %s7963_s22 = sshll.u32 %s7828_s21, 4  ;;  %s371_s22 = int_to_ptr.vmem [resolvable:$true] %s7963_s22 }
  0x19   : > { %s9215_s3 = sld [smem:[#allocation29_spill]] }
  0x1a   : > { %p7957_p6 = pnand %p6552_p5, %p9204_p1 }
  0x1c   : > { %p7973_p8 = pneg %p7957_p6 }
  0x1f   : > { %s7461_s29 = scalar_lea.hbm %s9215_s3, 64 }
  0x20   : > { %p7462_p7 = scmp.ne.s32.totalorder %s9215_s3, %s7461_s29  ;;  %p7468_p11 = scmp.lt.u32.totalorder %s7461_s29, %s9215_s3 }
  0x22   : > { %p7464_p9 = pnand %p7973_p8, %p7462_p7 }
  0x24   : > { %p7465_p10 = pneg %p7464_p9 }
  0x26   : > { %p7470_p12 = pnand %p7468_p11, %p7465_p10 }
  0x28   : > { %7473 = shalt.err (!%p7470_p12)
}
  0x29   : > { %s7474_s12 = scalar_lea.vmem %s7945_s30, 64  ;;  %p7482_p5 = scmp.lt.s32.totalorder %s7945_s30, %s7945_s30 }
  0x2a   : > { %p7475_p13 = scmp.ne.s32.totalorder %s7945_s30, %s7474_s12  ;;  %p7483_p3 = scmp.lt.s32.totalorder %s7474_s12, %s7474_s12 }
  0x2c   : > { %p7477_p0 = pnand %p7475_p13, %p7973_p8  ;;  %p7484_p7 = por %p7483_p3, %p7482_p5 }
  0x2e   : > { %p7478_p2 = pneg %p7477_p0 }
  0x30   : > { %p7485_p9 = pnand %p7484_p7, %p7478_p2 }
  0x32   : > { %7488 = shalt.err (!%p7485_p9)
}
  0x33   : > { %6555 = dma.hbm_to_vmem [thread:$0]  (!%p7957_p6), %s9215_s3, 64, %s7945_s30, [#allocation8]  }
  0x34   : > { %s9217_s5 = sld [smem:[#allocation31_spill]] }
  0x3a   : > { %s7489_s16 = scalar_lea.hbm %s9217_s5, 16 }
  0x3b   : > { %p7490_p10 = scmp.ne.s32.totalorder %s9217_s5, %s7489_s16  ;;  %p7496_p12 = scmp.lt.u32.totalorder %s7489_s16, %s9217_s5 }
  0x3d   : > { %p7492_p3 = pnand %p7490_p10, %p7973_p8 }
  0x3f   : > { %p7493_p11 = pneg %p7492_p3 }
  0x41   : > { %p7498_p13 = pnand %p7496_p12, %p7493_p11 }
  0x43   : > { %7501 = shalt.err (!%p7498_p13)
}
  0x44   : > { %s7502_s30 = scalar_lea.vmem %s7953_s17, 16  ;;  %s7509_s11 = scalar_lea.vmem %s7953_s17, 32 }
  0x45   : > { %p7503_p0 = scmp.ne.s32.totalorder %s7953_s17, %s7502_s30  ;;  %p7510_p7 = scmp.lt.s32.totalorder %s7953_s17, %s7953_s17 }
  0x46   : > { %p7511_p9 = scmp.lt.s32.totalorder %s7509_s11, %s7502_s30 }
  0x47   : > { %p7505_p2 = pnand %p7503_p0, %p7973_p8 }
  0x48   : > { %p7512_p10 = por %p7511_p9, %p7510_p7 }
  0x49   : > { %p7506_p5 = pneg %p7505_p2 }
  0x4b   : > { %p7513_p3 = pnand %p7512_p10, %p7506_p5 }
  0x4d   : > { %7516 = shalt.err (!%p7513_p3)
}
  0x4e   : > { %6561 = dma.hbm_to_vmem [thread:$0]  (!%p7957_p6), %s9217_s5, 16, %s7953_s17, [#allocation11]  }
  0x4f   : > { %s7517_s29 = scalar_lea.hbm %s9193_s7, 16 }
  0x50   : > { %p7518_p11 = scmp.ne.s32.totalorder %s9193_s7, %s7517_s29  ;;  %p7524_p0 = scmp.lt.u32.totalorder %s7517_s29, %s9193_s7 }
  0x52   : > { %p7520_p12 = pnand %p7518_p11, %p7973_p8 }
  0x54   : > { %p7521_p13 = pneg %p7520_p12 }
  0x56   : > { %p7526_p2 = pnand %p7524_p0, %p7521_p13 }
  0x58   : > { %7529 = shalt.err (!%p7526_p2)
}
  0x59   : > { %s7530_s17 = scalar_lea.vmem %s7961_s19, 16  ;;  %s7537_s11 = scalar_lea.vmem %s7961_s19, 32 }
  0x5a   : > { %p7531_p5 = scmp.ne.s32.totalorder %s7961_s19, %s7530_s17  ;;  %p7538_p10 = scmp.lt.s32.totalorder %s7961_s19, %s7961_s19 }
  0x5b   : > { %p7539_p3 = scmp.lt.s32.totalorder %s7537_s11, %s7530_s17 }
  0x5c   : > { %p7533_p7 = pnand %p7531_p5, %p7973_p8 }
  0x5d   : > { %p7540_p11 = por %p7539_p3, %p7538_p10 }
  0x5e   : > { %p7534_p9 = pneg %p7533_p7 }
  0x60   : > { %p7541_p12 = pnand %p7540_p11, %p7534_p9 }
  0x62   : > { %7544 = shalt.err (!%p7541_p12)
}
  0x63   : > { %6567 = dma.hbm_to_vmem [thread:$0]  (!%p7957_p6), %s9193_s7, 16, %s7961_s19, [#allocation14]  }
  0x64   : > { %s9218_s4 = sld [smem:[#allocation30_spill]] }
  0x6a   : > { %s7545_s29 = scalar_lea.hbm %s9218_s4, 4096 }
  0x6b   : > { %p7546_p13 = scmp.ne.s32.totalorder %s9218_s4, %s7545_s29  ;;  %p7552_p5 = scmp.lt.u32.totalorder %s7545_s29, %s9218_s4 }
  0x6d   : > { %p7548_p0 = pnand %p7546_p13, %p7973_p8 }
  0x6f   : > { %p7549_p2 = pneg %p7548_p0 }
  0x71   : > { %p7554_p7 = pnand %p7552_p5, %p7549_p2 }
  0x73   : > { %7557 = shalt.err (!%p7554_p7)
}
  0x74   : > { %s7558_s17 = scalar_lea.vmem %s371_s22, 4096  ;;  %p7566_p11 = scmp.lt.s32.totalorder %s371_s22, %s371_s22 }
  0x75   : > { %p7559_p9 = scmp.ne.s32.totalorder %s371_s22, %s7558_s17  ;;  %p7567_p12 = scmp.lt.s32.totalorder %s7558_s17, %s7558_s17 }
  0x77   : > { %p7561_p10 = pnand %p7559_p9, %p7973_p8  ;;  %p7568_p1 = por %p7567_p12, %p7566_p11 }
  0x79   : > { %p7562_p3 = pneg %p7561_p10 }
  0x7b   : > { %p7569_p4 = pnand %p7568_p1, %p7562_p3 }
  0x7d   : > { %7572 = shalt.err (!%p7569_p4)
}
  0x7e   : > { %s7829_s19 = smov 64   ;;  %s7830_s11 = smov 4  }
  0x7f   : > { %6558 = dma.hbm_to_vmem [thread:$0]  (!%p7957_p6), %s9218_s4, 4096, %s371_s22, [#allocation8], %s7829_s19, %s7829_s19, %s7830_s11  }
  0x80   : > { %s7831_s23 = smov [#allocation12]   ;;  %s7573_s21 = scalar_lea.hbm %s9192_s6, 4096 }
  0x81   : > { %s394_s24 = sshll.u32 %s7831_s23, 4  ;;  %p7574_p1 = scmp.ne.s32.totalorder %s9192_s6, %s7573_s21  ;;  %s395_s24 = int_to_ptr.vmem [resolvable:$true] %s394_s24 }
  0x82   : > { %p7580_p0 = scmp.lt.u32.totalorder %s7573_s21, %s9192_s6 }
  0x83   : > { %p7576_p4 = pnand %p7574_p1, %p7973_p8 }
  0x85   : > { %p7577_p13 = pneg %p7576_p4 }
  0x87   : > { %p7582_p2 = pnand %p7580_p0, %p7577_p13 }
  0x89   : > { %7585 = shalt.err (!%p7582_p2)
}
  0x8a   : > { %s7586_s22 = scalar_lea.vmem %s395_s24, 4096  ;;  %p7594_p10 = scmp.lt.s32.totalorder %s395_s24, %s395_s24 }
  0x8b   : > { %p7587_p5 = scmp.ne.s32.totalorder %s395_s24, %s7586_s22  ;;  %p7595_p3 = scmp.lt.s32.totalorder %s7586_s22, %s7586_s22 }
  0x8d   : > { %p7589_p7 = pnand %p7587_p5, %p7973_p8  ;;  %p7596_p11 = por %p7595_p3, %p7594_p10 }
  0x8f   : > { %p7590_p9 = pneg %p7589_p7 }
  0x91   : > { %p7597_p12 = pnand %p7596_p11, %p7590_p9 }
  0x93   : > { %7600 = shalt.err (!%p7597_p12)
}
  0x94   : > { %s7832_s19 = smov 128   ;;  %s7833_s11 = smov 8  }
  0x95   : > { %6564 = dma.hbm_to_vmem [thread:$0]  (!%p7957_p6), %s9192_s6, 4096, %s395_s24, [#allocation11], %s7832_s19, %s7832_s19, %s7833_s11  }
  0x96   : > { %s7834_s10 = smov [#allocation15]   ;;  %s7835_s29 = smov [#allocation16]  }
  0x97   : > { %s419_s23 = sshll.u32 %s7834_s10, 4  ;;  %s430_s16 = sshll.u32 %s7835_s29, 4  ;;  %s420_s23 = int_to_ptr.vmem [resolvable:$true] %s419_s23  ;;  %s431_s16 = int_to_ptr.vmem [resolvable:$true] %s430_s16 }
  0x98   : > { %s7601_s30 = scalar_lea.hbm %s9194_s8, 16 }
  0x99   : > { %p7602_p1 = scmp.ne.s32.totalorder %s9194_s8, %s7601_s30  ;;  %p7608_p0 = scmp.lt.u32.totalorder %s7601_s30, %s9194_s8 }
  0x9b   : > { %p7604_p4 = pnand %p7602_p1, %p7973_p8 }
  0x9d   : > { %p7605_p13 = pneg %p7604_p4 }
  0x9f   : > { %p7610_p2 = pnand %p7608_p0, %p7605_p13 }
  0xa1   : > { %7613 = shalt.err (!%p7610_p2)
}
  0xa2   : > { %s7614_s24 = scalar_lea.vmem %s420_s23, 16  ;;  %s7621_s19 = scalar_lea.vmem %s420_s23, 32 }
  0xa3   : > { %p7615_p5 = scmp.ne.s32.totalorder %s420_s23, %s7614_s24  ;;  %p7622_p10 = scmp.lt.s32.totalorder %s420_s23, %s420_s23 }
  0xa4   : > { %p7623_p3 = scmp.lt.s32.totalorder %s7621_s19, %s7614_s24 }
  0xa5   : > { %p7617_p7 = pnand %p7615_p5, %p7973_p8 }
  0xa6   : > { %p7624_p11 = por %p7623_p3, %p7622_p10 }
  0xa7   : > { %p7618_p9 = pneg %p7617_p7 }
  0xa9   : > { %p7625_p12 = pnand %p7624_p11, %p7618_p9 }
  0xab   : > { %7628 = shalt.err (!%p7625_p12)
}
  0xac   : > { %6570 = dma.hbm_to_vmem [thread:$0]  (!%p7957_p6), %s9194_s8, 16, %s420_s23, [#allocation14]  }
  0xad   : > { %s7629_s13 = scalar_lea.hbm %s9195_s9, 16 }
  0xae   : > { %p7630_p1 = scmp.ne.s32.totalorder %s9195_s9, %s7629_s13  ;;  %p7636_p0 = scmp.lt.u32.totalorder %s7629_s13, %s9195_s9 }
  0xb0   : > { %p7632_p4 = pnand %p7630_p1, %p7973_p8 }
  0xb2   : > { %p7633_p13 = pneg %p7632_p4 }
  0xb4   : > { %p7638_p2 = pnand %p7636_p0, %p7633_p13 }
  0xb6   : > { %7641 = shalt.err (!%p7638_p2)
}
  0xb7   : > { %s7642_s30 = scalar_lea.vmem %s431_s16, 16  ;;  %s7649_s23 = scalar_lea.vmem %s431_s16, 32 }
  0xb8   : > { %p7643_p5 = scmp.ne.s32.totalorder %s431_s16, %s7642_s30  ;;  %p7650_p10 = scmp.lt.s32.totalorder %s431_s16, %s431_s16 }
  0xb9   : > { %p7651_p3 = scmp.lt.s32.totalorder %s7649_s23, %s7642_s30 }
  0xba   : > { %p7645_p7 = pnand %p7643_p5, %p7973_p8 }
  0xbb   : > { %p7652_p11 = por %p7651_p3, %p7650_p10 }
  0xbc   : > { %p7646_p9 = pneg %p7645_p7 }
  0xbe   : > { %p7653_p12 = pnand %p7652_p11, %p7646_p9 }
  0xc0   : > { %7656 = shalt.err (!%p7653_p12)
}
  0xc1   : > { %6573 = dma.hbm_to_vmem [thread:$0]  (!%p7957_p6), %s9195_s9, 16, %s431_s16, [#allocation17]  }
  0xc2   : > { %s8116_s18 = sadd.s32 1, %s7823_s28   ;;  %s92_s24 = sadd.s32 1, %s7819_s27 }
  0xc3   : > { %s89_s20 = ssub.s32 %s7823_s28, %s8116_s18  ;;  %p99_p1 = scmp.ne.s32.totalorder %s7819_s27, %s7815_s26 }
  0xc4   : > { %p90_p8 = scmp.eq.s32.totalorder %s89_s20, 0  ;;  %p100_p4 = scmp.eq.s32.totalorder %s7823_s28, 0 }
  0xc5   : > { %p105_p13 = scmp.ne.s32.totalorder %s7815_s26, %s7811_s25  ;;  %p9219_p2 = scmp.eq.s32.totalorder %s7939_s14, 0 }
  0xc6   : > { %s8127_s19 = scalar_select %p90_p8, %s7819_s27, %s92_s24  }
  0xc7   : > { %p101_p0 = por %p100_p4, %p99_p1  ;;  %p8131_p5 = por %p9219_p2, %p105_p13 }
  0xc8   : > { %p6585_p7 = scmp.lt.s32.totalorder %s7823_s28, 2  ;;  %s459_s3 = sand.u32 1, %s7819_s27  }
  0xc9   : > { %s5645_s16 = sshll.u32 %s459_s3, 11  ;;  %s6221_s4 = sshll.u32 %s7823_s28, 15 }
  0xca   : > { %s8141_s10 = scalar_lea.hbm %s9188_s2, %s6221_s4  ;;  %s463_s25 = scalar_lea.vmem [#allocation4], %s5645_s16 }
  0xcb   : > { %s471_s29 = sshll.u32 %s463_s25, 4  ;;  %p8145_p6 = pnand %p6585_p7, %p101_p0  ;;  %s8143_s29 = int_to_ptr.vmem [resolvable:$true] %s471_s29 }
  0xcc   : > { %s8149_s28 = scalar_lea.sflag [#allocation5], %s459_s3  ;;  %s7657_s12 = scalar_lea.hbm %s8141_s10, 32768 }
  0xcd   : > { %p7658_p9 = scmp.ne.s32.totalorder %s8141_s10, %s7657_s12  ;;  %p7659_p10 = pneg %p8145_p6 }
  0xce   : > { %s7662_s17 = scalar_lea.hbm %s9188_s2, 65536  ;;  %p7663_p12 = scmp.lt.u32.totalorder %s8141_s10, %s9188_s2 }
  0xcf   : > { %p7660_p3 = pnand %p7659_p10, %p7658_p9  ;;  %p7664_p8 = scmp.lt.u32.totalorder %s7662_s17, %s7657_s12 }
  0xd0   : > { %p7666_p4 = scmp.lt.u32.totalorder %s7657_s12, %s8141_s10 }
  0xd1   : > { %p7661_p11 = pneg %p7660_p3  ;;  %p7665_p1 = por %p7664_p8, %p7663_p12 }
  0xd3   : > { %p7667_p13 = por %p7666_p4, %p7665_p1 }
  0xd5   : > { %p7668_p0 = pnand %p7667_p13, %p7661_p11 }
  0xd7   : > { %7671 = shalt.err (!%p7668_p0)
}
  0xd8   : > { %s7672_s24 = scalar_lea.vmem %s8143_s29, 32768  ;;  %s7836_s3 = smov [#allocation4]  }
  0xd9   : > { %p7673_p2 = scmp.ne.s32.totalorder %s8143_s29, %s7672_s24  ;;  %s7677_s16 = sshll.u32 %s7836_s3, 4  ;;  %s7678_s16 = int_to_ptr.vmem [resolvable:$false] %s7677_s16 }
  0xda   : > { %s7679_s4 = scalar_lea.vmem %s7678_s16, 65536  ;;  %p7680_p3 = scmp.lt.s32.totalorder %s8143_s29, %s7678_s16 }
  0xdb   : > { %p7675_p7 = pnand %p7673_p2, %p7659_p10  ;;  %p7681_p12 = scmp.lt.s32.totalorder %s7679_s4, %s7672_s24 }
  0xdd   : > { %p7676_p9 = pneg %p7675_p7  ;;  %p7682_p8 = por %p7681_p12, %p7680_p3 }
  0xdf   : > { %p7683_p1 = pnand %p7682_p8, %p7676_p9 }
  0xe1   : > { %7686 = shalt.err (!%p7683_p1)
}
  0xe2   : > { %s7837_s5 = smov 256   ;;  %s7838_s13 = smov 16  }
  0xe3   : > { %6577 = dma.hbm_to_vmem [thread:$0]  (!%p8145_p6), %s8141_s10, 32768, %s8143_s29, %s8149_s28, %s7837_s5, %s7837_s5, %s7838_s13  }
  0xe4   : > { %p9222_p10 = scmp.ne.s32.totalorder %s9213_s15, 0 }
  0xe5   : > { %s485_s25 = sand.u32 (!%p9222_p10), 1, %s7815_s26  }
  0xe6   : > { %483 = sbr.rel (%p9222_p10) target bundleno = 1913 (0x779), region = 60  ;;  %s5650_s12 = sshll.u32 (!%p9222_p10), %s485_s25, 11 }
  0xe7   : > { %s486_s30 = scalar_lea.sflag (!%p9222_p10), [#allocation5], %s485_s25  ;;  %s8180_s23 = scalar_lea.vmem (!%p9222_p10), [#allocation4], %s5650_s12 }
  0xed   : > { %7782 = dma.done.wait (%p8131_p5), %s486_s30, 32768  }
  0xee   : > { %7784 = vsyncadd (%p8131_p5), %s486_s30, 4294934528  ;;  %p9223_p11 = scmp.eq.s32.totalorder %s7939_s14, 0 }
  0xf0   : > { %7786 = dma.done.wait (%p9223_p11), [#allocation8], 4160   ;;  %p9224_p6 = pmov %p9223_p11 }
  0xf2   : > { %7788 = vsyncadd (%p9224_p6), [#allocation8], 4294963136  ;;  %p9225_p4 = pmov %p9224_p6 }
  0xf4   : > { %7790 = dma.done.wait (%p9225_p4), [#allocation11], 4112   ;;  %p9226_p13 = pmov %p9225_p4 }
  0xf5   : > { %p9227_p0 = pmov %p9225_p4 }
  0xf6   : > { %7792 = vsyncadd (%p9226_p13), [#allocation11], 4294963184 }
  0xf7   : > { %7794 = dma.done.wait (%p9227_p0), [#allocation14], 32   ;;  %p9228_p2 = pmov %p9227_p0 }
  0xf8   : > { %p9229_p5 = pmov %p9227_p0 }
  0xf9   : > { %7796 = vsyncadd (%p9228_p2), [#allocation14], 4294967264 }
  0xfa   : > { %7798 = dma.done.wait (%p9229_p5), [#allocation17], 16   ;;  %p9230_p7 = pmov %p9227_p0 }
  0xfb   : > { %s5658_s15 = sshll.u32 %s7939_s14, 3  ;;  %p9231_p3 = scmp.ne.s32.totalorder %s7939_s14, 0 }
  0xfc   : > { %7800 = vsyncadd (%p9230_p7), [#allocation17], 4294967280  ;;  %p566_p9 = scmp.lt.s32.totalorder %s5658_s15, 15  ;;  %v7839_v0 = vmov (!%p9231_p3), 0.0  }
  0xfd   : > { %582 = sbr.rel (%p9231_p3) target bundleno = 260 (0x104), region = 96  ;;  %583 = vst [vmem:[#allocation2] sm:$0xff] (!%p9231_p3), %v7839_v0  ;;  %584 = vst [vmem:[#allocation3] sm:$0xff] (!%p9231_p3), %v7839_v0 }
  0xfe   : > { %s9241_s15 = smov (!%p566_p9, %s5658_s15), 15 }
  0xff   : > { %s5659_s11 = sshll.u32 %s9241_s15, 1 }
 0x100   : > { %s8206_s21 = scalar_lea.vmem %s9186_s0, %s5659_s11  ;;  %s8211_s22 = scalar_lea.vmem %s9187_s1, %s5659_s11 }
 0x104 PF: > { %v6653_v1 = vld [vmem:[%s8180_s23 + $0x4] ss:$16 sps:$4 sm:$0xff]   ;;  %v6655_v2 = vld [vmem:[%s8180_s23 + $0xc] ss:$16 sps:$4 sm:$0xff]   ;;  %v6657_v3 = vld [vmem:[%s8180_s23] ss:$16 sps:$4 sm:$0xff]   ;;  %v594_v39 = vlaneseq }
 0x105   : > { %2176 = vmatprep.subr.bf16.mxu0 %v6653_v1  ;;  %v6658_v4 = vld [vmem:[%s8180_s23 + $0x8] ss:$16 sps:$4 sm:$0xff]   ;;  %2340 = vmatprep.subr.bf16.mxu1 %v6655_v2  ;;  %v6659_v5 = vld [vmem:[%s8180_s23 + $0x24] ss:$16 sps:$4 sm:$0xff]   ;;  %v6661_v6 = vld [vmem:[%s8180_s23 + $0x2c] ss:$16 sps:$4 sm:$0xff]  }
 0x106   : > { %2177 = vmatpush1.bf16.msra.mxu0 %v6657_v3  ;;  %2341 = vmatpush1.bf16.msra.mxu1 %v6658_v4  ;;  %v6663_v7 = vld [vmem:[%s8180_s23 + $0x20] ss:$16 sps:$4 sm:$0xff]   ;;  %v6664_v8 = vld [vmem:[%s8180_s23 + $0x28] ss:$16 sps:$4 sm:$0xff]   ;;  %v6665_v9 = vld [vmem:[%s8180_s23 + $0x44] ss:$16 sps:$4 sm:$0xff]  }
 0x107   : > { %2178 = vmatprep.subr.bf16.mxu0 %v6659_v5  ;;  %2342 = vmatprep.subr.bf16.mxu1 %v6661_v6  ;;  %v6667_v10 = vld [vmem:[%s8180_s23 + $0x4c] ss:$16 sps:$4 sm:$0xff]   ;;  %v6669_v11 = vld [vmem:[%s8180_s23 + $0x40] ss:$16 sps:$4 sm:$0xff]   ;;  %v6670_v12 = vld [vmem:[%s8180_s23 + $0x48] ss:$16 sps:$4 sm:$0xff]  }
 0x108   : > { %v6671_v13 = vld [vmem:[%s8180_s23 + $0x64] ss:$16 sps:$4 sm:$0xff]   ;;  %v6673_v14 = vld [vmem:[%s8180_s23 + $0x6c] ss:$16 sps:$4 sm:$0xff]   ;;  %v6675_v15 = vld [vmem:[%s8180_s23 + $0x60] ss:$16 sps:$4 sm:$0xff]  }
 0x109   : > { %v6676_v16 = vld [vmem:[%s8180_s23 + $0x68] ss:$16 sps:$4 sm:$0xff]   ;;  %v6677_v17 = vld [vmem:[%s8180_s23 + $0x84] ss:$16 sps:$4 sm:$0xff]   ;;  %v6679_v18 = vld [vmem:[%s8180_s23 + $0x8c] ss:$16 sps:$4 sm:$0xff]  }
 0x10a   : > { %2179 = vmatpush1.bf16.msra.mxu0 %v6663_v7  ;;  %2343 = vmatpush1.bf16.msra.mxu1 %v6664_v8  ;;  %v6681_v19 = vld [vmem:[%s8180_s23 + $0x80] ss:$16 sps:$4 sm:$0xff]   ;;  %v6682_v20 = vld [vmem:[%s8180_s23 + $0x88] ss:$16 sps:$4 sm:$0xff]   ;;  %v6683_v21 = vld [vmem:[%s8180_s23 + $0xa4] ss:$16 sps:$4 sm:$0xff]  }
 0x10b   : > { %2180 = vmatprep.subr.bf16.mxu0 %v6665_v9  ;;  %2344 = vmatprep.subr.bf16.mxu1 %v6667_v10  ;;  %v6685_v22 = vld [vmem:[%s8180_s23 + $0xac] ss:$16 sps:$4 sm:$0xff]   ;;  %v6687_v23 = vld [vmem:[%s8180_s23 + $0xa0] ss:$16 sps:$4 sm:$0xff]   ;;  %v6688_v24 = vld [vmem:[%s8180_s23 + $0xa8] ss:$16 sps:$4 sm:$0xff]  }
 0x10c   : > { %v6689_v25 = vld [vmem:[%s8180_s23 + $0xc4] ss:$16 sps:$4 sm:$0xff]   ;;  %v6691_v26 = vld [vmem:[%s8180_s23 + $0xcc] ss:$16 sps:$4 sm:$0xff]   ;;  %v6693_v27 = vld [vmem:[%s8180_s23 + $0xc0] ss:$16 sps:$4 sm:$0xff]  }
 0x10d   : > { %v6694_v28 = vld [vmem:[%s8180_s23 + $0xc8] ss:$16 sps:$4 sm:$0xff]   ;;  %v6695_v29 = vld [vmem:[%s8180_s23 + $0xe4] ss:$16 sps:$4 sm:$0xff]   ;;  %v6697_v30 = vld [vmem:[%s8180_s23 + $0xec] ss:$16 sps:$4 sm:$0xff]  }
 0x10e   : > { %2181 = vmatpush1.bf16.msra.mxu0 %v6669_v11  ;;  %2345 = vmatpush1.bf16.msra.mxu1 %v6670_v12  ;;  %v6699_v31 = vld [vmem:[%s8180_s23 + $0xe0] ss:$16 sps:$4 sm:$0xff]   ;;  %v6700_v32 = vld [vmem:[%s8180_s23 + $0xe8] ss:$16 sps:$4 sm:$0xff]   ;;  %v6701_v33 = vld [vmem:[%s8180_s23 + $0x104] ss:$16 sps:$4 sm:$0xff]  }
 0x10f   : > { %2182 = vmatprep.subr.bf16.mxu0 %v6671_v13  ;;  %2346 = vmatprep.subr.bf16.mxu1 %v6673_v14  ;;  %v6703_v34 = vld [vmem:[%s8180_s23 + $0x10c] ss:$16 sps:$4 sm:$0xff]   ;;  %v6705_v35 = vld [vmem:[%s8180_s23 + $0x100] ss:$16 sps:$4 sm:$0xff]   ;;  %v6706_v36 = vld [vmem:[%s8180_s23 + $0x108] ss:$16 sps:$4 sm:$0xff]  }
 0x110   : > { %v7840_v37 = vmov 1983009808   ;;  %v6707_v40 = vld [vmem:[%s8180_s23 + $0x124] ss:$16 sps:$4 sm:$0xff]   ;;  %v6709_v41 = vld [vmem:[%s8180_s23 + $0x12c] ss:$16 sps:$4 sm:$0xff]  }
 0x111   : > { %v592_v38 = vunpack.c.l.s4 %v7840_v37  ;;  %v6711_v42 = vld [vmem:[%s8180_s23 + $0x120] ss:$16 sps:$4 sm:$0xff]   ;;  %v8254_v44 = vshrl.u32 %v594_v39, 7  ;;  %v6712_v45 = vld [vmem:[%s8180_s23 + $0x128] ss:$16 sps:$4 sm:$0xff]   ;;  %p6175_p12 = scmp.ne.s32.totalorder %s7939_s14, 1 }
 0x112   : > { %2183 = vmatpush1.bf16.msra.mxu0 %v6675_v15  ;;  %2347 = vmatpush1.bf16.msra.mxu1 %v6676_v16  ;;  %v6713_v46 = vld [vmem:[%s8180_s23 + $0x144] ss:$16 sps:$4 sm:$0xff]   ;;  %v6715_v47 = vld [vmem:[%s8180_s23 + $0x14c] ss:$16 sps:$4 sm:$0xff]   ;;  %v6717_v48 = vld [vmem:[%s8180_s23 + $0x140] ss:$16 sps:$4 sm:$0xff]  }
 0x113   : > { %2184 = vmatprep.subr.bf16.mxu0 %v6677_v17  ;;  %2348 = vmatprep.subr.bf16.mxu1 %v6679_v18  ;;  %v593_v43 = vunpack.c.0.s8 %v592_v38  ;;  %v6718_v49 = vld [vmem:[%s8180_s23 + $0x148] ss:$16 sps:$4 sm:$0xff]   ;;  %v6719_v51 = vld [vmem:[%s8180_s23 + $0x164] ss:$16 sps:$4 sm:$0xff]   ;;  %v6721_v52 = vld [vmem:[%s8180_s23 + $0x16c] ss:$16 sps:$4 sm:$0xff]  }
 0x114   : > { %v586_v53 = vld [vmem:[%s8206_s21] sm:$0xff]  ;;  %v6724_v56 = vld [vmem:[%s8180_s23 + $0x168] ss:$16 sps:$4 sm:$0xff]   ;;  %v6727_v58 = vld [vmem:[%s8180_s23 + $0x18c] ss:$16 sps:$4 sm:$0xff]   ;;  %vm4884_vm0 = vcmask (!%p6175_p12), 1041408  }
 0x115   : > { %v8262_v50 = vsub.s32 %v593_v43, %v8254_v44  ;;  %v6723_v54 = vld [vmem:[%s8180_s23 + $0x160] ss:$16 sps:$4 sm:$0xff]   ;;  %v6725_v57 = vld [vmem:[%s8180_s23 + $0x184] ss:$16 sps:$4 sm:$0xff]   ;;  %v6730_v62 = vld [vmem:[%s8180_s23 + $0x188] ss:$16 sps:$4 sm:$0xff]   ;;  %v590_v5 = vcombine.high %v586_v53, %v586_v53 }
 0x116   : > { %2185 = vmatpush1.bf16.msra.mxu0 %v6681_v19  ;;  %2349 = vmatpush1.bf16.msra.mxu1 %v6682_v20  ;;  %v6729_v60 = vld [vmem:[%s8180_s23 + $0x180] ss:$16 sps:$4 sm:$0xff]   ;;  %v6731_v63 = vld [vmem:[%s8180_s23 + $0x1a4] ss:$16 sps:$4 sm:$0xff]   ;;  %v6733_v0 = vld [vmem:[%s8180_s23 + $0x1ac] ss:$16 sps:$4 sm:$0xff]  }
 0x117   : > { %2186 = vmatprep.subr.bf16.mxu0 %v6683_v21  ;;  %2350 = vmatprep.subr.bf16.mxu1 %v6685_v22  ;;  %v597_v55 = vrot.slane %v586_v53, %v8262_v50  ;;  %v6735_v1 = vld [vmem:[%s8180_s23 + $0x1a0] ss:$16 sps:$4 sm:$0xff]   ;;  %v6736_v2 = vld [vmem:[%s8180_s23 + $0x1a8] ss:$16 sps:$4 sm:$0xff]   ;;  %v6737_v3 = vld [vmem:[%s8180_s23 + $0x1c4] ss:$16 sps:$4 sm:$0xff]   ;;  %v8285_v10 = vrot.slane %v590_v5, %v8262_v50 }
 0x118   : > { %v6739_v4 = vld [vmem:[%s8180_s23 + $0x1cc] ss:$16 sps:$4 sm:$0xff]   ;;  %v6741_v6 = vld [vmem:[%s8180_s23 + $0x1c0] ss:$16 sps:$4 sm:$0xff]   ;;  %v6742_v7 = vld [vmem:[%s8180_s23 + $0x1c8] ss:$16 sps:$4 sm:$0xff]  }
 0x119   : > { %v605_v59 = vcombine.high %v597_v55, %v597_v55  ;;  %v6743_v8 = vld [vmem:[%s8180_s23 + $0x1e4] ss:$16 sps:$4 sm:$0xff]   ;;  %v6745_v9 = vld [vmem:[%s8180_s23 + $0x1ec] ss:$16 sps:$4 sm:$0xff]   ;;  %v6747_v11 = vld [vmem:[%s8180_s23 + $0x1e0] ss:$16 sps:$4 sm:$0xff]   ;;  %v606_v15 = vcombine.high %v8285_v10, %v8285_v10  ;;  %v632_v17 = vpack.c.bf16 %v597_v55, %v597_v55 }
 0x11a   : > { %2187 = vmatpush1.bf16.msra.mxu0 %v6687_v23  ;;  %2351 = vmatpush1.bf16.msra.mxu1 %v6688_v24  ;;  %v6748_v12 = vld [vmem:[%s8180_s23 + $0x1e8] ss:$16 sps:$4 sm:$0xff]   ;;  %v6752_v13 = vld [vmem:[%s8180_s23 + $0x204] ss:$16 sps:$4 sm:$0xff]   ;;  %v6755_v14 = vld [vmem:[%s8180_s23 + $0x20c] ss:$16 sps:$4 sm:$0xff]  }
 0x11b   : > { %2188 = vmatprep.subr.bf16.mxu0 %v6689_v25  ;;  %2352 = vmatprep.subr.bf16.mxu1 %v6691_v26  ;;  %v633_v61 = vpack.c.bf16 %v605_v59, %v605_v59  ;;  %v6750_v16 = vld [vmem:[%s8180_s23 + $0x200] ss:$16 sps:$4 sm:$0xff]   ;;  %v6753_v18 = vld [vmem:[%s8180_s23 + $0x208] ss:$16 sps:$4 sm:$0xff]   ;;  %v6758_v19 = vld [vmem:[%s8180_s23 + $0x224] ss:$16 sps:$4 sm:$0xff]   ;;  %v635_v21 = vpack.c.bf16 %v606_v15, %v606_v15 }
 0x11c   : > { %v6761_v20 = vld [vmem:[%s8180_s23 + $0x22c] ss:$16 sps:$4 sm:$0xff]   ;;  %v6756_v22 = vld [vmem:[%s8180_s23 + $0x220] ss:$16 sps:$4 sm:$0xff]   ;;  %v6759_v23 = vld [vmem:[%s8180_s23 + $0x228] ss:$16 sps:$4 sm:$0xff]  }
 0x11d   : > { %2208 = vmatprep.mubr.bf16.mxu0 %v633_v61  ;;  %2372 = vmatprep.mubr.bf16.mxu1 %v633_v61  ;;  %v6764_v24 = vld [vmem:[%s8180_s23 + $0x244] ss:$16 sps:$4 sm:$0xff]   ;;  %v6767_v25 = vld [vmem:[%s8180_s23 + $0x24c] ss:$16 sps:$4 sm:$0xff]   ;;  %v6762_v26 = vld [vmem:[%s8180_s23 + $0x240] ss:$16 sps:$4 sm:$0xff]  }
 0x11e   : > { %2189 = vmatpush1.bf16.msra.mxu0 %v6693_v27  ;;  %2353 = vmatpush1.bf16.msra.mxu1 %v6694_v28  ;;  %v6765_v27 = vld [vmem:[%s8180_s23 + $0x248] ss:$16 sps:$4 sm:$0xff]   ;;  %v6770_v28 = vld [vmem:[%s8180_s23 + $0x264] ss:$16 sps:$4 sm:$0xff]   ;;  %v6785_v37 = vld [vmem:[%s8180_s23 + $0x2ac] ss:$16 sps:$4 sm:$0xff]  }
 0x11f   : > { %2190 = vmatprep.subr.bf16.mxu0 %v6695_v29  ;;  %2354 = vmatprep.subr.bf16.mxu1 %v6697_v30  ;;  %v6773_v29 = vld [vmem:[%s8180_s23 + $0x26c] ss:$16 sps:$4 sm:$0xff]   ;;  %v6768_v30 = vld [vmem:[%s8180_s23 + $0x260] ss:$16 sps:$4 sm:$0xff]   ;;  %v6783_v39 = vld [vmem:[%s8180_s23 + $0x2a8] ss:$16 sps:$4 sm:$0xff]  }
 0x120   : > { %v6780_v38 = vld [vmem:[%s8180_s23 + $0x2a0] ss:$16 sps:$4 sm:$0xff]   ;;  %v6789_v43 = vld [vmem:[%s8180_s23 + $0x2c8] ss:$16 sps:$4 sm:$0xff]   ;;  %v6809_v55 = vld [vmem:[%s8180_s23 + $0x32c] ss:$16 sps:$4 sm:$0xff]  }
 0x121   : > { %v6801_v53 = vld [vmem:[%s8180_s23 + $0x308] ss:$16 sps:$4 sm:$0xff]   ;;  %v6815_v59 = vld [vmem:[%s8180_s23 + $0x34c] ss:$16 sps:$4 sm:$0xff]   ;;  %v6842_v15 = vld [vmem:[%s8180_s23 + $0x3e4] ss:$16 sps:$4 sm:$0xff]  }
 0x122   : > { %2191 = vmatpush1.bf16.msra.mxu0 %v6699_v31  ;;  %2355 = vmatpush1.bf16.msra.mxu1 %v6700_v32  ;;  %v6771_v31 = vld [vmem:[%s8180_s23 + $0x268] ss:$16 sps:$4 sm:$0xff]   ;;  %v6776_v32 = vld [vmem:[%s8180_s23 + $0x284] ss:$16 sps:$4 sm:$0xff]   ;;  %vm7842_vm1 = vmmov (!%p6175_p12), 0   ;;  %s9232_s3 = sld [smem:[#allocation35_spill]] (!%p6175_p12) }
 0x123   : > { %2192 = vmatprep.subr.bf16.mxu0 %v6701_v33  ;;  %2356 = vmatprep.subr.bf16.mxu1 %v6703_v34  ;;  %v6779_v33 = vld [vmem:[%s8180_s23 + $0x28c] ss:$16 sps:$4 sm:$0xff]   ;;  %v6774_v34 = vld [vmem:[%s8180_s23 + $0x280] ss:$16 sps:$4 sm:$0xff]   ;;  %v6813_v61 = vld [vmem:[%s8180_s23 + $0x348] ss:$16 sps:$4 sm:$0xff]  }
 0x124   : > { %v6825_v5 = vld [vmem:[%s8180_s23 + $0x388] ss:$16 sps:$4 sm:$0xff]  }
 0x126   : > { %2193 = vmatpush1.bf16.msra.mxu0 %v6705_v35  ;;  %2357 = vmatpush1.bf16.msra.mxu1 %v6706_v36  ;;  %v6777_v35 = vld [vmem:[%s8180_s23 + $0x288] ss:$16 sps:$4 sm:$0xff]   ;;  %v6782_v36 = vld [vmem:[%s8180_s23 + $0x2a4] ss:$16 sps:$4 sm:$0xff]  }
 0x127   : > { %2194 = vmatprep.subr.bf16.mxu0 %v6707_v40  ;;  %2358 = vmatprep.subr.bf16.mxu1 %v6709_v41  ;;  %v6788_v40 = vld [vmem:[%s8180_s23 + $0x2c4] ss:$16 sps:$4 sm:$0xff]   ;;  %v6791_v41 = vld [vmem:[%s8180_s23 + $0x2cc] ss:$16 sps:$4 sm:$0xff]  }
 0x12a   : > { %2195 = vmatpush1.bf16.msra.mxu0 %v6711_v42  ;;  %2359 = vmatpush1.bf16.msra.mxu1 %v6712_v45  ;;  %v6786_v42 = vld [vmem:[%s8180_s23 + $0x2c0] ss:$16 sps:$4 sm:$0xff]   ;;  %v6794_v45 = vld [vmem:[%s8180_s23 + $0x2e4] ss:$16 sps:$4 sm:$0xff]  }
 0x12b   : > { %2196 = vmatprep.subr.bf16.mxu0 %v6713_v46  ;;  %2360 = vmatprep.subr.bf16.mxu1 %v6715_v47  ;;  %v6797_v46 = vld [vmem:[%s8180_s23 + $0x2ec] ss:$16 sps:$4 sm:$0xff]   ;;  %v6792_v47 = vld [vmem:[%s8180_s23 + $0x2e0] ss:$16 sps:$4 sm:$0xff]  }
 0x12e   : > { %2197 = vmatpush1.bf16.msra.mxu0 %v6717_v48  ;;  %2361 = vmatpush1.bf16.msra.mxu1 %v6718_v49  ;;  %v6795_v48 = vld [vmem:[%s8180_s23 + $0x2e8] ss:$16 sps:$4 sm:$0xff]   ;;  %v6800_v49 = vld [vmem:[%s8180_s23 + $0x304] ss:$16 sps:$4 sm:$0xff]  }
 0x12f   : > { %2198 = vmatprep.subr.bf16.mxu0 %v6719_v51  ;;  %2362 = vmatprep.subr.bf16.mxu1 %v6721_v52  ;;  %v6803_v51 = vld [vmem:[%s8180_s23 + $0x30c] ss:$16 sps:$4 sm:$0xff]   ;;  %v6798_v52 = vld [vmem:[%s8180_s23 + $0x300] ss:$16 sps:$4 sm:$0xff]  }
 0x132   : > { %2199 = vmatpush1.bf16.msra.mxu0 %v6723_v54  ;;  %2363 = vmatpush1.bf16.msra.mxu1 %v6724_v56  ;;  %v6806_v54 = vld [vmem:[%s8180_s23 + $0x324] ss:$16 sps:$4 sm:$0xff]   ;;  %v6804_v56 = vld [vmem:[%s8180_s23 + $0x320] ss:$16 sps:$4 sm:$0xff]  }
 0x133   : > { %2200 = vmatprep.subr.bf16.mxu0 %v6725_v57  ;;  %2364 = vmatprep.subr.bf16.mxu1 %v6727_v58  ;;  %v6807_v57 = vld [vmem:[%s8180_s23 + $0x328] ss:$16 sps:$4 sm:$0xff]   ;;  %v6812_v58 = vld [vmem:[%s8180_s23 + $0x344] ss:$16 sps:$4 sm:$0xff]  }
 0x136   : > { %2201 = vmatpush1.bf16.msra.mxu0 %v6729_v60  ;;  %2365 = vmatpush1.bf16.msra.mxu1 %v6730_v62  ;;  %v6810_v60 = vld [vmem:[%s8180_s23 + $0x340] ss:$16 sps:$4 sm:$0xff]   ;;  %v6818_v62 = vld [vmem:[%s8180_s23 + $0x364] ss:$16 sps:$4 sm:$0xff]  }
 0x137   : > { %2202 = vmatprep.subr.bf16.mxu0 %v6731_v63  ;;  %2366 = vmatprep.subr.bf16.mxu1 %v6733_v0  ;;  %v6821_v63 = vld [vmem:[%s8180_s23 + $0x36c] ss:$16 sps:$4 sm:$0xff]   ;;  %v6816_v0 = vld [vmem:[%s8180_s23 + $0x360] ss:$16 sps:$4 sm:$0xff]  }
 0x13a   : > { %2203 = vmatpush1.bf16.msra.mxu0 %v6735_v1  ;;  %2367 = vmatpush1.bf16.msra.mxu1 %v6736_v2  ;;  %v6819_v1 = vld [vmem:[%s8180_s23 + $0x368] ss:$16 sps:$4 sm:$0xff]   ;;  %v6824_v2 = vld [vmem:[%s8180_s23 + $0x384] ss:$16 sps:$4 sm:$0xff]  }
 0x13b   : > { %2204 = vmatprep.subr.bf16.mxu0 %v6737_v3  ;;  %2368 = vmatprep.subr.bf16.mxu1 %v6739_v4  ;;  %v6827_v3 = vld [vmem:[%s8180_s23 + $0x38c] ss:$16 sps:$4 sm:$0xff]   ;;  %v6822_v4 = vld [vmem:[%s8180_s23 + $0x380] ss:$16 sps:$4 sm:$0xff]  }
 0x13e   : > { %2205 = vmatpush1.bf16.msra.mxu0 %v6741_v6  ;;  %2369 = vmatpush1.bf16.msra.mxu1 %v6742_v7  ;;  %v6830_v6 = vld [vmem:[%s8180_s23 + $0x3a4] ss:$16 sps:$4 sm:$0xff]   ;;  %v6833_v7 = vld [vmem:[%s8180_s23 + $0x3ac] ss:$16 sps:$4 sm:$0xff]  }
 0x13f   : > { %2206 = vmatprep.subr.bf16.mxu0 %v6743_v8  ;;  %2370 = vmatprep.subr.bf16.mxu1 %v6745_v9  ;;  %v6828_v8 = vld [vmem:[%s8180_s23 + $0x3a0] ss:$16 sps:$4 sm:$0xff]   ;;  %v6831_v9 = vld [vmem:[%s8180_s23 + $0x3a8] ss:$16 sps:$4 sm:$0xff]  }
 0x142   : > { %2207 = vmatpush1.bf16.msra.mxu0 %v6747_v11  ;;  %2371 = vmatpush1.bf16.msra.mxu1 %v6748_v12  ;;  %v6836_v11 = vld [vmem:[%s8180_s23 + $0x3c4] ss:$16 sps:$4 sm:$0xff]   ;;  %v6839_v12 = vld [vmem:[%s8180_s23 + $0x3cc] ss:$16 sps:$4 sm:$0xff]  }
 0x143   : > { %2217 = vmatprep.subr.bf16.mxu0 %v6752_v13  ;;  %2381 = vmatprep.subr.bf16.mxu1 %v6755_v14  ;;  %v6834_v13 = vld [vmem:[%s8180_s23 + $0x3c0] ss:$16 sps:$4 sm:$0xff]   ;;  %v6837_v14 = vld [vmem:[%s8180_s23 + $0x3c8] ss:$16 sps:$4 sm:$0xff]  }
 0x145   : > { %2209 = vmatmul.mubr.bf16.vlgmr.msra.gmra.mrb[0].mxu0 %v632_v17  ;;  %2373 = vmatmul.mubr.bf16.vlgmr.msra.gmra.mrb[0].mxu1 %v632_v17  ;;  %v6840_v17 = vld [vmem:[%s8180_s23 + $0x3e0] ss:$16 sps:$4 sm:$0xff]  }
 0x146   : > { %2218 = vmatpush1.bf16.msra.mxu0 %v6750_v16  ;;  %2382 = vmatpush1.bf16.msra.mxu1 %v6753_v18  ;;  %v6845_v16 = vld [vmem:[%s8180_s23 + $0x3ec] ss:$16 sps:$4 sm:$0xff]   ;;  %v6843_v18 = vld [vmem:[%s8180_s23 + $0x3e8] ss:$16 sps:$4 sm:$0xff]  }
 0x147   : > { %2219 = vmatprep.subr.bf16.mxu0 %v6758_v19  ;;  %2383 = vmatprep.subr.bf16.mxu1 %v6761_v20  ;;  %v6848_v19 = vld [vmem:[%s8180_s23 + $0x404] ss:$16 sps:$4 sm:$0xff]   ;;  %v6851_v20 = vld [vmem:[%s8180_s23 + $0x40c] ss:$16 sps:$4 sm:$0xff]  }
 0x148   : > { %2249 = vmatprep.mubr.bf16.mxu0 %v635_v21  ;;  %2413 = vmatprep.mubr.bf16.mxu1 %v635_v21  ;;  %v6846_v21 = vld [vmem:[%s8180_s23 + $0x400] ss:$16 sps:$4 sm:$0xff]  }
 0x14a   : > { %2220 = vmatpush1.bf16.msra.mxu0 %v6756_v22  ;;  %2384 = vmatpush1.bf16.msra.mxu1 %v6759_v23  ;;  %v634_v22 = vpack.c.bf16 %v8285_v10, %v8285_v10  ;;  %v6849_v23 = vld [vmem:[%s8180_s23 + $0x408] ss:$16 sps:$4 sm:$0xff]  }
 0x14b   : > { %2221 = vmatprep.subr.bf16.mxu0 %v6764_v24  ;;  %2385 = vmatprep.subr.bf16.mxu1 %v6767_v25  ;;  %v8362_v24 = vld [vmem:[%s8206_s21 + $0x8] sm:$0xff]  ;;  %v6854_v25 = vld [vmem:[%s8180_s23 + $0x424] ss:$16 sps:$4 sm:$0xff]  }
 0x14e   : > { %2222 = vmatpush1.bf16.msra.mxu0 %v6762_v26  ;;  %2386 = vmatpush1.bf16.msra.mxu1 %v6765_v27  ;;  %v6857_v26 = vld [vmem:[%s8180_s23 + $0x42c] ss:$16 sps:$4 sm:$0xff]   ;;  %v8368_v27 = vrot.slane %v8362_v24, %v8262_v50 }
 0x14f   : > { %2223 = vmatprep.subr.bf16.mxu0 %v6770_v28  ;;  %2387 = vmatprep.subr.bf16.mxu1 %v6773_v29  ;;  %v6852_v28 = vld [vmem:[%s8180_s23 + $0x420] ss:$16 sps:$4 sm:$0xff]   ;;  %v6855_v29 = vld [vmem:[%s8180_s23 + $0x428] ss:$16 sps:$4 sm:$0xff]  }
 0x150   : > { %v622_v10 = vcombine.high %v8368_v27, %v8368_v27 }
 0x152   : > { %2224 = vmatpush1.bf16.msra.mxu0 %v6768_v30  ;;  %2388 = vmatpush1.bf16.msra.mxu1 %v6771_v31  ;;  %v6860_v30 = vld [vmem:[%s8180_s23 + $0x444] ss:$16 sps:$4 sm:$0xff]   ;;  %v6863_v31 = vld [vmem:[%s8180_s23 + $0x44c] ss:$16 sps:$4 sm:$0xff]  }
 0x153   : > { %2225 = vmatprep.subr.bf16.mxu0 %v6776_v32  ;;  %2389 = vmatprep.subr.bf16.mxu1 %v6779_v33  ;;  %v637_v32 = vpack.c.bf16 %v622_v10, %v622_v10  ;;  %v6858_v33 = vld [vmem:[%s8180_s23 + $0x440] ss:$16 sps:$4 sm:$0xff]   ;;  %v6939_v10 = vld [vmem:[%s8180_s23 + $0x5e8] ss:$16 sps:$4 sm:$0xff]  }
 0x156   : > { %2226 = vmatpush1.bf16.msra.mxu0 %v6774_v34  ;;  %2390 = vmatpush1.bf16.msra.mxu1 %v6777_v35  ;;  %v6861_v34 = vld [vmem:[%s8180_s23 + $0x448] ss:$16 sps:$4 sm:$0xff]   ;;  %v6866_v35 = vld [vmem:[%s8180_s23 + $0x464] ss:$16 sps:$4 sm:$0xff]  }
 0x157   : > { %2227 = vmatprep.subr.bf16.mxu0 %v6782_v36  ;;  %2391 = vmatprep.subr.bf16.mxu1 %v6785_v37  ;;  %v6869_v36 = vld [vmem:[%s8180_s23 + $0x46c] ss:$16 sps:$4 sm:$0xff]   ;;  %v6864_v37 = vld [vmem:[%s8180_s23 + $0x460] ss:$16 sps:$4 sm:$0xff]  }
 0x15a   : > { %2228 = vmatpush1.bf16.msra.mxu0 %v6780_v38  ;;  %2392 = vmatpush1.bf16.msra.mxu1 %v6783_v39  ;;  %v6867_v38 = vld [vmem:[%s8180_s23 + $0x468] ss:$16 sps:$4 sm:$0xff]   ;;  %v6872_v39 = vld [vmem:[%s8180_s23 + $0x484] ss:$16 sps:$4 sm:$0xff]  }
 0x15b   : > { %2229 = vmatprep.subr.bf16.mxu0 %v6788_v40  ;;  %2393 = vmatprep.subr.bf16.mxu1 %v6791_v41  ;;  %v6875_v40 = vld [vmem:[%s8180_s23 + $0x48c] ss:$16 sps:$4 sm:$0xff]   ;;  %v6870_v41 = vld [vmem:[%s8180_s23 + $0x480] ss:$16 sps:$4 sm:$0xff]  }
 0x15e   : > { %2230 = vmatpush1.bf16.msra.mxu0 %v6786_v42  ;;  %2394 = vmatpush1.bf16.msra.mxu1 %v6789_v43  ;;  %v6873_v42 = vld [vmem:[%s8180_s23 + $0x488] ss:$16 sps:$4 sm:$0xff]   ;;  %v6878_v43 = vld [vmem:[%s8180_s23 + $0x4a4] ss:$16 sps:$4 sm:$0xff]  }
 0x15f   : > { %2231 = vmatprep.subr.bf16.mxu0 %v6794_v45  ;;  %2395 = vmatprep.subr.bf16.mxu1 %v6797_v46  ;;  %v6881_v45 = vld [vmem:[%s8180_s23 + $0x4ac] ss:$16 sps:$4 sm:$0xff]   ;;  %v6876_v46 = vld [vmem:[%s8180_s23 + $0x4a0] ss:$16 sps:$4 sm:$0xff]  }
 0x162   : > { %2232 = vmatpush1.bf16.msra.mxu0 %v6792_v47  ;;  %2396 = vmatpush1.bf16.msra.mxu1 %v6795_v48  ;;  %v6879_v47 = vld [vmem:[%s8180_s23 + $0x4a8] ss:$16 sps:$4 sm:$0xff]   ;;  %v6884_v48 = vld [vmem:[%s8180_s23 + $0x4c4] ss:$16 sps:$4 sm:$0xff]  }
 0x163   : > { %2233 = vmatprep.subr.bf16.mxu0 %v6800_v49  ;;  %2397 = vmatprep.subr.bf16.mxu1 %v6803_v51  ;;  %v6887_v49 = vld [vmem:[%s8180_s23 + $0x4cc] ss:$16 sps:$4 sm:$0xff]   ;;  %v6882_v51 = vld [vmem:[%s8180_s23 + $0x4c0] ss:$16 sps:$4 sm:$0xff]  }
 0x166   : > { %2234 = vmatpush1.bf16.msra.mxu0 %v6798_v52  ;;  %2398 = vmatpush1.bf16.msra.mxu1 %v6801_v53  ;;  %v6885_v52 = vld [vmem:[%s8180_s23 + $0x4c8] ss:$16 sps:$4 sm:$0xff]   ;;  %v6890_v53 = vld [vmem:[%s8180_s23 + $0x4e4] ss:$16 sps:$4 sm:$0xff]  }
 0x167   : > { %2235 = vmatprep.subr.bf16.mxu0 %v6806_v54  ;;  %2399 = vmatprep.subr.bf16.mxu1 %v6809_v55  ;;  %v6893_v54 = vld [vmem:[%s8180_s23 + $0x4ec] ss:$16 sps:$4 sm:$0xff]   ;;  %v6888_v55 = vld [vmem:[%s8180_s23 + $0x4e0] ss:$16 sps:$4 sm:$0xff]  }
 0x16a   : > { %2236 = vmatpush1.bf16.msra.mxu0 %v6804_v56  ;;  %2400 = vmatpush1.bf16.msra.mxu1 %v6807_v57  ;;  %v6891_v56 = vld [vmem:[%s8180_s23 + $0x4e8] ss:$16 sps:$4 sm:$0xff]   ;;  %v6896_v57 = vld [vmem:[%s8180_s23 + $0x504] ss:$16 sps:$4 sm:$0xff]  }
 0x16b   : > { %2237 = vmatprep.subr.bf16.mxu0 %v6812_v58  ;;  %2401 = vmatprep.subr.bf16.mxu1 %v6815_v59  ;;  %v6899_v58 = vld [vmem:[%s8180_s23 + $0x50c] ss:$16 sps:$4 sm:$0xff]   ;;  %v6894_v59 = vld [vmem:[%s8180_s23 + $0x500] ss:$16 sps:$4 sm:$0xff]  }
 0x16e   : > { %2238 = vmatpush1.bf16.msra.mxu0 %v6810_v60  ;;  %2402 = vmatpush1.bf16.msra.mxu1 %v6813_v61  ;;  %v6897_v60 = vld [vmem:[%s8180_s23 + $0x508] ss:$16 sps:$4 sm:$0xff]   ;;  %v6902_v61 = vld [vmem:[%s8180_s23 + $0x524] ss:$16 sps:$4 sm:$0xff]  }
 0x16f   : > { %2239 = vmatprep.subr.bf16.mxu0 %v6818_v62  ;;  %2403 = vmatprep.subr.bf16.mxu1 %v6821_v63  ;;  %v6905_v62 = vld [vmem:[%s8180_s23 + $0x52c] ss:$16 sps:$4 sm:$0xff]   ;;  %v6900_v63 = vld [vmem:[%s8180_s23 + $0x520] ss:$16 sps:$4 sm:$0xff]  }
 0x172   : > { %2240 = vmatpush1.bf16.msra.mxu0 %v6816_v0  ;;  %2404 = vmatpush1.bf16.msra.mxu1 %v6819_v1  ;;  %v6903_v0 = vld [vmem:[%s8180_s23 + $0x528] ss:$16 sps:$4 sm:$0xff]   ;;  %v6908_v1 = vld [vmem:[%s8180_s23 + $0x544] ss:$16 sps:$4 sm:$0xff]  }
 0x173   : > { %2241 = vmatprep.subr.bf16.mxu0 %v6824_v2  ;;  %2405 = vmatprep.subr.bf16.mxu1 %v6827_v3  ;;  %v6911_v2 = vld [vmem:[%s8180_s23 + $0x54c] ss:$16 sps:$4 sm:$0xff]   ;;  %v6906_v3 = vld [vmem:[%s8180_s23 + $0x540] ss:$16 sps:$4 sm:$0xff]  }
 0x176   : > { %2242 = vmatpush1.bf16.msra.mxu0 %v6822_v4  ;;  %2406 = vmatpush1.bf16.msra.mxu1 %v6825_v5  ;;  %v6909_v4 = vld [vmem:[%s8180_s23 + $0x548] ss:$16 sps:$4 sm:$0xff]   ;;  %v6914_v5 = vld [vmem:[%s8180_s23 + $0x564] ss:$16 sps:$4 sm:$0xff]  }
 0x177   : > { %2243 = vmatprep.subr.bf16.mxu0 %v6830_v6  ;;  %2407 = vmatprep.subr.bf16.mxu1 %v6833_v7  ;;  %v6917_v6 = vld [vmem:[%s8180_s23 + $0x56c] ss:$16 sps:$4 sm:$0xff]   ;;  %v6912_v7 = vld [vmem:[%s8180_s23 + $0x560] ss:$16 sps:$4 sm:$0xff]  }
 0x17a   : > { %2244 = vmatpush1.bf16.msra.mxu0 %v6828_v8  ;;  %2408 = vmatpush1.bf16.msra.mxu1 %v6831_v9  ;;  %v6915_v8 = vld [vmem:[%s8180_s23 + $0x568] ss:$16 sps:$4 sm:$0xff]   ;;  %v6920_v9 = vld [vmem:[%s8180_s23 + $0x584] ss:$16 sps:$4 sm:$0xff]  }
 0x17b   : > { %2245 = vmatprep.subr.bf16.mxu0 %v6836_v11  ;;  %2409 = vmatprep.subr.bf16.mxu1 %v6839_v12  ;;  %v6923_v11 = vld [vmem:[%s8180_s23 + $0x58c] ss:$16 sps:$4 sm:$0xff]   ;;  %v6918_v12 = vld [vmem:[%s8180_s23 + $0x580] ss:$16 sps:$4 sm:$0xff]  }
 0x17e   : > { %2246 = vmatpush1.bf16.msra.mxu0 %v6834_v13  ;;  %2410 = vmatpush1.bf16.msra.mxu1 %v6837_v14  ;;  %v6921_v13 = vld [vmem:[%s8180_s23 + $0x588] ss:$16 sps:$4 sm:$0xff]   ;;  %v6926_v14 = vld [vmem:[%s8180_s23 + $0x5a4] ss:$16 sps:$4 sm:$0xff]  }
 0x17f   : > { %2247 = vmatprep.subr.bf16.mxu0 %v6842_v15  ;;  %2411 = vmatprep.subr.bf16.mxu1 %v6845_v16  ;;  %v6929_v15 = vld [vmem:[%s8180_s23 + $0x5ac] ss:$16 sps:$4 sm:$0xff]   ;;  %v6924_v16 = vld [vmem:[%s8180_s23 + $0x5a0] ss:$16 sps:$4 sm:$0xff]  }
 0x182   : > { %2248 = vmatpush1.bf16.msra.mxu0 %v6840_v17  ;;  %2412 = vmatpush1.bf16.msra.mxu1 %v6843_v18  ;;  %v6927_v17 = vld [vmem:[%s8180_s23 + $0x5a8] ss:$16 sps:$4 sm:$0xff]   ;;  %v6932_v18 = vld [vmem:[%s8180_s23 + $0x5c4] ss:$16 sps:$4 sm:$0xff]  }
 0x183   : > { %2258 = vmatprep.subr.bf16.mxu0 %v6848_v19  ;;  %2422 = vmatprep.subr.bf16.mxu1 %v6851_v20  ;;  %v6935_v19 = vld [vmem:[%s8180_s23 + $0x5cc] ss:$16 sps:$4 sm:$0xff]   ;;  %v607_v20 = vcombine.high %v8362_v24, %v8362_v24  ;;  %v6936_v24 = vld [vmem:[%s8180_s23 + $0x5e0] ss:$16 sps:$4 sm:$0xff]  }
 0x185   : > { %2250 = vmatmul.mubr.bf16.vlgmr.msra.gmra.mrb[0].mxu0 %v634_v22  ;;  %2414 = vmatmul.mubr.bf16.vlgmr.msra.gmra.mrb[0].mxu1 %v634_v22  ;;  %v6933_v22 = vld [vmem:[%s8180_s23 + $0x5c8] ss:$16 sps:$4 sm:$0xff]  }
 0x186   : > { %2259 = vmatpush1.bf16.msra.mxu0 %v6846_v21  ;;  %2423 = vmatpush1.bf16.msra.mxu1 %v6849_v23  ;;  %v6930_v21 = vld [vmem:[%s8180_s23 + $0x5c0] ss:$16 sps:$4 sm:$0xff]   ;;  %v6938_v23 = vld [vmem:[%s8180_s23 + $0x5e4] ss:$16 sps:$4 sm:$0xff]  }
 0x187   : > { %2260 = vmatprep.subr.bf16.mxu0 %v6854_v25  ;;  %2424 = vmatprep.subr.bf16.mxu1 %v6857_v26  ;;  %v6941_v25 = vld [vmem:[%s8180_s23 + $0x5ec] ss:$16 sps:$4 sm:$0xff]   ;;  %v8431_v26 = vrot.slane %v607_v20, %v8262_v50  ;;  %v7017_v20 = vld [vmem:[%s8180_s23 + $0x788] ss:$16 sps:$4 sm:$0xff]  }
 0x188   : > { %2290 = vmatprep.mubr.bf16.mxu0 %v637_v32  ;;  %2454 = vmatprep.mubr.bf16.mxu1 %v637_v32  ;;  %v6942_v32 = vld [vmem:[%s8180_s23 + $0x600] ss:$16 sps:$4 sm:$0xff]  }
 0x18a   : > { %2261 = vmatpush1.bf16.msra.mxu0 %v6852_v28  ;;  %2425 = vmatpush1.bf16.msra.mxu1 %v6855_v29  ;;  %v6944_v28 = vld [vmem:[%s8180_s23 + $0x604] ss:$16 sps:$4 sm:$0xff]   ;;  %v6947_v29 = vld [vmem:[%s8180_s23 + $0x60c] ss:$16 sps:$4 sm:$0xff]  }
 0x18b   : > { %2262 = vmatprep.subr.bf16.mxu0 %v6860_v30  ;;  %2426 = vmatprep.subr.bf16.mxu1 %v6863_v31  ;;  %v623_v30 = vcombine.high %v8431_v26, %v8431_v26  ;;  %v636_v31 = vpack.c.bf16 %v8368_v27, %v8368_v27  ;;  %v6948_v27 = vld [vmem:[%s8180_s23 + $0x620] ss:$16 sps:$4 sm:$0xff]  }
 0x18e   : > { %2263 = vmatpush1.bf16.msra.mxu0 %v6858_v33  ;;  %2427 = vmatpush1.bf16.msra.mxu1 %v6861_v34  ;;  %v6945_v33 = vld [vmem:[%s8180_s23 + $0x608] ss:$16 sps:$4 sm:$0xff]   ;;  %v6950_v34 = vld [vmem:[%s8180_s23 + $0x624] ss:$16 sps:$4 sm:$0xff]  }
 0x18f   : > { %2264 = vmatprep.subr.bf16.mxu0 %v6866_v35  ;;  %2428 = vmatprep.subr.bf16.mxu1 %v6869_v36  ;;  %v6953_v35 = vld [vmem:[%s8180_s23 + $0x62c] ss:$16 sps:$4 sm:$0xff]   ;;  %v639_v36 = vpack.c.bf16 %v623_v30, %v623_v30  ;;  %v7029_v30 = vld [vmem:[%s8180_s23 + $0x7c8] ss:$16 sps:$4 sm:$0xff]  }
 0x192   : > { %2265 = vmatpush1.bf16.msra.mxu0 %v6864_v37  ;;  %2429 = vmatpush1.bf16.msra.mxu1 %v6867_v38  ;;  %v6951_v37 = vld [vmem:[%s8180_s23 + $0x628] ss:$16 sps:$4 sm:$0xff]   ;;  %v6956_v38 = vld [vmem:[%s8180_s23 + $0x644] ss:$16 sps:$4 sm:$0xff]  }
 0x193   : > { %2266 = vmatprep.subr.bf16.mxu0 %v6872_v39  ;;  %2430 = vmatprep.subr.bf16.mxu1 %v6875_v40  ;;  %v6959_v39 = vld [vmem:[%s8180_s23 + $0x64c] ss:$16 sps:$4 sm:$0xff]   ;;  %v6954_v40 = vld [vmem:[%s8180_s23 + $0x640] ss:$16 sps:$4 sm:$0xff]  }
 0x196   : > { %2267 = vmatpush1.bf16.msra.mxu0 %v6870_v41  ;;  %2431 = vmatpush1.bf16.msra.mxu1 %v6873_v42  ;;  %v6957_v41 = vld [vmem:[%s8180_s23 + $0x648] ss:$16 sps:$4 sm:$0xff]   ;;  %v6962_v42 = vld [vmem:[%s8180_s23 + $0x664] ss:$16 sps:$4 sm:$0xff]  }
 0x197   : > { %2268 = vmatprep.subr.bf16.mxu0 %v6878_v43  ;;  %2432 = vmatprep.subr.bf16.mxu1 %v6881_v45  ;;  %v6965_v43 = vld [vmem:[%s8180_s23 + $0x66c] ss:$16 sps:$4 sm:$0xff]   ;;  %v6960_v45 = vld [vmem:[%s8180_s23 + $0x660] ss:$16 sps:$4 sm:$0xff]  }
 0x19a   : > { %2269 = vmatpush1.bf16.msra.mxu0 %v6876_v46  ;;  %2433 = vmatpush1.bf16.msra.mxu1 %v6879_v47  ;;  %v6963_v46 = vld [vmem:[%s8180_s23 + $0x668] ss:$16 sps:$4 sm:$0xff]   ;;  %v6968_v47 = vld [vmem:[%s8180_s23 + $0x684] ss:$16 sps:$4 sm:$0xff]  }
 0x19b   : > { %2270 = vmatprep.subr.bf16.mxu0 %v6884_v48  ;;  %2434 = vmatprep.subr.bf16.mxu1 %v6887_v49  ;;  %v6971_v48 = vld [vmem:[%s8180_s23 + $0x68c] ss:$16 sps:$4 sm:$0xff]   ;;  %v6966_v49 = vld [vmem:[%s8180_s23 + $0x680] ss:$16 sps:$4 sm:$0xff]  }
 0x19e   : > { %2271 = vmatpush1.bf16.msra.mxu0 %v6882_v51  ;;  %2435 = vmatpush1.bf16.msra.mxu1 %v6885_v52  ;;  %v6969_v51 = vld [vmem:[%s8180_s23 + $0x688] ss:$16 sps:$4 sm:$0xff]   ;;  %v6974_v52 = vld [vmem:[%s8180_s23 + $0x6a4] ss:$16 sps:$4 sm:$0xff]  }
 0x19f   : > { %2272 = vmatprep.subr.bf16.mxu0 %v6890_v53  ;;  %2436 = vmatprep.subr.bf16.mxu1 %v6893_v54  ;;  %v6977_v53 = vld [vmem:[%s8180_s23 + $0x6ac] ss:$16 sps:$4 sm:$0xff]   ;;  %v6972_v54 = vld [vmem:[%s8180_s23 + $0x6a0] ss:$16 sps:$4 sm:$0xff]  }
 0x1a2   : > { %2273 = vmatpush1.bf16.msra.mxu0 %v6888_v55  ;;  %2437 = vmatpush1.bf16.msra.mxu1 %v6891_v56  ;;  %v6975_v55 = vld [vmem:[%s8180_s23 + $0x6a8] ss:$16 sps:$4 sm:$0xff]   ;;  %v6980_v56 = vld [vmem:[%s8180_s23 + $0x6c4] ss:$16 sps:$4 sm:$0xff]  }
 0x1a3   : > { %2274 = vmatprep.subr.bf16.mxu0 %v6896_v57  ;;  %2438 = vmatprep.subr.bf16.mxu1 %v6899_v58  ;;  %v6983_v57 = vld [vmem:[%s8180_s23 + $0x6cc] ss:$16 sps:$4 sm:$0xff]   ;;  %v6978_v58 = vld [vmem:[%s8180_s23 + $0x6c0] ss:$16 sps:$4 sm:$0xff]  }
 0x1a6   : > { %2275 = vmatpush1.bf16.msra.mxu0 %v6894_v59  ;;  %2439 = vmatpush1.bf16.msra.mxu1 %v6897_v60  ;;  %v6981_v59 = vld [vmem:[%s8180_s23 + $0x6c8] ss:$16 sps:$4 sm:$0xff]   ;;  %v6986_v60 = vld [vmem:[%s8180_s23 + $0x6e4] ss:$16 sps:$4 sm:$0xff]  }
 0x1a7   : > { %2276 = vmatprep.subr.bf16.mxu0 %v6902_v61  ;;  %2440 = vmatprep.subr.bf16.mxu1 %v6905_v62  ;;  %v6989_v61 = vld [vmem:[%s8180_s23 + $0x6ec] ss:$16 sps:$4 sm:$0xff]   ;;  %v6984_v62 = vld [vmem:[%s8180_s23 + $0x6e0] ss:$16 sps:$4 sm:$0xff]  }
 0x1aa   : > { %2277 = vmatpush1.bf16.msra.mxu0 %v6900_v63  ;;  %2441 = vmatpush1.bf16.msra.mxu1 %v6903_v0  ;;  %v6987_v63 = vld [vmem:[%s8180_s23 + $0x6e8] ss:$16 sps:$4 sm:$0xff]   ;;  %v6992_v0 = vld [vmem:[%s8180_s23 + $0x704] ss:$16 sps:$4 sm:$0xff]  }
 0x1ab   : > { %2278 = vmatprep.subr.bf16.mxu0 %v6908_v1  ;;  %2442 = vmatprep.subr.bf16.mxu1 %v6911_v2  ;;  %v6995_v1 = vld [vmem:[%s8180_s23 + $0x70c] ss:$16 sps:$4 sm:$0xff]   ;;  %v6990_v2 = vld [vmem:[%s8180_s23 + $0x700] ss:$16 sps:$4 sm:$0xff]  }
 0x1ae   : > { %2279 = vmatpush1.bf16.msra.mxu0 %v6906_v3  ;;  %2443 = vmatpush1.bf16.msra.mxu1 %v6909_v4  ;;  %v6993_v3 = vld [vmem:[%s8180_s23 + $0x708] ss:$16 sps:$4 sm:$0xff]   ;;  %v6998_v4 = vld [vmem:[%s8180_s23 + $0x724] ss:$16 sps:$4 sm:$0xff]  }
 0x1af   : > { %2280 = vmatprep.subr.bf16.mxu0 %v6914_v5  ;;  %2444 = vmatprep.subr.bf16.mxu1 %v6917_v6  ;;  %v7001_v5 = vld [vmem:[%s8180_s23 + $0x72c] ss:$16 sps:$4 sm:$0xff]   ;;  %v6996_v6 = vld [vmem:[%s8180_s23 + $0x720] ss:$16 sps:$4 sm:$0xff]  }
 0x1b2   : > { %2281 = vmatpush1.bf16.msra.mxu0 %v6912_v7  ;;  %2445 = vmatpush1.bf16.msra.mxu1 %v6915_v8  ;;  %v6999_v7 = vld [vmem:[%s8180_s23 + $0x728] ss:$16 sps:$4 sm:$0xff]   ;;  %v7004_v8 = vld [vmem:[%s8180_s23 + $0x744] ss:$16 sps:$4 sm:$0xff]  }
 0x1b3   : > { %2282 = vmatprep.subr.bf16.mxu0 %v6920_v9  ;;  %2446 = vmatprep.subr.bf16.mxu1 %v6923_v11  ;;  %v7007_v9 = vld [vmem:[%s8180_s23 + $0x74c] ss:$16 sps:$4 sm:$0xff]   ;;  %v7002_v11 = vld [vmem:[%s8180_s23 + $0x740] ss:$16 sps:$4 sm:$0xff]  }
 0x1b6   : > { %2283 = vmatpush1.bf16.msra.mxu0 %v6918_v12  ;;  %2447 = vmatpush1.bf16.msra.mxu1 %v6921_v13  ;;  %v7005_v12 = vld [vmem:[%s8180_s23 + $0x748] ss:$16 sps:$4 sm:$0xff]   ;;  %v7010_v13 = vld [vmem:[%s8180_s23 + $0x764] ss:$16 sps:$4 sm:$0xff]  }
 0x1b7   : > { %2284 = vmatprep.subr.bf16.mxu0 %v6926_v14  ;;  %2448 = vmatprep.subr.bf16.mxu1 %v6929_v15  ;;  %v7013_v14 = vld [vmem:[%s8180_s23 + $0x76c] ss:$16 sps:$4 sm:$0xff]   ;;  %v7008_v15 = vld [vmem:[%s8180_s23 + $0x760] ss:$16 sps:$4 sm:$0xff]  }
 0x1ba   : > { %2285 = vmatpush1.bf16.msra.mxu0 %v6924_v16  ;;  %2449 = vmatpush1.bf16.msra.mxu1 %v6927_v17  ;;  %v7011_v16 = vld [vmem:[%s8180_s23 + $0x768] ss:$16 sps:$4 sm:$0xff]   ;;  %v7016_v17 = vld [vmem:[%s8180_s23 + $0x784] ss:$16 sps:$4 sm:$0xff]  }
 0x1bb   : > { %2286 = vmatprep.subr.bf16.mxu0 %v6932_v18  ;;  %2450 = vmatprep.subr.bf16.mxu1 %v6935_v19  ;;  %v7019_v18 = vld [vmem:[%s8180_s23 + $0x78c] ss:$16 sps:$4 sm:$0xff]   ;;  %v7014_v19 = vld [vmem:[%s8180_s23 + $0x780] ss:$16 sps:$4 sm:$0xff]  }
 0x1be   : > { %2287 = vmatpush1.bf16.msra.mxu0 %v6930_v21  ;;  %2451 = vmatpush1.bf16.msra.mxu1 %v6933_v22  ;;  %v7022_v21 = vld [vmem:[%s8180_s23 + $0x7a4] ss:$16 sps:$4 sm:$0xff]   ;;  %v7025_v22 = vld [vmem:[%s8180_s23 + $0x7ac] ss:$16 sps:$4 sm:$0xff]  }
 0x1bf   : > { %2288 = vmatprep.subr.bf16.mxu0 %v6938_v23  ;;  %2452 = vmatprep.subr.bf16.mxu1 %v6941_v25  ;;  %v7020_v23 = vld [vmem:[%s8180_s23 + $0x7a0] ss:$16 sps:$4 sm:$0xff]   ;;  %v7023_v25 = vld [vmem:[%s8180_s23 + $0x7a8] ss:$16 sps:$4 sm:$0xff]  }
 0x1c2   : > { %2289 = vmatpush1.bf16.msra.mxu0 %v6936_v24  ;;  %2453 = vmatpush1.bf16.msra.mxu1 %v6939_v10  ;;  %v7028_v24 = vld [vmem:[%s8180_s23 + $0x7c4] ss:$16 sps:$4 sm:$0xff]   ;;  %v7031_v10 = vld [vmem:[%s8180_s23 + $0x7cc] ss:$16 sps:$4 sm:$0xff]  }
 0x1c3   : > { %2299 = vmatprep.subr.bf16.mxu0 %v6944_v28  ;;  %2463 = vmatprep.subr.bf16.mxu1 %v6947_v29  ;;  %v7026_v28 = vld [vmem:[%s8180_s23 + $0x7c0] ss:$16 sps:$4 sm:$0xff]  }
 0x1c4   : > { %v8499_v29 = vld [vmem:[%s8211_s22] sm:$0xff] }
 0x1c5   : > { %2291 = vmatmul.mubr.bf16.vlgmr.msra.gmra.mrb[0].mxu0 %v636_v31  ;;  %2455 = vmatmul.mubr.bf16.vlgmr.msra.gmra.mrb[0].mxu1 %v636_v31  ;;  %v7034_v31 = vld [vmem:[%s8180_s23 + $0x7e4] ss:$16 sps:$4 sm:$0xff]  }
 0x1c6   : > { %2300 = vmatpush1.bf16.msra.mxu0 %v6942_v32  ;;  %2464 = vmatpush1.bf16.msra.mxu1 %v6945_v33  ;;  %v7037_v32 = vld [vmem:[%s8180_s23 + $0x7ec] ss:$16 sps:$4 sm:$0xff]   ;;  %v8506_v33 = vrot.slane %v8499_v29, %v8262_v50 }
 0x1c7   : > { %2301 = vmatprep.subr.bf16.mxu0 %v6950_v34  ;;  %2465 = vmatprep.subr.bf16.mxu1 %v6953_v35  ;;  %v7032_v34 = vld [vmem:[%s8180_s23 + $0x7e0] ss:$16 sps:$4 sm:$0xff]   ;;  %v7035_v35 = vld [vmem:[%s8180_s23 + $0x7e8] ss:$16 sps:$4 sm:$0xff]  }
 0x1c8   : > { %2331 = vmatprep.mubr.bf16.mxu0 %v639_v36  ;;  %2495 = vmatprep.mubr.bf16.mxu1 %v639_v36  ;;  %v7041_v36 = vld [vmem:[%s8180_s23 + $0x4] ss:$16 sps:$4 sm:$0xff]  }
 0x1ca   : > { %2302 = vmatpush1.bf16.msra.mxu0 %v6948_v27  ;;  %2466 = vmatpush1.bf16.msra.mxu1 %v6951_v37  ;;  %v7044_v27 = vld [vmem:[%s8180_s23 + $0xc] ss:$16 sps:$4 sm:$0xff]   ;;  %v2548_v37 = vcombine.high %v8506_v33, %v8506_v33 }
 0x1cb   : > { %2303 = vmatprep.subr.bf16.mxu0 %v6956_v38  ;;  %2467 = vmatprep.subr.bf16.mxu1 %v6959_v39  ;;  %v638_v38 = vpack.c.bf16 %v8431_v26, %v8431_v26  ;;  %v7039_v39 = vld [vmem:[%s8180_s23] ss:$16 sps:$4 sm:$0xff]   ;;  %v7048_v26 = vld [vmem:[%s8180_s23 + $0x28] ss:$16 sps:$4 sm:$0xff]  }
 0x1ce   : > { %2304 = vmatpush1.bf16.msra.mxu0 %v6954_v40  ;;  %2468 = vmatpush1.bf16.msra.mxu1 %v6957_v41  ;;  %v7042_v40 = vld [vmem:[%s8180_s23 + $0x8] ss:$16 sps:$4 sm:$0xff]   ;;  %v7047_v41 = vld [vmem:[%s8180_s23 + $0x24] ss:$16 sps:$4 sm:$0xff]  }
 0x1cf   : > { %2305 = vmatprep.subr.bf16.mxu0 %v6962_v42  ;;  %2469 = vmatprep.subr.bf16.mxu1 %v6965_v43  ;;  %v7050_v42 = vld [vmem:[%s8180_s23 + $0x2c] ss:$16 sps:$4 sm:$0xff]   ;;  %v2576_v43 = vpack.c.bf16 %v2548_v37, %v2548_v37  ;;  %v7123_v37 = vld [vmem:[%s8180_s23 + $0x1c0] ss:$16 sps:$4 sm:$0xff]  }
 0x1d2   : > { %2306 = vmatpush1.bf16.msra.mxu0 %v6960_v45  ;;  %2470 = vmatpush1.bf16.msra.mxu1 %v6963_v46  ;;  %v7045_v45 = vld [vmem:[%s8180_s23 + $0x20] ss:$16 sps:$4 sm:$0xff]   ;;  %v7053_v46 = vld [vmem:[%s8180_s23 + $0x44] ss:$16 sps:$4 sm:$0xff]  }
 0x1d3   : > { %2307 = vmatprep.subr.bf16.mxu0 %v6968_v47  ;;  %2471 = vmatprep.subr.bf16.mxu1 %v6971_v48  ;;  %v7056_v47 = vld [vmem:[%s8180_s23 + $0x4c] ss:$16 sps:$4 sm:$0xff]   ;;  %v7051_v48 = vld [vmem:[%s8180_s23 + $0x40] ss:$16 sps:$4 sm:$0xff]  }
 0x1d6   : > { %2308 = vmatpush1.bf16.msra.mxu0 %v6966_v49  ;;  %2472 = vmatpush1.bf16.msra.mxu1 %v6969_v51  ;;  %v7054_v49 = vld [vmem:[%s8180_s23 + $0x48] ss:$16 sps:$4 sm:$0xff]   ;;  %v7059_v51 = vld [vmem:[%s8180_s23 + $0x64] ss:$16 sps:$4 sm:$0xff]  }
 0x1d7   : > { %2309 = vmatprep.subr.bf16.mxu0 %v6974_v52  ;;  %2473 = vmatprep.subr.bf16.mxu1 %v6977_v53  ;;  %v7062_v52 = vld [vmem:[%s8180_s23 + $0x6c] ss:$16 sps:$4 sm:$0xff]   ;;  %v7057_v53 = vld [vmem:[%s8180_s23 + $0x60] ss:$16 sps:$4 sm:$0xff]  }
 0x1da   : > { %2310 = vmatpush1.bf16.msra.mxu0 %v6972_v54  ;;  %2474 = vmatpush1.bf16.msra.mxu1 %v6975_v55  ;;  %v7060_v54 = vld [vmem:[%s8180_s23 + $0x68] ss:$16 sps:$4 sm:$0xff]   ;;  %v7065_v55 = vld [vmem:[%s8180_s23 + $0x84] ss:$16 sps:$4 sm:$0xff]  }
 0x1db   : > { %2311 = vmatprep.subr.bf16.mxu0 %v6980_v56  ;;  %2475 = vmatprep.subr.bf16.mxu1 %v6983_v57  ;;  %v7068_v56 = vld [vmem:[%s8180_s23 + $0x8c] ss:$16 sps:$4 sm:$0xff]   ;;  %v7063_v57 = vld [vmem:[%s8180_s23 + $0x80] ss:$16 sps:$4 sm:$0xff]  }
 0x1de   : > { %2312 = vmatpush1.bf16.msra.mxu0 %v6978_v58  ;;  %2476 = vmatpush1.bf16.msra.mxu1 %v6981_v59  ;;  %v7066_v58 = vld [vmem:[%s8180_s23 + $0x88] ss:$16 sps:$4 sm:$0xff]   ;;  %v7071_v59 = vld [vmem:[%s8180_s23 + $0xa4] ss:$16 sps:$4 sm:$0xff]  }
 0x1df   : > { %2313 = vmatprep.subr.bf16.mxu0 %v6986_v60  ;;  %2477 = vmatprep.subr.bf16.mxu1 %v6989_v61  ;;  %v7074_v60 = vld [vmem:[%s8180_s23 + $0xac] ss:$16 sps:$4 sm:$0xff]   ;;  %v7069_v61 = vld [vmem:[%s8180_s23 + $0xa0] ss:$16 sps:$4 sm:$0xff]  }
 0x1e2   : > { %2314 = vmatpush1.bf16.msra.mxu0 %v6984_v62  ;;  %2478 = vmatpush1.bf16.msra.mxu1 %v6987_v63  ;;  %v7072_v62 = vld [vmem:[%s8180_s23 + $0xa8] ss:$16 sps:$4 sm:$0xff]   ;;  %v7077_v63 = vld [vmem:[%s8180_s23 + $0xc4] ss:$16 sps:$4 sm:$0xff]  }
 0x1e3   : > { %2315 = vmatprep.subr.bf16.mxu0 %v6992_v0  ;;  %2479 = vmatprep.subr.bf16.mxu1 %v6995_v1  ;;  %v7080_v0 = vld [vmem:[%s8180_s23 + $0xcc] ss:$16 sps:$4 sm:$0xff]   ;;  %v7075_v1 = vld [vmem:[%s8180_s23 + $0xc0] ss:$16 sps:$4 sm:$0xff]  }
 0x1e6   : > { %2316 = vmatpush1.bf16.msra.mxu0 %v6990_v2  ;;  %2480 = vmatpush1.bf16.msra.mxu1 %v6993_v3  ;;  %v7078_v2 = vld [vmem:[%s8180_s23 + $0xc8] ss:$16 sps:$4 sm:$0xff]   ;;  %v7083_v3 = vld [vmem:[%s8180_s23 + $0xe4] ss:$16 sps:$4 sm:$0xff]  }
 0x1e7   : > { %2317 = vmatprep.subr.bf16.mxu0 %v6998_v4  ;;  %2481 = vmatprep.subr.bf16.mxu1 %v7001_v5  ;;  %v7086_v4 = vld [vmem:[%s8180_s23 + $0xec] ss:$16 sps:$4 sm:$0xff]   ;;  %v7081_v5 = vld [vmem:[%s8180_s23 + $0xe0] ss:$16 sps:$4 sm:$0xff]  }
 0x1ea   : > { %2318 = vmatpush1.bf16.msra.mxu0 %v6996_v6  ;;  %2482 = vmatpush1.bf16.msra.mxu1 %v6999_v7  ;;  %v7084_v6 = vld [vmem:[%s8180_s23 + $0xe8] ss:$16 sps:$4 sm:$0xff]   ;;  %v7089_v7 = vld [vmem:[%s8180_s23 + $0x104] ss:$16 sps:$4 sm:$0xff]  }
 0x1eb   : > { %2319 = vmatprep.subr.bf16.mxu0 %v7004_v8  ;;  %2483 = vmatprep.subr.bf16.mxu1 %v7007_v9  ;;  %v7092_v8 = vld [vmem:[%s8180_s23 + $0x10c] ss:$16 sps:$4 sm:$0xff]   ;;  %v7087_v9 = vld [vmem:[%s8180_s23 + $0x100] ss:$16 sps:$4 sm:$0xff]  }
 0x1ee   : > { %2320 = vmatpush1.bf16.msra.mxu0 %v7002_v11  ;;  %2484 = vmatpush1.bf16.msra.mxu1 %v7005_v12  ;;  %v7090_v11 = vld [vmem:[%s8180_s23 + $0x108] ss:$16 sps:$4 sm:$0xff]   ;;  %v7095_v12 = vld [vmem:[%s8180_s23 + $0x124] ss:$16 sps:$4 sm:$0xff]  }
 0x1ef   : > { %2321 = vmatprep.subr.bf16.mxu0 %v7010_v13  ;;  %2485 = vmatprep.subr.bf16.mxu1 %v7013_v14  ;;  %v7098_v13 = vld [vmem:[%s8180_s23 + $0x12c] ss:$16 sps:$4 sm:$0xff]   ;;  %v7093_v14 = vld [vmem:[%s8180_s23 + $0x120] ss:$16 sps:$4 sm:$0xff]  }
 0x1f2   : > { %2322 = vmatpush1.bf16.msra.mxu0 %v7008_v15  ;;  %2486 = vmatpush1.bf16.msra.mxu1 %v7011_v16  ;;  %v7096_v15 = vld [vmem:[%s8180_s23 + $0x128] ss:$16 sps:$4 sm:$0xff]   ;;  %v7101_v16 = vld [vmem:[%s8180_s23 + $0x144] ss:$16 sps:$4 sm:$0xff]  }
 0x1f3   : > { %2323 = vmatprep.subr.bf16.mxu0 %v7016_v17  ;;  %2487 = vmatprep.subr.bf16.mxu1 %v7019_v18  ;;  %v7104_v17 = vld [vmem:[%s8180_s23 + $0x14c] ss:$16 sps:$4 sm:$0xff]   ;;  %v7099_v18 = vld [vmem:[%s8180_s23 + $0x140] ss:$16 sps:$4 sm:$0xff]  }
 0x1f6   : > { %2324 = vmatpush1.bf16.msra.mxu0 %v7014_v19  ;;  %2488 = vmatpush1.bf16.msra.mxu1 %v7017_v20  ;;  %v7102_v19 = vld [vmem:[%s8180_s23 + $0x148] ss:$16 sps:$4 sm:$0xff]   ;;  %v7107_v20 = vld [vmem:[%s8180_s23 + $0x164] ss:$16 sps:$4 sm:$0xff]  }
 0x1f7   : > { %2325 = vmatprep.subr.bf16.mxu0 %v7022_v21  ;;  %2489 = vmatprep.subr.bf16.mxu1 %v7025_v22  ;;  %v7110_v21 = vld [vmem:[%s8180_s23 + $0x16c] ss:$16 sps:$4 sm:$0xff]   ;;  %v7105_v22 = vld [vmem:[%s8180_s23 + $0x160] ss:$16 sps:$4 sm:$0xff]  }
 0x1fa   : > { %2326 = vmatpush1.bf16.msra.mxu0 %v7020_v23  ;;  %2490 = vmatpush1.bf16.msra.mxu1 %v7023_v25  ;;  %v7108_v23 = vld [vmem:[%s8180_s23 + $0x168] ss:$16 sps:$4 sm:$0xff]   ;;  %v7113_v25 = vld [vmem:[%s8180_s23 + $0x184] ss:$16 sps:$4 sm:$0xff]  }
 0x1fb   : > { %2327 = vmatprep.subr.bf16.mxu0 %v7028_v24  ;;  %2491 = vmatprep.subr.bf16.mxu1 %v7031_v10  ;;  %v7116_v24 = vld [vmem:[%s8180_s23 + $0x18c] ss:$16 sps:$4 sm:$0xff]   ;;  %v7111_v10 = vld [vmem:[%s8180_s23 + $0x180] ss:$16 sps:$4 sm:$0xff]  }
 0x1fe   : > { %2328 = vmatpush1.bf16.msra.mxu0 %v7026_v28  ;;  %2492 = vmatpush1.bf16.msra.mxu1 %v7029_v30  ;;  %v7114_v28 = vld [vmem:[%s8180_s23 + $0x188] ss:$16 sps:$4 sm:$0xff]   ;;  %v7119_v30 = vld [vmem:[%s8180_s23 + $0x1a4] ss:$16 sps:$4 sm:$0xff]  }
 0x1ff   : > { %2329 = vmatprep.subr.bf16.mxu0 %v7034_v31  ;;  %2493 = vmatprep.subr.bf16.mxu1 %v7037_v32  ;;  %v7122_v31 = vld [vmem:[%s8180_s23 + $0x1ac] ss:$16 sps:$4 sm:$0xff]   ;;  %v7117_v32 = vld [vmem:[%s8180_s23 + $0x1a0] ss:$16 sps:$4 sm:$0xff]  }
 0x202   : > { %2330 = vmatpush1.bf16.msra.mxu0 %v7032_v34  ;;  %2494 = vmatpush1.bf16.msra.mxu1 %v7035_v35  ;;  %v7120_v34 = vld [vmem:[%s8180_s23 + $0x1a8] ss:$16 sps:$4 sm:$0xff]   ;;  %v7125_v35 = vld [vmem:[%s8180_s23 + $0x1c4] ss:$16 sps:$4 sm:$0xff]  }
 0x203   : > { %4119 = vmatprep.subr.bf16.mxu0 %v7041_v36  ;;  %4283 = vmatprep.subr.bf16.mxu1 %v7044_v27  ;;  %v7128_v36 = vld [vmem:[%s8180_s23 + $0x1cc] ss:$16 sps:$4 sm:$0xff]   ;;  %v2533_v27 = vcombine.high %v8499_v29, %v8499_v29  ;;  %v7129_v29 = vld [vmem:[%s8180_s23 + $0x1e0] ss:$16 sps:$4 sm:$0xff]  }
 0x205   : > { %2332 = vmatmul.mubr.bf16.vlgmr.msra.gmra.mrb[0].mxu0 %v638_v38  ;;  %2496 = vmatmul.mubr.bf16.vlgmr.msra.gmra.mrb[0].mxu1 %v638_v38  ;;  %v7126_v38 = vld [vmem:[%s8180_s23 + $0x1c8] ss:$16 sps:$4 sm:$0xff]  }
 0x206   : > { %4120 = vmatpush1.bf16.msra.mxu0 %v7039_v39  ;;  %4284 = vmatpush1.bf16.msra.mxu1 %v7042_v40  ;;  %v7131_v39 = vld [vmem:[%s8180_s23 + $0x1e4] ss:$16 sps:$4 sm:$0xff]   ;;  %v7134_v40 = vld [vmem:[%s8180_s23 + $0x1ec] ss:$16 sps:$4 sm:$0xff]  }
 0x207   : > { %4121 = vmatprep.subr.bf16.mxu0 %v7047_v41  ;;  %4285 = vmatprep.subr.bf16.mxu1 %v7050_v42  ;;  %v8579_v41 = vrot.slane %v2533_v27, %v8262_v50  ;;  %v7132_v42 = vld [vmem:[%s8180_s23 + $0x1e8] ss:$16 sps:$4 sm:$0xff]  }
 0x208   : > { %4151 = vmatprep.mubr.bf16.mxu0 %v2576_v43  ;;  %4315 = vmatprep.mubr.bf16.mxu1 %v2576_v43  ;;  %v7137_v43 = vld [vmem:[%s8180_s23 + $0x204] ss:$16 sps:$4 sm:$0xff]   ;;  %v7210_v27 = vld [vmem:[%s8180_s23 + $0x388] ss:$16 sps:$4 sm:$0xff]  }
 0x20a   : > { %4122 = vmatpush1.bf16.msra.mxu0 %v7045_v45  ;;  %4286 = vmatpush1.bf16.msra.mxu1 %v7048_v26  ;;  %v7140_v45 = vld [vmem:[%s8180_s23 + $0x20c] ss:$16 sps:$4 sm:$0xff]   ;;  %v2549_v26 = vcombine.high %v8579_v41, %v8579_v41 }
 0x20b   : > { %4123 = vmatprep.subr.bf16.mxu0 %v7053_v46  ;;  %4287 = vmatprep.subr.bf16.mxu1 %v7056_v47  ;;  %v2575_v46 = vpack.c.bf16 %v8506_v33, %v8506_v33  ;;  %v7135_v47 = vld [vmem:[%s8180_s23 + $0x200] ss:$16 sps:$4 sm:$0xff]  }
 0x20c   : > { %v7141_v33 = vld [vmem:[%s8180_s23 + $0x220] ss:$16 sps:$4 sm:$0xff]  }
 0x20e   : > { %4124 = vmatpush1.bf16.msra.mxu0 %v7051_v48  ;;  %4288 = vmatpush1.bf16.msra.mxu1 %v7054_v49  ;;  %v7138_v48 = vld [vmem:[%s8180_s23 + $0x208] ss:$16 sps:$4 sm:$0xff]   ;;  %v7143_v49 = vld [vmem:[%s8180_s23 + $0x224] ss:$16 sps:$4 sm:$0xff]  }
 0x20f   : > { %4125 = vmatprep.subr.bf16.mxu0 %v7059_v51  ;;  %4289 = vmatprep.subr.bf16.mxu1 %v7062_v52  ;;  %v7146_v51 = vld [vmem:[%s8180_s23 + $0x22c] ss:$16 sps:$4 sm:$0xff]   ;;  %v2578_v52 = vpack.c.bf16 %v2549_v26, %v2549_v26  ;;  %v7222_v26 = vld [vmem:[%s8180_s23 + $0x3c8] ss:$16 sps:$4 sm:$0xff]  }
 0x212   : > { %4126 = vmatpush1.bf16.msra.mxu0 %v7057_v53  ;;  %4290 = vmatpush1.bf16.msra.mxu1 %v7060_v54  ;;  %v7144_v53 = vld [vmem:[%s8180_s23 + $0x228] ss:$16 sps:$4 sm:$0xff]   ;;  %v7149_v54 = vld [vmem:[%s8180_s23 + $0x244] ss:$16 sps:$4 sm:$0xff]  }
 0x213   : > { %4127 = vmatprep.subr.bf16.mxu0 %v7065_v55  ;;  %4291 = vmatprep.subr.bf16.mxu1 %v7068_v56  ;;  %v7152_v55 = vld [vmem:[%s8180_s23 + $0x24c] ss:$16 sps:$4 sm:$0xff]   ;;  %v7147_v56 = vld [vmem:[%s8180_s23 + $0x240] ss:$16 sps:$4 sm:$0xff]  }
 0x216   : > { %4128 = vmatpush1.bf16.msra.mxu0 %v7063_v57  ;;  %4292 = vmatpush1.bf16.msra.mxu1 %v7066_v58  ;;  %v7150_v57 = vld [vmem:[%s8180_s23 + $0x248] ss:$16 sps:$4 sm:$0xff]   ;;  %v7155_v58 = vld [vmem:[%s8180_s23 + $0x264] ss:$16 sps:$4 sm:$0xff]  }
 0x217   : > { %4129 = vmatprep.subr.bf16.mxu0 %v7071_v59  ;;  %4293 = vmatprep.subr.bf16.mxu1 %v7074_v60  ;;  %v7158_v59 = vld [vmem:[%s8180_s23 + $0x26c] ss:$16 sps:$4 sm:$0xff]   ;;  %v7153_v60 = vld [vmem:[%s8180_s23 + $0x260] ss:$16 sps:$4 sm:$0xff]  }
 0x21a   : > { %4130 = vmatpush1.bf16.msra.mxu0 %v7069_v61  ;;  %4294 = vmatpush1.bf16.msra.mxu1 %v7072_v62  ;;  %v7156_v61 = vld [vmem:[%s8180_s23 + $0x268] ss:$16 sps:$4 sm:$0xff]   ;;  %v7161_v62 = vld [vmem:[%s8180_s23 + $0x284] ss:$16 sps:$4 sm:$0xff]  }
 0x21b   : > { %4131 = vmatprep.subr.bf16.mxu0 %v7077_v63  ;;  %4295 = vmatprep.subr.bf16.mxu1 %v7080_v0  ;;  %v7164_v63 = vld [vmem:[%s8180_s23 + $0x28c] ss:$16 sps:$4 sm:$0xff]   ;;  %v7159_v0 = vld [vmem:[%s8180_s23 + $0x280] ss:$16 sps:$4 sm:$0xff]  }
 0x21e   : > { %4132 = vmatpush1.bf16.msra.mxu0 %v7075_v1  ;;  %4296 = vmatpush1.bf16.msra.mxu1 %v7078_v2  ;;  %v7162_v1 = vld [vmem:[%s8180_s23 + $0x288] ss:$16 sps:$4 sm:$0xff]   ;;  %v7167_v2 = vld [vmem:[%s8180_s23 + $0x2a4] ss:$16 sps:$4 sm:$0xff]  }
 0x21f   : > { %4133 = vmatprep.subr.bf16.mxu0 %v7083_v3  ;;  %4297 = vmatprep.subr.bf16.mxu1 %v7086_v4  ;;  %v7170_v3 = vld [vmem:[%s8180_s23 + $0x2ac] ss:$16 sps:$4 sm:$0xff]   ;;  %v7165_v4 = vld [vmem:[%s8180_s23 + $0x2a0] ss:$16 sps:$4 sm:$0xff]  }
 0x222   : > { %4134 = vmatpush1.bf16.msra.mxu0 %v7081_v5  ;;  %4298 = vmatpush1.bf16.msra.mxu1 %v7084_v6  ;;  %v7168_v5 = vld [vmem:[%s8180_s23 + $0x2a8] ss:$16 sps:$4 sm:$0xff]   ;;  %v7173_v6 = vld [vmem:[%s8180_s23 + $0x2c4] ss:$16 sps:$4 sm:$0xff]  }
 0x223   : > { %4135 = vmatprep.subr.bf16.mxu0 %v7089_v7  ;;  %4299 = vmatprep.subr.bf16.mxu1 %v7092_v8  ;;  %v7176_v7 = vld [vmem:[%s8180_s23 + $0x2cc] ss:$16 sps:$4 sm:$0xff]   ;;  %v7171_v8 = vld [vmem:[%s8180_s23 + $0x2c0] ss:$16 sps:$4 sm:$0xff]  }
 0x226   : > { %4136 = vmatpush1.bf16.msra.mxu0 %v7087_v9  ;;  %4300 = vmatpush1.bf16.msra.mxu1 %v7090_v11  ;;  %v7174_v9 = vld [vmem:[%s8180_s23 + $0x2c8] ss:$16 sps:$4 sm:$0xff]   ;;  %v7179_v11 = vld [vmem:[%s8180_s23 + $0x2e4] ss:$16 sps:$4 sm:$0xff]  }
 0x227   : > { %4137 = vmatprep.subr.bf16.mxu0 %v7095_v12  ;;  %4301 = vmatprep.subr.bf16.mxu1 %v7098_v13  ;;  %v7182_v12 = vld [vmem:[%s8180_s23 + $0x2ec] ss:$16 sps:$4 sm:$0xff]   ;;  %v7177_v13 = vld [vmem:[%s8180_s23 + $0x2e0] ss:$16 sps:$4 sm:$0xff]  }
 0x22a   : > { %4138 = vmatpush1.bf16.msra.mxu0 %v7093_v14  ;;  %4302 = vmatpush1.bf16.msra.mxu1 %v7096_v15  ;;  %v7180_v14 = vld [vmem:[%s8180_s23 + $0x2e8] ss:$16 sps:$4 sm:$0xff]   ;;  %v7185_v15 = vld [vmem:[%s8180_s23 + $0x304] ss:$16 sps:$4 sm:$0xff]  }
 0x22b   : > { %4139 = vmatprep.subr.bf16.mxu0 %v7101_v16  ;;  %4303 = vmatprep.subr.bf16.mxu1 %v7104_v17  ;;  %v7188_v16 = vld [vmem:[%s8180_s23 + $0x30c] ss:$16 sps:$4 sm:$0xff]   ;;  %v7183_v17 = vld [vmem:[%s8180_s23 + $0x300] ss:$16 sps:$4 sm:$0xff]  }
 0x22e   : > { %4140 = vmatpush1.bf16.msra.mxu0 %v7099_v18  ;;  %4304 = vmatpush1.bf16.msra.mxu1 %v7102_v19  ;;  %v7186_v18 = vld [vmem:[%s8180_s23 + $0x308] ss:$16 sps:$4 sm:$0xff]   ;;  %v7191_v19 = vld [vmem:[%s8180_s23 + $0x324] ss:$16 sps:$4 sm:$0xff]  }
 0x22f   : > { %4141 = vmatprep.subr.bf16.mxu0 %v7107_v20  ;;  %4305 = vmatprep.subr.bf16.mxu1 %v7110_v21  ;;  %v7194_v20 = vld [vmem:[%s8180_s23 + $0x32c] ss:$16 sps:$4 sm:$0xff]   ;;  %v7189_v21 = vld [vmem:[%s8180_s23 + $0x320] ss:$16 sps:$4 sm:$0xff]  }
 0x232   : > { %4142 = vmatpush1.bf16.msra.mxu0 %v7105_v22  ;;  %4306 = vmatpush1.bf16.msra.mxu1 %v7108_v23  ;;  %v7192_v22 = vld [vmem:[%s8180_s23 + $0x328] ss:$16 sps:$4 sm:$0xff]   ;;  %v7197_v23 = vld [vmem:[%s8180_s23 + $0x344] ss:$16 sps:$4 sm:$0xff]  }
 0x233   : > { %4143 = vmatprep.subr.bf16.mxu0 %v7113_v25  ;;  %4307 = vmatprep.subr.bf16.mxu1 %v7116_v24  ;;  %v7200_v25 = vld [vmem:[%s8180_s23 + $0x34c] ss:$16 sps:$4 sm:$0xff]   ;;  %v7195_v24 = vld [vmem:[%s8180_s23 + $0x340] ss:$16 sps:$4 sm:$0xff]  }
 0x236   : > { %4144 = vmatpush1.bf16.msra.mxu0 %v7111_v10  ;;  %4308 = vmatpush1.bf16.msra.mxu1 %v7114_v28  ;;  %v7198_v10 = vld [vmem:[%s8180_s23 + $0x348] ss:$16 sps:$4 sm:$0xff]   ;;  %v7203_v28 = vld [vmem:[%s8180_s23 + $0x364] ss:$16 sps:$4 sm:$0xff]  }
 0x237   : > { %4145 = vmatprep.subr.bf16.mxu0 %v7119_v30  ;;  %4309 = vmatprep.subr.bf16.mxu1 %v7122_v31  ;;  %v7206_v30 = vld [vmem:[%s8180_s23 + $0x36c] ss:$16 sps:$4 sm:$0xff]   ;;  %v7201_v31 = vld [vmem:[%s8180_s23 + $0x360] ss:$16 sps:$4 sm:$0xff]  }
 0x23a   : > { %4146 = vmatpush1.bf16.msra.mxu0 %v7117_v32  ;;  %4310 = vmatpush1.bf16.msra.mxu1 %v7120_v34  ;;  %v7204_v32 = vld [vmem:[%s8180_s23 + $0x368] ss:$16 sps:$4 sm:$0xff]   ;;  %v7209_v34 = vld [vmem:[%s8180_s23 + $0x384] ss:$16 sps:$4 sm:$0xff]  }
 0x23b   : > { %4147 = vmatprep.subr.bf16.mxu0 %v7125_v35  ;;  %4311 = vmatprep.subr.bf16.mxu1 %v7128_v36  ;;  %v7212_v35 = vld [vmem:[%s8180_s23 + $0x38c] ss:$16 sps:$4 sm:$0xff]   ;;  %v7207_v36 = vld [vmem:[%s8180_s23 + $0x380] ss:$16 sps:$4 sm:$0xff]  }
 0x23e   : > { %4148 = vmatpush1.bf16.msra.mxu0 %v7123_v37  ;;  %4312 = vmatpush1.bf16.msra.mxu1 %v7126_v38  ;;  %v7215_v37 = vld [vmem:[%s8180_s23 + $0x3a4] ss:$16 sps:$4 sm:$0xff]   ;;  %v7218_v38 = vld [vmem:[%s8180_s23 + $0x3ac] ss:$16 sps:$4 sm:$0xff]  }
 0x23f   : > { %4149 = vmatprep.subr.bf16.mxu0 %v7131_v39  ;;  %4313 = vmatprep.subr.bf16.mxu1 %v7134_v40  ;;  %v7213_v39 = vld [vmem:[%s8180_s23 + $0x3a0] ss:$16 sps:$4 sm:$0xff]   ;;  %v7216_v40 = vld [vmem:[%s8180_s23 + $0x3a8] ss:$16 sps:$4 sm:$0xff]  }
 0x242   : > { %4150 = vmatpush1.bf16.msra.mxu0 %v7129_v29  ;;  %4314 = vmatpush1.bf16.msra.mxu1 %v7132_v42  ;;  %v7221_v29 = vld [vmem:[%s8180_s23 + $0x3c4] ss:$16 sps:$4 sm:$0xff]   ;;  %v7224_v42 = vld [vmem:[%s8180_s23 + $0x3cc] ss:$16 sps:$4 sm:$0xff]  }
 0x243   : > { %4160 = vmatprep.subr.bf16.mxu0 %v7137_v43  ;;  %4324 = vmatprep.subr.bf16.mxu1 %v7140_v45  ;;  %v8646_v43 = vld [vmem:[%s8211_s22 + $0x8] sm:$0xff]  ;;  %v7219_v45 = vld [vmem:[%s8180_s23 + $0x3c0] ss:$16 sps:$4 sm:$0xff]  }
 0x245   : > { %4152 = vmatmul.mubr.bf16.vlgmr.msra.gmra.mrb[4].mxu0 %v2575_v46  ;;  %4316 = vmatmul.mubr.bf16.vlgmr.msra.gmra.mrb[4].mxu1 %v2575_v46  ;;  %v7227_v46 = vld [vmem:[%s8180_s23 + $0x3e4] ss:$16 sps:$4 sm:$0xff]  }
 0x246   : > { %4161 = vmatpush1.bf16.msra.mxu0 %v7135_v47  ;;  %4325 = vmatpush1.bf16.msra.mxu1 %v7138_v48  ;;  %v7230_v47 = vld [vmem:[%s8180_s23 + $0x3ec] ss:$16 sps:$4 sm:$0xff]   ;;  %v8654_v48 = vrot.slane %v8646_v43, %v8262_v50 }
 0x247   : > { %4162 = vmatprep.subr.bf16.mxu0 %v7143_v49  ;;  %4326 = vmatprep.subr.bf16.mxu1 %v7146_v51  ;;  %v7225_v49 = vld [vmem:[%s8180_s23 + $0x3e0] ss:$16 sps:$4 sm:$0xff]   ;;  %v7228_v51 = vld [vmem:[%s8180_s23 + $0x3e8] ss:$16 sps:$4 sm:$0xff]  }
 0x248   : > { %4192 = vmatprep.mubr.bf16.mxu0 %v2578_v52  ;;  %4356 = vmatprep.mubr.bf16.mxu1 %v2578_v52  ;;  %v7234_v52 = vld [vmem:[%s8180_s23 + $0x404] ss:$16 sps:$4 sm:$0xff]  }
 0x24a   : > { %4163 = vmatpush1.bf16.msra.mxu0 %v7141_v33  ;;  %4327 = vmatpush1.bf16.msra.mxu1 %v7144_v53  ;;  %v7237_v33 = vld [vmem:[%s8180_s23 + $0x40c] ss:$16 sps:$4 sm:$0xff]   ;;  %v2565_v53 = vcombine.high %v8654_v48, %v8654_v48 }
 0x24b   : > { %4164 = vmatprep.subr.bf16.mxu0 %v7149_v54  ;;  %4328 = vmatprep.subr.bf16.mxu1 %v7152_v55  ;;  %v2577_v54 = vpack.c.bf16 %v8579_v41, %v8579_v41  ;;  %v7232_v55 = vld [vmem:[%s8180_s23 + $0x400] ss:$16 sps:$4 sm:$0xff]  }
 0x24c   : > { %v7238_v41 = vld [vmem:[%s8180_s23 + $0x420] ss:$16 sps:$4 sm:$0xff]  }
 0x24e   : > { %4165 = vmatpush1.bf16.msra.mxu0 %v7147_v56  ;;  %4329 = vmatpush1.bf16.msra.mxu1 %v7150_v57  ;;  %v7235_v56 = vld [vmem:[%s8180_s23 + $0x408] ss:$16 sps:$4 sm:$0xff]   ;;  %v7240_v57 = vld [vmem:[%s8180_s23 + $0x424] ss:$16 sps:$4 sm:$0xff]  }
 0x24f   : > { %4166 = vmatprep.subr.bf16.mxu0 %v7155_v58  ;;  %4330 = vmatprep.subr.bf16.mxu1 %v7158_v59  ;;  %v7243_v58 = vld [vmem:[%s8180_s23 + $0x42c] ss:$16 sps:$4 sm:$0xff]   ;;  %v2580_v59 = vpack.c.bf16 %v2565_v53, %v2565_v53  ;;  %v7316_v53 = vld [vmem:[%s8180_s23 + $0x5c0] ss:$16 sps:$4 sm:$0xff]  }
 0x252   : > { %4167 = vmatpush1.bf16.msra.mxu0 %v7153_v60  ;;  %4331 = vmatpush1.bf16.msra.mxu1 %v7156_v61  ;;  %v7241_v60 = vld [vmem:[%s8180_s23 + $0x428] ss:$16 sps:$4 sm:$0xff]   ;;  %v7246_v61 = vld [vmem:[%s8180_s23 + $0x444] ss:$16 sps:$4 sm:$0xff]  }
 0x253   : > { %4168 = vmatprep.subr.bf16.mxu0 %v7161_v62  ;;  %4332 = vmatprep.subr.bf16.mxu1 %v7164_v63  ;;  %v7249_v62 = vld [vmem:[%s8180_s23 + $0x44c] ss:$16 sps:$4 sm:$0xff]   ;;  %v7244_v63 = vld [vmem:[%s8180_s23 + $0x440] ss:$16 sps:$4 sm:$0xff]  }
 0x256   : > { %4169 = vmatpush1.bf16.msra.mxu0 %v7159_v0  ;;  %4333 = vmatpush1.bf16.msra.mxu1 %v7162_v1  ;;  %v7247_v0 = vld [vmem:[%s8180_s23 + $0x448] ss:$16 sps:$4 sm:$0xff]   ;;  %v7252_v1 = vld [vmem:[%s8180_s23 + $0x464] ss:$16 sps:$4 sm:$0xff]  }
 0x257   : > { %4170 = vmatprep.subr.bf16.mxu0 %v7167_v2  ;;  %4334 = vmatprep.subr.bf16.mxu1 %v7170_v3  ;;  %v7255_v2 = vld [vmem:[%s8180_s23 + $0x46c] ss:$16 sps:$4 sm:$0xff]   ;;  %v7250_v3 = vld [vmem:[%s8180_s23 + $0x460] ss:$16 sps:$4 sm:$0xff]  }
 0x25a   : > { %4171 = vmatpush1.bf16.msra.mxu0 %v7165_v4  ;;  %4335 = vmatpush1.bf16.msra.mxu1 %v7168_v5  ;;  %v7253_v4 = vld [vmem:[%s8180_s23 + $0x468] ss:$16 sps:$4 sm:$0xff]   ;;  %v7258_v5 = vld [vmem:[%s8180_s23 + $0x484] ss:$16 sps:$4 sm:$0xff]  }
 0x25b   : > { %4172 = vmatprep.subr.bf16.mxu0 %v7173_v6  ;;  %4336 = vmatprep.subr.bf16.mxu1 %v7176_v7  ;;  %v7261_v6 = vld [vmem:[%s8180_s23 + $0x48c] ss:$16 sps:$4 sm:$0xff]   ;;  %v7256_v7 = vld [vmem:[%s8180_s23 + $0x480] ss:$16 sps:$4 sm:$0xff]  }
 0x25e   : > { %4173 = vmatpush1.bf16.msra.mxu0 %v7171_v8  ;;  %4337 = vmatpush1.bf16.msra.mxu1 %v7174_v9  ;;  %v7259_v8 = vld [vmem:[%s8180_s23 + $0x488] ss:$16 sps:$4 sm:$0xff]   ;;  %v7264_v9 = vld [vmem:[%s8180_s23 + $0x4a4] ss:$16 sps:$4 sm:$0xff]  }
 0x25f   : > { %4174 = vmatprep.subr.bf16.mxu0 %v7179_v11  ;;  %4338 = vmatprep.subr.bf16.mxu1 %v7182_v12  ;;  %v7267_v11 = vld [vmem:[%s8180_s23 + $0x4ac] ss:$16 sps:$4 sm:$0xff]   ;;  %v7262_v12 = vld [vmem:[%s8180_s23 + $0x4a0] ss:$16 sps:$4 sm:$0xff]  }
 0x262   : > { %4175 = vmatpush1.bf16.msra.mxu0 %v7177_v13  ;;  %4339 = vmatpush1.bf16.msra.mxu1 %v7180_v14  ;;  %v7265_v13 = vld [vmem:[%s8180_s23 + $0x4a8] ss:$16 sps:$4 sm:$0xff]   ;;  %v7270_v14 = vld [vmem:[%s8180_s23 + $0x4c4] ss:$16 sps:$4 sm:$0xff]  }
 0x263   : > { %4176 = vmatprep.subr.bf16.mxu0 %v7185_v15  ;;  %4340 = vmatprep.subr.bf16.mxu1 %v7188_v16  ;;  %v7273_v15 = vld [vmem:[%s8180_s23 + $0x4cc] ss:$16 sps:$4 sm:$0xff]   ;;  %v7268_v16 = vld [vmem:[%s8180_s23 + $0x4c0] ss:$16 sps:$4 sm:$0xff]  }
 0x266   : > { %4177 = vmatpush1.bf16.msra.mxu0 %v7183_v17  ;;  %4341 = vmatpush1.bf16.msra.mxu1 %v7186_v18  ;;  %v7271_v17 = vld [vmem:[%s8180_s23 + $0x4c8] ss:$16 sps:$4 sm:$0xff]   ;;  %v7276_v18 = vld [vmem:[%s8180_s23 + $0x4e4] ss:$16 sps:$4 sm:$0xff]  }
 0x267   : > { %4178 = vmatprep.subr.bf16.mxu0 %v7191_v19  ;;  %4342 = vmatprep.subr.bf16.mxu1 %v7194_v20  ;;  %v7279_v19 = vld [vmem:[%s8180_s23 + $0x4ec] ss:$16 sps:$4 sm:$0xff]   ;;  %v7274_v20 = vld [vmem:[%s8180_s23 + $0x4e0] ss:$16 sps:$4 sm:$0xff]  }
 0x26a   : > { %4179 = vmatpush1.bf16.msra.mxu0 %v7189_v21  ;;  %4343 = vmatpush1.bf16.msra.mxu1 %v7192_v22  ;;  %v7277_v21 = vld [vmem:[%s8180_s23 + $0x4e8] ss:$16 sps:$4 sm:$0xff]   ;;  %v7282_v22 = vld [vmem:[%s8180_s23 + $0x504] ss:$16 sps:$4 sm:$0xff]  }
 0x26b   : > { %4180 = vmatprep.subr.bf16.mxu0 %v7197_v23  ;;  %4344 = vmatprep.subr.bf16.mxu1 %v7200_v25  ;;  %v7285_v23 = vld [vmem:[%s8180_s23 + $0x50c] ss:$16 sps:$4 sm:$0xff]   ;;  %v7280_v25 = vld [vmem:[%s8180_s23 + $0x500] ss:$16 sps:$4 sm:$0xff]  }
 0x26e   : > { %4181 = vmatpush1.bf16.msra.mxu0 %v7195_v24  ;;  %4345 = vmatpush1.bf16.msra.mxu1 %v7198_v10  ;;  %v7283_v24 = vld [vmem:[%s8180_s23 + $0x508] ss:$16 sps:$4 sm:$0xff]   ;;  %v7288_v10 = vld [vmem:[%s8180_s23 + $0x524] ss:$16 sps:$4 sm:$0xff]  }
 0x26f   : > { %4182 = vmatprep.subr.bf16.mxu0 %v7203_v28  ;;  %4346 = vmatprep.subr.bf16.mxu1 %v7206_v30  ;;  %v7291_v28 = vld [vmem:[%s8180_s23 + $0x52c] ss:$16 sps:$4 sm:$0xff]   ;;  %v7286_v30 = vld [vmem:[%s8180_s23 + $0x520] ss:$16 sps:$4 sm:$0xff]  }
 0x272   : > { %4183 = vmatpush1.bf16.msra.mxu0 %v7201_v31  ;;  %4347 = vmatpush1.bf16.msra.mxu1 %v7204_v32  ;;  %v7289_v31 = vld [vmem:[%s8180_s23 + $0x528] ss:$16 sps:$4 sm:$0xff]   ;;  %v7294_v32 = vld [vmem:[%s8180_s23 + $0x544] ss:$16 sps:$4 sm:$0xff]  }
 0x273   : > { %4184 = vmatprep.subr.bf16.mxu0 %v7209_v34  ;;  %4348 = vmatprep.subr.bf16.mxu1 %v7212_v35  ;;  %v7297_v34 = vld [vmem:[%s8180_s23 + $0x54c] ss:$16 sps:$4 sm:$0xff]   ;;  %v7292_v35 = vld [vmem:[%s8180_s23 + $0x540] ss:$16 sps:$4 sm:$0xff]  }
 0x276   : > { %4185 = vmatpush1.bf16.msra.mxu0 %v7207_v36  ;;  %4349 = vmatpush1.bf16.msra.mxu1 %v7210_v27  ;;  %v7295_v36 = vld [vmem:[%s8180_s23 + $0x548] ss:$16 sps:$4 sm:$0xff]   ;;  %v7300_v27 = vld [vmem:[%s8180_s23 + $0x564] ss:$16 sps:$4 sm:$0xff]  }
 0x277   : > { %4186 = vmatprep.subr.bf16.mxu0 %v7215_v37  ;;  %4350 = vmatprep.subr.bf16.mxu1 %v7218_v38  ;;  %v7303_v37 = vld [vmem:[%s8180_s23 + $0x56c] ss:$16 sps:$4 sm:$0xff]   ;;  %v7298_v38 = vld [vmem:[%s8180_s23 + $0x560] ss:$16 sps:$4 sm:$0xff]  }
 0x27a   : > { %4187 = vmatpush1.bf16.msra.mxu0 %v7213_v39  ;;  %4351 = vmatpush1.bf16.msra.mxu1 %v7216_v40  ;;  %v7301_v39 = vld [vmem:[%s8180_s23 + $0x568] ss:$16 sps:$4 sm:$0xff]   ;;  %v7306_v40 = vld [vmem:[%s8180_s23 + $0x584] ss:$16 sps:$4 sm:$0xff]  }
 0x27b   : > { %4188 = vmatprep.subr.bf16.mxu0 %v7221_v29  ;;  %4352 = vmatprep.subr.bf16.mxu1 %v7224_v42  ;;  %v7309_v29 = vld [vmem:[%s8180_s23 + $0x58c] ss:$16 sps:$4 sm:$0xff]   ;;  %v7304_v42 = vld [vmem:[%s8180_s23 + $0x580] ss:$16 sps:$4 sm:$0xff]  }
 0x27e   : > { %4189 = vmatpush1.bf16.msra.mxu0 %v7219_v45  ;;  %4353 = vmatpush1.bf16.msra.mxu1 %v7222_v26  ;;  %v7307_v45 = vld [vmem:[%s8180_s23 + $0x588] ss:$16 sps:$4 sm:$0xff]   ;;  %v7312_v26 = vld [vmem:[%s8180_s23 + $0x5a4] ss:$16 sps:$4 sm:$0xff]  }
 0x27f   : > { %4190 = vmatprep.subr.bf16.mxu0 %v7227_v46  ;;  %4354 = vmatprep.subr.bf16.mxu1 %v7230_v47  ;;  %v7315_v46 = vld [vmem:[%s8180_s23 + $0x5ac] ss:$16 sps:$4 sm:$0xff]   ;;  %v7310_v47 = vld [vmem:[%s8180_s23 + $0x5a0] ss:$16 sps:$4 sm:$0xff]  }
 0x282   : > { %4191 = vmatpush1.bf16.msra.mxu0 %v7225_v49  ;;  %4355 = vmatpush1.bf16.msra.mxu1 %v7228_v51  ;;  %v7313_v49 = vld [vmem:[%s8180_s23 + $0x5a8] ss:$16 sps:$4 sm:$0xff]   ;;  %v7318_v51 = vld [vmem:[%s8180_s23 + $0x5c4] ss:$16 sps:$4 sm:$0xff]  }
 0x283   : > { %4201 = vmatprep.subr.bf16.mxu0 %v7234_v52  ;;  %4365 = vmatprep.subr.bf16.mxu1 %v7237_v33  ;;  %v7321_v52 = vld [vmem:[%s8180_s23 + $0x5cc] ss:$16 sps:$4 sm:$0xff]   ;;  %v2550_v33 = vcombine.high %v8646_v43, %v8646_v43  ;;  %v7322_v43 = vld [vmem:[%s8180_s23 + $0x5e0] ss:$16 sps:$4 sm:$0xff]  }
 0x285   : > { %4193 = vmatmul.mubr.bf16.vlgmr.msra.gmra.mrb[4].mxu0 %v2577_v54  ;;  %4357 = vmatmul.mubr.bf16.vlgmr.msra.gmra.mrb[4].mxu1 %v2577_v54  ;;  %v7319_v54 = vld [vmem:[%s8180_s23 + $0x5c8] ss:$16 sps:$4 sm:$0xff]  }
 0x286   : > { %4202 = vmatpush1.bf16.msra.mxu0 %v7232_v55  ;;  %4366 = vmatpush1.bf16.msra.mxu1 %v7235_v56  ;;  %v7324_v55 = vld [vmem:[%s8180_s23 + $0x5e4] ss:$16 sps:$4 sm:$0xff]   ;;  %v7327_v56 = vld [vmem:[%s8180_s23 + $0x5ec] ss:$16 sps:$4 sm:$0xff]  }
 0x287   : > { %4203 = vmatprep.subr.bf16.mxu0 %v7240_v57  ;;  %4367 = vmatprep.subr.bf16.mxu1 %v7243_v58  ;;  %v8727_v57 = vrot.slane %v2550_v33, %v8262_v50  ;;  %v7325_v58 = vld [vmem:[%s8180_s23 + $0x5e8] ss:$16 sps:$4 sm:$0xff]   ;;  %v7384_v33 = vld [vmem:[%s8180_s23 + $0x724] ss:$16 sps:$4 sm:$0xff]  }
 0x288   : > { %4233 = vmatprep.mubr.bf16.mxu0 %v2580_v59  ;;  %4397 = vmatprep.mubr.bf16.mxu1 %v2580_v59  ;;  %v7330_v59 = vld [vmem:[%s8180_s23 + $0x604] ss:$16 sps:$4 sm:$0xff]  }
 0x28a   : > { %4204 = vmatpush1.bf16.msra.mxu0 %v7238_v41  ;;  %4368 = vmatpush1.bf16.msra.mxu1 %v7241_v60  ;;  %v7333_v41 = vld [vmem:[%s8180_s23 + $0x60c] ss:$16 sps:$4 sm:$0xff]   ;;  %v2566_v60 = vcombine.high %v8727_v57, %v8727_v57 }
 0x28b   : > { %4205 = vmatprep.subr.bf16.mxu0 %v7246_v61  ;;  %4369 = vmatprep.subr.bf16.mxu1 %v7249_v62  ;;  %v2579_v61 = vpack.c.bf16 %v8654_v48, %v8654_v48  ;;  %v7328_v62 = vld [vmem:[%s8180_s23 + $0x600] ss:$16 sps:$4 sm:$0xff]  }
 0x28c   : > { %v7334_v48 = vld [vmem:[%s8180_s23 + $0x620] ss:$16 sps:$4 sm:$0xff]  }
 0x28e   : > { %4206 = vmatpush1.bf16.msra.mxu0 %v7244_v63  ;;  %4370 = vmatpush1.bf16.msra.mxu1 %v7247_v0  ;;  %v7331_v63 = vld [vmem:[%s8180_s23 + $0x608] ss:$16 sps:$4 sm:$0xff]   ;;  %v7336_v0 = vld [vmem:[%s8180_s23 + $0x624] ss:$16 sps:$4 sm:$0xff]  }
 0x28f   : > { %4207 = vmatprep.subr.bf16.mxu0 %v7252_v1  ;;  %4371 = vmatprep.subr.bf16.mxu1 %v7255_v2  ;;  %v7339_v1 = vld [vmem:[%s8180_s23 + $0x62c] ss:$16 sps:$4 sm:$0xff]   ;;  %v2582_v2 = vpack.c.bf16 %v2566_v60, %v2566_v60 }
 0x290   : > { %v7399_v60 = vld [vmem:[%s8180_s23 + $0x76c] ss:$16 sps:$4 sm:$0xff]  }
 0x292   : > { %4208 = vmatpush1.bf16.msra.mxu0 %v7250_v3  ;;  %4372 = vmatpush1.bf16.msra.mxu1 %v7253_v4  ;;  %v7337_v3 = vld [vmem:[%s8180_s23 + $0x628] ss:$16 sps:$4 sm:$0xff]   ;;  %v7342_v4 = vld [vmem:[%s8180_s23 + $0x644] ss:$16 sps:$4 sm:$0xff]  }
 0x293   : > { %4209 = vmatprep.subr.bf16.mxu0 %v7258_v5  ;;  %4373 = vmatprep.subr.bf16.mxu1 %v7261_v6  ;;  %v7345_v5 = vld [vmem:[%s8180_s23 + $0x64c] ss:$16 sps:$4 sm:$0xff]   ;;  %v7340_v6 = vld [vmem:[%s8180_s23 + $0x640] ss:$16 sps:$4 sm:$0xff]  }
 0x296   : > { %4210 = vmatpush1.bf16.msra.mxu0 %v7256_v7  ;;  %4374 = vmatpush1.bf16.msra.mxu1 %v7259_v8  ;;  %v7343_v7 = vld [vmem:[%s8180_s23 + $0x648] ss:$16 sps:$4 sm:$0xff]   ;;  %v7348_v8 = vld [vmem:[%s8180_s23 + $0x664] ss:$16 sps:$4 sm:$0xff]  }
 0x297   : > { %4211 = vmatprep.subr.bf16.mxu0 %v7264_v9  ;;  %4375 = vmatprep.subr.bf16.mxu1 %v7267_v11  ;;  %v7351_v9 = vld [vmem:[%s8180_s23 + $0x66c] ss:$16 sps:$4 sm:$0xff]   ;;  %v7346_v11 = vld [vmem:[%s8180_s23 + $0x660] ss:$16 sps:$4 sm:$0xff]  }
 0x29a   : > { %4212 = vmatpush1.bf16.msra.mxu0 %v7262_v12  ;;  %4376 = vmatpush1.bf16.msra.mxu1 %v7265_v13  ;;  %v7349_v12 = vld [vmem:[%s8180_s23 + $0x668] ss:$16 sps:$4 sm:$0xff]   ;;  %v7354_v13 = vld [vmem:[%s8180_s23 + $0x684] ss:$16 sps:$4 sm:$0xff]  }
 0x29b   : > { %4213 = vmatprep.subr.bf16.mxu0 %v7270_v14  ;;  %4377 = vmatprep.subr.bf16.mxu1 %v7273_v15  ;;  %v7357_v14 = vld [vmem:[%s8180_s23 + $0x68c] ss:$16 sps:$4 sm:$0xff]   ;;  %v7352_v15 = vld [vmem:[%s8180_s23 + $0x680] ss:$16 sps:$4 sm:$0xff]  }
 0x29e   : > { %4214 = vmatpush1.bf16.msra.mxu0 %v7268_v16  ;;  %4378 = vmatpush1.bf16.msra.mxu1 %v7271_v17  ;;  %v7355_v16 = vld [vmem:[%s8180_s23 + $0x688] ss:$16 sps:$4 sm:$0xff]   ;;  %v7360_v17 = vld [vmem:[%s8180_s23 + $0x6a4] ss:$16 sps:$4 sm:$0xff]  }
 0x29f   : > { %4215 = vmatprep.subr.bf16.mxu0 %v7276_v18  ;;  %4379 = vmatprep.subr.bf16.mxu1 %v7279_v19  ;;  %v7363_v18 = vld [vmem:[%s8180_s23 + $0x6ac] ss:$16 sps:$4 sm:$0xff]   ;;  %v7358_v19 = vld [vmem:[%s8180_s23 + $0x6a0] ss:$16 sps:$4 sm:$0xff]  }
 0x2a2   : > { %4216 = vmatpush1.bf16.msra.mxu0 %v7274_v20  ;;  %4380 = vmatpush1.bf16.msra.mxu1 %v7277_v21  ;;  %v7361_v20 = vld [vmem:[%s8180_s23 + $0x6a8] ss:$16 sps:$4 sm:$0xff]   ;;  %v7366_v21 = vld [vmem:[%s8180_s23 + $0x6c4] ss:$16 sps:$4 sm:$0xff]  }
 0x2a3   : > { %4217 = vmatprep.subr.bf16.mxu0 %v7282_v22  ;;  %4381 = vmatprep.subr.bf16.mxu1 %v7285_v23  ;;  %v7369_v22 = vld [vmem:[%s8180_s23 + $0x6cc] ss:$16 sps:$4 sm:$0xff]  }
 0x2a6   : > { %4218 = vmatpush1.bf16.msra.mxu0 %v7280_v25  ;;  %4382 = vmatpush1.bf16.msra.mxu1 %v7283_v24 }
 0x2a7   : > { %4219 = vmatprep.subr.bf16.mxu0 %v7288_v10  ;;  %4383 = vmatprep.subr.bf16.mxu1 %v7291_v28 }
 0x2aa   : > { %4220 = vmatpush1.bf16.msra.mxu0 %v7286_v30  ;;  %4384 = vmatpush1.bf16.msra.mxu1 %v7289_v31 }
 0x2ab   : > { %4221 = vmatprep.subr.bf16.mxu0 %v7294_v32  ;;  %4385 = vmatprep.subr.bf16.mxu1 %v7297_v34  ;;  %v7364_v34 = vld [vmem:[%s8180_s23 + $0x6c0] ss:$16 sps:$4 sm:$0xff]  }
 0x2ae   : > { %4222 = vmatpush1.bf16.msra.mxu0 %v7292_v35  ;;  %4386 = vmatpush1.bf16.msra.mxu1 %v7295_v36  ;;  %v7367_v35 = vld [vmem:[%s8180_s23 + $0x6c8] ss:$16 sps:$4 sm:$0xff]  }
 0x2af   : > { %4223 = vmatprep.subr.bf16.mxu0 %v7300_v27  ;;  %4387 = vmatprep.subr.bf16.mxu1 %v7303_v37  ;;  %v7372_v37 = vld [vmem:[%s8180_s23 + $0x6e4] ss:$16 sps:$4 sm:$0xff]  }
 0x2b2   : > { %4224 = vmatpush1.bf16.msra.mxu0 %v7298_v38  ;;  %4388 = vmatpush1.bf16.msra.mxu1 %v7301_v39  ;;  %v7375_v38 = vld [vmem:[%s8180_s23 + $0x6ec] ss:$16 sps:$4 sm:$0xff]  }
 0x2b3   : > { %4225 = vmatprep.subr.bf16.mxu0 %v7306_v40  ;;  %4389 = vmatprep.subr.bf16.mxu1 %v7309_v29  ;;  %v585_v29 = vld [vmem:[#allocation2] sm:$0xff] }
 0x2b6   : > { %4226 = vmatpush1.bf16.msra.mxu0 %v7304_v42  ;;  %4390 = vmatpush1.bf16.msra.mxu1 %v7307_v45  ;;  %v7370_v45 = vld [vmem:[%s8180_s23 + $0x6e0] ss:$16 sps:$4 sm:$0xff]  }
 0x2b7   : > { %4227 = vmatprep.subr.bf16.mxu0 %v7312_v26  ;;  %4391 = vmatprep.subr.bf16.mxu1 %v7315_v46  ;;  %v7373_v26 = vld [vmem:[%s8180_s23 + $0x6e8] ss:$16 sps:$4 sm:$0xff]   ;;  %v7378_v46 = vld [vmem:[%s8180_s23 + $0x704] ss:$16 sps:$4 sm:$0xff]  }
 0x2ba   : > { %4228 = vmatpush1.bf16.msra.mxu0 %v7310_v47  ;;  %4392 = vmatpush1.bf16.msra.mxu1 %v7313_v49  ;;  %v7381_v47 = vld [vmem:[%s8180_s23 + $0x70c] ss:$16 sps:$4 sm:$0xff]  }
 0x2bb   : > { %4229 = vmatprep.subr.bf16.mxu0 %v7318_v51  ;;  %4393 = vmatprep.subr.bf16.mxu1 %v7321_v52  ;;  %v7376_v51 = vld [vmem:[%s8180_s23 + $0x700] ss:$16 sps:$4 sm:$0xff]   ;;  %v7379_v52 = vld [vmem:[%s8180_s23 + $0x708] ss:$16 sps:$4 sm:$0xff]  }
 0x2be   : > { %4230 = vmatpush1.bf16.msra.mxu0 %v7316_v53  ;;  %4394 = vmatpush1.bf16.msra.mxu1 %v7319_v54  ;;  %v7387_v53 = vld [vmem:[%s8180_s23 + $0x72c] ss:$16 sps:$4 sm:$0xff]   ;;  %v7382_v54 = vld [vmem:[%s8180_s23 + $0x720] ss:$16 sps:$4 sm:$0xff]  }
 0x2bf   : > { %4231 = vmatprep.subr.bf16.mxu0 %v7324_v55  ;;  %4395 = vmatprep.subr.bf16.mxu1 %v7327_v56  ;;  %v7385_v55 = vld [vmem:[%s8180_s23 + $0x728] ss:$16 sps:$4 sm:$0xff]   ;;  %v7390_v56 = vld [vmem:[%s8180_s23 + $0x744] ss:$16 sps:$4 sm:$0xff]  }
 0x2c2   : > { %4232 = vmatpush1.bf16.msra.mxu0 %v7322_v43  ;;  %4396 = vmatpush1.bf16.msra.mxu1 %v7325_v58  ;;  %v7393_v43 = vld [vmem:[%s8180_s23 + $0x74c] ss:$16 sps:$4 sm:$0xff]   ;;  %v7388_v58 = vld [vmem:[%s8180_s23 + $0x740] ss:$16 sps:$4 sm:$0xff]  }
 0x2c3   : > { %4242 = vmatprep.subr.bf16.mxu0 %v7330_v59  ;;  %4406 = vmatprep.subr.bf16.mxu1 %v7333_v41  ;;  %v7391_v59 = vld [vmem:[%s8180_s23 + $0x748] ss:$16 sps:$4 sm:$0xff]   ;;  %v7396_v41 = vld [vmem:[%s8180_s23 + $0x764] ss:$16 sps:$4 sm:$0xff]  }
 0x2c5   : > { %4234 = vmatmul.mubr.bf16.vlgmr.msra.gmra.mrb[4].mxu0 %v2579_v61  ;;  %4398 = vmatmul.mubr.bf16.vlgmr.msra.gmra.mrb[4].mxu1 %v2579_v61  ;;  %v7394_v61 = vld [vmem:[%s8180_s23 + $0x760] ss:$16 sps:$4 sm:$0xff]  }
 0x2c6   : > { %4243 = vmatpush1.bf16.msra.mxu0 %v7328_v62  ;;  %4407 = vmatpush1.bf16.msra.mxu1 %v7331_v63  ;;  %v7397_v62 = vld [vmem:[%s8180_s23 + $0x768] ss:$16 sps:$4 sm:$0xff]   ;;  %v7402_v63 = vld [vmem:[%s8180_s23 + $0x784] ss:$16 sps:$4 sm:$0xff]  }
 0x2c7   : > { %4244 = vmatprep.subr.bf16.mxu0 %v7336_v0  ;;  %4408 = vmatprep.subr.bf16.mxu1 %v7339_v1  ;;  %v7405_v0 = vld [vmem:[%s8180_s23 + $0x78c] ss:$16 sps:$4 sm:$0xff]   ;;  %v7400_v1 = vld [vmem:[%s8180_s23 + $0x780] ss:$16 sps:$4 sm:$0xff]  }
 0x2c8   : > { %4274 = vmatprep.mubr.bf16.mxu0 %v2582_v2  ;;  %4438 = vmatprep.mubr.bf16.mxu1 %v2582_v2  ;;  %v7403_v2 = vld [vmem:[%s8180_s23 + $0x788] ss:$16 sps:$4 sm:$0xff]  }
 0x2ca   : > { %4245 = vmatpush1.bf16.msra.mxu0 %v7334_v48  ;;  %4409 = vmatpush1.bf16.msra.mxu1 %v7337_v3  ;;  %v7408_v48 = vld [vmem:[%s8180_s23 + $0x7a4] ss:$16 sps:$4 sm:$0xff]   ;;  %v7411_v3 = vld [vmem:[%s8180_s23 + $0x7ac] ss:$16 sps:$4 sm:$0xff]  }
 0x2cb   : > { %4246 = vmatprep.subr.bf16.mxu0 %v7342_v4  ;;  %4410 = vmatprep.subr.bf16.mxu1 %v7345_v5  ;;  %v7406_v4 = vld [vmem:[%s8180_s23 + $0x7a0] ss:$16 sps:$4 sm:$0xff]   ;;  %v7409_v5 = vld [vmem:[%s8180_s23 + $0x7a8] ss:$16 sps:$4 sm:$0xff]  }
 0x2ce   : > { %4247 = vmatpush1.bf16.msra.mxu0 %v7340_v6  ;;  %4411 = vmatpush1.bf16.msra.mxu1 %v7343_v7  ;;  %v7414_v6 = vld [vmem:[%s8180_s23 + $0x7c4] ss:$16 sps:$4 sm:$0xff]   ;;  %v7417_v7 = vld [vmem:[%s8180_s23 + $0x7cc] ss:$16 sps:$4 sm:$0xff]  }
 0x2cf   : > { %4248 = vmatprep.subr.bf16.mxu0 %v7348_v8  ;;  %4412 = vmatprep.subr.bf16.mxu1 %v7351_v9  ;;  %v7412_v8 = vld [vmem:[%s8180_s23 + $0x7c0] ss:$16 sps:$4 sm:$0xff]   ;;  %v7415_v9 = vld [vmem:[%s8180_s23 + $0x7c8] ss:$16 sps:$4 sm:$0xff]  }
 0x2d2   : > { %4249 = vmatpush1.bf16.msra.mxu0 %v7346_v11  ;;  %4413 = vmatpush1.bf16.msra.mxu1 %v7349_v12  ;;  %v7420_v11 = vld [vmem:[%s8180_s23 + $0x7e4] ss:$16 sps:$4 sm:$0xff]   ;;  %v7423_v12 = vld [vmem:[%s8180_s23 + $0x7ec] ss:$16 sps:$4 sm:$0xff]  }
 0x2d3   : > { %4250 = vmatprep.subr.bf16.mxu0 %v7354_v13  ;;  %4414 = vmatprep.subr.bf16.mxu1 %v7357_v14  ;;  %v7418_v13 = vld [vmem:[%s8180_s23 + $0x7e0] ss:$16 sps:$4 sm:$0xff]   ;;  %v7421_v14 = vld [vmem:[%s8180_s23 + $0x7e8] ss:$16 sps:$4 sm:$0xff]  }
 0x2d6   : > { %4251 = vmatpush1.bf16.msra.mxu0 %v7352_v15  ;;  %4415 = vmatpush1.bf16.msra.mxu1 %v7355_v16  ;;  %v2581_v15 = vpack.c.bf16 %v8727_v57, %v8727_v57 }
 0x2d7   : > { %4252 = vmatprep.subr.bf16.mxu0 %v7360_v17  ;;  %4416 = vmatprep.subr.bf16.mxu1 %v7363_v18 }
 0x2d8   : > { %v2333_v23 = vpop.f32.mrb[0].mxu0  ;;  %v2497_v25 = vpop.f32.mrb[0].mxu1 }
 0x2d9   : > { %v2335_v24 = vpop.f32.mrb[1].mxu0  ;;  %v2499_v10 = vpop.f32.mrb[1].mxu1 }
 0x2da   : > { %v2508_v28 = vcombine.low %v2333_v23, %v2335_v24  ;;  %v2509_v30 = vcombine.low %v2497_v25, %v2499_v10  ;;  %v2337_v31 = vpop.f32.mrb[2].mxu0  ;;  %v2501_v32 = vpop.f32.mrb[2].mxu1  ;;  %4253 = vmatpush1.bf16.msra.mxu0 %v7358_v19  ;;  %4417 = vmatpush1.bf16.msra.mxu1 %v7361_v20 }
 0x2db   : > { %v2338_v36 = vpop.f32.mrb[3].mxu0  ;;  %v2502_v27 = vpop.f32.mrb[3].mxu1  ;;  %4254 = vmatprep.subr.bf16.mxu0 %v7366_v21  ;;  %4418 = vmatprep.subr.bf16.mxu1 %v7369_v22  ;;  %v8806_v32 = vld [vmem:[#allocation9 + $0x40] sm:$0xff] (!%p6175_p12)  }
 0x2dc   : > { %v2516_v39 = vrot.slane %v2508_v28, %v8262_v50  ;;  %v2523_v40 = vrot.slane %v2509_v30, %v8262_v50  ;;  %v2528_v30 = vld [vmem:[#allocation3] sm:$0xff]  ;;  %v8814_v36 = vld [vmem:[#allocation9 + $0x80] sm:$0xff] (!%p6175_p12)   ;;  %v8817_v27 = vld [vmem:[#allocation9 + $0x48] sm:$0xff] (!%p6175_p12)  }
 0x2de   : > { %v2524_v42 = vcombine.low %v2516_v39, %v2523_v40  ;;  %4255 = vmatpush1.bf16.msra.mxu0 %v7364_v34  ;;  %4419 = vmatpush1.bf16.msra.mxu1 %v7367_v35  ;;  %v8808_v34 = vld [vmem:[#allocation9 + $0xc0] sm:$0xff] (!%p6175_p12)   ;;  %v8826_v39 = vld [vmem:[#allocation9 + $0x88] sm:$0xff] (!%p6175_p12)   ;;  %v8829_v40 = vld [vmem:[#allocation9 + $0x50] sm:$0xff] (!%p6175_p12)  }
 0x2df   : > { %4256 = vmatprep.subr.bf16.mxu0 %v7372_v37  ;;  %4420 = vmatprep.subr.bf16.mxu1 %v7375_v38  ;;  %v8811_v35 = vld [vmem:[#allocation9] sm:$0xff] (!%p6175_p12)   ;;  %v8820_v37 = vld [vmem:[#allocation9 + $0xc8] sm:$0xff] (!%p6175_p12)  }
 0x2e0   : > { %v2526_v49 = vadd.f32 %v2524_v42, %v585_v29  ;;  %v8823_v38 = vld [vmem:[#allocation9 + $0x8] sm:$0xff] (!%p6175_p12)   ;;  %v8832_v29 = vld [vmem:[#allocation9 + $0xd0] sm:$0xff] (!%p6175_p12)  }
 0x2e1   : > { %v8835_v42 = vld [vmem:[#allocation9 + $0x10] sm:$0xff] (!%p6175_p12)  }
 0x2e2   : > { %2527 = vst [vmem:[#allocation2] sm:$0xff] %v2526_v49  ;;  %4257 = vmatpush1.bf16.msra.mxu0 %v7370_v45  ;;  %4421 = vmatpush1.bf16.msra.mxu1 %v7373_v26  ;;  %v8838_v45 = vld [vmem:[#allocation9 + $0x90] sm:$0xff] (!%p6175_p12)   ;;  %v8841_v26 = vld [vmem:[#allocation9 + $0x58] sm:$0xff] (!%p6175_p12)  }
 0x2e3   : > { %4258 = vmatprep.subr.bf16.mxu0 %v7378_v46  ;;  %4422 = vmatprep.subr.bf16.mxu1 %v7381_v47  ;;  %v8844_v46 = vld [vmem:[#allocation9 + $0xd8] sm:$0xff] (!%p6175_p12)  }
 0x2e4   : > { %v8847_v47 = vld [vmem:[#allocation9 + $0x18] sm:$0xff] (!%p6175_p12)  }
 0x2e5   : > { %v8850_v49 = vld [vmem:[#allocation9 + $0x98] sm:$0xff] (!%p6175_p12)  }
 0x2e6   : > { %4259 = vmatpush1.bf16.msra.mxu0 %v7376_v51  ;;  %4423 = vmatpush1.bf16.msra.mxu1 %v7379_v52  ;;  %v8853_v51 = vld [vmem:[#allocation9 + $0x60] sm:$0xff] (!%p6175_p12)  }
 0x2e7   : > { %4260 = vmatprep.subr.bf16.mxu0 %v7384_v33  ;;  %4424 = vmatprep.subr.bf16.mxu1 %v7387_v53  ;;  %v8856_v52 = vld [vmem:[#allocation9 + $0xe0] sm:$0xff] (!%p6175_p12)  }
 0x2e8   : > { %v8859_v33 = vld [vmem:[#allocation9 + $0x20] sm:$0xff] (!%p6175_p12)  }
 0x2e9   : > { %v8862_v53 = vld [vmem:[#allocation9 + $0xa0] sm:$0xff] (!%p6175_p12)  }
 0x2ea   : > { %4261 = vmatpush1.bf16.msra.mxu0 %v7382_v54  ;;  %4425 = vmatpush1.bf16.msra.mxu1 %v7385_v55  ;;  %v8865_v54 = vld [vmem:[#allocation9 + $0x68] sm:$0xff] (!%p6175_p12)  }
 0x2eb   : > { %4262 = vmatprep.subr.bf16.mxu0 %v7390_v56  ;;  %4426 = vmatprep.subr.bf16.mxu1 %v7393_v43  ;;  %v8868_v55 = vld [vmem:[#allocation9 + $0xe8] sm:$0xff] (!%p6175_p12)  }
 0x2ec   : > { %v8871_v56 = vld [vmem:[#allocation9 + $0x28] sm:$0xff] (!%p6175_p12)  }
 0x2ed   : > { %v8874_v43 = vld [vmem:[#allocation9 + $0xa8] sm:$0xff] (!%p6175_p12)  }
 0x2ee   : > { %4263 = vmatpush1.bf16.msra.mxu0 %v7388_v58  ;;  %4427 = vmatpush1.bf16.msra.mxu1 %v7391_v59  ;;  %v8877_v58 = vld [vmem:[#allocation9 + $0x70] sm:$0xff] (!%p6175_p12)  }
 0x2ef   : > { %4264 = vmatprep.subr.bf16.mxu0 %v7396_v41  ;;  %4428 = vmatprep.subr.bf16.mxu1 %v7399_v60  ;;  %v8880_v59 = vld [vmem:[#allocation9 + $0xf0] sm:$0xff] (!%p6175_p12)   ;;  %v8886_v60 = vsub.s32 (!%p6175_p12), 0, %v8254_v44 }
 0x2f0   : > { %v8883_v41 = vld [vmem:[#allocation9 + $0x30] sm:$0xff] (!%p6175_p12)  }
 0x2f2   : > { %4265 = vmatpush1.bf16.msra.mxu0 %v7394_v61  ;;  %4429 = vmatpush1.bf16.msra.mxu1 %v7397_v62  ;;  %v8889_v61 = vld [vmem:[#allocation9 + $0xb0] sm:$0xff] (!%p6175_p12)   ;;  %v4484_v62 = vsub.s32 (!%p6175_p12), 1, %v8254_v44 }
 0x2f3   : > { %4266 = vmatprep.subr.bf16.mxu0 %v7402_v63  ;;  %4430 = vmatprep.subr.bf16.mxu1 %v7405_v0  ;;  %v8893_v63 = vld [vmem:[#allocation9 + $0x78] sm:$0xff] (!%p6175_p12)   ;;  %v4488_v0 = vsub.s32 (!%p6175_p12), 2, %v8254_v44 }
 0x2f6   : > { %4267 = vmatpush1.bf16.msra.mxu0 %v7400_v1  ;;  %4431 = vmatpush1.bf16.msra.mxu1 %v7403_v2  ;;  %v8897_v1 = vld [vmem:[#allocation9 + $0xf8] sm:$0xff] (!%p6175_p12)   ;;  %v4492_v2 = vsub.s32 (!%p6175_p12), 3, %v8254_v44 }
 0x2f7   : > { %4268 = vmatprep.subr.bf16.mxu0 %v7408_v48  ;;  %4432 = vmatprep.subr.bf16.mxu1 %v7411_v3  ;;  %v8901_v48 = vld [vmem:[#allocation9 + $0x38] sm:$0xff] (!%p6175_p12)  }
 0x2f8   : > { %v8904_v3 = vld [vmem:[#allocation9 + $0xb8] sm:$0xff] (!%p6175_p12)  }
 0x2fa   : > { %4269 = vmatpush1.bf16.msra.mxu0 %v7406_v4  ;;  %4433 = vmatpush1.bf16.msra.mxu1 %v7409_v5  ;;  %v4476_v4 = vld [vmem:[#allocation7] sm:$0xf] (!%p6175_p12) }
 0x2fb   : > { %4270 = vmatprep.subr.bf16.mxu0 %v7414_v6  ;;  %4434 = vmatprep.subr.bf16.mxu1 %v7417_v7  ;;  %v4481_v5 = vrot.slane (!%p6175_p12), %v4476_v4, %v8886_v60  ;;  %v4485_v6 = vrot.slane (!%p6175_p12), %v4476_v4, %v4484_v62  ;;  %v4489_v7 = vrot.slane (!%p6175_p12), %v4476_v4, %v4488_v0 }
 0x2fe   : > { %4271 = vmatpush1.bf16.msra.mxu0 %v7412_v8  ;;  %4435 = vmatpush1.bf16.msra.mxu1 %v7415_v9  ;;  %v4493_v8 = vrot.slane (!%p6175_p12), %v4476_v4, %v4492_v2  ;;  %v4494_v9 = vcombine.low (!%p6175_p12), %v4481_v5, %v4485_v6  ;;  %v5018_v6 = vld [vmem:[#allocation12 + $0x48] sm:$0xff] (!%p6175_p12) }
 0x2ff   : > { %4272 = vmatprep.subr.bf16.mxu0 %v7420_v11  ;;  %4436 = vmatprep.subr.bf16.mxu1 %v7423_v12 }
 0x300   : > { %v4495_v11 = vcombine.low (!%p6175_p12), %v4489_v7, %v4493_v8  ;;  %v4502_v12 = vrot.slane (!%p6175_p12), %v4494_v9, %v8262_v50  ;;  %v5019_v8 = vld [vmem:[#allocation12 + $0x50] sm:$0xff] (!%p6175_p12)  ;;  %v5020_v9 = vld [vmem:[#allocation12 + $0x58] sm:$0xff] (!%p6175_p12) }
 0x302   : > { %4273 = vmatpush1.bf16.msra.mxu0 %v7418_v13  ;;  %4437 = vmatpush1.bf16.msra.mxu1 %v7421_v14  ;;  %v4509_v13 = vrot.slane (!%p6175_p12), %v4495_v11, %v8262_v50  ;;  %v4475_v14 = vld [vmem:[#allocation2] sm:$0xff] (!%p6175_p12)  ;;  %v6454_v11 = vpack.c.bf16 (!%p6175_p12), %v5020_v9, %v5019_v8 }
 0x303   : > { %6222 = vmatprep.subr.bf16.mxu0 (!%p6175_p12), %v8806_v32  ;;  %6244 = vmatprep.subr.bf16.mxu1 (!%p6175_p12), %v8808_v34 }
 0x305   : > { %4275 = vmatmul.mubr.bf16.vlgmr.msra.gmra.mrb[4].mxu0 %v2581_v15  ;;  %4439 = vmatmul.mubr.bf16.vlgmr.msra.gmra.mrb[4].mxu1 %v2581_v15 }
 0x306   : > { %6223 = vmatpush3.bf16.msra.mxu0 (!%p6175_p12), %v8811_v35  ;;  %6245 = vmatpush3.bf16.msra.mxu1 (!%p6175_p12), %v8814_v36 }
 0x307   : > { %6224 = vmatprep.subr.bf16.mxu0 (!%p6175_p12), %v8817_v27  ;;  %6246 = vmatprep.subr.bf16.mxu1 (!%p6175_p12), %v8820_v37 }
 0x30a   : > { %6225 = vmatpush3.bf16.msra.mxu0 (!%p6175_p12), %v8823_v38  ;;  %6247 = vmatpush3.bf16.msra.mxu1 (!%p6175_p12), %v8826_v39 }
 0x30b   : > { %6226 = vmatprep.subr.bf16.mxu0 (!%p6175_p12), %v8829_v40  ;;  %6248 = vmatprep.subr.bf16.mxu1 (!%p6175_p12), %v8832_v29 }
 0x30e   : > { %6227 = vmatpush3.bf16.msra.mxu0 (!%p6175_p12), %v8835_v42  ;;  %6249 = vmatpush3.bf16.msra.mxu1 (!%p6175_p12), %v8838_v45 }
 0x30f   : > { %6228 = vmatprep.subr.bf16.mxu0 (!%p6175_p12), %v8841_v26  ;;  %6250 = vmatprep.subr.bf16.mxu1 (!%p6175_p12), %v8844_v46 }
 0x312   : > { %6229 = vmatpush3.bf16.msra.mxu0 (!%p6175_p12), %v8847_v47  ;;  %6251 = vmatpush3.bf16.msra.mxu1 (!%p6175_p12), %v8850_v49 }
 0x313   : > { %6230 = vmatprep.subr.bf16.mxu0 (!%p6175_p12), %v8853_v51  ;;  %6252 = vmatprep.subr.bf16.mxu1 (!%p6175_p12), %v8856_v52 }
 0x316   : > { %6231 = vmatpush3.bf16.msra.mxu0 (!%p6175_p12), %v8859_v33  ;;  %6253 = vmatpush3.bf16.msra.mxu1 (!%p6175_p12), %v8862_v53 }
 0x317   : > { %6232 = vmatprep.subr.bf16.mxu0 (!%p6175_p12), %v8865_v54  ;;  %6254 = vmatprep.subr.bf16.mxu1 (!%p6175_p12), %v8868_v55 }
 0x31a   : > { %6233 = vmatpush3.bf16.msra.mxu0 (!%p6175_p12), %v8871_v56  ;;  %6255 = vmatpush3.bf16.msra.mxu1 (!%p6175_p12), %v8874_v43 }
 0x31b   : > { %6234 = vmatprep.subr.bf16.mxu0 (!%p6175_p12), %v8877_v58  ;;  %6256 = vmatprep.subr.bf16.mxu1 (!%p6175_p12), %v8880_v59 }
 0x31e   : > { %6235 = vmatpush3.bf16.msra.mxu0 (!%p6175_p12), %v8883_v41  ;;  %6257 = vmatpush3.bf16.msra.mxu1 (!%p6175_p12), %v8889_v61 }
 0x31f   : > { %6236 = vmatprep.subr.bf16.mxu0 (!%p6175_p12), %v8893_v63  ;;  %6258 = vmatprep.subr.bf16.mxu1 (!%p6175_p12), %v8897_v1 }
 0x322   : > { %6237 = vmatpush3.bf16.msra.mxu0 (!%p6175_p12), %v8901_v48  ;;  %6259 = vmatpush3.bf16.msra.mxu1 (!%p6175_p12), %v8904_v3 }
 0x323   : > { %6266 = vmatprep.subr.bf16.mxu0 (!%p6175_p12), %v8806_v32  ;;  %6288 = vmatprep.subr.bf16.mxu1 (!%p6175_p12), %v8808_v34 }
 0x3d8   : > { %v4276_v16 = vpop.f32.mrb[4].mxu0  ;;  %v4440_v17 = vpop.f32.mrb[4].mxu1 }
 0x3d9   : > { %v4278_v18 = vpop.f32.mrb[5].mxu0  ;;  %v4442_v19 = vpop.f32.mrb[5].mxu1 }
 0x3da   : > { %v4451_v20 = vcombine.low %v4276_v16, %v4278_v18  ;;  %v4452_v21 = vcombine.low %v4440_v17, %v4442_v19  ;;  %v4280_v22 = vpop.f32.mrb[6].mxu0  ;;  %v4444_v23 = vpop.f32.mrb[6].mxu1  ;;  %v4510_v16 = vcombine.low (!%p6175_p12), %v4502_v12, %v4509_v13  ;;  %v5021_v12 = vld [vmem:[#allocation12 + $0x60] sm:$0xff] (!%p6175_p12)  ;;  %v5022_v13 = vld [vmem:[#allocation12 + $0x68] sm:$0xff] (!%p6175_p12) }
 0x3db   : > { %v4281_v25 = vpop.f32.mrb[7].mxu0  ;;  %v4445_v24 = vpop.f32.mrb[7].mxu1 }
 0x3dc   : > { %v4459_v10 = vrot.slane %v4451_v20, %v8262_v50  ;;  %v4466_v28 = vrot.slane %v4452_v21, %v8262_v50  ;;  %4474 = sbr.rel (%p6175_p12) target bundleno = 1824 (0x720), region = 100  ;;  %v4512_v17 = vadd.f32 (!%p6175_p12), %v4510_v16, %v4475_v14  ;;  %v7843_v14 = vmov (!%p6175_p12), 0.0  }
 0x3de   : > { %v4467_v57 = vcombine.low %v4459_v10, %v4466_v28  ;;  %v4513_v19 = vmax.f32 (!%p6175_p12), %v4512_v17, 0.0  ;;  %v5023_v17 = vld [vmem:[#allocation12 + $0x70] sm:$0xff] (!%p6175_p12) }
 0x3e0   : > { %v4469_v31 = vadd.f32 %v4467_v57, %v2528_v30  ;;  %v4522_v21 = vrot.slane (!%p6175_p12), %v4513_v19, %v8262_v50  ;;  %v4515_v22 = vcombine.high (!%p6175_p12), %v4513_v19, %v4513_v19 }
 0x3e2   : > { %4470 = vst [vmem:[#allocation3] sm:$0xff] %v4469_v31  ;;  %v4530_v24 = vcombine.high (!%p6175_p12), %v4522_v21, %v4522_v21  ;;  %v4529_v10 = vrot.slane (!%p6175_p12), %v4515_v22, %v8262_v50  ;;  %v4536_v30 = vpack.c.bf16 (!%p6175_p12), %v4522_v21, %v4522_v21 }
 0x3e4   : > { %v4537_v31 = vpack.c.bf16 %v4530_v24, %v4530_v24  ;;  %v4531_v32 = vcombine.high %v4529_v10, %v4529_v10  ;;  %v4538_v34 = vpack.c.bf16 %v4529_v10, %v4529_v10 }
 0x3e6   : > { %4835 = vmatprep.mubr.bf16.mxu0 %v4537_v31  ;;  %v4539_v2 = vpack.c.bf16 %v4531_v32, %v4531_v32 }
 0x3e7   : > { %4836 = vmatmul.mubr.bf16.vlgmr.msra.gmra.mrb[0].mxu0 %v4536_v30 }
 0x3e8   : > { %4875 = vmatprep.mubr.bf16.mxu1 %v4539_v2  ;;  %6267 = vmatpush3.bf16.msra.mxu0 %v8811_v35  ;;  %v5027_v2 = vld [vmem:[#allocation12 + $0x90] sm:$0xff] }
 0x3e9   : > { %v4891_v15 = vld [vmem:[#allocation3] sm:$0xff]  ;;  %4876 = vmatmul.mubr.bf16.vlgmr.msra.gmra.mrb[0].mxu1 %v4538_v34  ;;  %6268 = vmatprep.subr.bf16.mxu0 %v8817_v27  ;;  %v5010_v27 = vld [vmem:[#allocation12 + $0x8] sm:$0xff]  ;;  %v5025_v34 = vld [vmem:[#allocation12 + $0x80] sm:$0xff] }
 0x3ea   : > { %v4892_v18 = vadd.f32 %v4891_v15, %v4510_v16  ;;  %6289 = vmatpush3.bf16.msra.mxu1 %v8814_v36  ;;  %v5009_v36 = vld [vmem:[#allocation12] sm:$0xff]  ;;  %v6457_v15 = vpack.c.bf16 %v5022_v13, %v5021_v12 }
 0x3eb   : > { %6290 = vmatprep.subr.bf16.mxu1 %v8820_v37  ;;  %v5011_v37 = vld [vmem:[#allocation12 + $0x10] sm:$0xff]  ;;  %v6210_v12 = vld [vmem:[#allocation15] ss:$0 sm:$0xff] }
 0x3ec   : > { %v4893_v20 = vmax.f32 %v4892_v18, 0.0  ;;  %6269 = vmatpush3.bf16.msra.mxu0 %v8823_v38  ;;  %v7841_v38 = vmov 0.0|0.0   ;;  %v5024_v18 = vld [vmem:[#allocation12 + $0x78] sm:$0xff] }
 0x3ed   : > { %6270 = vmatprep.subr.bf16.mxu0 %v8829_v40  ;;  %v5012_v40 = vld [vmem:[#allocation12 + $0x18] sm:$0xff]  ;;  %v6460_v24 = vpack.c.bf16 %v5024_v18, %v5023_v17 }
 0x3ee   : > { %v4902_v23 = vrot.slane %v4893_v20, %v8262_v50  ;;  %v4895_v25 = vcombine.high %v4893_v20, %v4893_v20  ;;  %6291 = vmatpush3.bf16.msra.mxu1 %v8826_v39  ;;  %v6439_v39 = vpack.c.bf16 %v5010_v27, %v5009_v36  ;;  %v5029_v36 = vld [vmem:[#allocation12 + $0xa0] sm:$0xff]  ;;  %v5030_v27 = vld [vmem:[#allocation12 + $0xa8] sm:$0xff] }
 0x3ef   : > { %6292 = vmatprep.subr.bf16.mxu1 %v8832_v29  ;;  %v6442_v29 = vpack.c.bf16 %v5012_v40, %v5011_v37  ;;  %v6421_v37 = vpack.c.bf16 %v5030_v27, %v5029_v36  ;;  %v5032_v40 = vld [vmem:[#allocation12 + $0xb8] sm:$0xff] }
 0x3f0   : > { %v4910_v28 = vcombine.high %v4902_v23, %v4902_v23  ;;  %v4909_v57 = vrot.slane %v4895_v25, %v8262_v50  ;;  %6271 = vmatpush3.bf16.msra.mxu0 %v8835_v42  ;;  %v4916_v50 = vpack.c.bf16 %v4902_v23, %v4902_v23  ;;  %v5013_v42 = vld [vmem:[#allocation12 + $0x20] sm:$0xff] }
 0x3f1   : > { %6272 = vmatprep.subr.bf16.mxu0 %v8841_v26 }
 0x3f2   : > { %v4911_v0 = vcombine.high %v4909_v57, %v4909_v57  ;;  %v4917_v4 = vpack.c.bf16 %v4910_v28, %v4910_v28  ;;  %6293 = vmatpush3.bf16.msra.mxu1 %v8838_v45  ;;  %v4918_v35 = vpack.c.bf16 %v4909_v57, %v4909_v57  ;;  %v5014_v45 = vld [vmem:[#allocation12 + $0x28] sm:$0xff] }
 0x3f3   : > { %6294 = vmatprep.subr.bf16.mxu1 %v8844_v46  ;;  %v6445_v26 = vpack.c.bf16 %v5014_v45, %v5013_v42  ;;  %v5015_v46 = vld [vmem:[#allocation12 + $0x30] sm:$0xff]  ;;  %v5033_v42 = vld [vmem:[#allocation12 + $0xc0] sm:$0xff]  ;;  %v5034_v45 = vld [vmem:[#allocation12 + $0xc8] sm:$0xff] }
 0x3f4   : > { %v4919_v5 = vpack.c.bf16 %v4911_v0, %v4911_v0  ;;  %4952 = vmatprep.mubr.bf16.mxu0 %v4917_v4  ;;  %6273 = vmatpush3.bf16.msra.mxu0 %v8847_v47  ;;  %v5016_v47 = vld [vmem:[#allocation12 + $0x38] sm:$0xff]  ;;  %v5026_v0 = vld [vmem:[#allocation12 + $0x88] sm:$0xff] }
 0x3f5   : > { %6274 = vmatprep.subr.bf16.mxu0 %v8853_v51  ;;  %v6415_v4 = vpack.c.bf16 %v5026_v0, %v5025_v34 }
 0x3f6   : > { %4992 = vmatprep.mubr.bf16.mxu1 %v4919_v5  ;;  %6295 = vmatpush3.bf16.msra.mxu1 %v8850_v49  ;;  %v6448_v49 = vpack.c.bf16 %v5016_v47, %v5015_v46  ;;  %v5028_v5 = vld [vmem:[#allocation12 + $0x98] sm:$0xff]  ;;  %v5035_v46 = vld [vmem:[#allocation12 + $0xd0] sm:$0xff] }
 0x3f7   : > { %6296 = vmatprep.subr.bf16.mxu1 %v8856_v52  ;;  %v6176_v52 = vld [vmem:[#allocation10] ss:$0 sm:$0xff] }
 0x3f8   : > { %6275 = vmatpush3.bf16.msra.mxu0 %v8859_v33  ;;  %v5036_v47 = vld [vmem:[#allocation12 + $0xd8] sm:$0xff] }
 0x3f9   : > { %6276 = vmatprep.subr.bf16.mxu0 %v8865_v54 }
 0x3fa   : > { %6297 = vmatpush3.bf16.msra.mxu1 %v8862_v53 }
 0x3fb   : > { %6298 = vmatprep.subr.bf16.mxu1 %v8868_v55 }
 0x3fc   : > { %6277 = vmatpush3.bf16.msra.mxu0 %v8871_v56 }
 0x3fd   : > { %6278 = vmatprep.subr.bf16.mxu0 %v8877_v58 }
 0x3fe   : > { %6299 = vmatpush3.bf16.msra.mxu1 %v8874_v43 }
 0x3ff   : > { %6300 = vmatprep.subr.bf16.mxu1 %v8880_v59 }
 0x400   : > { %6279 = vmatpush3.bf16.msra.mxu0 %v8883_v41 }
 0x401   : > { %6280 = vmatprep.subr.bf16.mxu0 %v8893_v63 }
 0x402   : > { %6301 = vmatpush3.bf16.msra.mxu1 %v8889_v61 }
 0x403   : > { %6302 = vmatprep.subr.bf16.mxu1 %v8897_v1 }
 0x404   : > { %6281 = vmatpush3.bf16.msra.mxu0 %v8901_v48 }
 0x405   : > { %6414 = vmatprep.subr.bf16.mxu0 %v7841_v38 }
 0x406   : > { %6303 = vmatpush3.bf16.msra.mxu1 %v8904_v3  ;;  %v5017_v3 = vld [vmem:[#allocation12 + $0x40] sm:$0xff] }
 0x407   : > { %4953 = vmatmul.mubr.bf16.vlgmr.msra.gmra.mrb[4].mxu0 %v4916_v50  ;;  %6438 = vmatprep.subr.bf16.mxu1 %v7841_v38  ;;  %v6451_v7 = vpack.c.bf16 %v5018_v6, %v5017_v3 }
 0x408   : > { %6376 = vmatprep.mubr.msk.f32.mxu0 %vm7842_vm1, %v7843_v14  ;;  %6416 = vmatpush3.bf16.msra.mxu0 %v6415_v4 }
 0x409   : > { %4993 = vmatmul.mubr.bf16.vlgmr.msra.gmra.mrb[4].mxu1 %v4918_v35  ;;  %v6418_v35 = vpack.c.bf16 %v5028_v5, %v5027_v2  ;;  %6417 = vmatprep.subr.bf16.mxu0 %v7841_v38 }
 0x40a   : > { %6440 = vmatpush3.bf16.msra.mxu1 %v6439_v39  ;;  %6411 = vmatprep.mubr.msk.f32.mxu1 %vm7842_vm1, %v7843_v14  ;;  %v5031_v39 = vld [vmem:[#allocation12 + $0xb0] sm:$0xff]  ;;  %v6211_v14 = vld [vmem:[#allocation16] ss:$0 sm:$0xff] }
 0x40b   : > { %6441 = vmatprep.subr.bf16.mxu1 %v7841_v38 }
 0x40c   : > { %6419 = vmatpush3.bf16.msra.mxu0 %v6418_v35 }
 0x40d   : > { %6420 = vmatprep.subr.bf16.mxu0 %v7841_v38 }
 0x40e   : > { %6443 = vmatpush3.bf16.msra.mxu1 %v6442_v29  ;;  %v6424_v29 = vpack.c.bf16 %v5032_v40, %v5031_v39 }
 0x40f   : > { %6444 = vmatprep.subr.bf16.mxu1 %v7841_v38 }
 0x410   : > { %6422 = vmatpush3.bf16.msra.mxu0 %v6421_v37 }
 0x411   : > { %6423 = vmatprep.subr.bf16.mxu0 %v7841_v38 }
 0x412   : > { %6446 = vmatpush3.bf16.msra.mxu1 %v6445_v26  ;;  %v6427_v26 = vpack.c.bf16 %v5034_v45, %v5033_v42 }
 0x413   : > { %6447 = vmatprep.subr.bf16.mxu1 %v7841_v38 }
 0x414   : > { %6425 = vmatpush3.bf16.msra.mxu0 %v6424_v29 }
 0x415   : > { %6426 = vmatprep.subr.bf16.mxu0 %v7841_v38 }
 0x416   : > { %6449 = vmatpush3.bf16.msra.mxu1 %v6448_v49  ;;  %v6430_v49 = vpack.c.bf16 %v5036_v47, %v5035_v46 }
 0x417   : > { %6450 = vmatprep.subr.bf16.mxu1 %v7841_v38 }
 0x418   : > { %6428 = vmatpush3.bf16.msra.mxu0 %v6427_v26 }
 0x419   : > { %6429 = vmatprep.subr.bf16.mxu0 %v7841_v38 }
 0x41a   : > { %6452 = vmatpush3.bf16.msra.mxu1 %v6451_v7 }
 0x41b   : > { %6453 = vmatprep.subr.bf16.mxu1 %v7841_v38 }
 0x41c   : > { %6431 = vmatpush3.bf16.msra.mxu0 %v6430_v49 }
 0x41d   : > { %6432 = vmatprep.subr.bf16.mxu0 %v7841_v38 }
 0x41e   : > { %6455 = vmatpush3.bf16.msra.mxu1 %v6454_v11 }
 0x41f   : > { %6456 = vmatprep.subr.bf16.mxu1 %v7841_v38 }
 0x422   : > { %6458 = vmatpush3.bf16.msra.mxu1 %v6457_v15 }
 0x423   : > { %6459 = vmatprep.subr.bf16.mxu1 %v7841_v38 }
 0x426   : > { %6461 = vmatpush3.bf16.msra.mxu1 %v6460_v24 }
 0x4ba   : > { %v6238_v51 = vpop.f32.mrb[0].mxu0 }
 0x4bb   : > { %v6239_v33 = vpop.f32.mrb[1].mxu0 }
 0x4bc   : > { %v6260_v53 = vpop.f32.mrb[0].mxu1  ;;  %v6240_v54 = vadd.f32 %v6239_v33, %v6238_v51  ;;  %v6241_v55 = vpop.f32.mrb[2].mxu0  ;;  %v5037_v51 = vld [vmem:[#allocation12 + $0xe0] sm:$0xff] }
 0x4bd   : > { %v6261_v56 = vpop.f32.mrb[1].mxu1  ;;  %v6242_v43 = vpop.f32.mrb[3].mxu0 }
 0x4be   : > { %v4838_v58 = vadd.f32 %v6240_v54, %v6176_v52  ;;  %v6262_v59 = vadd.f32 %v6261_v56, %v6260_v53  ;;  %v6263_v41 = vpop.f32.mrb[2].mxu1  ;;  %v5039_v53 = vld [vmem:[#allocation12 + $0xf0] sm:$0xff]  ;;  %v5040_v54 = vld [vmem:[#allocation12 + $0xf8] sm:$0xff] }
 0x4bf   : > { %v6264_v61 = vpop.f32.mrb[3].mxu1  ;;  %v6436_v55 = vpack.c.bf16 %v5040_v54, %v5039_v53 }
 0x4c0   : > { %v8955_v63 = vadd.f32 %v6262_v59, %v4838_v58 }
 0x4c2   : > { %v4883_v1 = vmul.f32 %v8955_v63, %v8955_v63 }
 0x4c4   : > { %v4885_v48 = vsel %vm4884_vm0, %v4883_v1, 0.0 }
 0x4c5   : > { %4886 = vadd.xlane.f32.xlu0 %v4885_v48 }
 0x4da   : > { %v6282_v16 = vpop.f32.mrb[4].mxu0 }
 0x4db   : > { %v6283_v19 = vpop.f32.mrb[5].mxu0 }
 0x4dc   : > { %v6304_v20 = vpop.f32.mrb[4].mxu1  ;;  %v6284_v21 = vadd.f32 %v6283_v19, %v6282_v16  ;;  %v6285_v22 = vpop.f32.mrb[6].mxu0 }
 0x4dd   : > { %v6305_v23 = vpop.f32.mrb[5].mxu1  ;;  %v6286_v25 = vpop.f32.mrb[7].mxu0 }
 0x4de   : > { %v4955_v10 = vadd.f32 %v6284_v21, %v6176_v52  ;;  %v6306_v28 = vadd.f32 %v6305_v23, %v6304_v20  ;;  %v6307_v30 = vpop.f32.mrb[6].mxu1  ;;  %v5038_v52 = vld [vmem:[#allocation12 + $0xe8] sm:$0xff] }
 0x4df   : > { %v6308_v57 = vpop.f32.mrb[7].mxu1  ;;  %v6433_v33 = vpack.c.bf16 %v5038_v52, %v5037_v51 }
 0x4e0   : > { %v4995_v31 = vadd.f32 %v6306_v28, %v4955_v10 }
 0x4e1   : > { %6434 = vmatpush3.bf16.msra.mxu0 %v6433_v33 }
 0x4e2   : > { %v5000_v32 = vmul.f32 %v4995_v31, %v4995_v31  ;;  %6435 = vmatprep.subr.bf16.mxu0 %v7841_v38  ;;  %v6209_v38 = vld [vmem:[#allocation13] ss:$0 sm:$0xff] }
 0x4e4   : > { %v5001_v50 = vsel %vm4884_vm0, %v5000_v32, 0.0 }
 0x4e5   : > { %5002 = vadd.xlane.f32.xlu0 %v5001_v50  ;;  %6437 = vmatpush3.bf16.msra.mxu0 %v6436_v55 }
 0x552   : > { %v4887_v56 = vpop.xlane.xlu0 %4886 }
 0x553   : > { %v4888_v43 = vmax.f32 %v4887_v56, 1e-24 }
 0x555   : > { %7457 = vrsqrt.f32 %v4888_v43 }
 0x55f   : > { %v7458_v58 = vpop.eup %7457 }
 0x560   : > { %v4890_v59 = vmul.f32 %v7458_v58, %v8955_v63 }
 0x562   : > { %5007 = vst [vmem:[#allocation18] sm:$0x3] %v4890_v59  ;;  %6412 = vmatmul.mubr.f32.vlgmr.msra.gmra.mrb[8].mxu1 %v4890_v59 }
 0x572   : > { %v5003_v41 = vpop.xlane.xlu0 %5002 }
 0x573   : > { %v5004_v61 = vmax.f32 %v5003_v41, 1e-24 }
 0x575   : > { %7459 = vrsqrt.f32 %v5004_v61 }
 0x57f   : > { %v7460_v1 = vpop.eup %7459 }
 0x580   : > { %v5006_v48 = vmul.f32 %v7460_v1, %v4995_v31 }
 0x582   : > { %5008 = vst [vmem:[#allocation19] sm:$0x3] %v5006_v48  ;;  %6377 = vmatmul.mubr.f32.vlgmr.msra.gmra.mrb[8].mxu0 %v5006_v48 }
 0x635   : > { %v5177_v3 = vpop.f32.mrb[8].mxu1 }
 0x636   : > { %v6413_v6 = vpop.f32.mrb[9].mxu1 }
 0x655   : > { %v5107_v7 = vpop.f32.mrb[8].mxu0 }
 0x656   : > { %v5178_v8 = vadd.f32 %v5177_v3, %v5107_v7  ;;  %v6378_v9 = vpop.f32.mrb[9].mxu0 }
 0x658   : > { %v5188_v11 = vadd.f32 %v6209_v38, %v5178_v8 }
 0x65a   : > { %v5189_v13 = vmax.f32 %v5188_v11, 0.0 }
 0x65c   : > { %v5197_v63 = vmul.f32 %v6210_v12, %v5189_v13 }
 0x65e   : > { %v5205_v15 = vadd.f32 %v6211_v14, %v5197_v63 }
 0x660   : > { %5206 = vst [vmem:[#allocation21] sm:$0x3] %v5205_v15  ;;  %v5210_v16 = vrot.slane %v5205_v15, %v8886_v60  ;;  %v5277_v17 = vrot.slane %v5205_v15, %v4484_v62  ;;  %v7844_v62 = vmov 1966171168  }
 0x661   : > { %v5343_v18 = vunpack.c.l.s4 %v7844_v62 }
 0x662   : > { %5220 = vbcast.lane.b32.xlu0 %v5210_v16, 272  ;;  %5212 = vbcast.lane.b32.xlu1 %v5210_v16, 256 }
 0x663   : > { %v5344_v19 = vunpack.c.0.s8 %v5343_v18 }
 0x665   : > { %v5347_v20 = vsub.s32 %v5344_v19, %v8254_v44 }
 0x666   : > { %5248 = vbcast.lane.b32.xlu0 %v5210_v16, 328  ;;  %5216 = vbcast.lane.b32.xlu1 %v5210_v16, 264 }
 0x667   : > { %v5348_v21 = vrot.slane %v5205_v15, %v5347_v20 }
 0x669   : > { %v5356_v22 = vrot.slane %v5348_v21, %v5347_v20  ;;  %v5349_v4 = vcombine.high %v5348_v21, %v5348_v21 }
 0x66a   : > { %5256 = vbcast.lane.b32.xlu0 %v5210_v16, 344  ;;  %5224 = vbcast.lane.b32.xlu1 %v5210_v16, 280 }
 0x66b   : > { %v8977_v23 = vrot.slane %v5356_v22, %v8886_v60  ;;  %v5363_v27 = vrot.slane %v5349_v4, %v5347_v20 }
 0x66d   : > { %v9014_v42 = vrot.slane %v5363_v27, %v8886_v60 }
 0x66e   : > { %5264 = vbcast.lane.b32.xlu0 %v5210_v16, 360  ;;  %5228 = vbcast.lane.b32.xlu1 %v5210_v16, 288 }
 0x672   : > { %5272 = vbcast.lane.b32.xlu0 %v5210_v16, 376  ;;  %5232 = vbcast.lane.b32.xlu1 %v5210_v16, 296 }
 0x676   : > { %5283 = vbcast.lane.b32.xlu0 %v5277_v17, 264  ;;  %5236 = vbcast.lane.b32.xlu1 %v5210_v16, 304 }
 0x67a   : > { %5291 = vbcast.lane.b32.xlu0 %v5277_v17, 280  ;;  %5240 = vbcast.lane.b32.xlu1 %v5210_v16, 312 }
 0x67e   : > { %5299 = vbcast.lane.b32.xlu0 %v5277_v17, 296  ;;  %5244 = vbcast.lane.b32.xlu1 %v5210_v16, 320 }
 0x682   : > { %5307 = vbcast.lane.b32.xlu0 %v5277_v17, 312  ;;  %5252 = vbcast.lane.b32.xlu1 %v5210_v16, 336 }
 0x686   : > { %5315 = vbcast.lane.b32.xlu0 %v5277_v17, 328  ;;  %5260 = vbcast.lane.b32.xlu1 %v5210_v16, 352 }
 0x68a   : > { %5323 = vbcast.lane.b32.xlu0 %v5277_v17, 344  ;;  %5268 = vbcast.lane.b32.xlu1 %v5210_v16, 368 }
 0x68e   : > { %5331 = vbcast.lane.b32.xlu0 %v5277_v17, 360  ;;  %5279 = vbcast.lane.b32.xlu1 %v5277_v17, 256 }
 0x692   : > { %5339 = vbcast.lane.b32.xlu0 %v5277_v17, 376  ;;  %5287 = vbcast.lane.b32.xlu1 %v5277_v17, 272 }
 0x696   : > { %5295 = vbcast.lane.b32.xlu1 %v5277_v17, 288 }
 0x69a   : > { %5303 = vbcast.lane.b32.xlu1 %v5277_v17, 304 }
 0x69e   : > { %5311 = vbcast.lane.b32.xlu1 %v5277_v17, 320 }
 0x6a2   : > { %5319 = vbcast.lane.b32.xlu1 %v5277_v17, 336 }
 0x6a6   : > { %5327 = vbcast.lane.b32.xlu1 %v5277_v17, 352 }
 0x6aa   : > { %5335 = vbcast.lane.b32.xlu1 %v5277_v17, 368 }
 0x6d4   : > { %v5221_v25 = vpop.permute.xlu0 %5220  ;;  %v5213_v24 = vpop.permute.xlu1 %5212 }
 0x6d5   : > { %v5376_v10 = vmul.f32 %v8977_v23, %v5221_v25  ;;  %v5374_v28 = vmul.f32 %v8977_v23, %v5213_v24 }
 0x6d7   : > { %5408 = vst [vmem:[%s9232_s3 + $0x10] sm:$0xff] %v5376_v10  ;;  %5406 = vst [vmem:[%s9232_s3] sm:$0xff] %v5374_v28 }
 0x6d8   : > { %v5249_v44 = vpop.permute.xlu0 %5248  ;;  %v5217_v30 = vpop.permute.xlu1 %5216 }
 0x6d9   : > { %v5383_v57 = vmul.f32 %v8977_v23, %v5249_v44  ;;  %v5375_v31 = vmul.f32 %v8977_v23, %v5217_v30 }
 0x6db   : > { %5415 = vst [vmem:[%s9232_s3 + $0x48] sm:$0xff] %v5383_v57  ;;  %5407 = vst [vmem:[%s9232_s3 + $0x8] sm:$0xff] %v5375_v31 }
 0x6dc   : > { %v5257_v32 = vpop.permute.xlu0 %5256  ;;  %v5225_v34 = vpop.permute.xlu1 %5224 }
 0x6dd   : > { %v5385_v0 = vmul.f32 %v8977_v23, %v5257_v32  ;;  %v5377_v2 = vmul.f32 %v8977_v23, %v5225_v34 }
 0x6df   : > { %5417 = vst [vmem:[%s9232_s3 + $0x58] sm:$0xff] %v5385_v0  ;;  %5409 = vst [vmem:[%s9232_s3 + $0x18] sm:$0xff] %v5377_v2 }
 0x6e0   : > { %v5265_v5 = vpop.permute.xlu0 %5264  ;;  %v5229_v50 = vpop.permute.xlu1 %5228 }
 0x6e1   : > { %v5387_v35 = vmul.f32 %v8977_v23, %v5265_v5  ;;  %v5378_v36 = vmul.f32 %v8977_v23, %v5229_v50 }
 0x6e3   : > { %5419 = vst [vmem:[%s9232_s3 + $0x68] sm:$0xff] %v5387_v35  ;;  %5410 = vst [vmem:[%s9232_s3 + $0x20] sm:$0xff] %v5378_v36 }
 0x6e4   : > { %v5273_v37 = vpop.permute.xlu0 %5272  ;;  %v5233_v39 = vpop.permute.xlu1 %5232 }
 0x6e5   : > { %v5389_v40 = vmul.f32 %v8977_v23, %v5273_v37  ;;  %v5379_v29 = vmul.f32 %v8977_v23, %v5233_v39 }
 0x6e7   : > { %5421 = vst [vmem:[%s9232_s3 + $0x78] sm:$0xff] %v5389_v40  ;;  %5411 = vst [vmem:[%s9232_s3 + $0x28] sm:$0xff] %v5379_v29 }
 0x6e8   : > { %v5284_v45 = vpop.permute.xlu0 %5283  ;;  %v5237_v26 = vpop.permute.xlu1 %5236 }
 0x6e9   : > { %v5391_v46 = vmul.f32 %v9014_v42, %v5284_v45  ;;  %v5380_v47 = vmul.f32 %v8977_v23, %v5237_v26 }
 0x6eb   : > { %5423 = vst [vmem:[%s9232_s3 + $0x88] sm:$0xff] %v5391_v46  ;;  %5412 = vst [vmem:[%s9232_s3 + $0x30] sm:$0xff] %v5380_v47 }
 0x6ec   : > { %v5292_v60 = vpop.permute.xlu0 %5291  ;;  %v5241_v49 = vpop.permute.xlu1 %5240 }
 0x6ed   : > { %v5393_v51 = vmul.f32 %v9014_v42, %v5292_v60  ;;  %v5381_v52 = vmul.f32 %v8977_v23, %v5241_v49 }
 0x6ef   : > { %5425 = vst [vmem:[%s9232_s3 + $0x98] sm:$0xff] %v5393_v51  ;;  %5413 = vst [vmem:[%s9232_s3 + $0x38] sm:$0xff] %v5381_v52 }
 0x6f0   : > { %v5300_v33 = vpop.permute.xlu0 %5299  ;;  %v5245_v53 = vpop.permute.xlu1 %5244 }
 0x6f1   : > { %v5395_v54 = vmul.f32 %v9014_v42, %v5300_v33  ;;  %v5382_v55 = vmul.f32 %v8977_v23, %v5245_v53 }
 0x6f3   : > { %5427 = vst [vmem:[%s9232_s3 + $0xa8] sm:$0xff] %v5395_v54  ;;  %5414 = vst [vmem:[%s9232_s3 + $0x40] sm:$0xff] %v5382_v55 }
 0x6f4   : > { %v5308_v56 = vpop.permute.xlu0 %5307  ;;  %v5253_v43 = vpop.permute.xlu1 %5252 }
 0x6f5   : > { %v5397_v58 = vmul.f32 %v9014_v42, %v5308_v56  ;;  %v5384_v59 = vmul.f32 %v8977_v23, %v5253_v43 }
 0x6f7   : > { %5429 = vst [vmem:[%s9232_s3 + $0xb8] sm:$0xff] %v5397_v58  ;;  %5416 = vst [vmem:[%s9232_s3 + $0x50] sm:$0xff] %v5384_v59 }
 0x6f8   : > { %v5316_v41 = vpop.permute.xlu0 %5315  ;;  %v5261_v61 = vpop.permute.xlu1 %5260 }
 0x6f9   : > { %v5399_v1 = vmul.f32 %v9014_v42, %v5316_v41  ;;  %v5386_v48 = vmul.f32 %v8977_v23, %v5261_v61 }
 0x6fb   : > { %5431 = vst [vmem:[%s9232_s3 + $0xc8] sm:$0xff] %v5399_v1  ;;  %5418 = vst [vmem:[%s9232_s3 + $0x60] sm:$0xff] %v5386_v48 }
 0x6fc   : > { %v5324_v3 = vpop.permute.xlu0 %5323  ;;  %v5269_v6 = vpop.permute.xlu1 %5268 }
 0x6fd   : > { %v5401_v7 = vmul.f32 %v9014_v42, %v5324_v3  ;;  %v5388_v38 = vmul.f32 %v8977_v23, %v5269_v6 }
 0x6ff   : > { %5433 = vst [vmem:[%s9232_s3 + $0xd8] sm:$0xff] %v5401_v7  ;;  %5420 = vst [vmem:[%s9232_s3 + $0x70] sm:$0xff] %v5388_v38 }
 0x700   : > { %v5332_v8 = vpop.permute.xlu0 %5331  ;;  %v5280_v9 = vpop.permute.xlu1 %5279 }
 0x701   : > { %v5403_v11 = vmul.f32 %v9014_v42, %v5332_v8  ;;  %v5390_v12 = vmul.f32 %v9014_v42, %v5280_v9 }
 0x703   : > { %5435 = vst [vmem:[%s9232_s3 + $0xe8] sm:$0xff] %v5403_v11  ;;  %5422 = vst [vmem:[%s9232_s3 + $0x80] sm:$0xff] %v5390_v12 }
 0x704   : > { %v5340_v13 = vpop.permute.xlu0 %5339  ;;  %v5288_v14 = vpop.permute.xlu1 %5287 }
 0x705   : > { %v5405_v63 = vmul.f32 %v9014_v42, %v5340_v13  ;;  %v5392_v15 = vmul.f32 %v9014_v42, %v5288_v14 }
 0x707   : > { %5437 = vst [vmem:[%s9232_s3 + $0xf8] sm:$0xff] %v5405_v63  ;;  %5424 = vst [vmem:[%s9232_s3 + $0x90] sm:$0xff] %v5392_v15 }
 0x708   : > { %v5296_v16 = vpop.permute.xlu1 %5295 }
 0x709   : > { %v5394_v17 = vmul.f32 %v9014_v42, %v5296_v16 }
 0x70b   : > { %5426 = vst [vmem:[%s9232_s3 + $0xa0] sm:$0xff] %v5394_v17 }
 0x70c   : > { %v5304_v62 = vpop.permute.xlu1 %5303 }
 0x70d   : > { %v5396_v18 = vmul.f32 %v9014_v42, %v5304_v62 }
 0x70f   : > { %5428 = vst [vmem:[%s9232_s3 + $0xb0] sm:$0xff] %v5396_v18 }
 0x710   : > { %v5312_v19 = vpop.permute.xlu1 %5311 }
 0x711   : > { %v5398_v20 = vmul.f32 %v9014_v42, %v5312_v19 }
 0x713   : > { %5430 = vst [vmem:[%s9232_s3 + $0xc0] sm:$0xff] %v5398_v20 }
 0x714   : > { %v5320_v21 = vpop.permute.xlu1 %5319 }
 0x715   : > { %v5400_v22 = vmul.f32 %v9014_v42, %v5320_v21 }
 0x717   : > { %5432 = vst [vmem:[%s9232_s3 + $0xd0] sm:$0xff] %v5400_v22 }
 0x718   : > { %v5328_v23 = vpop.permute.xlu1 %5327 }
 0x719   : > { %v5402_v25 = vmul.f32 %v9014_v42, %v5328_v23 }
 0x71b   : > { %5434 = vst [vmem:[%s9232_s3 + $0xe0] sm:$0xff] %v5402_v25 }
 0x71c   : > { %v5336_v24 = vpop.permute.xlu1 %5335 }
 0x71d   : > { %v5404_v10 = vmul.f32 %v9014_v42, %v5336_v24 }
 0x71f   : > { %5436 = vst [vmem:[%s9232_s3 + $0xf0] sm:$0xff] %v5404_v10 }
 0x720 PF: > { %p6593_p8 = scmp.eq.s32.totalorder %s7939_s14, 1  ;;  %s7845_s15 = smov [#allocation19]  }
 0x721   : > { %s5456_s11 = sshll.u32 %s7845_s15, 4  ;;  %s7846_s10 = smov [#allocation18]   ;;  %s5457_s11 = int_to_ptr.vmem [resolvable:$true] %s5456_s11 }
 0x722   : > { %s5445_s29 = sshll.u32 %s7846_s10, 4  ;;  %s7687_s21 = scalar_lea.vmem %s5457_s11, 32  ;;  %s5446_s29 = int_to_ptr.vmem [resolvable:$true] %s5445_s29 }
 0x723   : > { %p7688_p1 = scmp.ne.s32.totalorder %s5457_s11, %s7687_s21  ;;  %p7694_p6 = scmp.lt.s32.totalorder %s5457_s11, %s5457_s11 }
 0x724   : > { %p7695_p4 = scmp.lt.s32.totalorder %s7687_s21, %s7687_s21 }
 0x725   : > { %p7689_p10 = pnand %p7688_p1, %p6593_p8 }
 0x726   : > { %p7696_p13 = por %p7695_p4, %p7694_p6 }
 0x727   : > { %p7690_p11 = pneg %p7689_p10 }
 0x729   : > { %p7697_p0 = pnand %p7696_p13, %p7690_p11 }
 0x72b   : > { %7700 = shalt.err (!%p7697_p0)
}
 0x72c   : > { %s9233_s22 = sld [smem:[#allocation33_spill]] }
 0x732   : > { %s7701_s20 = scalar_lea.hbm %s9233_s22, 32 }
 0x733   : > { %p7702_p2 = scmp.ne.s32.totalorder %s9233_s22, %s7701_s20  ;;  %p7707_p9 = scmp.lt.u32.totalorder %s7701_s20, %s9233_s22 }
 0x735   : > { %p7703_p5 = pnand %p7702_p2, %p6593_p8 }
 0x737   : > { %p7704_p7 = pneg %p7703_p5 }
 0x739   : > { %p7709_p3 = pnand %p7707_p9, %p7704_p7 }
 0x73b   : > { %7712 = shalt.err (!%p7709_p3)
}
 0x73c   : > { %6543 = dma.vmem_to_hbm [thread:$0]  (%p6593_p8), %s5457_s11, 32, %s9233_s22, [#allocation20]  }
 0x73d   : > { %s7713_s12 = scalar_lea.vmem %s5446_s29, 32  ;;  %p7720_p11 = scmp.lt.s32.totalorder %s5446_s29, %s5446_s29 }
 0x73e   : > { %p7714_p12 = scmp.ne.s32.totalorder %s5446_s29, %s7713_s12  ;;  %p7721_p6 = scmp.lt.s32.totalorder %s7713_s12, %s7713_s12 }
 0x740   : > { %p7715_p1 = pnand %p7714_p12, %p6593_p8  ;;  %p7722_p4 = por %p7721_p6, %p7720_p11 }
 0x742   : > { %p7716_p10 = pneg %p7715_p1 }
 0x744   : > { %p7723_p13 = pnand %p7722_p4, %p7716_p10 }
 0x746   : > { %7726 = shalt.err (!%p7723_p13)
}
 0x747   : > { %s9234_s15 = sld [smem:[#allocation32_spill]] }
 0x74d   : > { %s7727_s10 = scalar_lea.hbm %s9234_s15, 32 }
 0x74e   : > { %p7728_p0 = scmp.ne.s32.totalorder %s9234_s15, %s7727_s10  ;;  %p7733_p7 = scmp.lt.u32.totalorder %s7727_s10, %s9234_s15 }
 0x750   : > { %p7729_p2 = pnand %p7728_p0, %p6593_p8 }
 0x752   : > { %p7730_p5 = pneg %p7729_p2 }
 0x754   : > { %p7735_p9 = pnand %p7733_p7, %p7730_p5 }
 0x756   : > { %7738 = shalt.err (!%p7735_p9)
}
 0x757   : > { %6541 = dma.vmem_to_hbm [thread:$0]  (%p6593_p8), %s5446_s29, 32, %s9234_s15, [#allocation6]  }
 0x758   : > { %s7847_s16 = smov [#allocation21]  }
 0x759   : > { %s5467_s4 = sshll.u32 %s7847_s16, 4  ;;  %s5468_s4 = int_to_ptr.vmem [resolvable:$true] %s5467_s4 }
 0x75a   : > { %s7739_s5 = scalar_lea.vmem %s5468_s4, 32  ;;  %p7746_p10 = scmp.lt.s32.totalorder %s5468_s4, %s5468_s4 }
 0x75b   : > { %p7740_p3 = scmp.ne.s32.totalorder %s5468_s4, %s7739_s5  ;;  %p7747_p11 = scmp.lt.s32.totalorder %s7739_s5, %s7739_s5 }
 0x75d   : > { %p7741_p12 = pnand %p7740_p3, %p6593_p8  ;;  %p7748_p6 = por %p7747_p11, %p7746_p10 }
 0x75f   : > { %p7742_p1 = pneg %p7741_p12 }
 0x761   : > { %p7749_p4 = pnand %p7748_p6, %p7742_p1 }
 0x763   : > { %7752 = shalt.err (!%p7749_p4)
}
 0x764   : > { %s9235_s12 = sld [smem:[#allocation34_spill]] }
 0x76a   : > { %s7753_s30 = scalar_lea.hbm %s9235_s12, 32 }
 0x76b   : > { %p7754_p13 = scmp.ne.s32.totalorder %s9235_s12, %s7753_s30  ;;  %p7759_p5 = scmp.lt.u32.totalorder %s7753_s30, %s9235_s12 }
 0x76d   : > { %p7755_p0 = pnand %p7754_p13, %p6593_p8 }
 0x76f   : > { %p7756_p2 = pneg %p7755_p0 }
 0x771   : > { %p7761_p7 = pnand %p7759_p5, %p7756_p2 }
 0x773   : > { %7764 = shalt.err (!%p7761_p7)
}
 0x774   : > { %6545 = dma.vmem_to_hbm [thread:$0]  (%p6593_p8), %s5468_s4, 32, %s9235_s12, [#allocation20]  }
 0x775   : > { %7802 = dma.done.wait (%p6593_p8), [#allocation6], 32  }
 0x776   : > { %7804 = vsyncadd (%p6593_p8), [#allocation6], 4294967264 }
 0x777   : > { %7806 = dma.done.wait (%p6593_p8), [#allocation20], 64  }
 0x778   : > { %7808 = vsyncadd (%p6593_p8), [#allocation20], 4294967232 }
 0x779 PF: > { %p30_p9 = scmp.ge.s32.totalorder %s8116_s18, 4   ;;  %s9236_s25 = smov %s7815_s26 }
 0x77a   : > { %s9237_s26 = smov %s7819_s27  ;;  %s9238_s27 = smov %s8127_s19 }
 0x77b   : > { %s9239_s28 = smov %s8116_s18  ;;  %32 = sbr.rel (!%p30_p9) target bundleno = 17 (0x11), region = 163 }
 0x782   :  { %5494 = vsyncpa [#allocation5], 1 }
 0x783   :  { %5496 = vsyncpa [#allocation5 + $0x1], 1 }
 0x784   :  { %5497 = vsyncpa [#allocation8], 1 }
 0x785   :  { %5498 = vsyncpa [#allocation11], 1 }
 0x786   :  { %5499 = vsyncpa [#allocation14], 1 }
 0x787   :  { %5500 = vsyncpa [#allocation17], 1 }
 0x788   :  { %5501 = vsyncpa [#allocation6], 1 }
 0x789   :  { %5503 = vsyncpa [#allocation6 + $0x1], 1 }
 0x78a   :  { %5504 = vsyncpa [#allocation20], 1 }

// kernel: pairwise_forward.3
= control target key start
LH: loop header
LB: loop body
LE: loop exit
PB: predicated region body
PF: predicated region fallthrough
CT: control target
= control target key end

     0   :  { %s14285_s0 = inlined_call_operand.vmem [shape: f32[2,16384], index: 0, kind: input, shape index: {}]   ;;  %s14286_s1 = inlined_call_operand.hbm [shape: bf16[16384,512], index: 1, kind: input, shape index: {}]   ;;  %s14287_s2 = inlined_call_operand.hbm [shape: f32[1,512], index: 2, kind: input, shape index: {}]   ;;  %s14288_s3 = inlined_call_operand.hbm [shape: f32[1,512], index: 3, kind: input, shape index: {}]   ;;  %s14289_s4 = inlined_call_operand.hbm [shape: f32[1,512], index: 4, kind: input, shape index: {}]   ;;  %s14290_s5 = inlined_call_operand.hbm [shape: bf16[512,256], index: 5, kind: input, shape index: {}]   ;;  %s14291_s6 = inlined_call_operand.hbm [shape: f32[1,256], index: 6, kind: input, shape index: {}]   ;;  %s14292_s7 = inlined_call_operand.hbm [shape: f32[1,256], index: 7, kind: input, shape index: {}]   ;;  %s14293_s8 = inlined_call_operand.hbm [shape: f32[1,256], index: 8, kind: input, shape index: {}]   ;;  %s14294_s9 = inlined_call_operand.vmem [shape: f32[256,2], index: 9, kind: input, shape index: {}]   ;;  %s14295_s10 = inlined_call_operand.hbm [shape: f32[1,2], index: 10, kind: input, shape index: {}]   ;;  %s14296_s11 = inlined_call_operand.hbm [shape: f32[2,2], index: 11, kind: output, shape index: {}]  }
   0x1   :  { %14301 = sst [smem:[#allocation25_spill]] %s14287_s2 }
   0x2   :  { %14302 = sst [smem:[#allocation26_spill]] %s14294_s9 }
   0x3   :  { %14303 = sst [smem:[#allocation27_spill]] %s14296_s11 }
   0x4   :  { %16 = vsyncpa [#allocation4], 0 }
   0x5   :  { %18 = vsyncpa [#allocation4 + $0x1], 0 }
   0x6   :  { %19 = vsyncpa [#allocation7], 0 }
   0x7   :  { %20 = vsyncpa [#allocation10], 0 }
   0x8   :  { %21 = vsyncpa [#allocation13], 0 }
   0x9   :  { %22 = vsyncpa [#allocation16], 0 }
   0xa   :  { %23 = vsyncpa [#allocation5], 0  ;;  %s12628_s17 = smov 0   ;;  %s12630_s18 = smov 0  }
   0xb   :  { %s12632_s19 = smov 0   ;;  %s12634_s20 = smov 0  }
   0xc LB: > { %s12552_s21 = smov [#allocation6]   ;;  %s12649_s23 = sadd.s32 4294967295, %s12550_s20   ;;  %s12550_s20 = sphi %s12634_s20, %s14327_s20   ;;  %s12546_s19 = sphi %s12632_s19, %s14326_s19   ;;  %s12542_s18 = sphi %s12630_s18, %s14325_s18   ;;  %s12538_s17 = sphi %s12628_s17, %s14324_s17  }
   0xd   : > { %s309_s22 = sshll.u32 %s12552_s21, 4  ;;  %p9129_p0 = scmp.ge.s32.totalorder %s12550_s20, 1  ;;  %s12655_s22 = int_to_ptr.vmem [resolvable:$true] %s309_s22 }
   0xe   : > { %p14299_p1 = scmp.eq.s32.totalorder %s12649_s23, 0  ;;  %p296_p2 = scmp.lt.s32.totalorder %s12550_s20, 5 }
   0xf   : > { %s12553_s25 = smov [#allocation9]   ;;  %s12554_s27 = smov [#allocation12]  }
  0x10   : > { %p12657_p4 = pnand %p9129_p0, %p296_p2  ;;  %s331_s26 = sshll.u32 %s12553_s25, 4  ;;  %s12663_s26 = int_to_ptr.vmem [resolvable:$true] %s331_s26 }
  0x11   : > { %s355_s28 = sshll.u32 %s12554_s27, 4  ;;  %s12555_s30 = smov [#allocation15]   ;;  %s12671_s28 = int_to_ptr.vmem [resolvable:$true] %s355_s28 }
  0x12   : > { %s14304_s24 = scalar_select %p12657_p4, 1, 0 }
  0x13   : > { %p10481_p5 = pneg %p12657_p4  ;;  %s12673_s12 = sshll.u32 %s12555_s30, 4  ;;  %s378_s12 = int_to_ptr.vmem [resolvable:$true] %s12673_s12 }
  0x14   : > { %s14306_s2 = sld [smem:[#allocation25_spill]] }
  0x15   : > { %p12667_p6 = pnand %p10481_p5, %p14299_p1 }
  0x17   : > { %p12683_p8 = pneg %p12667_p6 }
  0x1a   : > { %s12216_s15 = scalar_lea.hbm %s14306_s2, 64 }
  0x1b   : > { %p12217_p7 = scmp.ne.s32.totalorder %s14306_s2, %s12216_s15  ;;  %p12223_p11 = scmp.lt.u32.totalorder %s12216_s15, %s14306_s2 }
  0x1d   : > { %p12219_p9 = pnand %p12683_p8, %p12217_p7 }
  0x1f   : > { %p12220_p10 = pneg %p12219_p9 }
  0x21   : > { %p12225_p12 = pnand %p12223_p11, %p12220_p10 }
  0x23   : > { %12228 = shalt.err (!%p12225_p12)
}
  0x24   : > { %s12229_s13 = scalar_lea.vmem %s12655_s22, 64  ;;  %p12237_p5 = scmp.lt.s32.totalorder %s12655_s22, %s12655_s22 }
  0x25   : > { %p12230_p13 = scmp.ne.s32.totalorder %s12655_s22, %s12229_s13  ;;  %p12238_p3 = scmp.lt.s32.totalorder %s12229_s13, %s12229_s13 }
  0x27   : > { %p12232_p0 = pnand %p12230_p13, %p12683_p8  ;;  %p12239_p7 = por %p12238_p3, %p12237_p5 }
  0x29   : > { %p12233_p2 = pneg %p12232_p0 }
  0x2b   : > { %p12240_p9 = pnand %p12239_p7, %p12233_p2 }
  0x2d   : > { %12243 = shalt.err (!%p12240_p9)
}
  0x2e   : > { %10484 = dma.hbm_to_vmem [thread:$0]  (!%p12667_p6), %s14306_s2, 64, %s12655_s22, [#allocation7]  }
  0x2f   : > { %s12244_s27 = scalar_lea.hbm %s14289_s4, 64 }
  0x30   : > { %p12245_p10 = scmp.ne.s32.totalorder %s14289_s4, %s12244_s27  ;;  %p12251_p12 = scmp.lt.u32.totalorder %s12244_s27, %s14289_s4 }
  0x32   : > { %p12247_p3 = pnand %p12245_p10, %p12683_p8 }
  0x34   : > { %p12248_p11 = pneg %p12247_p3 }
  0x36   : > { %p12253_p13 = pnand %p12251_p12, %p12248_p11 }
  0x38   : > { %12256 = shalt.err (!%p12253_p13)
}
  0x39   : > { %s12257_s22 = scalar_lea.vmem %s12663_s26, 64  ;;  %p12265_p7 = scmp.lt.s32.totalorder %s12663_s26, %s12663_s26 }
  0x3a   : > { %p12258_p0 = scmp.ne.s32.totalorder %s12663_s26, %s12257_s22  ;;  %p12266_p9 = scmp.lt.s32.totalorder %s12257_s22, %s12257_s22 }
  0x3c   : > { %p12260_p2 = pnand %p12258_p0, %p12683_p8  ;;  %p12267_p10 = por %p12266_p9, %p12265_p7 }
  0x3e   : > { %p12261_p5 = pneg %p12260_p2 }
  0x40   : > { %p12268_p3 = pnand %p12267_p10, %p12261_p5 }
  0x42   : > { %12271 = shalt.err (!%p12268_p3)
}
  0x43   : > { %10490 = dma.hbm_to_vmem [thread:$0]  (!%p12667_p6), %s14289_s4, 64, %s12663_s26, [#allocation10]  }
  0x44   : > { %s12272_s16 = scalar_lea.hbm %s14291_s6, 32 }
  0x45   : > { %p12273_p11 = scmp.ne.s32.totalorder %s14291_s6, %s12272_s16  ;;  %p12279_p0 = scmp.lt.u32.totalorder %s12272_s16, %s14291_s6 }
  0x47   : > { %p12275_p12 = pnand %p12273_p11, %p12683_p8 }
  0x49   : > { %p12276_p13 = pneg %p12275_p12 }
  0x4b   : > { %p12281_p2 = pnand %p12279_p0, %p12276_p13 }
  0x4d   : > { %12284 = shalt.err (!%p12281_p2)
}
  0x4e   : > { %s12285_s26 = scalar_lea.vmem %s12671_s28, 32  ;;  %p12293_p10 = scmp.lt.s32.totalorder %s12671_s28, %s12671_s28 }
  0x4f   : > { %p12286_p5 = scmp.ne.s32.totalorder %s12671_s28, %s12285_s26  ;;  %p12294_p3 = scmp.lt.s32.totalorder %s12285_s26, %s12285_s26 }
  0x51   : > { %p12288_p7 = pnand %p12286_p5, %p12683_p8  ;;  %p12295_p11 = por %p12294_p3, %p12293_p10 }
  0x53   : > { %p12289_p9 = pneg %p12288_p7 }
  0x55   : > { %p12296_p12 = pnand %p12295_p11, %p12289_p9 }
  0x57   : > { %12299 = shalt.err (!%p12296_p12)
}
  0x58   : > { %10496 = dma.hbm_to_vmem [thread:$0]  (!%p12667_p6), %s14291_s6, 32, %s12671_s28, [#allocation13]  }
  0x59   : > { %s12556_s11 = smov [#allocation8]   ;;  %s12300_s21 = scalar_lea.hbm %s14293_s8, 32 }
  0x5a   : > { %s320_s14 = sshll.u32 %s12556_s11, 4  ;;  %p12301_p13 = scmp.ne.s32.totalorder %s14293_s8, %s12300_s21  ;;  %s321_s14 = int_to_ptr.vmem [resolvable:$true] %s320_s14 }
  0x5b   : > { %p12307_p5 = scmp.lt.u32.totalorder %s12300_s21, %s14293_s8 }
  0x5c   : > { %p12303_p0 = pnand %p12301_p13, %p12683_p8 }
  0x5e   : > { %p12304_p2 = pneg %p12303_p0 }
  0x60   : > { %p12309_p7 = pnand %p12307_p5, %p12304_p2 }
  0x62   : > { %12312 = shalt.err (!%p12309_p7)
}
  0x63   : > { %s12313_s28 = scalar_lea.vmem %s378_s12, 32  ;;  %p12321_p11 = scmp.lt.s32.totalorder %s378_s12, %s378_s12 }
  0x64   : > { %p12314_p9 = scmp.ne.s32.totalorder %s378_s12, %s12313_s28  ;;  %p12322_p12 = scmp.lt.s32.totalorder %s12313_s28, %s12313_s28 }
  0x66   : > { %p12316_p10 = pnand %p12314_p9, %p12683_p8  ;;  %p12323_p1 = por %p12322_p12, %p12321_p11 }
  0x68   : > { %p12317_p3 = pneg %p12316_p10 }
  0x6a   : > { %p12324_p4 = pnand %p12323_p1, %p12317_p3 }
  0x6c   : > { %12327 = shalt.err (!%p12324_p4)
}
  0x6d   : > { %10502 = dma.hbm_to_vmem [thread:$0]  (!%p12667_p6), %s14293_s8, 32, %s378_s12, [#allocation16]  }
  0x6e   : > { %s12328_s16 = scalar_lea.hbm %s14288_s3, 64 }
  0x6f   : > { %p12329_p13 = scmp.ne.s32.totalorder %s14288_s3, %s12328_s16  ;;  %p12335_p4 = scmp.lt.u32.totalorder %s12328_s16, %s14288_s3 }
  0x71   : > { %p12331_p0 = pnand %p12329_p13, %p12683_p8 }
  0x73   : > { %p12332_p1 = pneg %p12331_p0 }
  0x75   : > { %p12337_p2 = pnand %p12335_p4, %p12332_p1 }
  0x77   : > { %12340 = shalt.err (!%p12337_p2)
}
  0x78   : > { %s12341_s26 = scalar_lea.vmem %s321_s14, 64  ;;  %p12349_p10 = scmp.lt.s32.totalorder %s321_s14, %s321_s14 }
  0x79   : > { %p12342_p5 = scmp.ne.s32.totalorder %s321_s14, %s12341_s26  ;;  %p12350_p3 = scmp.lt.s32.totalorder %s12341_s26, %s12341_s26 }
  0x7b   : > { %p12344_p7 = pnand %p12342_p5, %p12683_p8  ;;  %p12351_p11 = por %p12350_p3, %p12349_p10 }
  0x7d   : > { %p12345_p9 = pneg %p12344_p7 }
  0x7f   : > { %p12352_p12 = pnand %p12351_p11, %p12345_p9 }
  0x81   : > { %12355 = shalt.err (!%p12352_p12)
}
  0x82   : > { %10487 = dma.hbm_to_vmem [thread:$0]  (!%p12667_p6), %s14288_s3, 64, %s321_s14, [#allocation7]  }
  0x83   : > { %s12557_s22 = smov [#allocation11]   ;;  %s12356_s16 = scalar_lea.hbm %s14290_s5, 8192 }
  0x84   : > { %s341_s9 = sshll.u32 %s12557_s22, 4  ;;  %p12357_p13 = scmp.ne.s32.totalorder %s14290_s5, %s12356_s16  ;;  %s342_s9 = int_to_ptr.vmem [resolvable:$true] %s341_s9 }
  0x85   : > { %p12363_p4 = scmp.lt.u32.totalorder %s12356_s16, %s14290_s5 }
  0x86   : > { %p12359_p0 = pnand %p12357_p13, %p12683_p8 }
  0x88   : > { %p12360_p1 = pneg %p12359_p0 }
  0x8a   : > { %p12365_p2 = pnand %p12363_p4, %p12360_p1 }
  0x8c   : > { %12368 = shalt.err (!%p12365_p2)
}
  0x8d   : > { %s12369_s14 = scalar_lea.vmem %s342_s9, 8192  ;;  %p12377_p10 = scmp.lt.s32.totalorder %s342_s9, %s342_s9 }
  0x8e   : > { %p12370_p5 = scmp.ne.s32.totalorder %s342_s9, %s12369_s14  ;;  %p12378_p3 = scmp.lt.s32.totalorder %s12369_s14, %s12369_s14 }
  0x90   : > { %p12372_p7 = pnand %p12370_p5, %p12683_p8  ;;  %p12379_p11 = por %p12378_p3, %p12377_p10 }
  0x92   : > { %p12373_p9 = pneg %p12372_p7 }
  0x94   : > { %p12380_p12 = pnand %p12379_p11, %p12373_p9 }
  0x96   : > { %12383 = shalt.err (!%p12380_p12)
}
  0x97   : > { %s12558_s26 = smov 128   ;;  %s12559_s12 = smov 8  }
  0x98   : > { %10493 = dma.hbm_to_vmem [thread:$0]  (!%p12667_p6), %s14290_s5, 8192, %s342_s9, [#allocation10], %s12558_s26, %s12558_s26, %s12559_s12  }
  0x99   : > { %s12560_s11 = smov [#allocation14]   ;;  %s12561_s16 = smov [#allocation17]  }
  0x9a   : > { %s366_s15 = sshll.u32 %s12560_s11, 4  ;;  %s391_s21 = sshll.u32 %s12561_s16, 4  ;;  %s367_s15 = int_to_ptr.vmem [resolvable:$true] %s366_s15  ;;  %s12805_s21 = int_to_ptr.vmem [resolvable:$true] %s391_s21 }
  0x9b   : > { %s12384_s13 = scalar_lea.hbm %s14292_s7, 32 }
  0x9c   : > { %p12385_p13 = scmp.ne.s32.totalorder %s14292_s7, %s12384_s13  ;;  %p12391_p4 = scmp.lt.u32.totalorder %s12384_s13, %s14292_s7 }
  0x9e   : > { %p12387_p0 = pnand %p12385_p13, %p12683_p8 }
  0xa0   : > { %p12388_p1 = pneg %p12387_p0 }
  0xa2   : > { %p12393_p2 = pnand %p12391_p4, %p12388_p1 }
  0xa4   : > { %12396 = shalt.err (!%p12393_p2)
}
  0xa5   : > { %s12397_s26 = scalar_lea.vmem %s367_s15, 32  ;;  %p12405_p10 = scmp.lt.s32.totalorder %s367_s15, %s367_s15 }
  0xa6   : > { %p12398_p5 = scmp.ne.s32.totalorder %s367_s15, %s12397_s26  ;;  %p12406_p3 = scmp.lt.s32.totalorder %s12397_s26, %s12397_s26 }
  0xa8   : > { %p12400_p7 = pnand %p12398_p5, %p12683_p8  ;;  %p12407_p11 = por %p12406_p3, %p12405_p10 }
  0xaa   : > { %p12401_p9 = pneg %p12400_p7 }
  0xac   : > { %p12408_p12 = pnand %p12407_p11, %p12401_p9 }
  0xae   : > { %12411 = shalt.err (!%p12408_p12)
}
  0xaf   : > { %10499 = dma.hbm_to_vmem [thread:$0]  (!%p12667_p6), %s14292_s7, 32, %s367_s15, [#allocation13]  }
  0xb0   : > { %s12412_s16 = scalar_lea.hbm %s14295_s10, 16 }
  0xb1   : > { %p12413_p13 = scmp.ne.s32.totalorder %s14295_s10, %s12412_s16  ;;  %p12419_p4 = scmp.lt.u32.totalorder %s12412_s16, %s14295_s10 }
  0xb3   : > { %p12415_p0 = pnand %p12413_p13, %p12683_p8 }
  0xb5   : > { %p12416_p1 = pneg %p12415_p0 }
  0xb7   : > { %p12421_p2 = pnand %p12419_p4, %p12416_p1 }
  0xb9   : > { %12424 = shalt.err (!%p12421_p2)
}
  0xba   : > { %s12425_s15 = scalar_lea.vmem %s12805_s21, 16  ;;  %s12432_s28 = scalar_lea.vmem %s12805_s21, 32 }
  0xbb   : > { %p12426_p5 = scmp.ne.s32.totalorder %s12805_s21, %s12425_s15  ;;  %p12433_p10 = scmp.lt.s32.totalorder %s12805_s21, %s12805_s21 }
  0xbc   : > { %p12434_p3 = scmp.lt.s32.totalorder %s12432_s28, %s12425_s15 }
  0xbd   : > { %p12428_p7 = pnand %p12426_p5, %p12683_p8 }
  0xbe   : > { %p12435_p11 = por %p12434_p3, %p12433_p10 }
  0xbf   : > { %p12429_p9 = pneg %p12428_p7 }
  0xc1   : > { %p12436_p12 = pnand %p12435_p11, %p12429_p9 }
  0xc3   : > { %12439 = shalt.err (!%p12436_p12)
}
  0xc4   : > { %10505 = dma.hbm_to_vmem [thread:$0]  (!%p12667_p6), %s14295_s10, 16, %s12805_s21, [#allocation16]  }
  0xc5   : > { %s12850_s25 = sadd.s32 1, %s12550_s20   ;;  %s62_s29 = sadd.s32 1, %s12546_s19 }
  0xc6   : > { %s59_s2 = ssub.s32 %s12550_s20, %s12850_s25  ;;  %p69_p8 = scmp.ne.s32.totalorder %s12546_s19, %s12542_s18 }
  0xc7   : > { %p60_p13 = scmp.eq.s32.totalorder %s59_s2, 0  ;;  %p70_p0 = scmp.eq.s32.totalorder %s12550_s20, 0 }
  0xc8   : > { %p75_p1 = scmp.ne.s32.totalorder %s12542_s18, %s12538_s17  ;;  %p10518_p4 = scmp.lt.s32.totalorder %s12550_s20, 4 }
  0xc9   : > { %s12862_s12 = scalar_select %p60_p13, %s12546_s19, %s62_s29  }
  0xca   : > { %p71_p2 = por %p70_p0, %p69_p8  ;;  %p14308_p5 = scmp.eq.s32.totalorder %s12649_s23, 0 }
  0xcb   : > { %s411_s11 = sand.u32 1, %s12546_s19   ;;  %s10251_s21 = sshll.u32 %s12550_s20, 17 }
  0xcc   : > { %p12866_p7 = por %p14308_p5, %p75_p1  ;;  %s9139_s16 = sshll.u32 %s411_s11, 13 }
  0xcd   : > { %s12875_s13 = scalar_lea.hbm %s14286_s1, %s10251_s21  ;;  %s415_s17 = scalar_lea.vmem [#allocation3], %s9139_s16 }
  0xce   : > { %s423_s14 = sshll.u32 %s415_s17, 4  ;;  %p12877_p6 = pnand %p10518_p4, %p71_p2  ;;  %s12881_s14 = int_to_ptr.vmem [resolvable:$true] %s423_s14 }
  0xcf   : > { %s12883_s20 = scalar_lea.sflag [#allocation4], %s411_s11  ;;  %s12440_s28 = scalar_lea.hbm %s12875_s13, 131072 }
  0xd0   : > { %p12441_p9 = scmp.ne.s32.totalorder %s12875_s13, %s12440_s28  ;;  %p12442_p10 = pneg %p12877_p6 }
  0xd1   : > { %s12445_s29 = scalar_lea.hbm %s14286_s1, 524288  ;;  %p12446_p12 = scmp.lt.u32.totalorder %s12875_s13, %s14286_s1 }
  0xd2   : > { %p12443_p3 = pnand %p12442_p10, %p12441_p9  ;;  %p12447_p8 = scmp.lt.u32.totalorder %s12445_s29, %s12440_s28 }
  0xd3   : > { %p12449_p0 = scmp.lt.u32.totalorder %s12440_s28, %s12875_s13 }
  0xd4   : > { %p12444_p11 = pneg %p12443_p3  ;;  %p12448_p13 = por %p12447_p8, %p12446_p12 }
  0xd6   : > { %p12450_p1 = por %p12449_p0, %p12448_p13 }
  0xd8   : > { %p12451_p4 = pnand %p12450_p1, %p12444_p11 }
  0xda   : > { %12454 = shalt.err (!%p12451_p4)
}
  0xdb   : > { %s12455_s11 = scalar_lea.vmem %s12881_s14, 131072  ;;  %s12562_s16 = smov [#allocation3]  }
  0xdc   : > { %p12456_p2 = scmp.ne.s32.totalorder %s12881_s14, %s12455_s11  ;;  %s12460_s27 = sshll.u32 %s12562_s16, 4  ;;  %s12461_s27 = int_to_ptr.vmem [resolvable:$false] %s12460_s27 }
  0xdd   : > { %s12462_s30 = scalar_lea.vmem %s12461_s27, 262144  ;;  %p12463_p3 = scmp.lt.s32.totalorder %s12881_s14, %s12461_s27 }
  0xde   : > { %p12458_p5 = pnand %p12456_p2, %p12442_p10  ;;  %p12464_p12 = scmp.lt.s32.totalorder %s12462_s30, %s12455_s11 }
  0xe0   : > { %p12459_p9 = pneg %p12458_p5  ;;  %p12465_p8 = por %p12464_p12, %p12463_p3 }
  0xe2   : > { %p12466_p13 = pnand %p12465_p8, %p12459_p9 }
  0xe4   : > { %12469 = shalt.err (!%p12466_p13)
}
  0xe5   : > { %s12563_s17 = smov 256   ;;  %s12564_s28 = smov 16  }
  0xe6   : > { %10509 = dma.hbm_to_vmem [thread:$0]  (!%p12877_p6), %s12875_s13, 131072, %s12881_s14, %s12883_s20, %s12563_s17, %s12563_s17, %s12564_s28  }
  0xe7   : > { %p14311_p10 = scmp.ne.s32.totalorder %s14304_s24, 0 }
  0xe8   : > { %s437_s9 = sand.u32 (!%p14311_p10), 1, %s12542_s18  }
  0xe9   : > { %435 = sbr.rel (%p14311_p10) target bundleno = 2005 (0x7d5), region = 64  ;;  %s9144_s26 = sshll.u32 (!%p14311_p10), %s437_s9, 13 }
  0xea   : > { %s438_s29 = scalar_lea.sflag (!%p14311_p10), [#allocation4], %s437_s9  ;;  %s12914_s2 = scalar_lea.vmem (!%p14311_p10), [#allocation3], %s9144_s26 }
  0xf0   : > { %12513 = dma.done.wait (%p12866_p7), %s438_s29, 131072  }
  0xf1   : > { %12515 = vsyncadd (%p12866_p7), %s438_s29, 4294836224  ;;  %p14312_p11 = scmp.eq.s32.totalorder %s12649_s23, 0 }
  0xf3   : > { %12517 = dma.done.wait (%p14312_p11), [#allocation7], 128   ;;  %p14313_p6 = pmov %p14312_p11 }
  0xf5   : > { %12519 = vsyncadd (%p14313_p6), [#allocation7], 4294967168  ;;  %p14314_p0 = pmov %p14313_p6 }
  0xf7   : > { %12521 = dma.done.wait (%p14314_p0), [#allocation10], 8256   ;;  %p14315_p1 = pmov %p14314_p0 }
  0xf8   : > { %p14316_p4 = pmov %p14314_p0 }
  0xf9   : > { %12523 = vsyncadd (%p14315_p1), [#allocation10], 4294959040 }
  0xfa   : > { %12525 = dma.done.wait (%p14316_p4), [#allocation13], 64   ;;  %p14317_p2 = pmov %p14314_p0 }
  0xfb   : > { %p14318_p7 = pmov %p14314_p0 }
  0xfc   : > { %12527 = vsyncadd (%p14317_p2), [#allocation13], 4294967232 }
  0xfd   : > { %12529 = dma.done.wait (%p14318_p7), [#allocation16], 48   ;;  %p14319_p5 = pmov %p14314_p0 }
  0xfe   : > { %s9153_s24 = sshll.u32 %s12649_s23, 5  ;;  %p14320_p3 = scmp.ne.s32.totalorder %s12649_s23, 0 }
  0xff   : > { %12531 = vsyncadd (%p14319_p5), [#allocation16], 4294967248  ;;  %p513_p9 = scmp.lt.s32.totalorder %s9153_s24, 127  ;;  %v12565_v0 = vmov (!%p14320_p3), 0.0  }
 0x100   : > { %522 = sbr.rel (%p14320_p3) target bundleno = 263 (0x107), region = 104  ;;  %523 = vst [vmem:[#allocation2] sm:$0xff] (!%p14320_p3), %v12565_v0 }
 0x101   : > { %s14329_s24 = smov (!%p513_p9, %s9153_s24), 127 }
 0x102   : > { %s9154_s22 = sshll.u32 %s14329_s24, 1 }
 0x103   : > { %s12940_s15 = scalar_lea.vmem %s14285_s0, %s9154_s22 }
 0x107 PF: > { %v10576_v1 = vld [vmem:[%s12914_s2 + $0x4] ss:$16 sps:$4 sm:$0xff]   ;;  %v10578_v2 = vld [vmem:[%s12914_s2 + $0xc] ss:$16 sps:$4 sm:$0xff]   ;;  %v10580_v3 = vld [vmem:[%s12914_s2] ss:$16 sps:$4 sm:$0xff]   ;;  %v545_v39 = vlaneseq }
 0x108   : > { %6885 = vmatprep.subr.bf16.mxu0 %v10576_v1  ;;  %v10581_v4 = vld [vmem:[%s12914_s2 + $0x8] ss:$16 sps:$4 sm:$0xff]   ;;  %7541 = vmatprep.subr.bf16.mxu1 %v10578_v2  ;;  %v10582_v5 = vld [vmem:[%s12914_s2 + $0x24] ss:$16 sps:$4 sm:$0xff]   ;;  %v10584_v6 = vld [vmem:[%s12914_s2 + $0x2c] ss:$16 sps:$4 sm:$0xff]  }
 0x109   : > { %6886 = vmatpush1.bf16.msra.mxu0 %v10580_v3  ;;  %7542 = vmatpush1.bf16.msra.mxu1 %v10581_v4  ;;  %v10586_v7 = vld [vmem:[%s12914_s2 + $0x20] ss:$16 sps:$4 sm:$0xff]   ;;  %v10587_v8 = vld [vmem:[%s12914_s2 + $0x28] ss:$16 sps:$4 sm:$0xff]   ;;  %v10588_v9 = vld [vmem:[%s12914_s2 + $0x44] ss:$16 sps:$4 sm:$0xff]  }
 0x10a   : > { %6887 = vmatprep.subr.bf16.mxu0 %v10582_v5  ;;  %7543 = vmatprep.subr.bf16.mxu1 %v10584_v6  ;;  %v10590_v10 = vld [vmem:[%s12914_s2 + $0x4c] ss:$16 sps:$4 sm:$0xff]   ;;  %v10592_v11 = vld [vmem:[%s12914_s2 + $0x40] ss:$16 sps:$4 sm:$0xff]   ;;  %v10593_v12 = vld [vmem:[%s12914_s2 + $0x48] ss:$16 sps:$4 sm:$0xff]  }
 0x10b   : > { %v10594_v13 = vld [vmem:[%s12914_s2 + $0x64] ss:$16 sps:$4 sm:$0xff]   ;;  %v10596_v14 = vld [vmem:[%s12914_s2 + $0x6c] ss:$16 sps:$4 sm:$0xff]   ;;  %v10598_v15 = vld [vmem:[%s12914_s2 + $0x60] ss:$16 sps:$4 sm:$0xff]  }
 0x10c   : > { %v10599_v16 = vld [vmem:[%s12914_s2 + $0x68] ss:$16 sps:$4 sm:$0xff]   ;;  %v10600_v17 = vld [vmem:[%s12914_s2 + $0x84] ss:$16 sps:$4 sm:$0xff]   ;;  %v10602_v18 = vld [vmem:[%s12914_s2 + $0x8c] ss:$16 sps:$4 sm:$0xff]  }
 0x10d   : > { %6888 = vmatpush1.bf16.msra.mxu0 %v10586_v7  ;;  %7544 = vmatpush1.bf16.msra.mxu1 %v10587_v8  ;;  %v10604_v19 = vld [vmem:[%s12914_s2 + $0x80] ss:$16 sps:$4 sm:$0xff]   ;;  %v10605_v20 = vld [vmem:[%s12914_s2 + $0x88] ss:$16 sps:$4 sm:$0xff]   ;;  %v10606_v21 = vld [vmem:[%s12914_s2 + $0xa4] ss:$16 sps:$4 sm:$0xff]  }
 0x10e   : > { %6889 = vmatprep.subr.bf16.mxu0 %v10588_v9  ;;  %7545 = vmatprep.subr.bf16.mxu1 %v10590_v10  ;;  %v10608_v22 = vld [vmem:[%s12914_s2 + $0xac] ss:$16 sps:$4 sm:$0xff]   ;;  %v10610_v23 = vld [vmem:[%s12914_s2 + $0xa0] ss:$16 sps:$4 sm:$0xff]   ;;  %v10611_v24 = vld [vmem:[%s12914_s2 + $0xa8] ss:$16 sps:$4 sm:$0xff]  }
 0x10f   : > { %v10612_v25 = vld [vmem:[%s12914_s2 + $0xc4] ss:$16 sps:$4 sm:$0xff]   ;;  %v10614_v26 = vld [vmem:[%s12914_s2 + $0xcc] ss:$16 sps:$4 sm:$0xff]   ;;  %v10616_v27 = vld [vmem:[%s12914_s2 + $0xc0] ss:$16 sps:$4 sm:$0xff]  }
 0x110   : > { %v10617_v28 = vld [vmem:[%s12914_s2 + $0xc8] ss:$16 sps:$4 sm:$0xff]   ;;  %v10618_v29 = vld [vmem:[%s12914_s2 + $0xe4] ss:$16 sps:$4 sm:$0xff]   ;;  %v10620_v30 = vld [vmem:[%s12914_s2 + $0xec] ss:$16 sps:$4 sm:$0xff]  }
 0x111   : > { %6890 = vmatpush1.bf16.msra.mxu0 %v10592_v11  ;;  %7546 = vmatpush1.bf16.msra.mxu1 %v10593_v12  ;;  %v10622_v31 = vld [vmem:[%s12914_s2 + $0xe0] ss:$16 sps:$4 sm:$0xff]   ;;  %v10623_v32 = vld [vmem:[%s12914_s2 + $0xe8] ss:$16 sps:$4 sm:$0xff]   ;;  %v10624_v33 = vld [vmem:[%s12914_s2 + $0x104] ss:$16 sps:$4 sm:$0xff]  }
 0x112   : > { %6891 = vmatprep.subr.bf16.mxu0 %v10594_v13  ;;  %7547 = vmatprep.subr.bf16.mxu1 %v10596_v14  ;;  %v10626_v34 = vld [vmem:[%s12914_s2 + $0x10c] ss:$16 sps:$4 sm:$0xff]   ;;  %v10628_v35 = vld [vmem:[%s12914_s2 + $0x100] ss:$16 sps:$4 sm:$0xff]   ;;  %v10629_v36 = vld [vmem:[%s12914_s2 + $0x108] ss:$16 sps:$4 sm:$0xff]  }
 0x113   : > { %v12566_v37 = vmov 1983009808   ;;  %v10630_v40 = vld [vmem:[%s12914_s2 + $0x124] ss:$16 sps:$4 sm:$0xff]   ;;  %v10632_v41 = vld [vmem:[%s12914_s2 + $0x12c] ss:$16 sps:$4 sm:$0xff]  }
 0x114   : > { %v543_v38 = vunpack.c.l.s4 %v12566_v37  ;;  %v10634_v42 = vld [vmem:[%s12914_s2 + $0x120] ss:$16 sps:$4 sm:$0xff]   ;;  %v12983_v44 = vshrl.u32 %v545_v39, 7  ;;  %v10635_v45 = vld [vmem:[%s12914_s2 + $0x128] ss:$16 sps:$4 sm:$0xff]   ;;  %p10180_p12 = scmp.ne.s32.totalorder %s12649_s23, 3 }
 0x115   : > { %6892 = vmatpush1.bf16.msra.mxu0 %v10598_v15  ;;  %7548 = vmatpush1.bf16.msra.mxu1 %v10599_v16  ;;  %v10636_v46 = vld [vmem:[%s12914_s2 + $0x144] ss:$16 sps:$4 sm:$0xff]   ;;  %v10638_v47 = vld [vmem:[%s12914_s2 + $0x14c] ss:$16 sps:$4 sm:$0xff]   ;;  %v10640_v48 = vld [vmem:[%s12914_s2 + $0x140] ss:$16 sps:$4 sm:$0xff]  }
 0x116   : > { %6893 = vmatprep.subr.bf16.mxu0 %v10600_v17  ;;  %7549 = vmatprep.subr.bf16.mxu1 %v10602_v18  ;;  %v544_v43 = vunpack.c.0.s8 %v543_v38  ;;  %v10641_v49 = vld [vmem:[%s12914_s2 + $0x148] ss:$16 sps:$4 sm:$0xff]   ;;  %v10642_v51 = vld [vmem:[%s12914_s2 + $0x164] ss:$16 sps:$4 sm:$0xff]   ;;  %v10644_v52 = vld [vmem:[%s12914_s2 + $0x16c] ss:$16 sps:$4 sm:$0xff]  }
 0x117   : > { %v525_v53 = vld [vmem:[%s12940_s15] sm:$0xff]  ;;  %v10646_v54 = vld [vmem:[%s12914_s2 + $0x160] ss:$16 sps:$4 sm:$0xff]   ;;  %v10648_v57 = vld [vmem:[%s12914_s2 + $0x184] ss:$16 sps:$4 sm:$0xff]   ;;  %s14321_s11 = sld [smem:[#allocation26_spill]] (!%p10180_p12) }
 0x118   : > { %v12991_v50 = vsub.s32 %v544_v43, %v12983_v44  ;;  %v10647_v56 = vld [vmem:[%s12914_s2 + $0x168] ss:$16 sps:$4 sm:$0xff]   ;;  %v10650_v58 = vld [vmem:[%s12914_s2 + $0x18c] ss:$16 sps:$4 sm:$0xff]   ;;  %v10652_v60 = vld [vmem:[%s12914_s2 + $0x180] ss:$16 sps:$4 sm:$0xff]   ;;  %v541_v5 = vcombine.high %v525_v53, %v525_v53 }
 0x119   : > { %6894 = vmatpush1.bf16.msra.mxu0 %v10604_v19  ;;  %7550 = vmatpush1.bf16.msra.mxu1 %v10605_v20  ;;  %v10653_v62 = vld [vmem:[%s12914_s2 + $0x188] ss:$16 sps:$4 sm:$0xff]   ;;  %v10654_v63 = vld [vmem:[%s12914_s2 + $0x1a4] ss:$16 sps:$4 sm:$0xff]   ;;  %v10656_v0 = vld [vmem:[%s12914_s2 + $0x1ac] ss:$16 sps:$4 sm:$0xff]  }
 0x11a   : > { %6895 = vmatprep.subr.bf16.mxu0 %v10606_v21  ;;  %7551 = vmatprep.subr.bf16.mxu1 %v10608_v22  ;;  %v548_v55 = vrot.slane %v525_v53, %v12991_v50  ;;  %v10658_v1 = vld [vmem:[%s12914_s2 + $0x1a0] ss:$16 sps:$4 sm:$0xff]   ;;  %v10659_v2 = vld [vmem:[%s12914_s2 + $0x1a8] ss:$16 sps:$4 sm:$0xff]   ;;  %v10660_v3 = vld [vmem:[%s12914_s2 + $0x1c4] ss:$16 sps:$4 sm:$0xff]   ;;  %v13014_v10 = vrot.slane %v541_v5, %v12991_v50 }
 0x11b   : > { %v10662_v4 = vld [vmem:[%s12914_s2 + $0x1cc] ss:$16 sps:$4 sm:$0xff]   ;;  %v10664_v6 = vld [vmem:[%s12914_s2 + $0x1c0] ss:$16 sps:$4 sm:$0xff]   ;;  %v10665_v7 = vld [vmem:[%s12914_s2 + $0x1c8] ss:$16 sps:$4 sm:$0xff]  }
 0x11c   : > { %v556_v59 = vcombine.high %v548_v55, %v548_v55  ;;  %v10666_v8 = vld [vmem:[%s12914_s2 + $0x1e4] ss:$16 sps:$4 sm:$0xff]   ;;  %v10668_v9 = vld [vmem:[%s12914_s2 + $0x1ec] ss:$16 sps:$4 sm:$0xff]   ;;  %v10670_v11 = vld [vmem:[%s12914_s2 + $0x1e0] ss:$16 sps:$4 sm:$0xff]   ;;  %v557_v15 = vcombine.high %v13014_v10, %v13014_v10  ;;  %v709_v17 = vpack.c.bf16 %v548_v55, %v548_v55 }
 0x11d   : > { %6896 = vmatpush1.bf16.msra.mxu0 %v10610_v23  ;;  %7552 = vmatpush1.bf16.msra.mxu1 %v10611_v24  ;;  %v10671_v12 = vld [vmem:[%s12914_s2 + $0x1e8] ss:$16 sps:$4 sm:$0xff]   ;;  %v10675_v13 = vld [vmem:[%s12914_s2 + $0x204] ss:$16 sps:$4 sm:$0xff]   ;;  %v10678_v14 = vld [vmem:[%s12914_s2 + $0x20c] ss:$16 sps:$4 sm:$0xff]  }
 0x11e   : > { %6897 = vmatprep.subr.bf16.mxu0 %v10612_v25  ;;  %7553 = vmatprep.subr.bf16.mxu1 %v10614_v26  ;;  %v710_v61 = vpack.c.bf16 %v556_v59, %v556_v59  ;;  %v10673_v16 = vld [vmem:[%s12914_s2 + $0x200] ss:$16 sps:$4 sm:$0xff]   ;;  %v10676_v18 = vld [vmem:[%s12914_s2 + $0x208] ss:$16 sps:$4 sm:$0xff]   ;;  %v10681_v19 = vld [vmem:[%s12914_s2 + $0x224] ss:$16 sps:$4 sm:$0xff]   ;;  %v712_v21 = vpack.c.bf16 %v557_v15, %v557_v15 }
 0x11f   : > { %v10684_v20 = vld [vmem:[%s12914_s2 + $0x22c] ss:$16 sps:$4 sm:$0xff]   ;;  %v10679_v22 = vld [vmem:[%s12914_s2 + $0x220] ss:$16 sps:$4 sm:$0xff]   ;;  %v10682_v23 = vld [vmem:[%s12914_s2 + $0x228] ss:$16 sps:$4 sm:$0xff]  }
 0x120   : > { %6917 = vmatprep.mubr.bf16.mxu0 %v710_v61  ;;  %7573 = vmatprep.mubr.bf16.mxu1 %v710_v61  ;;  %v10687_v24 = vld [vmem:[%s12914_s2 + $0x244] ss:$16 sps:$4 sm:$0xff]   ;;  %v10690_v25 = vld [vmem:[%s12914_s2 + $0x24c] ss:$16 sps:$4 sm:$0xff]   ;;  %v10685_v26 = vld [vmem:[%s12914_s2 + $0x240] ss:$16 sps:$4 sm:$0xff]  }
 0x121   : > { %6898 = vmatpush1.bf16.msra.mxu0 %v10616_v27  ;;  %7554 = vmatpush1.bf16.msra.mxu1 %v10617_v28  ;;  %v10688_v27 = vld [vmem:[%s12914_s2 + $0x248] ss:$16 sps:$4 sm:$0xff]   ;;  %v10693_v28 = vld [vmem:[%s12914_s2 + $0x264] ss:$16 sps:$4 sm:$0xff]   ;;  %v10708_v37 = vld [vmem:[%s12914_s2 + $0x2ac] ss:$16 sps:$4 sm:$0xff]  }
 0x122   : > { %6899 = vmatprep.subr.bf16.mxu0 %v10618_v29  ;;  %7555 = vmatprep.subr.bf16.mxu1 %v10620_v30  ;;  %v10696_v29 = vld [vmem:[%s12914_s2 + $0x26c] ss:$16 sps:$4 sm:$0xff]   ;;  %v10691_v30 = vld [vmem:[%s12914_s2 + $0x260] ss:$16 sps:$4 sm:$0xff]   ;;  %v10706_v39 = vld [vmem:[%s12914_s2 + $0x2a8] ss:$16 sps:$4 sm:$0xff]  }
 0x123   : > { %v10703_v38 = vld [vmem:[%s12914_s2 + $0x2a0] ss:$16 sps:$4 sm:$0xff]   ;;  %v10712_v43 = vld [vmem:[%s12914_s2 + $0x2c8] ss:$16 sps:$4 sm:$0xff]   ;;  %v10732_v55 = vld [vmem:[%s12914_s2 + $0x32c] ss:$16 sps:$4 sm:$0xff]  }
 0x124   : > { %v10724_v53 = vld [vmem:[%s12914_s2 + $0x308] ss:$16 sps:$4 sm:$0xff]   ;;  %v10738_v59 = vld [vmem:[%s12914_s2 + $0x34c] ss:$16 sps:$4 sm:$0xff]   ;;  %v10765_v15 = vld [vmem:[%s12914_s2 + $0x3e4] ss:$16 sps:$4 sm:$0xff]  }
 0x125   : > { %6900 = vmatpush1.bf16.msra.mxu0 %v10622_v31  ;;  %7556 = vmatpush1.bf16.msra.mxu1 %v10623_v32  ;;  %v10694_v31 = vld [vmem:[%s12914_s2 + $0x268] ss:$16 sps:$4 sm:$0xff]   ;;  %v10699_v32 = vld [vmem:[%s12914_s2 + $0x284] ss:$16 sps:$4 sm:$0xff]   ;;  %vm8981_vm0 = vcmask (!%p10180_p12), 9216  }
 0x126   : > { %6901 = vmatprep.subr.bf16.mxu0 %v10624_v33  ;;  %7557 = vmatprep.subr.bf16.mxu1 %v10626_v34  ;;  %v10702_v33 = vld [vmem:[%s12914_s2 + $0x28c] ss:$16 sps:$4 sm:$0xff]   ;;  %v10697_v34 = vld [vmem:[%s12914_s2 + $0x280] ss:$16 sps:$4 sm:$0xff]   ;;  %v10736_v61 = vld [vmem:[%s12914_s2 + $0x348] ss:$16 sps:$4 sm:$0xff]  }
 0x127   : > { %v10748_v5 = vld [vmem:[%s12914_s2 + $0x388] ss:$16 sps:$4 sm:$0xff]  }
 0x129   : > { %6902 = vmatpush1.bf16.msra.mxu0 %v10628_v35  ;;  %7558 = vmatpush1.bf16.msra.mxu1 %v10629_v36  ;;  %v10700_v35 = vld [vmem:[%s12914_s2 + $0x288] ss:$16 sps:$4 sm:$0xff]   ;;  %v10705_v36 = vld [vmem:[%s12914_s2 + $0x2a4] ss:$16 sps:$4 sm:$0xff]  }
 0x12a   : > { %6903 = vmatprep.subr.bf16.mxu0 %v10630_v40  ;;  %7559 = vmatprep.subr.bf16.mxu1 %v10632_v41  ;;  %v10711_v40 = vld [vmem:[%s12914_s2 + $0x2c4] ss:$16 sps:$4 sm:$0xff]   ;;  %v10714_v41 = vld [vmem:[%s12914_s2 + $0x2cc] ss:$16 sps:$4 sm:$0xff]  }
 0x12d   : > { %6904 = vmatpush1.bf16.msra.mxu0 %v10634_v42  ;;  %7560 = vmatpush1.bf16.msra.mxu1 %v10635_v45  ;;  %v10709_v42 = vld [vmem:[%s12914_s2 + $0x2c0] ss:$16 sps:$4 sm:$0xff]   ;;  %v10717_v45 = vld [vmem:[%s12914_s2 + $0x2e4] ss:$16 sps:$4 sm:$0xff]  }
 0x12e   : > { %6905 = vmatprep.subr.bf16.mxu0 %v10636_v46  ;;  %7561 = vmatprep.subr.bf16.mxu1 %v10638_v47  ;;  %v10720_v46 = vld [vmem:[%s12914_s2 + $0x2ec] ss:$16 sps:$4 sm:$0xff]   ;;  %v10715_v47 = vld [vmem:[%s12914_s2 + $0x2e0] ss:$16 sps:$4 sm:$0xff]  }
 0x131   : > { %6906 = vmatpush1.bf16.msra.mxu0 %v10640_v48  ;;  %7562 = vmatpush1.bf16.msra.mxu1 %v10641_v49  ;;  %v10718_v48 = vld [vmem:[%s12914_s2 + $0x2e8] ss:$16 sps:$4 sm:$0xff]   ;;  %v10723_v49 = vld [vmem:[%s12914_s2 + $0x304] ss:$16 sps:$4 sm:$0xff]  }
 0x132   : > { %6907 = vmatprep.subr.bf16.mxu0 %v10642_v51  ;;  %7563 = vmatprep.subr.bf16.mxu1 %v10644_v52  ;;  %v10726_v51 = vld [vmem:[%s12914_s2 + $0x30c] ss:$16 sps:$4 sm:$0xff]   ;;  %v10721_v52 = vld [vmem:[%s12914_s2 + $0x300] ss:$16 sps:$4 sm:$0xff]  }
 0x135   : > { %6908 = vmatpush1.bf16.msra.mxu0 %v10646_v54  ;;  %7564 = vmatpush1.bf16.msra.mxu1 %v10647_v56  ;;  %v10729_v54 = vld [vmem:[%s12914_s2 + $0x324] ss:$16 sps:$4 sm:$0xff]   ;;  %v10727_v56 = vld [vmem:[%s12914_s2 + $0x320] ss:$16 sps:$4 sm:$0xff]  }
 0x136   : > { %6909 = vmatprep.subr.bf16.mxu0 %v10648_v57  ;;  %7565 = vmatprep.subr.bf16.mxu1 %v10650_v58  ;;  %v10730_v57 = vld [vmem:[%s12914_s2 + $0x328] ss:$16 sps:$4 sm:$0xff]   ;;  %v10735_v58 = vld [vmem:[%s12914_s2 + $0x344] ss:$16 sps:$4 sm:$0xff]  }
 0x139   : > { %6910 = vmatpush1.bf16.msra.mxu0 %v10652_v60  ;;  %7566 = vmatpush1.bf16.msra.mxu1 %v10653_v62  ;;  %v10733_v60 = vld [vmem:[%s12914_s2 + $0x340] ss:$16 sps:$4 sm:$0xff]   ;;  %v10741_v62 = vld [vmem:[%s12914_s2 + $0x364] ss:$16 sps:$4 sm:$0xff]  }
 0x13a   : > { %6911 = vmatprep.subr.bf16.mxu0 %v10654_v63  ;;  %7567 = vmatprep.subr.bf16.mxu1 %v10656_v0  ;;  %v10744_v63 = vld [vmem:[%s12914_s2 + $0x36c] ss:$16 sps:$4 sm:$0xff]   ;;  %v10739_v0 = vld [vmem:[%s12914_s2 + $0x360] ss:$16 sps:$4 sm:$0xff]  }
 0x13d   : > { %6912 = vmatpush1.bf16.msra.mxu0 %v10658_v1  ;;  %7568 = vmatpush1.bf16.msra.mxu1 %v10659_v2  ;;  %v10742_v1 = vld [vmem:[%s12914_s2 + $0x368] ss:$16 sps:$4 sm:$0xff]   ;;  %v10747_v2 = vld [vmem:[%s12914_s2 + $0x384] ss:$16 sps:$4 sm:$0xff]  }
 0x13e   : > { %6913 = vmatprep.subr.bf16.mxu0 %v10660_v3  ;;  %7569 = vmatprep.subr.bf16.mxu1 %v10662_v4  ;;  %v10750_v3 = vld [vmem:[%s12914_s2 + $0x38c] ss:$16 sps:$4 sm:$0xff]   ;;  %v10745_v4 = vld [vmem:[%s12914_s2 + $0x380] ss:$16 sps:$4 sm:$0xff]  }
 0x141   : > { %6914 = vmatpush1.bf16.msra.mxu0 %v10664_v6  ;;  %7570 = vmatpush1.bf16.msra.mxu1 %v10665_v7  ;;  %v10753_v6 = vld [vmem:[%s12914_s2 + $0x3a4] ss:$16 sps:$4 sm:$0xff]   ;;  %v10756_v7 = vld [vmem:[%s12914_s2 + $0x3ac] ss:$16 sps:$4 sm:$0xff]  }
 0x142   : > { %6915 = vmatprep.subr.bf16.mxu0 %v10666_v8  ;;  %7571 = vmatprep.subr.bf16.mxu1 %v10668_v9  ;;  %v10751_v8 = vld [vmem:[%s12914_s2 + $0x3a0] ss:$16 sps:$4 sm:$0xff]   ;;  %v10754_v9 = vld [vmem:[%s12914_s2 + $0x3a8] ss:$16 sps:$4 sm:$0xff]  }
 0x145   : > { %6916 = vmatpush1.bf16.msra.mxu0 %v10670_v11  ;;  %7572 = vmatpush1.bf16.msra.mxu1 %v10671_v12  ;;  %v10759_v11 = vld [vmem:[%s12914_s2 + $0x3c4] ss:$16 sps:$4 sm:$0xff]   ;;  %v10762_v12 = vld [vmem:[%s12914_s2 + $0x3cc] ss:$16 sps:$4 sm:$0xff]  }
 0x146   : > { %6926 = vmatprep.subr.bf16.mxu0 %v10675_v13  ;;  %7582 = vmatprep.subr.bf16.mxu1 %v10678_v14  ;;  %v10757_v13 = vld [vmem:[%s12914_s2 + $0x3c0] ss:$16 sps:$4 sm:$0xff]   ;;  %v10760_v14 = vld [vmem:[%s12914_s2 + $0x3c8] ss:$16 sps:$4 sm:$0xff]  }
 0x148   : > { %6918 = vmatmul.mubr.bf16.vlgmr.msra.gmra.mrb[0].mxu0 %v709_v17  ;;  %7574 = vmatmul.mubr.bf16.vlgmr.msra.gmra.mrb[0].mxu1 %v709_v17  ;;  %v10763_v17 = vld [vmem:[%s12914_s2 + $0x3e0] ss:$16 sps:$4 sm:$0xff]  }
 0x149   : > { %6927 = vmatpush1.bf16.msra.mxu0 %v10673_v16  ;;  %7583 = vmatpush1.bf16.msra.mxu1 %v10676_v18  ;;  %v10768_v16 = vld [vmem:[%s12914_s2 + $0x3ec] ss:$16 sps:$4 sm:$0xff]   ;;  %v10766_v18 = vld [vmem:[%s12914_s2 + $0x3e8] ss:$16 sps:$4 sm:$0xff]  }
 0x14a   : > { %6928 = vmatprep.subr.bf16.mxu0 %v10681_v19  ;;  %7584 = vmatprep.subr.bf16.mxu1 %v10684_v20  ;;  %v10771_v19 = vld [vmem:[%s12914_s2 + $0x404] ss:$16 sps:$4 sm:$0xff]   ;;  %v10774_v20 = vld [vmem:[%s12914_s2 + $0x40c] ss:$16 sps:$4 sm:$0xff]  }
 0x14b   : > { %6958 = vmatprep.mubr.bf16.mxu0 %v712_v21  ;;  %7614 = vmatprep.mubr.bf16.mxu1 %v712_v21  ;;  %v10769_v21 = vld [vmem:[%s12914_s2 + $0x400] ss:$16 sps:$4 sm:$0xff]  }
 0x14d   : > { %6929 = vmatpush1.bf16.msra.mxu0 %v10679_v22  ;;  %7585 = vmatpush1.bf16.msra.mxu1 %v10682_v23  ;;  %v711_v22 = vpack.c.bf16 %v13014_v10, %v13014_v10  ;;  %v10772_v23 = vld [vmem:[%s12914_s2 + $0x408] ss:$16 sps:$4 sm:$0xff]  }
 0x14e   : > { %6930 = vmatprep.subr.bf16.mxu0 %v10687_v24  ;;  %7586 = vmatprep.subr.bf16.mxu1 %v10690_v25  ;;  %v13091_v24 = vld [vmem:[%s12940_s15 + $0x8] sm:$0xff] }
 0x14f   : > { %v10777_v25 = vld [vmem:[%s12914_s2 + $0x424] ss:$16 sps:$4 sm:$0xff]  }
 0x151   : > { %6931 = vmatpush1.bf16.msra.mxu0 %v10685_v26  ;;  %7587 = vmatpush1.bf16.msra.mxu1 %v10688_v27  ;;  %v10780_v26 = vld [vmem:[%s12914_s2 + $0x42c] ss:$16 sps:$4 sm:$0xff]   ;;  %v13097_v27 = vrot.slane %v13091_v24, %v12991_v50 }
 0x152   : > { %6932 = vmatprep.subr.bf16.mxu0 %v10693_v28  ;;  %7588 = vmatprep.subr.bf16.mxu1 %v10696_v29  ;;  %v10775_v28 = vld [vmem:[%s12914_s2 + $0x420] ss:$16 sps:$4 sm:$0xff]   ;;  %v10778_v29 = vld [vmem:[%s12914_s2 + $0x428] ss:$16 sps:$4 sm:$0xff]  }
 0x153   : > { %v573_v10 = vcombine.high %v13097_v27, %v13097_v27 }
 0x155   : > { %6933 = vmatpush1.bf16.msra.mxu0 %v10691_v30  ;;  %7589 = vmatpush1.bf16.msra.mxu1 %v10694_v31  ;;  %v10783_v30 = vld [vmem:[%s12914_s2 + $0x444] ss:$16 sps:$4 sm:$0xff]   ;;  %v10786_v31 = vld [vmem:[%s12914_s2 + $0x44c] ss:$16 sps:$4 sm:$0xff]  }
 0x156   : > { %6934 = vmatprep.subr.bf16.mxu0 %v10699_v32  ;;  %7590 = vmatprep.subr.bf16.mxu1 %v10702_v33  ;;  %v714_v32 = vpack.c.bf16 %v573_v10, %v573_v10  ;;  %v10781_v33 = vld [vmem:[%s12914_s2 + $0x440] ss:$16 sps:$4 sm:$0xff]   ;;  %v10862_v10 = vld [vmem:[%s12914_s2 + $0x5e8] ss:$16 sps:$4 sm:$0xff]  }
 0x159   : > { %6935 = vmatpush1.bf16.msra.mxu0 %v10697_v34  ;;  %7591 = vmatpush1.bf16.msra.mxu1 %v10700_v35  ;;  %v10784_v34 = vld [vmem:[%s12914_s2 + $0x448] ss:$16 sps:$4 sm:$0xff]   ;;  %v10789_v35 = vld [vmem:[%s12914_s2 + $0x464] ss:$16 sps:$4 sm:$0xff]  }
 0x15a   : > { %6936 = vmatprep.subr.bf16.mxu0 %v10705_v36  ;;  %7592 = vmatprep.subr.bf16.mxu1 %v10708_v37  ;;  %v10792_v36 = vld [vmem:[%s12914_s2 + $0x46c] ss:$16 sps:$4 sm:$0xff]   ;;  %v10787_v37 = vld [vmem:[%s12914_s2 + $0x460] ss:$16 sps:$4 sm:$0xff]  }
 0x15d   : > { %6937 = vmatpush1.bf16.msra.mxu0 %v10703_v38  ;;  %7593 = vmatpush1.bf16.msra.mxu1 %v10706_v39  ;;  %v10790_v38 = vld [vmem:[%s12914_s2 + $0x468] ss:$16 sps:$4 sm:$0xff]   ;;  %v10795_v39 = vld [vmem:[%s12914_s2 + $0x484] ss:$16 sps:$4 sm:$0xff]  }
 0x15e   : > { %6938 = vmatprep.subr.bf16.mxu0 %v10711_v40  ;;  %7594 = vmatprep.subr.bf16.mxu1 %v10714_v41  ;;  %v10798_v40 = vld [vmem:[%s12914_s2 + $0x48c] ss:$16 sps:$4 sm:$0xff]   ;;  %v10793_v41 = vld [vmem:[%s12914_s2 + $0x480] ss:$16 sps:$4 sm:$0xff]  }
 0x161   : > { %6939 = vmatpush1.bf16.msra.mxu0 %v10709_v42  ;;  %7595 = vmatpush1.bf16.msra.mxu1 %v10712_v43  ;;  %v10796_v42 = vld [vmem:[%s12914_s2 + $0x488] ss:$16 sps:$4 sm:$0xff]   ;;  %v10801_v43 = vld [vmem:[%s12914_s2 + $0x4a4] ss:$16 sps:$4 sm:$0xff]  }
 0x162   : > { %6940 = vmatprep.subr.bf16.mxu0 %v10717_v45  ;;  %7596 = vmatprep.subr.bf16.mxu1 %v10720_v46  ;;  %v10804_v45 = vld [vmem:[%s12914_s2 + $0x4ac] ss:$16 sps:$4 sm:$0xff]   ;;  %v10799_v46 = vld [vmem:[%s12914_s2 + $0x4a0] ss:$16 sps:$4 sm:$0xff]  }
 0x165   : > { %6941 = vmatpush1.bf16.msra.mxu0 %v10715_v47  ;;  %7597 = vmatpush1.bf16.msra.mxu1 %v10718_v48  ;;  %v10802_v47 = vld [vmem:[%s12914_s2 + $0x4a8] ss:$16 sps:$4 sm:$0xff]   ;;  %v10807_v48 = vld [vmem:[%s12914_s2 + $0x4c4] ss:$16 sps:$4 sm:$0xff]  }
 0x166   : > { %6942 = vmatprep.subr.bf16.mxu0 %v10723_v49  ;;  %7598 = vmatprep.subr.bf16.mxu1 %v10726_v51  ;;  %v10810_v49 = vld [vmem:[%s12914_s2 + $0x4cc] ss:$16 sps:$4 sm:$0xff]   ;;  %v10805_v51 = vld [vmem:[%s12914_s2 + $0x4c0] ss:$16 sps:$4 sm:$0xff]  }
 0x169   : > { %6943 = vmatpush1.bf16.msra.mxu0 %v10721_v52  ;;  %7599 = vmatpush1.bf16.msra.mxu1 %v10724_v53  ;;  %v10808_v52 = vld [vmem:[%s12914_s2 + $0x4c8] ss:$16 sps:$4 sm:$0xff]   ;;  %v10813_v53 = vld [vmem:[%s12914_s2 + $0x4e4] ss:$16 sps:$4 sm:$0xff]  }
 0x16a   : > { %6944 = vmatprep.subr.bf16.mxu0 %v10729_v54  ;;  %7600 = vmatprep.subr.bf16.mxu1 %v10732_v55  ;;  %v10816_v54 = vld [vmem:[%s12914_s2 + $0x4ec] ss:$16 sps:$4 sm:$0xff]   ;;  %v10811_v55 = vld [vmem:[%s12914_s2 + $0x4e0] ss:$16 sps:$4 sm:$0xff]  }
 0x16d   : > { %6945 = vmatpush1.bf16.msra.mxu0 %v10727_v56  ;;  %7601 = vmatpush1.bf16.msra.mxu1 %v10730_v57  ;;  %v10814_v56 = vld [vmem:[%s12914_s2 + $0x4e8] ss:$16 sps:$4 sm:$0xff]   ;;  %v10819_v57 = vld [vmem:[%s12914_s2 + $0x504] ss:$16 sps:$4 sm:$0xff]  }
 0x16e   : > { %6946 = vmatprep.subr.bf16.mxu0 %v10735_v58  ;;  %7602 = vmatprep.subr.bf16.mxu1 %v10738_v59  ;;  %v10822_v58 = vld [vmem:[%s12914_s2 + $0x50c] ss:$16 sps:$4 sm:$0xff]   ;;  %v10817_v59 = vld [vmem:[%s12914_s2 + $0x500] ss:$16 sps:$4 sm:$0xff]  }
 0x171   : > { %6947 = vmatpush1.bf16.msra.mxu0 %v10733_v60  ;;  %7603 = vmatpush1.bf16.msra.mxu1 %v10736_v61  ;;  %v10820_v60 = vld [vmem:[%s12914_s2 + $0x508] ss:$16 sps:$4 sm:$0xff]   ;;  %v10825_v61 = vld [vmem:[%s12914_s2 + $0x524] ss:$16 sps:$4 sm:$0xff]  }
 0x172   : > { %6948 = vmatprep.subr.bf16.mxu0 %v10741_v62  ;;  %7604 = vmatprep.subr.bf16.mxu1 %v10744_v63  ;;  %v10828_v62 = vld [vmem:[%s12914_s2 + $0x52c] ss:$16 sps:$4 sm:$0xff]   ;;  %v10823_v63 = vld [vmem:[%s12914_s2 + $0x520] ss:$16 sps:$4 sm:$0xff]  }
 0x175   : > { %6949 = vmatpush1.bf16.msra.mxu0 %v10739_v0  ;;  %7605 = vmatpush1.bf16.msra.mxu1 %v10742_v1  ;;  %v10826_v0 = vld [vmem:[%s12914_s2 + $0x528] ss:$16 sps:$4 sm:$0xff]   ;;  %v10831_v1 = vld [vmem:[%s12914_s2 + $0x544] ss:$16 sps:$4 sm:$0xff]  }
 0x176   : > { %6950 = vmatprep.subr.bf16.mxu0 %v10747_v2  ;;  %7606 = vmatprep.subr.bf16.mxu1 %v10750_v3  ;;  %v10834_v2 = vld [vmem:[%s12914_s2 + $0x54c] ss:$16 sps:$4 sm:$0xff]   ;;  %v10829_v3 = vld [vmem:[%s12914_s2 + $0x540] ss:$16 sps:$4 sm:$0xff]  }
 0x179   : > { %6951 = vmatpush1.bf16.msra.mxu0 %v10745_v4  ;;  %7607 = vmatpush1.bf16.msra.mxu1 %v10748_v5  ;;  %v10832_v4 = vld [vmem:[%s12914_s2 + $0x548] ss:$16 sps:$4 sm:$0xff]   ;;  %v10837_v5 = vld [vmem:[%s12914_s2 + $0x564] ss:$16 sps:$4 sm:$0xff]  }
 0x17a   : > { %6952 = vmatprep.subr.bf16.mxu0 %v10753_v6  ;;  %7608 = vmatprep.subr.bf16.mxu1 %v10756_v7  ;;  %v10840_v6 = vld [vmem:[%s12914_s2 + $0x56c] ss:$16 sps:$4 sm:$0xff]   ;;  %v10835_v7 = vld [vmem:[%s12914_s2 + $0x560] ss:$16 sps:$4 sm:$0xff]  }
 0x17d   : > { %6953 = vmatpush1.bf16.msra.mxu0 %v10751_v8  ;;  %7609 = vmatpush1.bf16.msra.mxu1 %v10754_v9  ;;  %v10838_v8 = vld [vmem:[%s12914_s2 + $0x568] ss:$16 sps:$4 sm:$0xff]   ;;  %v10843_v9 = vld [vmem:[%s12914_s2 + $0x584] ss:$16 sps:$4 sm:$0xff]  }
 0x17e   : > { %6954 = vmatprep.subr.bf16.mxu0 %v10759_v11  ;;  %7610 = vmatprep.subr.bf16.mxu1 %v10762_v12  ;;  %v10846_v11 = vld [vmem:[%s12914_s2 + $0x58c] ss:$16 sps:$4 sm:$0xff]   ;;  %v10841_v12 = vld [vmem:[%s12914_s2 + $0x580] ss:$16 sps:$4 sm:$0xff]  }
 0x181   : > { %6955 = vmatpush1.bf16.msra.mxu0 %v10757_v13  ;;  %7611 = vmatpush1.bf16.msra.mxu1 %v10760_v14  ;;  %v10844_v13 = vld [vmem:[%s12914_s2 + $0x588] ss:$16 sps:$4 sm:$0xff]   ;;  %v10849_v14 = vld [vmem:[%s12914_s2 + $0x5a4] ss:$16 sps:$4 sm:$0xff]  }
 0x182   : > { %6956 = vmatprep.subr.bf16.mxu0 %v10765_v15  ;;  %7612 = vmatprep.subr.bf16.mxu1 %v10768_v16  ;;  %v10852_v15 = vld [vmem:[%s12914_s2 + $0x5ac] ss:$16 sps:$4 sm:$0xff]   ;;  %v10847_v16 = vld [vmem:[%s12914_s2 + $0x5a0] ss:$16 sps:$4 sm:$0xff]  }
 0x185   : > { %6957 = vmatpush1.bf16.msra.mxu0 %v10763_v17  ;;  %7613 = vmatpush1.bf16.msra.mxu1 %v10766_v18  ;;  %v10850_v17 = vld [vmem:[%s12914_s2 + $0x5a8] ss:$16 sps:$4 sm:$0xff]   ;;  %v10855_v18 = vld [vmem:[%s12914_s2 + $0x5c4] ss:$16 sps:$4 sm:$0xff]  }
 0x186   : > { %6967 = vmatprep.subr.bf16.mxu0 %v10771_v19  ;;  %7623 = vmatprep.subr.bf16.mxu1 %v10774_v20  ;;  %v10858_v19 = vld [vmem:[%s12914_s2 + $0x5cc] ss:$16 sps:$4 sm:$0xff]   ;;  %v558_v20 = vcombine.high %v13091_v24, %v13091_v24  ;;  %v10859_v24 = vld [vmem:[%s12914_s2 + $0x5e0] ss:$16 sps:$4 sm:$0xff]  }
 0x188   : > { %6959 = vmatmul.mubr.bf16.vlgmr.msra.gmra.mrb[0].mxu0 %v711_v22  ;;  %7615 = vmatmul.mubr.bf16.vlgmr.msra.gmra.mrb[0].mxu1 %v711_v22  ;;  %v10856_v22 = vld [vmem:[%s12914_s2 + $0x5c8] ss:$16 sps:$4 sm:$0xff]  }
 0x189   : > { %6968 = vmatpush1.bf16.msra.mxu0 %v10769_v21  ;;  %7624 = vmatpush1.bf16.msra.mxu1 %v10772_v23  ;;  %v10853_v21 = vld [vmem:[%s12914_s2 + $0x5c0] ss:$16 sps:$4 sm:$0xff]   ;;  %v10861_v23 = vld [vmem:[%s12914_s2 + $0x5e4] ss:$16 sps:$4 sm:$0xff]  }
 0x18a   : > { %6969 = vmatprep.subr.bf16.mxu0 %v10777_v25  ;;  %7625 = vmatprep.subr.bf16.mxu1 %v10780_v26  ;;  %v10864_v25 = vld [vmem:[%s12914_s2 + $0x5ec] ss:$16 sps:$4 sm:$0xff]   ;;  %v13160_v26 = vrot.slane %v558_v20, %v12991_v50  ;;  %v10940_v20 = vld [vmem:[%s12914_s2 + $0x788] ss:$16 sps:$4 sm:$0xff]  }
 0x18b   : > { %6999 = vmatprep.mubr.bf16.mxu0 %v714_v32  ;;  %7655 = vmatprep.mubr.bf16.mxu1 %v714_v32  ;;  %v10865_v32 = vld [vmem:[%s12914_s2 + $0x600] ss:$16 sps:$4 sm:$0xff]  }
 0x18d   : > { %6970 = vmatpush1.bf16.msra.mxu0 %v10775_v28  ;;  %7626 = vmatpush1.bf16.msra.mxu1 %v10778_v29  ;;  %v10867_v28 = vld [vmem:[%s12914_s2 + $0x604] ss:$16 sps:$4 sm:$0xff]   ;;  %v10870_v29 = vld [vmem:[%s12914_s2 + $0x60c] ss:$16 sps:$4 sm:$0xff]  }
 0x18e   : > { %6971 = vmatprep.subr.bf16.mxu0 %v10783_v30  ;;  %7627 = vmatprep.subr.bf16.mxu1 %v10786_v31  ;;  %v574_v30 = vcombine.high %v13160_v26, %v13160_v26  ;;  %v713_v31 = vpack.c.bf16 %v13097_v27, %v13097_v27  ;;  %v10871_v27 = vld [vmem:[%s12914_s2 + $0x620] ss:$16 sps:$4 sm:$0xff]  }
 0x191   : > { %6972 = vmatpush1.bf16.msra.mxu0 %v10781_v33  ;;  %7628 = vmatpush1.bf16.msra.mxu1 %v10784_v34  ;;  %v10868_v33 = vld [vmem:[%s12914_s2 + $0x608] ss:$16 sps:$4 sm:$0xff]   ;;  %v10873_v34 = vld [vmem:[%s12914_s2 + $0x624] ss:$16 sps:$4 sm:$0xff]  }
 0x192   : > { %6973 = vmatprep.subr.bf16.mxu0 %v10789_v35  ;;  %7629 = vmatprep.subr.bf16.mxu1 %v10792_v36  ;;  %v10876_v35 = vld [vmem:[%s12914_s2 + $0x62c] ss:$16 sps:$4 sm:$0xff]   ;;  %v716_v36 = vpack.c.bf16 %v574_v30, %v574_v30  ;;  %v10952_v30 = vld [vmem:[%s12914_s2 + $0x7c8] ss:$16 sps:$4 sm:$0xff]  }
 0x195   : > { %6974 = vmatpush1.bf16.msra.mxu0 %v10787_v37  ;;  %7630 = vmatpush1.bf16.msra.mxu1 %v10790_v38  ;;  %v10874_v37 = vld [vmem:[%s12914_s2 + $0x628] ss:$16 sps:$4 sm:$0xff]   ;;  %v10879_v38 = vld [vmem:[%s12914_s2 + $0x644] ss:$16 sps:$4 sm:$0xff]  }
 0x196   : > { %6975 = vmatprep.subr.bf16.mxu0 %v10795_v39  ;;  %7631 = vmatprep.subr.bf16.mxu1 %v10798_v40  ;;  %v10882_v39 = vld [vmem:[%s12914_s2 + $0x64c] ss:$16 sps:$4 sm:$0xff]   ;;  %v10877_v40 = vld [vmem:[%s12914_s2 + $0x640] ss:$16 sps:$4 sm:$0xff]  }
 0x199   : > { %6976 = vmatpush1.bf16.msra.mxu0 %v10793_v41  ;;  %7632 = vmatpush1.bf16.msra.mxu1 %v10796_v42  ;;  %v10880_v41 = vld [vmem:[%s12914_s2 + $0x648] ss:$16 sps:$4 sm:$0xff]   ;;  %v10885_v42 = vld [vmem:[%s12914_s2 + $0x664] ss:$16 sps:$4 sm:$0xff]  }
 0x19a   : > { %6977 = vmatprep.subr.bf16.mxu0 %v10801_v43  ;;  %7633 = vmatprep.subr.bf16.mxu1 %v10804_v45  ;;  %v10888_v43 = vld [vmem:[%s12914_s2 + $0x66c] ss:$16 sps:$4 sm:$0xff]   ;;  %v10883_v45 = vld [vmem:[%s12914_s2 + $0x660] ss:$16 sps:$4 sm:$0xff]  }
 0x19d   : > { %6978 = vmatpush1.bf16.msra.mxu0 %v10799_v46  ;;  %7634 = vmatpush1.bf16.msra.mxu1 %v10802_v47  ;;  %v10886_v46 = vld [vmem:[%s12914_s2 + $0x668] ss:$16 sps:$4 sm:$0xff]   ;;  %v10891_v47 = vld [vmem:[%s12914_s2 + $0x684] ss:$16 sps:$4 sm:$0xff]  }
 0x19e   : > { %6979 = vmatprep.subr.bf16.mxu0 %v10807_v48  ;;  %7635 = vmatprep.subr.bf16.mxu1 %v10810_v49  ;;  %v10894_v48 = vld [vmem:[%s12914_s2 + $0x68c] ss:$16 sps:$4 sm:$0xff]   ;;  %v10889_v49 = vld [vmem:[%s12914_s2 + $0x680] ss:$16 sps:$4 sm:$0xff]  }
 0x1a1   : > { %6980 = vmatpush1.bf16.msra.mxu0 %v10805_v51  ;;  %7636 = vmatpush1.bf16.msra.mxu1 %v10808_v52  ;;  %v10892_v51 = vld [vmem:[%s12914_s2 + $0x688] ss:$16 sps:$4 sm:$0xff]   ;;  %v10897_v52 = vld [vmem:[%s12914_s2 + $0x6a4] ss:$16 sps:$4 sm:$0xff]  }
 0x1a2   : > { %6981 = vmatprep.subr.bf16.mxu0 %v10813_v53  ;;  %7637 = vmatprep.subr.bf16.mxu1 %v10816_v54  ;;  %v10900_v53 = vld [vmem:[%s12914_s2 + $0x6ac] ss:$16 sps:$4 sm:$0xff]   ;;  %v10895_v54 = vld [vmem:[%s12914_s2 + $0x6a0] ss:$16 sps:$4 sm:$0xff]  }
 0x1a5   : > { %6982 = vmatpush1.bf16.msra.mxu0 %v10811_v55  ;;  %7638 = vmatpush1.bf16.msra.mxu1 %v10814_v56  ;;  %v10898_v55 = vld [vmem:[%s12914_s2 + $0x6a8] ss:$16 sps:$4 sm:$0xff]   ;;  %v10903_v56 = vld [vmem:[%s12914_s2 + $0x6c4] ss:$16 sps:$4 sm:$0xff]  }
 0x1a6   : > { %6983 = vmatprep.subr.bf16.mxu0 %v10819_v57  ;;  %7639 = vmatprep.subr.bf16.mxu1 %v10822_v58  ;;  %v10906_v57 = vld [vmem:[%s12914_s2 + $0x6cc] ss:$16 sps:$4 sm:$0xff]   ;;  %v10901_v58 = vld [vmem:[%s12914_s2 + $0x6c0] ss:$16 sps:$4 sm:$0xff]  }
 0x1a9   : > { %6984 = vmatpush1.bf16.msra.mxu0 %v10817_v59  ;;  %7640 = vmatpush1.bf16.msra.mxu1 %v10820_v60  ;;  %v10904_v59 = vld [vmem:[%s12914_s2 + $0x6c8] ss:$16 sps:$4 sm:$0xff]   ;;  %v10909_v60 = vld [vmem:[%s12914_s2 + $0x6e4] ss:$16 sps:$4 sm:$0xff]  }
 0x1aa   : > { %6985 = vmatprep.subr.bf16.mxu0 %v10825_v61  ;;  %7641 = vmatprep.subr.bf16.mxu1 %v10828_v62  ;;  %v10912_v61 = vld [vmem:[%s12914_s2 + $0x6ec] ss:$16 sps:$4 sm:$0xff]   ;;  %v10907_v62 = vld [vmem:[%s12914_s2 + $0x6e0] ss:$16 sps:$4 sm:$0xff]  }
 0x1ad   : > { %6986 = vmatpush1.bf16.msra.mxu0 %v10823_v63  ;;  %7642 = vmatpush1.bf16.msra.mxu1 %v10826_v0  ;;  %v10910_v63 = vld [vmem:[%s12914_s2 + $0x6e8] ss:$16 sps:$4 sm:$0xff]   ;;  %v10915_v0 = vld [vmem:[%s12914_s2 + $0x704] ss:$16 sps:$4 sm:$0xff]  }
 0x1ae   : > { %6987 = vmatprep.subr.bf16.mxu0 %v10831_v1  ;;  %7643 = vmatprep.subr.bf16.mxu1 %v10834_v2  ;;  %v10918_v1 = vld [vmem:[%s12914_s2 + $0x70c] ss:$16 sps:$4 sm:$0xff]   ;;  %v10913_v2 = vld [vmem:[%s12914_s2 + $0x700] ss:$16 sps:$4 sm:$0xff]  }
 0x1b1   : > { %6988 = vmatpush1.bf16.msra.mxu0 %v10829_v3  ;;  %7644 = vmatpush1.bf16.msra.mxu1 %v10832_v4  ;;  %v10916_v3 = vld [vmem:[%s12914_s2 + $0x708] ss:$16 sps:$4 sm:$0xff]   ;;  %v10921_v4 = vld [vmem:[%s12914_s2 + $0x724] ss:$16 sps:$4 sm:$0xff]  }
 0x1b2   : > { %6989 = vmatprep.subr.bf16.mxu0 %v10837_v5  ;;  %7645 = vmatprep.subr.bf16.mxu1 %v10840_v6  ;;  %v10924_v5 = vld [vmem:[%s12914_s2 + $0x72c] ss:$16 sps:$4 sm:$0xff]   ;;  %v10919_v6 = vld [vmem:[%s12914_s2 + $0x720] ss:$16 sps:$4 sm:$0xff]  }
 0x1b5   : > { %6990 = vmatpush1.bf16.msra.mxu0 %v10835_v7  ;;  %7646 = vmatpush1.bf16.msra.mxu1 %v10838_v8  ;;  %v10922_v7 = vld [vmem:[%s12914_s2 + $0x728] ss:$16 sps:$4 sm:$0xff]   ;;  %v10927_v8 = vld [vmem:[%s12914_s2 + $0x744] ss:$16 sps:$4 sm:$0xff]  }
 0x1b6   : > { %6991 = vmatprep.subr.bf16.mxu0 %v10843_v9  ;;  %7647 = vmatprep.subr.bf16.mxu1 %v10846_v11  ;;  %v10930_v9 = vld [vmem:[%s12914_s2 + $0x74c] ss:$16 sps:$4 sm:$0xff]   ;;  %v10925_v11 = vld [vmem:[%s12914_s2 + $0x740] ss:$16 sps:$4 sm:$0xff]  }
 0x1b9   : > { %6992 = vmatpush1.bf16.msra.mxu0 %v10841_v12  ;;  %7648 = vmatpush1.bf16.msra.mxu1 %v10844_v13  ;;  %v10928_v12 = vld [vmem:[%s12914_s2 + $0x748] ss:$16 sps:$4 sm:$0xff]   ;;  %v10933_v13 = vld [vmem:[%s12914_s2 + $0x764] ss:$16 sps:$4 sm:$0xff]  }
 0x1ba   : > { %6993 = vmatprep.subr.bf16.mxu0 %v10849_v14  ;;  %7649 = vmatprep.subr.bf16.mxu1 %v10852_v15  ;;  %v10936_v14 = vld [vmem:[%s12914_s2 + $0x76c] ss:$16 sps:$4 sm:$0xff]   ;;  %v10931_v15 = vld [vmem:[%s12914_s2 + $0x760] ss:$16 sps:$4 sm:$0xff]  }
 0x1bd   : > { %6994 = vmatpush1.bf16.msra.mxu0 %v10847_v16  ;;  %7650 = vmatpush1.bf16.msra.mxu1 %v10850_v17  ;;  %v10934_v16 = vld [vmem:[%s12914_s2 + $0x768] ss:$16 sps:$4 sm:$0xff]   ;;  %v10939_v17 = vld [vmem:[%s12914_s2 + $0x784] ss:$16 sps:$4 sm:$0xff]  }
 0x1be   : > { %6995 = vmatprep.subr.bf16.mxu0 %v10855_v18  ;;  %7651 = vmatprep.subr.bf16.mxu1 %v10858_v19  ;;  %v10942_v18 = vld [vmem:[%s12914_s2 + $0x78c] ss:$16 sps:$4 sm:$0xff]   ;;  %v10937_v19 = vld [vmem:[%s12914_s2 + $0x780] ss:$16 sps:$4 sm:$0xff]  }
 0x1c1   : > { %6996 = vmatpush1.bf16.msra.mxu0 %v10853_v21  ;;  %7652 = vmatpush1.bf16.msra.mxu1 %v10856_v22  ;;  %v10945_v21 = vld [vmem:[%s12914_s2 + $0x7a4] ss:$16 sps:$4 sm:$0xff]   ;;  %v10948_v22 = vld [vmem:[%s12914_s2 + $0x7ac] ss:$16 sps:$4 sm:$0xff]  }
 0x1c2   : > { %6997 = vmatprep.subr.bf16.mxu0 %v10861_v23  ;;  %7653 = vmatprep.subr.bf16.mxu1 %v10864_v25  ;;  %v10943_v23 = vld [vmem:[%s12914_s2 + $0x7a0] ss:$16 sps:$4 sm:$0xff]   ;;  %v10946_v25 = vld [vmem:[%s12914_s2 + $0x7a8] ss:$16 sps:$4 sm:$0xff]  }
 0x1c5   : > { %6998 = vmatpush1.bf16.msra.mxu0 %v10859_v24  ;;  %7654 = vmatpush1.bf16.msra.mxu1 %v10862_v10  ;;  %v10951_v24 = vld [vmem:[%s12914_s2 + $0x7c4] ss:$16 sps:$4 sm:$0xff]   ;;  %v10954_v10 = vld [vmem:[%s12914_s2 + $0x7cc] ss:$16 sps:$4 sm:$0xff]  }
 0x1c6   : > { %7008 = vmatprep.subr.bf16.mxu0 %v10867_v28  ;;  %7664 = vmatprep.subr.bf16.mxu1 %v10870_v29  ;;  %v10949_v28 = vld [vmem:[%s12914_s2 + $0x7c0] ss:$16 sps:$4 sm:$0xff]   ;;  %v13228_v29 = vld [vmem:[%s12940_s15 + $0x10] sm:$0xff] }
 0x1c8   : > { %7000 = vmatmul.mubr.bf16.vlgmr.msra.gmra.mrb[0].mxu0 %v713_v31  ;;  %7656 = vmatmul.mubr.bf16.vlgmr.msra.gmra.mrb[0].mxu1 %v713_v31  ;;  %v10957_v31 = vld [vmem:[%s12914_s2 + $0x7e4] ss:$16 sps:$4 sm:$0xff]  }
 0x1c9   : > { %7009 = vmatpush1.bf16.msra.mxu0 %v10865_v32  ;;  %7665 = vmatpush1.bf16.msra.mxu1 %v10868_v33  ;;  %v10960_v32 = vld [vmem:[%s12914_s2 + $0x7ec] ss:$16 sps:$4 sm:$0xff]   ;;  %v13235_v33 = vrot.slane %v13228_v29, %v12991_v50 }
 0x1ca   : > { %7010 = vmatprep.subr.bf16.mxu0 %v10873_v34  ;;  %7666 = vmatprep.subr.bf16.mxu1 %v10876_v35  ;;  %v10955_v34 = vld [vmem:[%s12914_s2 + $0x7e0] ss:$16 sps:$4 sm:$0xff]   ;;  %v10958_v35 = vld [vmem:[%s12914_s2 + $0x7e8] ss:$16 sps:$4 sm:$0xff]  }
 0x1cb   : > { %7040 = vmatprep.mubr.bf16.mxu0 %v716_v36  ;;  %7696 = vmatprep.mubr.bf16.mxu1 %v716_v36  ;;  %v10964_v36 = vld [vmem:[%s12914_s2 + $0x804] ss:$16 sps:$4 sm:$0xff]  }
 0x1cd   : > { %7011 = vmatpush1.bf16.msra.mxu0 %v10871_v27  ;;  %7667 = vmatpush1.bf16.msra.mxu1 %v10874_v37  ;;  %v10967_v27 = vld [vmem:[%s12914_s2 + $0x80c] ss:$16 sps:$4 sm:$0xff]   ;;  %v590_v37 = vcombine.high %v13235_v33, %v13235_v33 }
 0x1ce   : > { %7012 = vmatprep.subr.bf16.mxu0 %v10879_v38  ;;  %7668 = vmatprep.subr.bf16.mxu1 %v10882_v39  ;;  %v10962_v38 = vld [vmem:[%s12914_s2 + $0x800] ss:$16 sps:$4 sm:$0xff]   ;;  %v715_v39 = vpack.c.bf16 %v13160_v26, %v13160_v26  ;;  %v10976_v26 = vld [vmem:[%s12914_s2 + $0x844] ss:$16 sps:$4 sm:$0xff]  }
 0x1d1   : > { %7013 = vmatpush1.bf16.msra.mxu0 %v10877_v40  ;;  %7669 = vmatpush1.bf16.msra.mxu1 %v10880_v41  ;;  %v10965_v40 = vld [vmem:[%s12914_s2 + $0x808] ss:$16 sps:$4 sm:$0xff]   ;;  %v10970_v41 = vld [vmem:[%s12914_s2 + $0x824] ss:$16 sps:$4 sm:$0xff]  }
 0x1d2   : > { %7014 = vmatprep.subr.bf16.mxu0 %v10885_v42  ;;  %7670 = vmatprep.subr.bf16.mxu1 %v10888_v43  ;;  %v10973_v42 = vld [vmem:[%s12914_s2 + $0x82c] ss:$16 sps:$4 sm:$0xff]   ;;  %v718_v43 = vpack.c.bf16 %v590_v37, %v590_v37  ;;  %v11046_v37 = vld [vmem:[%s12914_s2 + $0x9c0] ss:$16 sps:$4 sm:$0xff]  }
 0x1d5   : > { %7015 = vmatpush1.bf16.msra.mxu0 %v10883_v45  ;;  %7671 = vmatpush1.bf16.msra.mxu1 %v10886_v46  ;;  %v10968_v45 = vld [vmem:[%s12914_s2 + $0x820] ss:$16 sps:$4 sm:$0xff]   ;;  %v10971_v46 = vld [vmem:[%s12914_s2 + $0x828] ss:$16 sps:$4 sm:$0xff]  }
 0x1d6   : > { %7016 = vmatprep.subr.bf16.mxu0 %v10891_v47  ;;  %7672 = vmatprep.subr.bf16.mxu1 %v10894_v48  ;;  %v10979_v47 = vld [vmem:[%s12914_s2 + $0x84c] ss:$16 sps:$4 sm:$0xff]   ;;  %v10974_v48 = vld [vmem:[%s12914_s2 + $0x840] ss:$16 sps:$4 sm:$0xff]  }
 0x1d9   : > { %7017 = vmatpush1.bf16.msra.mxu0 %v10889_v49  ;;  %7673 = vmatpush1.bf16.msra.mxu1 %v10892_v51  ;;  %v10977_v49 = vld [vmem:[%s12914_s2 + $0x848] ss:$16 sps:$4 sm:$0xff]   ;;  %v10982_v51 = vld [vmem:[%s12914_s2 + $0x864] ss:$16 sps:$4 sm:$0xff]  }
 0x1da   : > { %7018 = vmatprep.subr.bf16.mxu0 %v10897_v52  ;;  %7674 = vmatprep.subr.bf16.mxu1 %v10900_v53  ;;  %v10985_v52 = vld [vmem:[%s12914_s2 + $0x86c] ss:$16 sps:$4 sm:$0xff]   ;;  %v10980_v53 = vld [vmem:[%s12914_s2 + $0x860] ss:$16 sps:$4 sm:$0xff]  }
 0x1dd   : > { %7019 = vmatpush1.bf16.msra.mxu0 %v10895_v54  ;;  %7675 = vmatpush1.bf16.msra.mxu1 %v10898_v55  ;;  %v10983_v54 = vld [vmem:[%s12914_s2 + $0x868] ss:$16 sps:$4 sm:$0xff]   ;;  %v10988_v55 = vld [vmem:[%s12914_s2 + $0x884] ss:$16 sps:$4 sm:$0xff]  }
 0x1de   : > { %7020 = vmatprep.subr.bf16.mxu0 %v10903_v56  ;;  %7676 = vmatprep.subr.bf16.mxu1 %v10906_v57  ;;  %v10991_v56 = vld [vmem:[%s12914_s2 + $0x88c] ss:$16 sps:$4 sm:$0xff]   ;;  %v10986_v57 = vld [vmem:[%s12914_s2 + $0x880] ss:$16 sps:$4 sm:$0xff]  }
 0x1e1   : > { %7021 = vmatpush1.bf16.msra.mxu0 %v10901_v58  ;;  %7677 = vmatpush1.bf16.msra.mxu1 %v10904_v59  ;;  %v10989_v58 = vld [vmem:[%s12914_s2 + $0x888] ss:$16 sps:$4 sm:$0xff]   ;;  %v10994_v59 = vld [vmem:[%s12914_s2 + $0x8a4] ss:$16 sps:$4 sm:$0xff]  }
 0x1e2   : > { %7022 = vmatprep.subr.bf16.mxu0 %v10909_v60  ;;  %7678 = vmatprep.subr.bf16.mxu1 %v10912_v61  ;;  %v10997_v60 = vld [vmem:[%s12914_s2 + $0x8ac] ss:$16 sps:$4 sm:$0xff]   ;;  %v10992_v61 = vld [vmem:[%s12914_s2 + $0x8a0] ss:$16 sps:$4 sm:$0xff]  }
 0x1e5   : > { %7023 = vmatpush1.bf16.msra.mxu0 %v10907_v62  ;;  %7679 = vmatpush1.bf16.msra.mxu1 %v10910_v63  ;;  %v10995_v62 = vld [vmem:[%s12914_s2 + $0x8a8] ss:$16 sps:$4 sm:$0xff]   ;;  %v11000_v63 = vld [vmem:[%s12914_s2 + $0x8c4] ss:$16 sps:$4 sm:$0xff]  }
 0x1e6   : > { %7024 = vmatprep.subr.bf16.mxu0 %v10915_v0  ;;  %7680 = vmatprep.subr.bf16.mxu1 %v10918_v1  ;;  %v11003_v0 = vld [vmem:[%s12914_s2 + $0x8cc] ss:$16 sps:$4 sm:$0xff]   ;;  %v10998_v1 = vld [vmem:[%s12914_s2 + $0x8c0] ss:$16 sps:$4 sm:$0xff]  }
 0x1e9   : > { %7025 = vmatpush1.bf16.msra.mxu0 %v10913_v2  ;;  %7681 = vmatpush1.bf16.msra.mxu1 %v10916_v3  ;;  %v11001_v2 = vld [vmem:[%s12914_s2 + $0x8c8] ss:$16 sps:$4 sm:$0xff]   ;;  %v11006_v3 = vld [vmem:[%s12914_s2 + $0x8e4] ss:$16 sps:$4 sm:$0xff]  }
 0x1ea   : > { %7026 = vmatprep.subr.bf16.mxu0 %v10921_v4  ;;  %7682 = vmatprep.subr.bf16.mxu1 %v10924_v5  ;;  %v11009_v4 = vld [vmem:[%s12914_s2 + $0x8ec] ss:$16 sps:$4 sm:$0xff]   ;;  %v11004_v5 = vld [vmem:[%s12914_s2 + $0x8e0] ss:$16 sps:$4 sm:$0xff]  }
 0x1ed   : > { %7027 = vmatpush1.bf16.msra.mxu0 %v10919_v6  ;;  %7683 = vmatpush1.bf16.msra.mxu1 %v10922_v7  ;;  %v11007_v6 = vld [vmem:[%s12914_s2 + $0x8e8] ss:$16 sps:$4 sm:$0xff]   ;;  %v11012_v7 = vld [vmem:[%s12914_s2 + $0x904] ss:$16 sps:$4 sm:$0xff]  }
 0x1ee   : > { %7028 = vmatprep.subr.bf16.mxu0 %v10927_v8  ;;  %7684 = vmatprep.subr.bf16.mxu1 %v10930_v9  ;;  %v11015_v8 = vld [vmem:[%s12914_s2 + $0x90c] ss:$16 sps:$4 sm:$0xff]   ;;  %v11010_v9 = vld [vmem:[%s12914_s2 + $0x900] ss:$16 sps:$4 sm:$0xff]  }
 0x1f1   : > { %7029 = vmatpush1.bf16.msra.mxu0 %v10925_v11  ;;  %7685 = vmatpush1.bf16.msra.mxu1 %v10928_v12  ;;  %v11013_v11 = vld [vmem:[%s12914_s2 + $0x908] ss:$16 sps:$4 sm:$0xff]   ;;  %v11018_v12 = vld [vmem:[%s12914_s2 + $0x924] ss:$16 sps:$4 sm:$0xff]  }
 0x1f2   : > { %7030 = vmatprep.subr.bf16.mxu0 %v10933_v13  ;;  %7686 = vmatprep.subr.bf16.mxu1 %v10936_v14  ;;  %v11021_v13 = vld [vmem:[%s12914_s2 + $0x92c] ss:$16 sps:$4 sm:$0xff]   ;;  %v11016_v14 = vld [vmem:[%s12914_s2 + $0x920] ss:$16 sps:$4 sm:$0xff]  }
 0x1f5   : > { %7031 = vmatpush1.bf16.msra.mxu0 %v10931_v15  ;;  %7687 = vmatpush1.bf16.msra.mxu1 %v10934_v16  ;;  %v11019_v15 = vld [vmem:[%s12914_s2 + $0x928] ss:$16 sps:$4 sm:$0xff]   ;;  %v11024_v16 = vld [vmem:[%s12914_s2 + $0x944] ss:$16 sps:$4 sm:$0xff]  }
 0x1f6   : > { %7032 = vmatprep.subr.bf16.mxu0 %v10939_v17  ;;  %7688 = vmatprep.subr.bf16.mxu1 %v10942_v18  ;;  %v11027_v17 = vld [vmem:[%s12914_s2 + $0x94c] ss:$16 sps:$4 sm:$0xff]   ;;  %v11022_v18 = vld [vmem:[%s12914_s2 + $0x940] ss:$16 sps:$4 sm:$0xff]  }
 0x1f9   : > { %7033 = vmatpush1.bf16.msra.mxu0 %v10937_v19  ;;  %7689 = vmatpush1.bf16.msra.mxu1 %v10940_v20  ;;  %v11025_v19 = vld [vmem:[%s12914_s2 + $0x948] ss:$16 sps:$4 sm:$0xff]   ;;  %v11030_v20 = vld [vmem:[%s12914_s2 + $0x964] ss:$16 sps:$4 sm:$0xff]  }
 0x1fa   : > { %7034 = vmatprep.subr.bf16.mxu0 %v10945_v21  ;;  %7690 = vmatprep.subr.bf16.mxu1 %v10948_v22  ;;  %v11033_v21 = vld [vmem:[%s12914_s2 + $0x96c] ss:$16 sps:$4 sm:$0xff]   ;;  %v11028_v22 = vld [vmem:[%s12914_s2 + $0x960] ss:$16 sps:$4 sm:$0xff]  }
 0x1fd   : > { %7035 = vmatpush1.bf16.msra.mxu0 %v10943_v23  ;;  %7691 = vmatpush1.bf16.msra.mxu1 %v10946_v25  ;;  %v11031_v23 = vld [vmem:[%s12914_s2 + $0x968] ss:$16 sps:$4 sm:$0xff]   ;;  %v11036_v25 = vld [vmem:[%s12914_s2 + $0x984] ss:$16 sps:$4 sm:$0xff]  }
 0x1fe   : > { %7036 = vmatprep.subr.bf16.mxu0 %v10951_v24  ;;  %7692 = vmatprep.subr.bf16.mxu1 %v10954_v10  ;;  %v11039_v24 = vld [vmem:[%s12914_s2 + $0x98c] ss:$16 sps:$4 sm:$0xff]   ;;  %v11034_v10 = vld [vmem:[%s12914_s2 + $0x980] ss:$16 sps:$4 sm:$0xff]  }
 0x201   : > { %7037 = vmatpush1.bf16.msra.mxu0 %v10949_v28  ;;  %7693 = vmatpush1.bf16.msra.mxu1 %v10952_v30  ;;  %v11037_v28 = vld [vmem:[%s12914_s2 + $0x988] ss:$16 sps:$4 sm:$0xff]   ;;  %v11042_v30 = vld [vmem:[%s12914_s2 + $0x9a4] ss:$16 sps:$4 sm:$0xff]  }
 0x202   : > { %7038 = vmatprep.subr.bf16.mxu0 %v10957_v31  ;;  %7694 = vmatprep.subr.bf16.mxu1 %v10960_v32  ;;  %v11045_v31 = vld [vmem:[%s12914_s2 + $0x9ac] ss:$16 sps:$4 sm:$0xff]   ;;  %v11040_v32 = vld [vmem:[%s12914_s2 + $0x9a0] ss:$16 sps:$4 sm:$0xff]  }
 0x205   : > { %7039 = vmatpush1.bf16.msra.mxu0 %v10955_v34  ;;  %7695 = vmatpush1.bf16.msra.mxu1 %v10958_v35  ;;  %v11043_v34 = vld [vmem:[%s12914_s2 + $0x9a8] ss:$16 sps:$4 sm:$0xff]   ;;  %v11048_v35 = vld [vmem:[%s12914_s2 + $0x9c4] ss:$16 sps:$4 sm:$0xff]  }
 0x206   : > { %7049 = vmatprep.subr.bf16.mxu0 %v10964_v36  ;;  %7705 = vmatprep.subr.bf16.mxu1 %v10967_v27  ;;  %v11051_v36 = vld [vmem:[%s12914_s2 + $0x9cc] ss:$16 sps:$4 sm:$0xff]   ;;  %v575_v27 = vcombine.high %v13228_v29, %v13228_v29  ;;  %v11052_v29 = vld [vmem:[%s12914_s2 + $0x9e0] ss:$16 sps:$4 sm:$0xff]  }
 0x208   : > { %7041 = vmatmul.mubr.bf16.vlgmr.msra.gmra.mrb[0].mxu0 %v715_v39  ;;  %7697 = vmatmul.mubr.bf16.vlgmr.msra.gmra.mrb[0].mxu1 %v715_v39  ;;  %v11054_v39 = vld [vmem:[%s12914_s2 + $0x9e4] ss:$16 sps:$4 sm:$0xff]  }
 0x209   : > { %7050 = vmatpush1.bf16.msra.mxu0 %v10962_v38  ;;  %7706 = vmatpush1.bf16.msra.mxu1 %v10965_v40  ;;  %v11049_v38 = vld [vmem:[%s12914_s2 + $0x9c8] ss:$16 sps:$4 sm:$0xff]   ;;  %v11057_v40 = vld [vmem:[%s12914_s2 + $0x9ec] ss:$16 sps:$4 sm:$0xff]  }
 0x20a   : > { %7051 = vmatprep.subr.bf16.mxu0 %v10970_v41  ;;  %7707 = vmatprep.subr.bf16.mxu1 %v10973_v42  ;;  %v13308_v41 = vrot.slane %v575_v27, %v12991_v50  ;;  %v11055_v42 = vld [vmem:[%s12914_s2 + $0x9e8] ss:$16 sps:$4 sm:$0xff]  }
 0x20b   : > { %7081 = vmatprep.mubr.bf16.mxu0 %v718_v43  ;;  %7737 = vmatprep.mubr.bf16.mxu1 %v718_v43  ;;  %v11060_v43 = vld [vmem:[%s12914_s2 + $0xa04] ss:$16 sps:$4 sm:$0xff]   ;;  %v11133_v27 = vld [vmem:[%s12914_s2 + $0xb88] ss:$16 sps:$4 sm:$0xff]  }
 0x20d   : > { %7052 = vmatpush1.bf16.msra.mxu0 %v10968_v45  ;;  %7708 = vmatpush1.bf16.msra.mxu1 %v10971_v46  ;;  %v11063_v45 = vld [vmem:[%s12914_s2 + $0xa0c] ss:$16 sps:$4 sm:$0xff]   ;;  %v591_v46 = vcombine.high %v13308_v41, %v13308_v41 }
 0x20e   : > { %7053 = vmatprep.subr.bf16.mxu0 %v10976_v26  ;;  %7709 = vmatprep.subr.bf16.mxu1 %v10979_v47  ;;  %v717_v26 = vpack.c.bf16 %v13235_v33, %v13235_v33  ;;  %v11058_v47 = vld [vmem:[%s12914_s2 + $0xa00] ss:$16 sps:$4 sm:$0xff]  }
 0x20f   : > { %v11064_v33 = vld [vmem:[%s12914_s2 + $0xa20] ss:$16 sps:$4 sm:$0xff]  }
 0x211   : > { %7054 = vmatpush1.bf16.msra.mxu0 %v10974_v48  ;;  %7710 = vmatpush1.bf16.msra.mxu1 %v10977_v49  ;;  %v11061_v48 = vld [vmem:[%s12914_s2 + $0xa08] ss:$16 sps:$4 sm:$0xff]   ;;  %v11066_v49 = vld [vmem:[%s12914_s2 + $0xa24] ss:$16 sps:$4 sm:$0xff]  }
 0x212   : > { %7055 = vmatprep.subr.bf16.mxu0 %v10982_v51  ;;  %7711 = vmatprep.subr.bf16.mxu1 %v10985_v52  ;;  %v11069_v51 = vld [vmem:[%s12914_s2 + $0xa2c] ss:$16 sps:$4 sm:$0xff]   ;;  %v720_v52 = vpack.c.bf16 %v591_v46, %v591_v46  ;;  %v11145_v46 = vld [vmem:[%s12914_s2 + $0xbc8] ss:$16 sps:$4 sm:$0xff]  }
 0x215   : > { %7056 = vmatpush1.bf16.msra.mxu0 %v10980_v53  ;;  %7712 = vmatpush1.bf16.msra.mxu1 %v10983_v54  ;;  %v11067_v53 = vld [vmem:[%s12914_s2 + $0xa28] ss:$16 sps:$4 sm:$0xff]   ;;  %v11072_v54 = vld [vmem:[%s12914_s2 + $0xa44] ss:$16 sps:$4 sm:$0xff]  }
 0x216   : > { %7057 = vmatprep.subr.bf16.mxu0 %v10988_v55  ;;  %7713 = vmatprep.subr.bf16.mxu1 %v10991_v56  ;;  %v11075_v55 = vld [vmem:[%s12914_s2 + $0xa4c] ss:$16 sps:$4 sm:$0xff]   ;;  %v11070_v56 = vld [vmem:[%s12914_s2 + $0xa40] ss:$16 sps:$4 sm:$0xff]  }
 0x219   : > { %7058 = vmatpush1.bf16.msra.mxu0 %v10986_v57  ;;  %7714 = vmatpush1.bf16.msra.mxu1 %v10989_v58  ;;  %v11073_v57 = vld [vmem:[%s12914_s2 + $0xa48] ss:$16 sps:$4 sm:$0xff]   ;;  %v11078_v58 = vld [vmem:[%s12914_s2 + $0xa64] ss:$16 sps:$4 sm:$0xff]  }
 0x21a   : > { %7059 = vmatprep.subr.bf16.mxu0 %v10994_v59  ;;  %7715 = vmatprep.subr.bf16.mxu1 %v10997_v60  ;;  %v11081_v59 = vld [vmem:[%s12914_s2 + $0xa6c] ss:$16 sps:$4 sm:$0xff]   ;;  %v11076_v60 = vld [vmem:[%s12914_s2 + $0xa60] ss:$16 sps:$4 sm:$0xff]  }
 0x21d   : > { %7060 = vmatpush1.bf16.msra.mxu0 %v10992_v61  ;;  %7716 = vmatpush1.bf16.msra.mxu1 %v10995_v62  ;;  %v11079_v61 = vld [vmem:[%s12914_s2 + $0xa68] ss:$16 sps:$4 sm:$0xff]   ;;  %v11084_v62 = vld [vmem:[%s12914_s2 + $0xa84] ss:$16 sps:$4 sm:$0xff]  }
 0x21e   : > { %7061 = vmatprep.subr.bf16.mxu0 %v11000_v63  ;;  %7717 = vmatprep.subr.bf16.mxu1 %v11003_v0  ;;  %v11087_v63 = vld [vmem:[%s12914_s2 + $0xa8c] ss:$16 sps:$4 sm:$0xff]   ;;  %v11082_v0 = vld [vmem:[%s12914_s2 + $0xa80] ss:$16 sps:$4 sm:$0xff]  }
 0x221   : > { %7062 = vmatpush1.bf16.msra.mxu0 %v10998_v1  ;;  %7718 = vmatpush1.bf16.msra.mxu1 %v11001_v2  ;;  %v11085_v1 = vld [vmem:[%s12914_s2 + $0xa88] ss:$16 sps:$4 sm:$0xff]   ;;  %v11090_v2 = vld [vmem:[%s12914_s2 + $0xaa4] ss:$16 sps:$4 sm:$0xff]  }
 0x222   : > { %7063 = vmatprep.subr.bf16.mxu0 %v11006_v3  ;;  %7719 = vmatprep.subr.bf16.mxu1 %v11009_v4  ;;  %v11093_v3 = vld [vmem:[%s12914_s2 + $0xaac] ss:$16 sps:$4 sm:$0xff]   ;;  %v11088_v4 = vld [vmem:[%s12914_s2 + $0xaa0] ss:$16 sps:$4 sm:$0xff]  }
 0x225   : > { %7064 = vmatpush1.bf16.msra.mxu0 %v11004_v5  ;;  %7720 = vmatpush1.bf16.msra.mxu1 %v11007_v6  ;;  %v11091_v5 = vld [vmem:[%s12914_s2 + $0xaa8] ss:$16 sps:$4 sm:$0xff]   ;;  %v11096_v6 = vld [vmem:[%s12914_s2 + $0xac4] ss:$16 sps:$4 sm:$0xff]  }
 0x226   : > { %7065 = vmatprep.subr.bf16.mxu0 %v11012_v7  ;;  %7721 = vmatprep.subr.bf16.mxu1 %v11015_v8  ;;  %v11099_v7 = vld [vmem:[%s12914_s2 + $0xacc] ss:$16 sps:$4 sm:$0xff]   ;;  %v11094_v8 = vld [vmem:[%s12914_s2 + $0xac0] ss:$16 sps:$4 sm:$0xff]  }
 0x229   : > { %7066 = vmatpush1.bf16.msra.mxu0 %v11010_v9  ;;  %7722 = vmatpush1.bf16.msra.mxu1 %v11013_v11  ;;  %v11097_v9 = vld [vmem:[%s12914_s2 + $0xac8] ss:$16 sps:$4 sm:$0xff]   ;;  %v11102_v11 = vld [vmem:[%s12914_s2 + $0xae4] ss:$16 sps:$4 sm:$0xff]  }
 0x22a   : > { %7067 = vmatprep.subr.bf16.mxu0 %v11018_v12  ;;  %7723 = vmatprep.subr.bf16.mxu1 %v11021_v13  ;;  %v11105_v12 = vld [vmem:[%s12914_s2 + $0xaec] ss:$16 sps:$4 sm:$0xff]   ;;  %v11100_v13 = vld [vmem:[%s12914_s2 + $0xae0] ss:$16 sps:$4 sm:$0xff]  }
 0x22d   : > { %7068 = vmatpush1.bf16.msra.mxu0 %v11016_v14  ;;  %7724 = vmatpush1.bf16.msra.mxu1 %v11019_v15  ;;  %v11103_v14 = vld [vmem:[%s12914_s2 + $0xae8] ss:$16 sps:$4 sm:$0xff]   ;;  %v11108_v15 = vld [vmem:[%s12914_s2 + $0xb04] ss:$16 sps:$4 sm:$0xff]  }
 0x22e   : > { %7069 = vmatprep.subr.bf16.mxu0 %v11024_v16  ;;  %7725 = vmatprep.subr.bf16.mxu1 %v11027_v17  ;;  %v11111_v16 = vld [vmem:[%s12914_s2 + $0xb0c] ss:$16 sps:$4 sm:$0xff]   ;;  %v11106_v17 = vld [vmem:[%s12914_s2 + $0xb00] ss:$16 sps:$4 sm:$0xff]  }
 0x231   : > { %7070 = vmatpush1.bf16.msra.mxu0 %v11022_v18  ;;  %7726 = vmatpush1.bf16.msra.mxu1 %v11025_v19  ;;  %v11109_v18 = vld [vmem:[%s12914_s2 + $0xb08] ss:$16 sps:$4 sm:$0xff]   ;;  %v11114_v19 = vld [vmem:[%s12914_s2 + $0xb24] ss:$16 sps:$4 sm:$0xff]  }
 0x232   : > { %7071 = vmatprep.subr.bf16.mxu0 %v11030_v20  ;;  %7727 = vmatprep.subr.bf16.mxu1 %v11033_v21  ;;  %v11117_v20 = vld [vmem:[%s12914_s2 + $0xb2c] ss:$16 sps:$4 sm:$0xff]   ;;  %v11112_v21 = vld [vmem:[%s12914_s2 + $0xb20] ss:$16 sps:$4 sm:$0xff]  }
 0x235   : > { %7072 = vmatpush1.bf16.msra.mxu0 %v11028_v22  ;;  %7728 = vmatpush1.bf16.msra.mxu1 %v11031_v23  ;;  %v11115_v22 = vld [vmem:[%s12914_s2 + $0xb28] ss:$16 sps:$4 sm:$0xff]   ;;  %v11120_v23 = vld [vmem:[%s12914_s2 + $0xb44] ss:$16 sps:$4 sm:$0xff]  }
 0x236   : > { %7073 = vmatprep.subr.bf16.mxu0 %v11036_v25  ;;  %7729 = vmatprep.subr.bf16.mxu1 %v11039_v24  ;;  %v11123_v25 = vld [vmem:[%s12914_s2 + $0xb4c] ss:$16 sps:$4 sm:$0xff]   ;;  %v11118_v24 = vld [vmem:[%s12914_s2 + $0xb40] ss:$16 sps:$4 sm:$0xff]  }
 0x239   : > { %7074 = vmatpush1.bf16.msra.mxu0 %v11034_v10  ;;  %7730 = vmatpush1.bf16.msra.mxu1 %v11037_v28  ;;  %v11121_v10 = vld [vmem:[%s12914_s2 + $0xb48] ss:$16 sps:$4 sm:$0xff]   ;;  %v11126_v28 = vld [vmem:[%s12914_s2 + $0xb64] ss:$16 sps:$4 sm:$0xff]  }
 0x23a   : > { %7075 = vmatprep.subr.bf16.mxu0 %v11042_v30  ;;  %7731 = vmatprep.subr.bf16.mxu1 %v11045_v31  ;;  %v11129_v30 = vld [vmem:[%s12914_s2 + $0xb6c] ss:$16 sps:$4 sm:$0xff]   ;;  %v11124_v31 = vld [vmem:[%s12914_s2 + $0xb60] ss:$16 sps:$4 sm:$0xff]  }
 0x23d   : > { %7076 = vmatpush1.bf16.msra.mxu0 %v11040_v32  ;;  %7732 = vmatpush1.bf16.msra.mxu1 %v11043_v34  ;;  %v11127_v32 = vld [vmem:[%s12914_s2 + $0xb68] ss:$16 sps:$4 sm:$0xff]   ;;  %v11132_v34 = vld [vmem:[%s12914_s2 + $0xb84] ss:$16 sps:$4 sm:$0xff]  }
 0x23e   : > { %7077 = vmatprep.subr.bf16.mxu0 %v11048_v35  ;;  %7733 = vmatprep.subr.bf16.mxu1 %v11051_v36  ;;  %v11135_v35 = vld [vmem:[%s12914_s2 + $0xb8c] ss:$16 sps:$4 sm:$0xff]   ;;  %v11130_v36 = vld [vmem:[%s12914_s2 + $0xb80] ss:$16 sps:$4 sm:$0xff]  }
 0x241   : > { %7078 = vmatpush1.bf16.msra.mxu0 %v11046_v37  ;;  %7734 = vmatpush1.bf16.msra.mxu1 %v11049_v38  ;;  %v11138_v37 = vld [vmem:[%s12914_s2 + $0xba4] ss:$16 sps:$4 sm:$0xff]   ;;  %v11141_v38 = vld [vmem:[%s12914_s2 + $0xbac] ss:$16 sps:$4 sm:$0xff]  }
 0x242   : > { %7079 = vmatprep.subr.bf16.mxu0 %v11054_v39  ;;  %7735 = vmatprep.subr.bf16.mxu1 %v11057_v40  ;;  %v11136_v39 = vld [vmem:[%s12914_s2 + $0xba0] ss:$16 sps:$4 sm:$0xff]   ;;  %v11139_v40 = vld [vmem:[%s12914_s2 + $0xba8] ss:$16 sps:$4 sm:$0xff]  }
 0x245   : > { %7080 = vmatpush1.bf16.msra.mxu0 %v11052_v29  ;;  %7736 = vmatpush1.bf16.msra.mxu1 %v11055_v42  ;;  %v11144_v29 = vld [vmem:[%s12914_s2 + $0xbc4] ss:$16 sps:$4 sm:$0xff]   ;;  %v11147_v42 = vld [vmem:[%s12914_s2 + $0xbcc] ss:$16 sps:$4 sm:$0xff]  }
 0x246   : > { %7090 = vmatprep.subr.bf16.mxu0 %v11060_v43  ;;  %7746 = vmatprep.subr.bf16.mxu1 %v11063_v45  ;;  %v13375_v43 = vld [vmem:[%s12940_s15 + $0x18] sm:$0xff] }
 0x247   : > { %v11142_v45 = vld [vmem:[%s12914_s2 + $0xbc0] ss:$16 sps:$4 sm:$0xff]  }
 0x248   : > { %7082 = vmatmul.mubr.bf16.vlgmr.msra.gmra.mrb[0].mxu0 %v717_v26  ;;  %7738 = vmatmul.mubr.bf16.vlgmr.msra.gmra.mrb[0].mxu1 %v717_v26  ;;  %v11150_v26 = vld [vmem:[%s12914_s2 + $0xbe4] ss:$16 sps:$4 sm:$0xff]  }
 0x249   : > { %7091 = vmatpush1.bf16.msra.mxu0 %v11058_v47  ;;  %7747 = vmatpush1.bf16.msra.mxu1 %v11061_v48  ;;  %v11153_v47 = vld [vmem:[%s12914_s2 + $0xbec] ss:$16 sps:$4 sm:$0xff]   ;;  %v13383_v48 = vrot.slane %v13375_v43, %v12991_v50 }
 0x24a   : > { %7092 = vmatprep.subr.bf16.mxu0 %v11066_v49  ;;  %7748 = vmatprep.subr.bf16.mxu1 %v11069_v51  ;;  %v11148_v49 = vld [vmem:[%s12914_s2 + $0xbe0] ss:$16 sps:$4 sm:$0xff]   ;;  %v11151_v51 = vld [vmem:[%s12914_s2 + $0xbe8] ss:$16 sps:$4 sm:$0xff]  }
 0x24b   : > { %7122 = vmatprep.mubr.bf16.mxu0 %v720_v52  ;;  %7778 = vmatprep.mubr.bf16.mxu1 %v720_v52  ;;  %v11157_v52 = vld [vmem:[%s12914_s2 + $0xc04] ss:$16 sps:$4 sm:$0xff]  }
 0x24d   : > { %7093 = vmatpush1.bf16.msra.mxu0 %v11064_v33  ;;  %7749 = vmatpush1.bf16.msra.mxu1 %v11067_v53  ;;  %v11160_v33 = vld [vmem:[%s12914_s2 + $0xc0c] ss:$16 sps:$4 sm:$0xff]   ;;  %v607_v53 = vcombine.high %v13383_v48, %v13383_v48 }
 0x24e   : > { %7094 = vmatprep.subr.bf16.mxu0 %v11072_v54  ;;  %7750 = vmatprep.subr.bf16.mxu1 %v11075_v55  ;;  %v719_v54 = vpack.c.bf16 %v13308_v41, %v13308_v41  ;;  %v11155_v55 = vld [vmem:[%s12914_s2 + $0xc00] ss:$16 sps:$4 sm:$0xff]  }
 0x24f   : > { %v11161_v41 = vld [vmem:[%s12914_s2 + $0xc20] ss:$16 sps:$4 sm:$0xff]  }
 0x251   : > { %7095 = vmatpush1.bf16.msra.mxu0 %v11070_v56  ;;  %7751 = vmatpush1.bf16.msra.mxu1 %v11073_v57  ;;  %v11158_v56 = vld [vmem:[%s12914_s2 + $0xc08] ss:$16 sps:$4 sm:$0xff]   ;;  %v11163_v57 = vld [vmem:[%s12914_s2 + $0xc24] ss:$16 sps:$4 sm:$0xff]  }
 0x252   : > { %7096 = vmatprep.subr.bf16.mxu0 %v11078_v58  ;;  %7752 = vmatprep.subr.bf16.mxu1 %v11081_v59  ;;  %v11166_v58 = vld [vmem:[%s12914_s2 + $0xc2c] ss:$16 sps:$4 sm:$0xff]   ;;  %v722_v59 = vpack.c.bf16 %v607_v53, %v607_v53  ;;  %v11239_v53 = vld [vmem:[%s12914_s2 + $0xdc0] ss:$16 sps:$4 sm:$0xff]  }
 0x255   : > { %7097 = vmatpush1.bf16.msra.mxu0 %v11076_v60  ;;  %7753 = vmatpush1.bf16.msra.mxu1 %v11079_v61  ;;  %v11164_v60 = vld [vmem:[%s12914_s2 + $0xc28] ss:$16 sps:$4 sm:$0xff]   ;;  %v11169_v61 = vld [vmem:[%s12914_s2 + $0xc44] ss:$16 sps:$4 sm:$0xff]  }
 0x256   : > { %7098 = vmatprep.subr.bf16.mxu0 %v11084_v62  ;;  %7754 = vmatprep.subr.bf16.mxu1 %v11087_v63  ;;  %v11172_v62 = vld [vmem:[%s12914_s2 + $0xc4c] ss:$16 sps:$4 sm:$0xff]   ;;  %v11167_v63 = vld [vmem:[%s12914_s2 + $0xc40] ss:$16 sps:$4 sm:$0xff]  }
 0x259   : > { %7099 = vmatpush1.bf16.msra.mxu0 %v11082_v0  ;;  %7755 = vmatpush1.bf16.msra.mxu1 %v11085_v1  ;;  %v11170_v0 = vld [vmem:[%s12914_s2 + $0xc48] ss:$16 sps:$4 sm:$0xff]   ;;  %v11175_v1 = vld [vmem:[%s12914_s2 + $0xc64] ss:$16 sps:$4 sm:$0xff]  }
 0x25a   : > { %7100 = vmatprep.subr.bf16.mxu0 %v11090_v2  ;;  %7756 = vmatprep.subr.bf16.mxu1 %v11093_v3  ;;  %v11178_v2 = vld [vmem:[%s12914_s2 + $0xc6c] ss:$16 sps:$4 sm:$0xff]   ;;  %v11173_v3 = vld [vmem:[%s12914_s2 + $0xc60] ss:$16 sps:$4 sm:$0xff]  }
 0x25d   : > { %7101 = vmatpush1.bf16.msra.mxu0 %v11088_v4  ;;  %7757 = vmatpush1.bf16.msra.mxu1 %v11091_v5  ;;  %v11176_v4 = vld [vmem:[%s12914_s2 + $0xc68] ss:$16 sps:$4 sm:$0xff]   ;;  %v11181_v5 = vld [vmem:[%s12914_s2 + $0xc84] ss:$16 sps:$4 sm:$0xff]  }
 0x25e   : > { %7102 = vmatprep.subr.bf16.mxu0 %v11096_v6  ;;  %7758 = vmatprep.subr.bf16.mxu1 %v11099_v7  ;;  %v11184_v6 = vld [vmem:[%s12914_s2 + $0xc8c] ss:$16 sps:$4 sm:$0xff]   ;;  %v11179_v7 = vld [vmem:[%s12914_s2 + $0xc80] ss:$16 sps:$4 sm:$0xff]  }
 0x261   : > { %7103 = vmatpush1.bf16.msra.mxu0 %v11094_v8  ;;  %7759 = vmatpush1.bf16.msra.mxu1 %v11097_v9  ;;  %v11182_v8 = vld [vmem:[%s12914_s2 + $0xc88] ss:$16 sps:$4 sm:$0xff]   ;;  %v11187_v9 = vld [vmem:[%s12914_s2 + $0xca4] ss:$16 sps:$4 sm:$0xff]  }
 0x262   : > { %7104 = vmatprep.subr.bf16.mxu0 %v11102_v11  ;;  %7760 = vmatprep.subr.bf16.mxu1 %v11105_v12  ;;  %v11190_v11 = vld [vmem:[%s12914_s2 + $0xcac] ss:$16 sps:$4 sm:$0xff]   ;;  %v11185_v12 = vld [vmem:[%s12914_s2 + $0xca0] ss:$16 sps:$4 sm:$0xff]  }
 0x265   : > { %7105 = vmatpush1.bf16.msra.mxu0 %v11100_v13  ;;  %7761 = vmatpush1.bf16.msra.mxu1 %v11103_v14  ;;  %v11188_v13 = vld [vmem:[%s12914_s2 + $0xca8] ss:$16 sps:$4 sm:$0xff]   ;;  %v11193_v14 = vld [vmem:[%s12914_s2 + $0xcc4] ss:$16 sps:$4 sm:$0xff]  }
 0x266   : > { %7106 = vmatprep.subr.bf16.mxu0 %v11108_v15  ;;  %7762 = vmatprep.subr.bf16.mxu1 %v11111_v16  ;;  %v11196_v15 = vld [vmem:[%s12914_s2 + $0xccc] ss:$16 sps:$4 sm:$0xff]   ;;  %v11191_v16 = vld [vmem:[%s12914_s2 + $0xcc0] ss:$16 sps:$4 sm:$0xff]  }
 0x269   : > { %7107 = vmatpush1.bf16.msra.mxu0 %v11106_v17  ;;  %7763 = vmatpush1.bf16.msra.mxu1 %v11109_v18  ;;  %v11194_v17 = vld [vmem:[%s12914_s2 + $0xcc8] ss:$16 sps:$4 sm:$0xff]   ;;  %v11199_v18 = vld [vmem:[%s12914_s2 + $0xce4] ss:$16 sps:$4 sm:$0xff]  }
 0x26a   : > { %7108 = vmatprep.subr.bf16.mxu0 %v11114_v19  ;;  %7764 = vmatprep.subr.bf16.mxu1 %v11117_v20  ;;  %v11202_v19 = vld [vmem:[%s12914_s2 + $0xcec] ss:$16 sps:$4 sm:$0xff]   ;;  %v11197_v20 = vld [vmem:[%s12914_s2 + $0xce0] ss:$16 sps:$4 sm:$0xff]  }
 0x26d   : > { %7109 = vmatpush1.bf16.msra.mxu0 %v11112_v21  ;;  %7765 = vmatpush1.bf16.msra.mxu1 %v11115_v22  ;;  %v11200_v21 = vld [vmem:[%s12914_s2 + $0xce8] ss:$16 sps:$4 sm:$0xff]   ;;  %v11205_v22 = vld [vmem:[%s12914_s2 + $0xd04] ss:$16 sps:$4 sm:$0xff]  }
 0x26e   : > { %7110 = vmatprep.subr.bf16.mxu0 %v11120_v23  ;;  %7766 = vmatprep.subr.bf16.mxu1 %v11123_v25  ;;  %v11208_v23 = vld [vmem:[%s12914_s2 + $0xd0c] ss:$16 sps:$4 sm:$0xff]   ;;  %v11203_v25 = vld [vmem:[%s12914_s2 + $0xd00] ss:$16 sps:$4 sm:$0xff]  }
 0x271   : > { %7111 = vmatpush1.bf16.msra.mxu0 %v11118_v24  ;;  %7767 = vmatpush1.bf16.msra.mxu1 %v11121_v10  ;;  %v11206_v24 = vld [vmem:[%s12914_s2 + $0xd08] ss:$16 sps:$4 sm:$0xff]   ;;  %v11211_v10 = vld [vmem:[%s12914_s2 + $0xd24] ss:$16 sps:$4 sm:$0xff]  }
 0x272   : > { %7112 = vmatprep.subr.bf16.mxu0 %v11126_v28  ;;  %7768 = vmatprep.subr.bf16.mxu1 %v11129_v30  ;;  %v11214_v28 = vld [vmem:[%s12914_s2 + $0xd2c] ss:$16 sps:$4 sm:$0xff]   ;;  %v11209_v30 = vld [vmem:[%s12914_s2 + $0xd20] ss:$16 sps:$4 sm:$0xff]  }
 0x275   : > { %7113 = vmatpush1.bf16.msra.mxu0 %v11124_v31  ;;  %7769 = vmatpush1.bf16.msra.mxu1 %v11127_v32  ;;  %v11212_v31 = vld [vmem:[%s12914_s2 + $0xd28] ss:$16 sps:$4 sm:$0xff]   ;;  %v11217_v32 = vld [vmem:[%s12914_s2 + $0xd44] ss:$16 sps:$4 sm:$0xff]  }
 0x276   : > { %7114 = vmatprep.subr.bf16.mxu0 %v11132_v34  ;;  %7770 = vmatprep.subr.bf16.mxu1 %v11135_v35  ;;  %v11220_v34 = vld [vmem:[%s12914_s2 + $0xd4c] ss:$16 sps:$4 sm:$0xff]   ;;  %v11215_v35 = vld [vmem:[%s12914_s2 + $0xd40] ss:$16 sps:$4 sm:$0xff]  }
 0x279   : > { %7115 = vmatpush1.bf16.msra.mxu0 %v11130_v36  ;;  %7771 = vmatpush1.bf16.msra.mxu1 %v11133_v27  ;;  %v11218_v36 = vld [vmem:[%s12914_s2 + $0xd48] ss:$16 sps:$4 sm:$0xff]   ;;  %v11223_v27 = vld [vmem:[%s12914_s2 + $0xd64] ss:$16 sps:$4 sm:$0xff]  }
 0x27a   : > { %7116 = vmatprep.subr.bf16.mxu0 %v11138_v37  ;;  %7772 = vmatprep.subr.bf16.mxu1 %v11141_v38  ;;  %v11226_v37 = vld [vmem:[%s12914_s2 + $0xd6c] ss:$16 sps:$4 sm:$0xff]   ;;  %v11221_v38 = vld [vmem:[%s12914_s2 + $0xd60] ss:$16 sps:$4 sm:$0xff]  }
 0x27d   : > { %7117 = vmatpush1.bf16.msra.mxu0 %v11136_v39  ;;  %7773 = vmatpush1.bf16.msra.mxu1 %v11139_v40  ;;  %v11224_v39 = vld [vmem:[%s12914_s2 + $0xd68] ss:$16 sps:$4 sm:$0xff]   ;;  %v11229_v40 = vld [vmem:[%s12914_s2 + $0xd84] ss:$16 sps:$4 sm:$0xff]  }
 0x27e   : > { %7118 = vmatprep.subr.bf16.mxu0 %v11144_v29  ;;  %7774 = vmatprep.subr.bf16.mxu1 %v11147_v42  ;;  %v11232_v29 = vld [vmem:[%s12914_s2 + $0xd8c] ss:$16 sps:$4 sm:$0xff]   ;;  %v11227_v42 = vld [vmem:[%s12914_s2 + $0xd80] ss:$16 sps:$4 sm:$0xff]  }
 0x281   : > { %7119 = vmatpush1.bf16.msra.mxu0 %v11142_v45  ;;  %7775 = vmatpush1.bf16.msra.mxu1 %v11145_v46  ;;  %v11230_v45 = vld [vmem:[%s12914_s2 + $0xd88] ss:$16 sps:$4 sm:$0xff]   ;;  %v11235_v46 = vld [vmem:[%s12914_s2 + $0xda4] ss:$16 sps:$4 sm:$0xff]  }
 0x282   : > { %7120 = vmatprep.subr.bf16.mxu0 %v11150_v26  ;;  %7776 = vmatprep.subr.bf16.mxu1 %v11153_v47  ;;  %v11238_v26 = vld [vmem:[%s12914_s2 + $0xdac] ss:$16 sps:$4 sm:$0xff]   ;;  %v11233_v47 = vld [vmem:[%s12914_s2 + $0xda0] ss:$16 sps:$4 sm:$0xff]  }
 0x285   : > { %7121 = vmatpush1.bf16.msra.mxu0 %v11148_v49  ;;  %7777 = vmatpush1.bf16.msra.mxu1 %v11151_v51  ;;  %v11236_v49 = vld [vmem:[%s12914_s2 + $0xda8] ss:$16 sps:$4 sm:$0xff]   ;;  %v11241_v51 = vld [vmem:[%s12914_s2 + $0xdc4] ss:$16 sps:$4 sm:$0xff]  }
 0x286   : > { %7131 = vmatprep.subr.bf16.mxu0 %v11157_v52  ;;  %7787 = vmatprep.subr.bf16.mxu1 %v11160_v33  ;;  %v11244_v52 = vld [vmem:[%s12914_s2 + $0xdcc] ss:$16 sps:$4 sm:$0xff]   ;;  %v592_v33 = vcombine.high %v13375_v43, %v13375_v43  ;;  %v11245_v43 = vld [vmem:[%s12914_s2 + $0xde0] ss:$16 sps:$4 sm:$0xff]  }
 0x288   : > { %7123 = vmatmul.mubr.bf16.vlgmr.msra.gmra.mrb[0].mxu0 %v719_v54  ;;  %7779 = vmatmul.mubr.bf16.vlgmr.msra.gmra.mrb[0].mxu1 %v719_v54  ;;  %v11242_v54 = vld [vmem:[%s12914_s2 + $0xdc8] ss:$16 sps:$4 sm:$0xff]  }
 0x289   : > { %7132 = vmatpush1.bf16.msra.mxu0 %v11155_v55  ;;  %7788 = vmatpush1.bf16.msra.mxu1 %v11158_v56  ;;  %v11247_v55 = vld [vmem:[%s12914_s2 + $0xde4] ss:$16 sps:$4 sm:$0xff]   ;;  %v11250_v56 = vld [vmem:[%s12914_s2 + $0xdec] ss:$16 sps:$4 sm:$0xff]  }
 0x28a   : > { %7133 = vmatprep.subr.bf16.mxu0 %v11163_v57  ;;  %7789 = vmatprep.subr.bf16.mxu1 %v11166_v58  ;;  %v13456_v57 = vrot.slane %v592_v33, %v12991_v50  ;;  %v11248_v58 = vld [vmem:[%s12914_s2 + $0xde8] ss:$16 sps:$4 sm:$0xff]  }
 0x28b   : > { %7163 = vmatprep.mubr.bf16.mxu0 %v722_v59  ;;  %7819 = vmatprep.mubr.bf16.mxu1 %v722_v59  ;;  %v11253_v59 = vld [vmem:[%s12914_s2 + $0xe04] ss:$16 sps:$4 sm:$0xff]   ;;  %v11326_v33 = vld [vmem:[%s12914_s2 + $0xf88] ss:$16 sps:$4 sm:$0xff]  }
 0x28d   : > { %7134 = vmatpush1.bf16.msra.mxu0 %v11161_v41  ;;  %7790 = vmatpush1.bf16.msra.mxu1 %v11164_v60  ;;  %v11256_v41 = vld [vmem:[%s12914_s2 + $0xe0c] ss:$16 sps:$4 sm:$0xff]   ;;  %v608_v60 = vcombine.high %v13456_v57, %v13456_v57 }
 0x28e   : > { %7135 = vmatprep.subr.bf16.mxu0 %v11169_v61  ;;  %7791 = vmatprep.subr.bf16.mxu1 %v11172_v62  ;;  %v721_v61 = vpack.c.bf16 %v13383_v48, %v13383_v48  ;;  %v11251_v62 = vld [vmem:[%s12914_s2 + $0xe00] ss:$16 sps:$4 sm:$0xff]  }
 0x28f   : > { %v11257_v48 = vld [vmem:[%s12914_s2 + $0xe20] ss:$16 sps:$4 sm:$0xff]  }
 0x291   : > { %7136 = vmatpush1.bf16.msra.mxu0 %v11167_v63  ;;  %7792 = vmatpush1.bf16.msra.mxu1 %v11170_v0  ;;  %v11254_v63 = vld [vmem:[%s12914_s2 + $0xe08] ss:$16 sps:$4 sm:$0xff]   ;;  %v11259_v0 = vld [vmem:[%s12914_s2 + $0xe24] ss:$16 sps:$4 sm:$0xff]  }
 0x292   : > { %7137 = vmatprep.subr.bf16.mxu0 %v11175_v1  ;;  %7793 = vmatprep.subr.bf16.mxu1 %v11178_v2  ;;  %v11262_v1 = vld [vmem:[%s12914_s2 + $0xe2c] ss:$16 sps:$4 sm:$0xff]   ;;  %v724_v2 = vpack.c.bf16 %v608_v60, %v608_v60  ;;  %v11338_v60 = vld [vmem:[%s12914_s2 + $0xfc8] ss:$16 sps:$4 sm:$0xff]  }
 0x295   : > { %7138 = vmatpush1.bf16.msra.mxu0 %v11173_v3  ;;  %7794 = vmatpush1.bf16.msra.mxu1 %v11176_v4  ;;  %v11260_v3 = vld [vmem:[%s12914_s2 + $0xe28] ss:$16 sps:$4 sm:$0xff]   ;;  %v11265_v4 = vld [vmem:[%s12914_s2 + $0xe44] ss:$16 sps:$4 sm:$0xff]  }
 0x296   : > { %7139 = vmatprep.subr.bf16.mxu0 %v11181_v5  ;;  %7795 = vmatprep.subr.bf16.mxu1 %v11184_v6  ;;  %v11268_v5 = vld [vmem:[%s12914_s2 + $0xe4c] ss:$16 sps:$4 sm:$0xff]   ;;  %v11263_v6 = vld [vmem:[%s12914_s2 + $0xe40] ss:$16 sps:$4 sm:$0xff]  }
 0x299   : > { %7140 = vmatpush1.bf16.msra.mxu0 %v11179_v7  ;;  %7796 = vmatpush1.bf16.msra.mxu1 %v11182_v8  ;;  %v11266_v7 = vld [vmem:[%s12914_s2 + $0xe48] ss:$16 sps:$4 sm:$0xff]   ;;  %v11271_v8 = vld [vmem:[%s12914_s2 + $0xe64] ss:$16 sps:$4 sm:$0xff]  }
 0x29a   : > { %7141 = vmatprep.subr.bf16.mxu0 %v11187_v9  ;;  %7797 = vmatprep.subr.bf16.mxu1 %v11190_v11  ;;  %v11274_v9 = vld [vmem:[%s12914_s2 + $0xe6c] ss:$16 sps:$4 sm:$0xff]   ;;  %v11269_v11 = vld [vmem:[%s12914_s2 + $0xe60] ss:$16 sps:$4 sm:$0xff]  }
 0x29d   : > { %7142 = vmatpush1.bf16.msra.mxu0 %v11185_v12  ;;  %7798 = vmatpush1.bf16.msra.mxu1 %v11188_v13  ;;  %v11272_v12 = vld [vmem:[%s12914_s2 + $0xe68] ss:$16 sps:$4 sm:$0xff]   ;;  %v11277_v13 = vld [vmem:[%s12914_s2 + $0xe84] ss:$16 sps:$4 sm:$0xff]  }
 0x29e   : > { %7143 = vmatprep.subr.bf16.mxu0 %v11193_v14  ;;  %7799 = vmatprep.subr.bf16.mxu1 %v11196_v15  ;;  %v11280_v14 = vld [vmem:[%s12914_s2 + $0xe8c] ss:$16 sps:$4 sm:$0xff]   ;;  %v11275_v15 = vld [vmem:[%s12914_s2 + $0xe80] ss:$16 sps:$4 sm:$0xff]  }
 0x2a1   : > { %7144 = vmatpush1.bf16.msra.mxu0 %v11191_v16  ;;  %7800 = vmatpush1.bf16.msra.mxu1 %v11194_v17  ;;  %v11278_v16 = vld [vmem:[%s12914_s2 + $0xe88] ss:$16 sps:$4 sm:$0xff]   ;;  %v11283_v17 = vld [vmem:[%s12914_s2 + $0xea4] ss:$16 sps:$4 sm:$0xff]  }
 0x2a2   : > { %7145 = vmatprep.subr.bf16.mxu0 %v11199_v18  ;;  %7801 = vmatprep.subr.bf16.mxu1 %v11202_v19  ;;  %v11286_v18 = vld [vmem:[%s12914_s2 + $0xeac] ss:$16 sps:$4 sm:$0xff]   ;;  %v11281_v19 = vld [vmem:[%s12914_s2 + $0xea0] ss:$16 sps:$4 sm:$0xff]  }
 0x2a5   : > { %7146 = vmatpush1.bf16.msra.mxu0 %v11197_v20  ;;  %7802 = vmatpush1.bf16.msra.mxu1 %v11200_v21  ;;  %v11284_v20 = vld [vmem:[%s12914_s2 + $0xea8] ss:$16 sps:$4 sm:$0xff]   ;;  %v11289_v21 = vld [vmem:[%s12914_s2 + $0xec4] ss:$16 sps:$4 sm:$0xff]  }
 0x2a6   : > { %7147 = vmatprep.subr.bf16.mxu0 %v11205_v22  ;;  %7803 = vmatprep.subr.bf16.mxu1 %v11208_v23  ;;  %v11292_v22 = vld [vmem:[%s12914_s2 + $0xecc] ss:$16 sps:$4 sm:$0xff]   ;;  %v11287_v23 = vld [vmem:[%s12914_s2 + $0xec0] ss:$16 sps:$4 sm:$0xff]  }
 0x2a9   : > { %7148 = vmatpush1.bf16.msra.mxu0 %v11203_v25  ;;  %7804 = vmatpush1.bf16.msra.mxu1 %v11206_v24  ;;  %v11290_v25 = vld [vmem:[%s12914_s2 + $0xec8] ss:$16 sps:$4 sm:$0xff]   ;;  %v11295_v24 = vld [vmem:[%s12914_s2 + $0xee4] ss:$16 sps:$4 sm:$0xff]  }
 0x2aa   : > { %7149 = vmatprep.subr.bf16.mxu0 %v11211_v10  ;;  %7805 = vmatprep.subr.bf16.mxu1 %v11214_v28  ;;  %v11298_v10 = vld [vmem:[%s12914_s2 + $0xeec] ss:$16 sps:$4 sm:$0xff]   ;;  %v11293_v28 = vld [vmem:[%s12914_s2 + $0xee0] ss:$16 sps:$4 sm:$0xff]  }
 0x2ad   : > { %7150 = vmatpush1.bf16.msra.mxu0 %v11209_v30  ;;  %7806 = vmatpush1.bf16.msra.mxu1 %v11212_v31  ;;  %v11296_v30 = vld [vmem:[%s12914_s2 + $0xee8] ss:$16 sps:$4 sm:$0xff]   ;;  %v11301_v31 = vld [vmem:[%s12914_s2 + $0xf04] ss:$16 sps:$4 sm:$0xff]  }
 0x2ae   : > { %7151 = vmatprep.subr.bf16.mxu0 %v11217_v32  ;;  %7807 = vmatprep.subr.bf16.mxu1 %v11220_v34  ;;  %v11304_v32 = vld [vmem:[%s12914_s2 + $0xf0c] ss:$16 sps:$4 sm:$0xff]   ;;  %v11299_v34 = vld [vmem:[%s12914_s2 + $0xf00] ss:$16 sps:$4 sm:$0xff]  }
 0x2b1   : > { %7152 = vmatpush1.bf16.msra.mxu0 %v11215_v35  ;;  %7808 = vmatpush1.bf16.msra.mxu1 %v11218_v36  ;;  %v11302_v35 = vld [vmem:[%s12914_s2 + $0xf08] ss:$16 sps:$4 sm:$0xff]   ;;  %v11307_v36 = vld [vmem:[%s12914_s2 + $0xf24] ss:$16 sps:$4 sm:$0xff]  }
 0x2b2   : > { %7153 = vmatprep.subr.bf16.mxu0 %v11223_v27  ;;  %7809 = vmatprep.subr.bf16.mxu1 %v11226_v37  ;;  %v11310_v27 = vld [vmem:[%s12914_s2 + $0xf2c] ss:$16 sps:$4 sm:$0xff]   ;;  %v11305_v37 = vld [vmem:[%s12914_s2 + $0xf20] ss:$16 sps:$4 sm:$0xff]  }
 0x2b5   : > { %7154 = vmatpush1.bf16.msra.mxu0 %v11221_v38  ;;  %7810 = vmatpush1.bf16.msra.mxu1 %v11224_v39  ;;  %v11308_v38 = vld [vmem:[%s12914_s2 + $0xf28] ss:$16 sps:$4 sm:$0xff]   ;;  %v11313_v39 = vld [vmem:[%s12914_s2 + $0xf44] ss:$16 sps:$4 sm:$0xff]  }
 0x2b6   : > { %7155 = vmatprep.subr.bf16.mxu0 %v11229_v40  ;;  %7811 = vmatprep.subr.bf16.mxu1 %v11232_v29  ;;  %v11316_v40 = vld [vmem:[%s12914_s2 + $0xf4c] ss:$16 sps:$4 sm:$0xff]   ;;  %v11311_v29 = vld [vmem:[%s12914_s2 + $0xf40] ss:$16 sps:$4 sm:$0xff]  }
 0x2b9   : > { %7156 = vmatpush1.bf16.msra.mxu0 %v11227_v42  ;;  %7812 = vmatpush1.bf16.msra.mxu1 %v11230_v45  ;;  %v11314_v42 = vld [vmem:[%s12914_s2 + $0xf48] ss:$16 sps:$4 sm:$0xff]   ;;  %v11319_v45 = vld [vmem:[%s12914_s2 + $0xf64] ss:$16 sps:$4 sm:$0xff]  }
 0x2ba   : > { %7157 = vmatprep.subr.bf16.mxu0 %v11235_v46  ;;  %7813 = vmatprep.subr.bf16.mxu1 %v11238_v26  ;;  %v11322_v46 = vld [vmem:[%s12914_s2 + $0xf6c] ss:$16 sps:$4 sm:$0xff]   ;;  %v11317_v26 = vld [vmem:[%s12914_s2 + $0xf60] ss:$16 sps:$4 sm:$0xff]  }
 0x2bd   : > { %7158 = vmatpush1.bf16.msra.mxu0 %v11233_v47  ;;  %7814 = vmatpush1.bf16.msra.mxu1 %v11236_v49  ;;  %v11320_v47 = vld [vmem:[%s12914_s2 + $0xf68] ss:$16 sps:$4 sm:$0xff]   ;;  %v11325_v49 = vld [vmem:[%s12914_s2 + $0xf84] ss:$16 sps:$4 sm:$0xff]  }
 0x2be   : > { %7159 = vmatprep.subr.bf16.mxu0 %v11241_v51  ;;  %7815 = vmatprep.subr.bf16.mxu1 %v11244_v52  ;;  %v11328_v51 = vld [vmem:[%s12914_s2 + $0xf8c] ss:$16 sps:$4 sm:$0xff]   ;;  %v11323_v52 = vld [vmem:[%s12914_s2 + $0xf80] ss:$16 sps:$4 sm:$0xff]  }
 0x2c1   : > { %7160 = vmatpush1.bf16.msra.mxu0 %v11239_v53  ;;  %7816 = vmatpush1.bf16.msra.mxu1 %v11242_v54  ;;  %v11331_v53 = vld [vmem:[%s12914_s2 + $0xfa4] ss:$16 sps:$4 sm:$0xff]   ;;  %v11334_v54 = vld [vmem:[%s12914_s2 + $0xfac] ss:$16 sps:$4 sm:$0xff]  }
 0x2c2   : > { %7161 = vmatprep.subr.bf16.mxu0 %v11247_v55  ;;  %7817 = vmatprep.subr.bf16.mxu1 %v11250_v56  ;;  %v11329_v55 = vld [vmem:[%s12914_s2 + $0xfa0] ss:$16 sps:$4 sm:$0xff]   ;;  %v11332_v56 = vld [vmem:[%s12914_s2 + $0xfa8] ss:$16 sps:$4 sm:$0xff]  }
 0x2c5   : > { %7162 = vmatpush1.bf16.msra.mxu0 %v11245_v43  ;;  %7818 = vmatpush1.bf16.msra.mxu1 %v11248_v58  ;;  %v11337_v43 = vld [vmem:[%s12914_s2 + $0xfc4] ss:$16 sps:$4 sm:$0xff]   ;;  %v11340_v58 = vld [vmem:[%s12914_s2 + $0xfcc] ss:$16 sps:$4 sm:$0xff]  }
 0x2c6   : > { %7172 = vmatprep.subr.bf16.mxu0 %v11253_v59  ;;  %7828 = vmatprep.subr.bf16.mxu1 %v11256_v41  ;;  %v13523_v59 = vld [vmem:[%s12940_s15 + $0x20] sm:$0xff]  ;;  %v11335_v41 = vld [vmem:[%s12914_s2 + $0xfc0] ss:$16 sps:$4 sm:$0xff]  }
 0x2c8   : > { %7164 = vmatmul.mubr.bf16.vlgmr.msra.gmra.mrb[0].mxu0 %v721_v61  ;;  %7820 = vmatmul.mubr.bf16.vlgmr.msra.gmra.mrb[0].mxu1 %v721_v61  ;;  %v11343_v61 = vld [vmem:[%s12914_s2 + $0xfe4] ss:$16 sps:$4 sm:$0xff]  }
 0x2c9   : > { %7173 = vmatpush1.bf16.msra.mxu0 %v11251_v62  ;;  %7829 = vmatpush1.bf16.msra.mxu1 %v11254_v63  ;;  %v11346_v62 = vld [vmem:[%s12914_s2 + $0xfec] ss:$16 sps:$4 sm:$0xff]   ;;  %v13531_v63 = vrot.slane %v13523_v59, %v12991_v50 }
 0x2ca   : > { %7174 = vmatprep.subr.bf16.mxu0 %v11259_v0  ;;  %7830 = vmatprep.subr.bf16.mxu1 %v11262_v1  ;;  %v11341_v0 = vld [vmem:[%s12914_s2 + $0xfe0] ss:$16 sps:$4 sm:$0xff]   ;;  %v11344_v1 = vld [vmem:[%s12914_s2 + $0xfe8] ss:$16 sps:$4 sm:$0xff]  }
 0x2cb   : > { %7204 = vmatprep.mubr.bf16.mxu0 %v724_v2  ;;  %7860 = vmatprep.mubr.bf16.mxu1 %v724_v2  ;;  %v11350_v2 = vld [vmem:[%s12914_s2 + $0x1004] ss:$16 sps:$4 sm:$0xff]  }
 0x2cd   : > { %7175 = vmatpush1.bf16.msra.mxu0 %v11257_v48  ;;  %7831 = vmatpush1.bf16.msra.mxu1 %v11260_v3  ;;  %v11353_v48 = vld [vmem:[%s12914_s2 + $0x100c] ss:$16 sps:$4 sm:$0xff]   ;;  %v624_v3 = vcombine.high %v13531_v63, %v13531_v63 }
 0x2ce   : > { %7176 = vmatprep.subr.bf16.mxu0 %v11265_v4  ;;  %7832 = vmatprep.subr.bf16.mxu1 %v11268_v5  ;;  %v723_v4 = vpack.c.bf16 %v13456_v57, %v13456_v57  ;;  %v11348_v5 = vld [vmem:[%s12914_s2 + $0x1000] ss:$16 sps:$4 sm:$0xff]  }
 0x2cf   : > { %v11354_v57 = vld [vmem:[%s12914_s2 + $0x1020] ss:$16 sps:$4 sm:$0xff]  }
 0x2d1   : > { %7177 = vmatpush1.bf16.msra.mxu0 %v11263_v6  ;;  %7833 = vmatpush1.bf16.msra.mxu1 %v11266_v7  ;;  %v11351_v6 = vld [vmem:[%s12914_s2 + $0x1008] ss:$16 sps:$4 sm:$0xff]   ;;  %v11356_v7 = vld [vmem:[%s12914_s2 + $0x1024] ss:$16 sps:$4 sm:$0xff]  }
 0x2d2   : > { %7178 = vmatprep.subr.bf16.mxu0 %v11271_v8  ;;  %7834 = vmatprep.subr.bf16.mxu1 %v11274_v9  ;;  %v11359_v8 = vld [vmem:[%s12914_s2 + $0x102c] ss:$16 sps:$4 sm:$0xff]   ;;  %v726_v9 = vpack.c.bf16 %v624_v3, %v624_v3  ;;  %v11432_v3 = vld [vmem:[%s12914_s2 + $0x11c0] ss:$16 sps:$4 sm:$0xff]  }
 0x2d5   : > { %7179 = vmatpush1.bf16.msra.mxu0 %v11269_v11  ;;  %7835 = vmatpush1.bf16.msra.mxu1 %v11272_v12  ;;  %v11357_v11 = vld [vmem:[%s12914_s2 + $0x1028] ss:$16 sps:$4 sm:$0xff]   ;;  %v11362_v12 = vld [vmem:[%s12914_s2 + $0x1044] ss:$16 sps:$4 sm:$0xff]  }
 0x2d6   : > { %7180 = vmatprep.subr.bf16.mxu0 %v11277_v13  ;;  %7836 = vmatprep.subr.bf16.mxu1 %v11280_v14  ;;  %v11365_v13 = vld [vmem:[%s12914_s2 + $0x104c] ss:$16 sps:$4 sm:$0xff]   ;;  %v11360_v14 = vld [vmem:[%s12914_s2 + $0x1040] ss:$16 sps:$4 sm:$0xff]  }
 0x2d9   : > { %7181 = vmatpush1.bf16.msra.mxu0 %v11275_v15  ;;  %7837 = vmatpush1.bf16.msra.mxu1 %v11278_v16  ;;  %v11363_v15 = vld [vmem:[%s12914_s2 + $0x1048] ss:$16 sps:$4 sm:$0xff]   ;;  %v11368_v16 = vld [vmem:[%s12914_s2 + $0x1064] ss:$16 sps:$4 sm:$0xff]  }
 0x2da   : > { %7182 = vmatprep.subr.bf16.mxu0 %v11283_v17  ;;  %7838 = vmatprep.subr.bf16.mxu1 %v11286_v18  ;;  %v11371_v17 = vld [vmem:[%s12914_s2 + $0x106c] ss:$16 sps:$4 sm:$0xff]   ;;  %v11366_v18 = vld [vmem:[%s12914_s2 + $0x1060] ss:$16 sps:$4 sm:$0xff]  }
 0x2dd   : > { %7183 = vmatpush1.bf16.msra.mxu0 %v11281_v19  ;;  %7839 = vmatpush1.bf16.msra.mxu1 %v11284_v20  ;;  %v11369_v19 = vld [vmem:[%s12914_s2 + $0x1068] ss:$16 sps:$4 sm:$0xff]   ;;  %v11374_v20 = vld [vmem:[%s12914_s2 + $0x1084] ss:$16 sps:$4 sm:$0xff]  }
 0x2de   : > { %7184 = vmatprep.subr.bf16.mxu0 %v11289_v21  ;;  %7840 = vmatprep.subr.bf16.mxu1 %v11292_v22  ;;  %v11377_v21 = vld [vmem:[%s12914_s2 + $0x108c] ss:$16 sps:$4 sm:$0xff]   ;;  %v11372_v22 = vld [vmem:[%s12914_s2 + $0x1080] ss:$16 sps:$4 sm:$0xff]  }
 0x2e1   : > { %7185 = vmatpush1.bf16.msra.mxu0 %v11287_v23  ;;  %7841 = vmatpush1.bf16.msra.mxu1 %v11290_v25  ;;  %v11375_v23 = vld [vmem:[%s12914_s2 + $0x1088] ss:$16 sps:$4 sm:$0xff]   ;;  %v11380_v25 = vld [vmem:[%s12914_s2 + $0x10a4] ss:$16 sps:$4 sm:$0xff]  }
 0x2e2   : > { %7186 = vmatprep.subr.bf16.mxu0 %v11295_v24  ;;  %7842 = vmatprep.subr.bf16.mxu1 %v11298_v10  ;;  %v11383_v24 = vld [vmem:[%s12914_s2 + $0x10ac] ss:$16 sps:$4 sm:$0xff]   ;;  %v11378_v10 = vld [vmem:[%s12914_s2 + $0x10a0] ss:$16 sps:$4 sm:$0xff]  }
 0x2e5   : > { %7187 = vmatpush1.bf16.msra.mxu0 %v11293_v28  ;;  %7843 = vmatpush1.bf16.msra.mxu1 %v11296_v30  ;;  %v11381_v28 = vld [vmem:[%s12914_s2 + $0x10a8] ss:$16 sps:$4 sm:$0xff]   ;;  %v11386_v30 = vld [vmem:[%s12914_s2 + $0x10c4] ss:$16 sps:$4 sm:$0xff]  }
 0x2e6   : > { %7188 = vmatprep.subr.bf16.mxu0 %v11301_v31  ;;  %7844 = vmatprep.subr.bf16.mxu1 %v11304_v32  ;;  %v11389_v31 = vld [vmem:[%s12914_s2 + $0x10cc] ss:$16 sps:$4 sm:$0xff]   ;;  %v11384_v32 = vld [vmem:[%s12914_s2 + $0x10c0] ss:$16 sps:$4 sm:$0xff]  }
 0x2e9   : > { %7189 = vmatpush1.bf16.msra.mxu0 %v11299_v34  ;;  %7845 = vmatpush1.bf16.msra.mxu1 %v11302_v35  ;;  %v11387_v34 = vld [vmem:[%s12914_s2 + $0x10c8] ss:$16 sps:$4 sm:$0xff]   ;;  %v11392_v35 = vld [vmem:[%s12914_s2 + $0x10e4] ss:$16 sps:$4 sm:$0xff]  }
 0x2ea   : > { %7190 = vmatprep.subr.bf16.mxu0 %v11307_v36  ;;  %7846 = vmatprep.subr.bf16.mxu1 %v11310_v27  ;;  %v11395_v36 = vld [vmem:[%s12914_s2 + $0x10ec] ss:$16 sps:$4 sm:$0xff]   ;;  %v11390_v27 = vld [vmem:[%s12914_s2 + $0x10e0] ss:$16 sps:$4 sm:$0xff]  }
 0x2ed   : > { %7191 = vmatpush1.bf16.msra.mxu0 %v11305_v37  ;;  %7847 = vmatpush1.bf16.msra.mxu1 %v11308_v38  ;;  %v11393_v37 = vld [vmem:[%s12914_s2 + $0x10e8] ss:$16 sps:$4 sm:$0xff]   ;;  %v11398_v38 = vld [vmem:[%s12914_s2 + $0x1104] ss:$16 sps:$4 sm:$0xff]  }
 0x2ee   : > { %7192 = vmatprep.subr.bf16.mxu0 %v11313_v39  ;;  %7848 = vmatprep.subr.bf16.mxu1 %v11316_v40  ;;  %v11401_v39 = vld [vmem:[%s12914_s2 + $0x110c] ss:$16 sps:$4 sm:$0xff]   ;;  %v11396_v40 = vld [vmem:[%s12914_s2 + $0x1100] ss:$16 sps:$4 sm:$0xff]  }
 0x2f1   : > { %7193 = vmatpush1.bf16.msra.mxu0 %v11311_v29  ;;  %7849 = vmatpush1.bf16.msra.mxu1 %v11314_v42  ;;  %v11399_v29 = vld [vmem:[%s12914_s2 + $0x1108] ss:$16 sps:$4 sm:$0xff]   ;;  %v11404_v42 = vld [vmem:[%s12914_s2 + $0x1124] ss:$16 sps:$4 sm:$0xff]  }
 0x2f2   : > { %7194 = vmatprep.subr.bf16.mxu0 %v11319_v45  ;;  %7850 = vmatprep.subr.bf16.mxu1 %v11322_v46  ;;  %v11407_v45 = vld [vmem:[%s12914_s2 + $0x112c] ss:$16 sps:$4 sm:$0xff]   ;;  %v11402_v46 = vld [vmem:[%s12914_s2 + $0x1120] ss:$16 sps:$4 sm:$0xff]  }
 0x2f5   : > { %7195 = vmatpush1.bf16.msra.mxu0 %v11317_v26  ;;  %7851 = vmatpush1.bf16.msra.mxu1 %v11320_v47  ;;  %v11405_v26 = vld [vmem:[%s12914_s2 + $0x1128] ss:$16 sps:$4 sm:$0xff]   ;;  %v11410_v47 = vld [vmem:[%s12914_s2 + $0x1144] ss:$16 sps:$4 sm:$0xff]  }
 0x2f6   : > { %7196 = vmatprep.subr.bf16.mxu0 %v11325_v49  ;;  %7852 = vmatprep.subr.bf16.mxu1 %v11328_v51  ;;  %v11413_v49 = vld [vmem:[%s12914_s2 + $0x114c] ss:$16 sps:$4 sm:$0xff]   ;;  %v11408_v51 = vld [vmem:[%s12914_s2 + $0x1140] ss:$16 sps:$4 sm:$0xff]  }
 0x2f9   : > { %7197 = vmatpush1.bf16.msra.mxu0 %v11323_v52  ;;  %7853 = vmatpush1.bf16.msra.mxu1 %v11326_v33  ;;  %v11411_v52 = vld [vmem:[%s12914_s2 + $0x1148] ss:$16 sps:$4 sm:$0xff]   ;;  %v11416_v33 = vld [vmem:[%s12914_s2 + $0x1164] ss:$16 sps:$4 sm:$0xff]  }
 0x2fa   : > { %7198 = vmatprep.subr.bf16.mxu0 %v11331_v53  ;;  %7854 = vmatprep.subr.bf16.mxu1 %v11334_v54  ;;  %v11419_v53 = vld [vmem:[%s12914_s2 + $0x116c] ss:$16 sps:$4 sm:$0xff]   ;;  %v11414_v54 = vld [vmem:[%s12914_s2 + $0x1160] ss:$16 sps:$4 sm:$0xff]  }
 0x2fd   : > { %7199 = vmatpush1.bf16.msra.mxu0 %v11329_v55  ;;  %7855 = vmatpush1.bf16.msra.mxu1 %v11332_v56  ;;  %v11417_v55 = vld [vmem:[%s12914_s2 + $0x1168] ss:$16 sps:$4 sm:$0xff]   ;;  %v11422_v56 = vld [vmem:[%s12914_s2 + $0x1184] ss:$16 sps:$4 sm:$0xff]  }
 0x2fe   : > { %7200 = vmatprep.subr.bf16.mxu0 %v11337_v43  ;;  %7856 = vmatprep.subr.bf16.mxu1 %v11340_v58  ;;  %v11425_v43 = vld [vmem:[%s12914_s2 + $0x118c] ss:$16 sps:$4 sm:$0xff]   ;;  %v11420_v58 = vld [vmem:[%s12914_s2 + $0x1180] ss:$16 sps:$4 sm:$0xff]  }
 0x301   : > { %7201 = vmatpush1.bf16.msra.mxu0 %v11335_v41  ;;  %7857 = vmatpush1.bf16.msra.mxu1 %v11338_v60  ;;  %v11423_v41 = vld [vmem:[%s12914_s2 + $0x1188] ss:$16 sps:$4 sm:$0xff]   ;;  %v11428_v60 = vld [vmem:[%s12914_s2 + $0x11a4] ss:$16 sps:$4 sm:$0xff]  }
 0x302   : > { %7202 = vmatprep.subr.bf16.mxu0 %v11343_v61  ;;  %7858 = vmatprep.subr.bf16.mxu1 %v11346_v62  ;;  %v11431_v61 = vld [vmem:[%s12914_s2 + $0x11ac] ss:$16 sps:$4 sm:$0xff]   ;;  %v11426_v62 = vld [vmem:[%s12914_s2 + $0x11a0] ss:$16 sps:$4 sm:$0xff]  }
 0x305   : > { %7203 = vmatpush1.bf16.msra.mxu0 %v11341_v0  ;;  %7859 = vmatpush1.bf16.msra.mxu1 %v11344_v1  ;;  %v11429_v0 = vld [vmem:[%s12914_s2 + $0x11a8] ss:$16 sps:$4 sm:$0xff]   ;;  %v11434_v1 = vld [vmem:[%s12914_s2 + $0x11c4] ss:$16 sps:$4 sm:$0xff]  }
 0x306   : > { %7213 = vmatprep.subr.bf16.mxu0 %v11350_v2  ;;  %7869 = vmatprep.subr.bf16.mxu1 %v11353_v48  ;;  %v11437_v2 = vld [vmem:[%s12914_s2 + $0x11cc] ss:$16 sps:$4 sm:$0xff]   ;;  %v609_v48 = vcombine.high %v13523_v59, %v13523_v59  ;;  %v11438_v59 = vld [vmem:[%s12914_s2 + $0x11e0] ss:$16 sps:$4 sm:$0xff]  }
 0x308   : > { %7205 = vmatmul.mubr.bf16.vlgmr.msra.gmra.mrb[0].mxu0 %v723_v4  ;;  %7861 = vmatmul.mubr.bf16.vlgmr.msra.gmra.mrb[0].mxu1 %v723_v4  ;;  %v11435_v4 = vld [vmem:[%s12914_s2 + $0x11c8] ss:$16 sps:$4 sm:$0xff]  }
 0x309   : > { %7214 = vmatpush1.bf16.msra.mxu0 %v11348_v5  ;;  %7870 = vmatpush1.bf16.msra.mxu1 %v11351_v6  ;;  %v11440_v5 = vld [vmem:[%s12914_s2 + $0x11e4] ss:$16 sps:$4 sm:$0xff]   ;;  %v11443_v6 = vld [vmem:[%s12914_s2 + $0x11ec] ss:$16 sps:$4 sm:$0xff]  }
 0x30a   : > { %7215 = vmatprep.subr.bf16.mxu0 %v11356_v7  ;;  %7871 = vmatprep.subr.bf16.mxu1 %v11359_v8  ;;  %v13604_v7 = vrot.slane %v609_v48, %v12991_v50  ;;  %v11441_v8 = vld [vmem:[%s12914_s2 + $0x11e8] ss:$16 sps:$4 sm:$0xff]  }
 0x30b   : > { %7245 = vmatprep.mubr.bf16.mxu0 %v726_v9  ;;  %7901 = vmatprep.mubr.bf16.mxu1 %v726_v9  ;;  %v11446_v9 = vld [vmem:[%s12914_s2 + $0x1204] ss:$16 sps:$4 sm:$0xff]   ;;  %v11519_v48 = vld [vmem:[%s12914_s2 + $0x1388] ss:$16 sps:$4 sm:$0xff]  }
 0x30d   : > { %7216 = vmatpush1.bf16.msra.mxu0 %v11354_v57  ;;  %7872 = vmatpush1.bf16.msra.mxu1 %v11357_v11  ;;  %v11449_v57 = vld [vmem:[%s12914_s2 + $0x120c] ss:$16 sps:$4 sm:$0xff]   ;;  %v625_v11 = vcombine.high %v13604_v7, %v13604_v7 }
 0x30e   : > { %7217 = vmatprep.subr.bf16.mxu0 %v11362_v12  ;;  %7873 = vmatprep.subr.bf16.mxu1 %v11365_v13  ;;  %v725_v12 = vpack.c.bf16 %v13531_v63, %v13531_v63  ;;  %v11444_v13 = vld [vmem:[%s12914_s2 + $0x1200] ss:$16 sps:$4 sm:$0xff]  }
 0x30f   : > { %v11450_v63 = vld [vmem:[%s12914_s2 + $0x1220] ss:$16 sps:$4 sm:$0xff]  }
 0x311   : > { %7218 = vmatpush1.bf16.msra.mxu0 %v11360_v14  ;;  %7874 = vmatpush1.bf16.msra.mxu1 %v11363_v15  ;;  %v11447_v14 = vld [vmem:[%s12914_s2 + $0x1208] ss:$16 sps:$4 sm:$0xff]   ;;  %v11452_v15 = vld [vmem:[%s12914_s2 + $0x1224] ss:$16 sps:$4 sm:$0xff]  }
 0x312   : > { %7219 = vmatprep.subr.bf16.mxu0 %v11368_v16  ;;  %7875 = vmatprep.subr.bf16.mxu1 %v11371_v17  ;;  %v11455_v16 = vld [vmem:[%s12914_s2 + $0x122c] ss:$16 sps:$4 sm:$0xff]   ;;  %v728_v17 = vpack.c.bf16 %v625_v11, %v625_v11  ;;  %v11531_v11 = vld [vmem:[%s12914_s2 + $0x13c8] ss:$16 sps:$4 sm:$0xff]  }
 0x315   : > { %7220 = vmatpush1.bf16.msra.mxu0 %v11366_v18  ;;  %7876 = vmatpush1.bf16.msra.mxu1 %v11369_v19  ;;  %v11453_v18 = vld [vmem:[%s12914_s2 + $0x1228] ss:$16 sps:$4 sm:$0xff]   ;;  %v11458_v19 = vld [vmem:[%s12914_s2 + $0x1244] ss:$16 sps:$4 sm:$0xff]  }
 0x316   : > { %7221 = vmatprep.subr.bf16.mxu0 %v11374_v20  ;;  %7877 = vmatprep.subr.bf16.mxu1 %v11377_v21  ;;  %v11461_v20 = vld [vmem:[%s12914_s2 + $0x124c] ss:$16 sps:$4 sm:$0xff]   ;;  %v11456_v21 = vld [vmem:[%s12914_s2 + $0x1240] ss:$16 sps:$4 sm:$0xff]  }
 0x319   : > { %7222 = vmatpush1.bf16.msra.mxu0 %v11372_v22  ;;  %7878 = vmatpush1.bf16.msra.mxu1 %v11375_v23  ;;  %v11459_v22 = vld [vmem:[%s12914_s2 + $0x1248] ss:$16 sps:$4 sm:$0xff]   ;;  %v11464_v23 = vld [vmem:[%s12914_s2 + $0x1264] ss:$16 sps:$4 sm:$0xff]  }
 0x31a   : > { %7223 = vmatprep.subr.bf16.mxu0 %v11380_v25  ;;  %7879 = vmatprep.subr.bf16.mxu1 %v11383_v24  ;;  %v11467_v25 = vld [vmem:[%s12914_s2 + $0x126c] ss:$16 sps:$4 sm:$0xff]   ;;  %v11462_v24 = vld [vmem:[%s12914_s2 + $0x1260] ss:$16 sps:$4 sm:$0xff]  }
 0x31d   : > { %7224 = vmatpush1.bf16.msra.mxu0 %v11378_v10  ;;  %7880 = vmatpush1.bf16.msra.mxu1 %v11381_v28  ;;  %v11465_v10 = vld [vmem:[%s12914_s2 + $0x1268] ss:$16 sps:$4 sm:$0xff]   ;;  %v11470_v28 = vld [vmem:[%s12914_s2 + $0x1284] ss:$16 sps:$4 sm:$0xff]  }
 0x31e   : > { %7225 = vmatprep.subr.bf16.mxu0 %v11386_v30  ;;  %7881 = vmatprep.subr.bf16.mxu1 %v11389_v31  ;;  %v11473_v30 = vld [vmem:[%s12914_s2 + $0x128c] ss:$16 sps:$4 sm:$0xff]   ;;  %v11468_v31 = vld [vmem:[%s12914_s2 + $0x1280] ss:$16 sps:$4 sm:$0xff]  }
 0x321   : > { %7226 = vmatpush1.bf16.msra.mxu0 %v11384_v32  ;;  %7882 = vmatpush1.bf16.msra.mxu1 %v11387_v34  ;;  %v11471_v32 = vld [vmem:[%s12914_s2 + $0x1288] ss:$16 sps:$4 sm:$0xff]   ;;  %v11476_v34 = vld [vmem:[%s12914_s2 + $0x12a4] ss:$16 sps:$4 sm:$0xff]  }
 0x322   : > { %7227 = vmatprep.subr.bf16.mxu0 %v11392_v35  ;;  %7883 = vmatprep.subr.bf16.mxu1 %v11395_v36  ;;  %v11479_v35 = vld [vmem:[%s12914_s2 + $0x12ac] ss:$16 sps:$4 sm:$0xff]   ;;  %v11474_v36 = vld [vmem:[%s12914_s2 + $0x12a0] ss:$16 sps:$4 sm:$0xff]  }
 0x325   : > { %7228 = vmatpush1.bf16.msra.mxu0 %v11390_v27  ;;  %7884 = vmatpush1.bf16.msra.mxu1 %v11393_v37  ;;  %v11477_v27 = vld [vmem:[%s12914_s2 + $0x12a8] ss:$16 sps:$4 sm:$0xff]   ;;  %v11482_v37 = vld [vmem:[%s12914_s2 + $0x12c4] ss:$16 sps:$4 sm:$0xff]  }
 0x326   : > { %7229 = vmatprep.subr.bf16.mxu0 %v11398_v38  ;;  %7885 = vmatprep.subr.bf16.mxu1 %v11401_v39  ;;  %v11485_v38 = vld [vmem:[%s12914_s2 + $0x12cc] ss:$16 sps:$4 sm:$0xff]   ;;  %v11480_v39 = vld [vmem:[%s12914_s2 + $0x12c0] ss:$16 sps:$4 sm:$0xff]  }
 0x329   : > { %7230 = vmatpush1.bf16.msra.mxu0 %v11396_v40  ;;  %7886 = vmatpush1.bf16.msra.mxu1 %v11399_v29  ;;  %v11483_v40 = vld [vmem:[%s12914_s2 + $0x12c8] ss:$16 sps:$4 sm:$0xff]   ;;  %v11488_v29 = vld [vmem:[%s12914_s2 + $0x12e4] ss:$16 sps:$4 sm:$0xff]  }
 0x32a   : > { %7231 = vmatprep.subr.bf16.mxu0 %v11404_v42  ;;  %7887 = vmatprep.subr.bf16.mxu1 %v11407_v45  ;;  %v11491_v42 = vld [vmem:[%s12914_s2 + $0x12ec] ss:$16 sps:$4 sm:$0xff]   ;;  %v11486_v45 = vld [vmem:[%s12914_s2 + $0x12e0] ss:$16 sps:$4 sm:$0xff]  }
 0x32d   : > { %7232 = vmatpush1.bf16.msra.mxu0 %v11402_v46  ;;  %7888 = vmatpush1.bf16.msra.mxu1 %v11405_v26  ;;  %v11489_v46 = vld [vmem:[%s12914_s2 + $0x12e8] ss:$16 sps:$4 sm:$0xff]   ;;  %v11494_v26 = vld [vmem:[%s12914_s2 + $0x1304] ss:$16 sps:$4 sm:$0xff]  }
 0x32e   : > { %7233 = vmatprep.subr.bf16.mxu0 %v11410_v47  ;;  %7889 = vmatprep.subr.bf16.mxu1 %v11413_v49  ;;  %v11497_v47 = vld [vmem:[%s12914_s2 + $0x130c] ss:$16 sps:$4 sm:$0xff]   ;;  %v11492_v49 = vld [vmem:[%s12914_s2 + $0x1300] ss:$16 sps:$4 sm:$0xff]  }
 0x331   : > { %7234 = vmatpush1.bf16.msra.mxu0 %v11408_v51  ;;  %7890 = vmatpush1.bf16.msra.mxu1 %v11411_v52  ;;  %v11495_v51 = vld [vmem:[%s12914_s2 + $0x1308] ss:$16 sps:$4 sm:$0xff]   ;;  %v11500_v52 = vld [vmem:[%s12914_s2 + $0x1324] ss:$16 sps:$4 sm:$0xff]  }
 0x332   : > { %7235 = vmatprep.subr.bf16.mxu0 %v11416_v33  ;;  %7891 = vmatprep.subr.bf16.mxu1 %v11419_v53  ;;  %v11503_v33 = vld [vmem:[%s12914_s2 + $0x132c] ss:$16 sps:$4 sm:$0xff]   ;;  %v11498_v53 = vld [vmem:[%s12914_s2 + $0x1320] ss:$16 sps:$4 sm:$0xff]  }
 0x335   : > { %7236 = vmatpush1.bf16.msra.mxu0 %v11414_v54  ;;  %7892 = vmatpush1.bf16.msra.mxu1 %v11417_v55  ;;  %v11501_v54 = vld [vmem:[%s12914_s2 + $0x1328] ss:$16 sps:$4 sm:$0xff]   ;;  %v11506_v55 = vld [vmem:[%s12914_s2 + $0x1344] ss:$16 sps:$4 sm:$0xff]  }
 0x336   : > { %7237 = vmatprep.subr.bf16.mxu0 %v11422_v56  ;;  %7893 = vmatprep.subr.bf16.mxu1 %v11425_v43  ;;  %v11509_v56 = vld [vmem:[%s12914_s2 + $0x134c] ss:$16 sps:$4 sm:$0xff]   ;;  %v11504_v43 = vld [vmem:[%s12914_s2 + $0x1340] ss:$16 sps:$4 sm:$0xff]  }
 0x339   : > { %7238 = vmatpush1.bf16.msra.mxu0 %v11420_v58  ;;  %7894 = vmatpush1.bf16.msra.mxu1 %v11423_v41  ;;  %v11507_v58 = vld [vmem:[%s12914_s2 + $0x1348] ss:$16 sps:$4 sm:$0xff]   ;;  %v11512_v41 = vld [vmem:[%s12914_s2 + $0x1364] ss:$16 sps:$4 sm:$0xff]  }
 0x33a   : > { %7239 = vmatprep.subr.bf16.mxu0 %v11428_v60  ;;  %7895 = vmatprep.subr.bf16.mxu1 %v11431_v61  ;;  %v11515_v60 = vld [vmem:[%s12914_s2 + $0x136c] ss:$16 sps:$4 sm:$0xff]   ;;  %v11510_v61 = vld [vmem:[%s12914_s2 + $0x1360] ss:$16 sps:$4 sm:$0xff]  }
 0x33d   : > { %7240 = vmatpush1.bf16.msra.mxu0 %v11426_v62  ;;  %7896 = vmatpush1.bf16.msra.mxu1 %v11429_v0  ;;  %v11513_v62 = vld [vmem:[%s12914_s2 + $0x1368] ss:$16 sps:$4 sm:$0xff]   ;;  %v11518_v0 = vld [vmem:[%s12914_s2 + $0x1384] ss:$16 sps:$4 sm:$0xff]  }
 0x33e   : > { %7241 = vmatprep.subr.bf16.mxu0 %v11434_v1  ;;  %7897 = vmatprep.subr.bf16.mxu1 %v11437_v2  ;;  %v11521_v1 = vld [vmem:[%s12914_s2 + $0x138c] ss:$16 sps:$4 sm:$0xff]   ;;  %v11516_v2 = vld [vmem:[%s12914_s2 + $0x1380] ss:$16 sps:$4 sm:$0xff]  }
 0x341   : > { %7242 = vmatpush1.bf16.msra.mxu0 %v11432_v3  ;;  %7898 = vmatpush1.bf16.msra.mxu1 %v11435_v4  ;;  %v11524_v3 = vld [vmem:[%s12914_s2 + $0x13a4] ss:$16 sps:$4 sm:$0xff]   ;;  %v11527_v4 = vld [vmem:[%s12914_s2 + $0x13ac] ss:$16 sps:$4 sm:$0xff]  }
 0x342   : > { %7243 = vmatprep.subr.bf16.mxu0 %v11440_v5  ;;  %7899 = vmatprep.subr.bf16.mxu1 %v11443_v6  ;;  %v11522_v5 = vld [vmem:[%s12914_s2 + $0x13a0] ss:$16 sps:$4 sm:$0xff]   ;;  %v11525_v6 = vld [vmem:[%s12914_s2 + $0x13a8] ss:$16 sps:$4 sm:$0xff]  }
 0x345   : > { %7244 = vmatpush1.bf16.msra.mxu0 %v11438_v59  ;;  %7900 = vmatpush1.bf16.msra.mxu1 %v11441_v8  ;;  %v11530_v59 = vld [vmem:[%s12914_s2 + $0x13c4] ss:$16 sps:$4 sm:$0xff]   ;;  %v11533_v8 = vld [vmem:[%s12914_s2 + $0x13cc] ss:$16 sps:$4 sm:$0xff]  }
 0x346   : > { %7254 = vmatprep.subr.bf16.mxu0 %v11446_v9  ;;  %7910 = vmatprep.subr.bf16.mxu1 %v11449_v57  ;;  %v13671_v9 = vld [vmem:[%s12940_s15 + $0x28] sm:$0xff] }
 0x347   : > { %v11528_v57 = vld [vmem:[%s12914_s2 + $0x13c0] ss:$16 sps:$4 sm:$0xff]  }
 0x348   : > { %7246 = vmatmul.mubr.bf16.vlgmr.msra.gmra.mrb[0].mxu0 %v725_v12  ;;  %7902 = vmatmul.mubr.bf16.vlgmr.msra.gmra.mrb[0].mxu1 %v725_v12  ;;  %v11536_v12 = vld [vmem:[%s12914_s2 + $0x13e4] ss:$16 sps:$4 sm:$0xff]  }
 0x349   : > { %7255 = vmatpush1.bf16.msra.mxu0 %v11444_v13  ;;  %7911 = vmatpush1.bf16.msra.mxu1 %v11447_v14  ;;  %v11539_v13 = vld [vmem:[%s12914_s2 + $0x13ec] ss:$16 sps:$4 sm:$0xff]   ;;  %v13679_v14 = vrot.slane %v13671_v9, %v12991_v50 }
 0x34a   : > { %7256 = vmatprep.subr.bf16.mxu0 %v11452_v15  ;;  %7912 = vmatprep.subr.bf16.mxu1 %v11455_v16  ;;  %v11534_v15 = vld [vmem:[%s12914_s2 + $0x13e0] ss:$16 sps:$4 sm:$0xff]   ;;  %v11537_v16 = vld [vmem:[%s12914_s2 + $0x13e8] ss:$16 sps:$4 sm:$0xff]  }
 0x34b   : > { %7286 = vmatprep.mubr.bf16.mxu0 %v728_v17  ;;  %7942 = vmatprep.mubr.bf16.mxu1 %v728_v17  ;;  %v11543_v17 = vld [vmem:[%s12914_s2 + $0x1404] ss:$16 sps:$4 sm:$0xff]  }
 0x34d   : > { %7257 = vmatpush1.bf16.msra.mxu0 %v11450_v63  ;;  %7913 = vmatpush1.bf16.msra.mxu1 %v11453_v18  ;;  %v11546_v63 = vld [vmem:[%s12914_s2 + $0x140c] ss:$16 sps:$4 sm:$0xff]   ;;  %v641_v18 = vcombine.high %v13679_v14, %v13679_v14 }
 0x34e   : > { %7258 = vmatprep.subr.bf16.mxu0 %v11458_v19  ;;  %7914 = vmatprep.subr.bf16.mxu1 %v11461_v20  ;;  %v727_v19 = vpack.c.bf16 %v13604_v7, %v13604_v7  ;;  %v11541_v20 = vld [vmem:[%s12914_s2 + $0x1400] ss:$16 sps:$4 sm:$0xff]  }
 0x34f   : > { %v11547_v7 = vld [vmem:[%s12914_s2 + $0x1420] ss:$16 sps:$4 sm:$0xff]  }
 0x351   : > { %7259 = vmatpush1.bf16.msra.mxu0 %v11456_v21  ;;  %7915 = vmatpush1.bf16.msra.mxu1 %v11459_v22  ;;  %v11544_v21 = vld [vmem:[%s12914_s2 + $0x1408] ss:$16 sps:$4 sm:$0xff]   ;;  %v11549_v22 = vld [vmem:[%s12914_s2 + $0x1424] ss:$16 sps:$4 sm:$0xff]  }
 0x352   : > { %7260 = vmatprep.subr.bf16.mxu0 %v11464_v23  ;;  %7916 = vmatprep.subr.bf16.mxu1 %v11467_v25  ;;  %v11552_v23 = vld [vmem:[%s12914_s2 + $0x142c] ss:$16 sps:$4 sm:$0xff]   ;;  %v730_v25 = vpack.c.bf16 %v641_v18, %v641_v18  ;;  %v11625_v18 = vld [vmem:[%s12914_s2 + $0x15c0] ss:$16 sps:$4 sm:$0xff]  }
 0x355   : > { %7261 = vmatpush1.bf16.msra.mxu0 %v11462_v24  ;;  %7917 = vmatpush1.bf16.msra.mxu1 %v11465_v10  ;;  %v11550_v24 = vld [vmem:[%s12914_s2 + $0x1428] ss:$16 sps:$4 sm:$0xff]   ;;  %v11555_v10 = vld [vmem:[%s12914_s2 + $0x1444] ss:$16 sps:$4 sm:$0xff]  }
 0x356   : > { %7262 = vmatprep.subr.bf16.mxu0 %v11470_v28  ;;  %7918 = vmatprep.subr.bf16.mxu1 %v11473_v30  ;;  %v11558_v28 = vld [vmem:[%s12914_s2 + $0x144c] ss:$16 sps:$4 sm:$0xff]   ;;  %v11553_v30 = vld [vmem:[%s12914_s2 + $0x1440] ss:$16 sps:$4 sm:$0xff]  }
 0x359   : > { %7263 = vmatpush1.bf16.msra.mxu0 %v11468_v31  ;;  %7919 = vmatpush1.bf16.msra.mxu1 %v11471_v32  ;;  %v11556_v31 = vld [vmem:[%s12914_s2 + $0x1448] ss:$16 sps:$4 sm:$0xff]   ;;  %v11561_v32 = vld [vmem:[%s12914_s2 + $0x1464] ss:$16 sps:$4 sm:$0xff]  }
 0x35a   : > { %7264 = vmatprep.subr.bf16.mxu0 %v11476_v34  ;;  %7920 = vmatprep.subr.bf16.mxu1 %v11479_v35  ;;  %v11564_v34 = vld [vmem:[%s12914_s2 + $0x146c] ss:$16 sps:$4 sm:$0xff]   ;;  %v11559_v35 = vld [vmem:[%s12914_s2 + $0x1460] ss:$16 sps:$4 sm:$0xff]  }
 0x35d   : > { %7265 = vmatpush1.bf16.msra.mxu0 %v11474_v36  ;;  %7921 = vmatpush1.bf16.msra.mxu1 %v11477_v27  ;;  %v11562_v36 = vld [vmem:[%s12914_s2 + $0x1468] ss:$16 sps:$4 sm:$0xff]   ;;  %v11567_v27 = vld [vmem:[%s12914_s2 + $0x1484] ss:$16 sps:$4 sm:$0xff]  }
 0x35e   : > { %7266 = vmatprep.subr.bf16.mxu0 %v11482_v37  ;;  %7922 = vmatprep.subr.bf16.mxu1 %v11485_v38  ;;  %v11570_v37 = vld [vmem:[%s12914_s2 + $0x148c] ss:$16 sps:$4 sm:$0xff]   ;;  %v11565_v38 = vld [vmem:[%s12914_s2 + $0x1480] ss:$16 sps:$4 sm:$0xff]  }
 0x361   : > { %7267 = vmatpush1.bf16.msra.mxu0 %v11480_v39  ;;  %7923 = vmatpush1.bf16.msra.mxu1 %v11483_v40  ;;  %v11568_v39 = vld [vmem:[%s12914_s2 + $0x1488] ss:$16 sps:$4 sm:$0xff]   ;;  %v11573_v40 = vld [vmem:[%s12914_s2 + $0x14a4] ss:$16 sps:$4 sm:$0xff]  }
 0x362   : > { %7268 = vmatprep.subr.bf16.mxu0 %v11488_v29  ;;  %7924 = vmatprep.subr.bf16.mxu1 %v11491_v42  ;;  %v11576_v29 = vld [vmem:[%s12914_s2 + $0x14ac] ss:$16 sps:$4 sm:$0xff]   ;;  %v11571_v42 = vld [vmem:[%s12914_s2 + $0x14a0] ss:$16 sps:$4 sm:$0xff]  }
 0x365   : > { %7269 = vmatpush1.bf16.msra.mxu0 %v11486_v45  ;;  %7925 = vmatpush1.bf16.msra.mxu1 %v11489_v46  ;;  %v11574_v45 = vld [vmem:[%s12914_s2 + $0x14a8] ss:$16 sps:$4 sm:$0xff]   ;;  %v11579_v46 = vld [vmem:[%s12914_s2 + $0x14c4] ss:$16 sps:$4 sm:$0xff]  }
 0x366   : > { %7270 = vmatprep.subr.bf16.mxu0 %v11494_v26  ;;  %7926 = vmatprep.subr.bf16.mxu1 %v11497_v47  ;;  %v11582_v26 = vld [vmem:[%s12914_s2 + $0x14cc] ss:$16 sps:$4 sm:$0xff]   ;;  %v11577_v47 = vld [vmem:[%s12914_s2 + $0x14c0] ss:$16 sps:$4 sm:$0xff]  }
 0x369   : > { %7271 = vmatpush1.bf16.msra.mxu0 %v11492_v49  ;;  %7927 = vmatpush1.bf16.msra.mxu1 %v11495_v51  ;;  %v11580_v49 = vld [vmem:[%s12914_s2 + $0x14c8] ss:$16 sps:$4 sm:$0xff]   ;;  %v11585_v51 = vld [vmem:[%s12914_s2 + $0x14e4] ss:$16 sps:$4 sm:$0xff]  }
 0x36a   : > { %7272 = vmatprep.subr.bf16.mxu0 %v11500_v52  ;;  %7928 = vmatprep.subr.bf16.mxu1 %v11503_v33  ;;  %v11588_v52 = vld [vmem:[%s12914_s2 + $0x14ec] ss:$16 sps:$4 sm:$0xff]   ;;  %v11583_v33 = vld [vmem:[%s12914_s2 + $0x14e0] ss:$16 sps:$4 sm:$0xff]  }
 0x36d   : > { %7273 = vmatpush1.bf16.msra.mxu0 %v11498_v53  ;;  %7929 = vmatpush1.bf16.msra.mxu1 %v11501_v54  ;;  %v11586_v53 = vld [vmem:[%s12914_s2 + $0x14e8] ss:$16 sps:$4 sm:$0xff]   ;;  %v11591_v54 = vld [vmem:[%s12914_s2 + $0x1504] ss:$16 sps:$4 sm:$0xff]  }
 0x36e   : > { %7274 = vmatprep.subr.bf16.mxu0 %v11506_v55  ;;  %7930 = vmatprep.subr.bf16.mxu1 %v11509_v56  ;;  %v11594_v55 = vld [vmem:[%s12914_s2 + $0x150c] ss:$16 sps:$4 sm:$0xff]   ;;  %v11589_v56 = vld [vmem:[%s12914_s2 + $0x1500] ss:$16 sps:$4 sm:$0xff]  }
 0x371   : > { %7275 = vmatpush1.bf16.msra.mxu0 %v11504_v43  ;;  %7931 = vmatpush1.bf16.msra.mxu1 %v11507_v58  ;;  %v11592_v43 = vld [vmem:[%s12914_s2 + $0x1508] ss:$16 sps:$4 sm:$0xff]   ;;  %v11597_v58 = vld [vmem:[%s12914_s2 + $0x1524] ss:$16 sps:$4 sm:$0xff]  }
 0x372   : > { %7276 = vmatprep.subr.bf16.mxu0 %v11512_v41  ;;  %7932 = vmatprep.subr.bf16.mxu1 %v11515_v60  ;;  %v11600_v41 = vld [vmem:[%s12914_s2 + $0x152c] ss:$16 sps:$4 sm:$0xff]   ;;  %v11595_v60 = vld [vmem:[%s12914_s2 + $0x1520] ss:$16 sps:$4 sm:$0xff]  }
 0x375   : > { %7277 = vmatpush1.bf16.msra.mxu0 %v11510_v61  ;;  %7933 = vmatpush1.bf16.msra.mxu1 %v11513_v62  ;;  %v11598_v61 = vld [vmem:[%s12914_s2 + $0x1528] ss:$16 sps:$4 sm:$0xff]   ;;  %v11603_v62 = vld [vmem:[%s12914_s2 + $0x1544] ss:$16 sps:$4 sm:$0xff]  }
 0x376   : > { %7278 = vmatprep.subr.bf16.mxu0 %v11518_v0  ;;  %7934 = vmatprep.subr.bf16.mxu1 %v11521_v1  ;;  %v11606_v0 = vld [vmem:[%s12914_s2 + $0x154c] ss:$16 sps:$4 sm:$0xff]   ;;  %v11601_v1 = vld [vmem:[%s12914_s2 + $0x1540] ss:$16 sps:$4 sm:$0xff]  }
 0x379   : > { %7279 = vmatpush1.bf16.msra.mxu0 %v11516_v2  ;;  %7935 = vmatpush1.bf16.msra.mxu1 %v11519_v48  ;;  %v11604_v2 = vld [vmem:[%s12914_s2 + $0x1548] ss:$16 sps:$4 sm:$0xff]   ;;  %v11609_v48 = vld [vmem:[%s12914_s2 + $0x1564] ss:$16 sps:$4 sm:$0xff]  }
 0x37a   : > { %7280 = vmatprep.subr.bf16.mxu0 %v11524_v3  ;;  %7936 = vmatprep.subr.bf16.mxu1 %v11527_v4  ;;  %v11612_v3 = vld [vmem:[%s12914_s2 + $0x156c] ss:$16 sps:$4 sm:$0xff]   ;;  %v11607_v4 = vld [vmem:[%s12914_s2 + $0x1560] ss:$16 sps:$4 sm:$0xff]  }
 0x37d   : > { %7281 = vmatpush1.bf16.msra.mxu0 %v11522_v5  ;;  %7937 = vmatpush1.bf16.msra.mxu1 %v11525_v6  ;;  %v11610_v5 = vld [vmem:[%s12914_s2 + $0x1568] ss:$16 sps:$4 sm:$0xff]   ;;  %v11615_v6 = vld [vmem:[%s12914_s2 + $0x1584] ss:$16 sps:$4 sm:$0xff]  }
 0x37e   : > { %7282 = vmatprep.subr.bf16.mxu0 %v11530_v59  ;;  %7938 = vmatprep.subr.bf16.mxu1 %v11533_v8  ;;  %v11618_v59 = vld [vmem:[%s12914_s2 + $0x158c] ss:$16 sps:$4 sm:$0xff]   ;;  %v11613_v8 = vld [vmem:[%s12914_s2 + $0x1580] ss:$16 sps:$4 sm:$0xff]  }
 0x381   : > { %7283 = vmatpush1.bf16.msra.mxu0 %v11528_v57  ;;  %7939 = vmatpush1.bf16.msra.mxu1 %v11531_v11  ;;  %v11616_v57 = vld [vmem:[%s12914_s2 + $0x1588] ss:$16 sps:$4 sm:$0xff]   ;;  %v11621_v11 = vld [vmem:[%s12914_s2 + $0x15a4] ss:$16 sps:$4 sm:$0xff]  }
 0x382   : > { %7284 = vmatprep.subr.bf16.mxu0 %v11536_v12  ;;  %7940 = vmatprep.subr.bf16.mxu1 %v11539_v13  ;;  %v11624_v12 = vld [vmem:[%s12914_s2 + $0x15ac] ss:$16 sps:$4 sm:$0xff]   ;;  %v11619_v13 = vld [vmem:[%s12914_s2 + $0x15a0] ss:$16 sps:$4 sm:$0xff]  }
 0x385   : > { %7285 = vmatpush1.bf16.msra.mxu0 %v11534_v15  ;;  %7941 = vmatpush1.bf16.msra.mxu1 %v11537_v16  ;;  %v11622_v15 = vld [vmem:[%s12914_s2 + $0x15a8] ss:$16 sps:$4 sm:$0xff]   ;;  %v11627_v16 = vld [vmem:[%s12914_s2 + $0x15c4] ss:$16 sps:$4 sm:$0xff]  }
 0x386   : > { %7295 = vmatprep.subr.bf16.mxu0 %v11543_v17  ;;  %7951 = vmatprep.subr.bf16.mxu1 %v11546_v63  ;;  %v11630_v17 = vld [vmem:[%s12914_s2 + $0x15cc] ss:$16 sps:$4 sm:$0xff]   ;;  %v626_v63 = vcombine.high %v13671_v9, %v13671_v9  ;;  %v11631_v9 = vld [vmem:[%s12914_s2 + $0x15e0] ss:$16 sps:$4 sm:$0xff]  }
 0x388   : > { %7287 = vmatmul.mubr.bf16.vlgmr.msra.gmra.mrb[0].mxu0 %v727_v19  ;;  %7943 = vmatmul.mubr.bf16.vlgmr.msra.gmra.mrb[0].mxu1 %v727_v19  ;;  %v11628_v19 = vld [vmem:[%s12914_s2 + $0x15c8] ss:$16 sps:$4 sm:$0xff]  }
 0x389   : > { %7296 = vmatpush1.bf16.msra.mxu0 %v11541_v20  ;;  %7952 = vmatpush1.bf16.msra.mxu1 %v11544_v21  ;;  %v11633_v20 = vld [vmem:[%s12914_s2 + $0x15e4] ss:$16 sps:$4 sm:$0xff]   ;;  %v11636_v21 = vld [vmem:[%s12914_s2 + $0x15ec] ss:$16 sps:$4 sm:$0xff]  }
 0x38a   : > { %7297 = vmatprep.subr.bf16.mxu0 %v11549_v22  ;;  %7953 = vmatprep.subr.bf16.mxu1 %v11552_v23  ;;  %v13752_v22 = vrot.slane %v626_v63, %v12991_v50  ;;  %v11634_v23 = vld [vmem:[%s12914_s2 + $0x15e8] ss:$16 sps:$4 sm:$0xff]  }
 0x38b   : > { %7327 = vmatprep.mubr.bf16.mxu0 %v730_v25  ;;  %7983 = vmatprep.mubr.bf16.mxu1 %v730_v25  ;;  %v11639_v25 = vld [vmem:[%s12914_s2 + $0x1604] ss:$16 sps:$4 sm:$0xff]   ;;  %v11712_v63 = vld [vmem:[%s12914_s2 + $0x1788] ss:$16 sps:$4 sm:$0xff]  }
 0x38d   : > { %7298 = vmatpush1.bf16.msra.mxu0 %v11547_v7  ;;  %7954 = vmatpush1.bf16.msra.mxu1 %v11550_v24  ;;  %v11642_v7 = vld [vmem:[%s12914_s2 + $0x160c] ss:$16 sps:$4 sm:$0xff]   ;;  %v642_v24 = vcombine.high %v13752_v22, %v13752_v22 }
 0x38e   : > { %7299 = vmatprep.subr.bf16.mxu0 %v11555_v10  ;;  %7955 = vmatprep.subr.bf16.mxu1 %v11558_v28  ;;  %v729_v10 = vpack.c.bf16 %v13679_v14, %v13679_v14  ;;  %v11637_v28 = vld [vmem:[%s12914_s2 + $0x1600] ss:$16 sps:$4 sm:$0xff]  }
 0x38f   : > { %v11643_v14 = vld [vmem:[%s12914_s2 + $0x1620] ss:$16 sps:$4 sm:$0xff]  }
 0x391   : > { %7300 = vmatpush1.bf16.msra.mxu0 %v11553_v30  ;;  %7956 = vmatpush1.bf16.msra.mxu1 %v11556_v31  ;;  %v11640_v30 = vld [vmem:[%s12914_s2 + $0x1608] ss:$16 sps:$4 sm:$0xff]   ;;  %v11645_v31 = vld [vmem:[%s12914_s2 + $0x1624] ss:$16 sps:$4 sm:$0xff]  }
 0x392   : > { %7301 = vmatprep.subr.bf16.mxu0 %v11561_v32  ;;  %7957 = vmatprep.subr.bf16.mxu1 %v11564_v34  ;;  %v11648_v32 = vld [vmem:[%s12914_s2 + $0x162c] ss:$16 sps:$4 sm:$0xff]   ;;  %v732_v34 = vpack.c.bf16 %v642_v24, %v642_v24  ;;  %v11724_v24 = vld [vmem:[%s12914_s2 + $0x17c8] ss:$16 sps:$4 sm:$0xff]  }
 0x395   : > { %7302 = vmatpush1.bf16.msra.mxu0 %v11559_v35  ;;  %7958 = vmatpush1.bf16.msra.mxu1 %v11562_v36  ;;  %v11646_v35 = vld [vmem:[%s12914_s2 + $0x1628] ss:$16 sps:$4 sm:$0xff]   ;;  %v11651_v36 = vld [vmem:[%s12914_s2 + $0x1644] ss:$16 sps:$4 sm:$0xff]  }
 0x396   : > { %7303 = vmatprep.subr.bf16.mxu0 %v11567_v27  ;;  %7959 = vmatprep.subr.bf16.mxu1 %v11570_v37  ;;  %v11654_v27 = vld [vmem:[%s12914_s2 + $0x164c] ss:$16 sps:$4 sm:$0xff]   ;;  %v11649_v37 = vld [vmem:[%s12914_s2 + $0x1640] ss:$16 sps:$4 sm:$0xff]  }
 0x399   : > { %7304 = vmatpush1.bf16.msra.mxu0 %v11565_v38  ;;  %7960 = vmatpush1.bf16.msra.mxu1 %v11568_v39  ;;  %v11652_v38 = vld [vmem:[%s12914_s2 + $0x1648] ss:$16 sps:$4 sm:$0xff]   ;;  %v11657_v39 = vld [vmem:[%s12914_s2 + $0x1664] ss:$16 sps:$4 sm:$0xff]  }
 0x39a   : > { %7305 = vmatprep.subr.bf16.mxu0 %v11573_v40  ;;  %7961 = vmatprep.subr.bf16.mxu1 %v11576_v29  ;;  %v11660_v40 = vld [vmem:[%s12914_s2 + $0x166c] ss:$16 sps:$4 sm:$0xff]   ;;  %v11655_v29 = vld [vmem:[%s12914_s2 + $0x1660] ss:$16 sps:$4 sm:$0xff]  }
 0x39d   : > { %7306 = vmatpush1.bf16.msra.mxu0 %v11571_v42  ;;  %7962 = vmatpush1.bf16.msra.mxu1 %v11574_v45  ;;  %v11658_v42 = vld [vmem:[%s12914_s2 + $0x1668] ss:$16 sps:$4 sm:$0xff]   ;;  %v11663_v45 = vld [vmem:[%s12914_s2 + $0x1684] ss:$16 sps:$4 sm:$0xff]  }
 0x39e   : > { %7307 = vmatprep.subr.bf16.mxu0 %v11579_v46  ;;  %7963 = vmatprep.subr.bf16.mxu1 %v11582_v26  ;;  %v11666_v46 = vld [vmem:[%s12914_s2 + $0x168c] ss:$16 sps:$4 sm:$0xff]   ;;  %v11661_v26 = vld [vmem:[%s12914_s2 + $0x1680] ss:$16 sps:$4 sm:$0xff]  }
 0x3a1   : > { %7308 = vmatpush1.bf16.msra.mxu0 %v11577_v47  ;;  %7964 = vmatpush1.bf16.msra.mxu1 %v11580_v49  ;;  %v11664_v47 = vld [vmem:[%s12914_s2 + $0x1688] ss:$16 sps:$4 sm:$0xff]   ;;  %v11669_v49 = vld [vmem:[%s12914_s2 + $0x16a4] ss:$16 sps:$4 sm:$0xff]  }
 0x3a2   : > { %7309 = vmatprep.subr.bf16.mxu0 %v11585_v51  ;;  %7965 = vmatprep.subr.bf16.mxu1 %v11588_v52  ;;  %v11672_v51 = vld [vmem:[%s12914_s2 + $0x16ac] ss:$16 sps:$4 sm:$0xff]   ;;  %v11667_v52 = vld [vmem:[%s12914_s2 + $0x16a0] ss:$16 sps:$4 sm:$0xff]  }
 0x3a5   : > { %7310 = vmatpush1.bf16.msra.mxu0 %v11583_v33  ;;  %7966 = vmatpush1.bf16.msra.mxu1 %v11586_v53  ;;  %v11670_v33 = vld [vmem:[%s12914_s2 + $0x16a8] ss:$16 sps:$4 sm:$0xff]   ;;  %v11675_v53 = vld [vmem:[%s12914_s2 + $0x16c4] ss:$16 sps:$4 sm:$0xff]  }
 0x3a6   : > { %7311 = vmatprep.subr.bf16.mxu0 %v11591_v54  ;;  %7967 = vmatprep.subr.bf16.mxu1 %v11594_v55  ;;  %v11678_v54 = vld [vmem:[%s12914_s2 + $0x16cc] ss:$16 sps:$4 sm:$0xff]   ;;  %v11673_v55 = vld [vmem:[%s12914_s2 + $0x16c0] ss:$16 sps:$4 sm:$0xff]  }
 0x3a9   : > { %7312 = vmatpush1.bf16.msra.mxu0 %v11589_v56  ;;  %7968 = vmatpush1.bf16.msra.mxu1 %v11592_v43  ;;  %v11676_v56 = vld [vmem:[%s12914_s2 + $0x16c8] ss:$16 sps:$4 sm:$0xff]   ;;  %v11681_v43 = vld [vmem:[%s12914_s2 + $0x16e4] ss:$16 sps:$4 sm:$0xff]  }
 0x3aa   : > { %7313 = vmatprep.subr.bf16.mxu0 %v11597_v58  ;;  %7969 = vmatprep.subr.bf16.mxu1 %v11600_v41  ;;  %v11684_v58 = vld [vmem:[%s12914_s2 + $0x16ec] ss:$16 sps:$4 sm:$0xff]   ;;  %v11679_v41 = vld [vmem:[%s12914_s2 + $0x16e0] ss:$16 sps:$4 sm:$0xff]  }
 0x3ad   : > { %7314 = vmatpush1.bf16.msra.mxu0 %v11595_v60  ;;  %7970 = vmatpush1.bf16.msra.mxu1 %v11598_v61  ;;  %v11682_v60 = vld [vmem:[%s12914_s2 + $0x16e8] ss:$16 sps:$4 sm:$0xff]   ;;  %v11687_v61 = vld [vmem:[%s12914_s2 + $0x1704] ss:$16 sps:$4 sm:$0xff]  }
 0x3ae   : > { %7315 = vmatprep.subr.bf16.mxu0 %v11603_v62  ;;  %7971 = vmatprep.subr.bf16.mxu1 %v11606_v0  ;;  %v11690_v62 = vld [vmem:[%s12914_s2 + $0x170c] ss:$16 sps:$4 sm:$0xff]   ;;  %v11685_v0 = vld [vmem:[%s12914_s2 + $0x1700] ss:$16 sps:$4 sm:$0xff]  }
 0x3b1   : > { %7316 = vmatpush1.bf16.msra.mxu0 %v11601_v1  ;;  %7972 = vmatpush1.bf16.msra.mxu1 %v11604_v2  ;;  %v11688_v1 = vld [vmem:[%s12914_s2 + $0x1708] ss:$16 sps:$4 sm:$0xff]   ;;  %v11693_v2 = vld [vmem:[%s12914_s2 + $0x1724] ss:$16 sps:$4 sm:$0xff]  }
 0x3b2   : > { %7317 = vmatprep.subr.bf16.mxu0 %v11609_v48  ;;  %7973 = vmatprep.subr.bf16.mxu1 %v11612_v3  ;;  %v11696_v48 = vld [vmem:[%s12914_s2 + $0x172c] ss:$16 sps:$4 sm:$0xff]   ;;  %v11691_v3 = vld [vmem:[%s12914_s2 + $0x1720] ss:$16 sps:$4 sm:$0xff]  }
 0x3b5   : > { %7318 = vmatpush1.bf16.msra.mxu0 %v11607_v4  ;;  %7974 = vmatpush1.bf16.msra.mxu1 %v11610_v5  ;;  %v11694_v4 = vld [vmem:[%s12914_s2 + $0x1728] ss:$16 sps:$4 sm:$0xff]   ;;  %v11699_v5 = vld [vmem:[%s12914_s2 + $0x1744] ss:$16 sps:$4 sm:$0xff]  }
 0x3b6   : > { %7319 = vmatprep.subr.bf16.mxu0 %v11615_v6  ;;  %7975 = vmatprep.subr.bf16.mxu1 %v11618_v59  ;;  %v11702_v6 = vld [vmem:[%s12914_s2 + $0x174c] ss:$16 sps:$4 sm:$0xff]   ;;  %v11697_v59 = vld [vmem:[%s12914_s2 + $0x1740] ss:$16 sps:$4 sm:$0xff]  }
 0x3b9   : > { %7320 = vmatpush1.bf16.msra.mxu0 %v11613_v8  ;;  %7976 = vmatpush1.bf16.msra.mxu1 %v11616_v57  ;;  %v11700_v8 = vld [vmem:[%s12914_s2 + $0x1748] ss:$16 sps:$4 sm:$0xff]   ;;  %v11705_v57 = vld [vmem:[%s12914_s2 + $0x1764] ss:$16 sps:$4 sm:$0xff]  }
 0x3ba   : > { %7321 = vmatprep.subr.bf16.mxu0 %v11621_v11  ;;  %7977 = vmatprep.subr.bf16.mxu1 %v11624_v12  ;;  %v11708_v11 = vld [vmem:[%s12914_s2 + $0x176c] ss:$16 sps:$4 sm:$0xff]   ;;  %v11703_v12 = vld [vmem:[%s12914_s2 + $0x1760] ss:$16 sps:$4 sm:$0xff]  }
 0x3bd   : > { %7322 = vmatpush1.bf16.msra.mxu0 %v11619_v13  ;;  %7978 = vmatpush1.bf16.msra.mxu1 %v11622_v15  ;;  %v11706_v13 = vld [vmem:[%s12914_s2 + $0x1768] ss:$16 sps:$4 sm:$0xff]   ;;  %v11711_v15 = vld [vmem:[%s12914_s2 + $0x1784] ss:$16 sps:$4 sm:$0xff]  }
 0x3be   : > { %7323 = vmatprep.subr.bf16.mxu0 %v11627_v16  ;;  %7979 = vmatprep.subr.bf16.mxu1 %v11630_v17  ;;  %v11714_v16 = vld [vmem:[%s12914_s2 + $0x178c] ss:$16 sps:$4 sm:$0xff]   ;;  %v11709_v17 = vld [vmem:[%s12914_s2 + $0x1780] ss:$16 sps:$4 sm:$0xff]  }
 0x3c1   : > { %7324 = vmatpush1.bf16.msra.mxu0 %v11625_v18  ;;  %7980 = vmatpush1.bf16.msra.mxu1 %v11628_v19  ;;  %v11717_v18 = vld [vmem:[%s12914_s2 + $0x17a4] ss:$16 sps:$4 sm:$0xff]   ;;  %v11720_v19 = vld [vmem:[%s12914_s2 + $0x17ac] ss:$16 sps:$4 sm:$0xff]  }
 0x3c2   : > { %7325 = vmatprep.subr.bf16.mxu0 %v11633_v20  ;;  %7981 = vmatprep.subr.bf16.mxu1 %v11636_v21  ;;  %v11715_v20 = vld [vmem:[%s12914_s2 + $0x17a0] ss:$16 sps:$4 sm:$0xff]   ;;  %v11718_v21 = vld [vmem:[%s12914_s2 + $0x17a8] ss:$16 sps:$4 sm:$0xff]  }
 0x3c5   : > { %7326 = vmatpush1.bf16.msra.mxu0 %v11631_v9  ;;  %7982 = vmatpush1.bf16.msra.mxu1 %v11634_v23  ;;  %v11723_v9 = vld [vmem:[%s12914_s2 + $0x17c4] ss:$16 sps:$4 sm:$0xff]   ;;  %v11726_v23 = vld [vmem:[%s12914_s2 + $0x17cc] ss:$16 sps:$4 sm:$0xff]  }
 0x3c6   : > { %7336 = vmatprep.subr.bf16.mxu0 %v11639_v25  ;;  %7992 = vmatprep.subr.bf16.mxu1 %v11642_v7  ;;  %v13819_v25 = vld [vmem:[%s12940_s15 + $0x30] sm:$0xff]  ;;  %v11721_v7 = vld [vmem:[%s12914_s2 + $0x17c0] ss:$16 sps:$4 sm:$0xff]  }
 0x3c8   : > { %7328 = vmatmul.mubr.bf16.vlgmr.msra.gmra.mrb[0].mxu0 %v729_v10  ;;  %7984 = vmatmul.mubr.bf16.vlgmr.msra.gmra.mrb[0].mxu1 %v729_v10  ;;  %v11729_v10 = vld [vmem:[%s12914_s2 + $0x17e4] ss:$16 sps:$4 sm:$0xff]  }
 0x3c9   : > { %7337 = vmatpush1.bf16.msra.mxu0 %v11637_v28  ;;  %7993 = vmatpush1.bf16.msra.mxu1 %v11640_v30  ;;  %v11732_v28 = vld [vmem:[%s12914_s2 + $0x17ec] ss:$16 sps:$4 sm:$0xff]   ;;  %v13827_v30 = vrot.slane %v13819_v25, %v12991_v50 }
 0x3ca   : > { %7338 = vmatprep.subr.bf16.mxu0 %v11645_v31  ;;  %7994 = vmatprep.subr.bf16.mxu1 %v11648_v32  ;;  %v11727_v31 = vld [vmem:[%s12914_s2 + $0x17e0] ss:$16 sps:$4 sm:$0xff]   ;;  %v11730_v32 = vld [vmem:[%s12914_s2 + $0x17e8] ss:$16 sps:$4 sm:$0xff]  }
 0x3cb   : > { %7368 = vmatprep.mubr.bf16.mxu0 %v732_v34  ;;  %8024 = vmatprep.mubr.bf16.mxu1 %v732_v34  ;;  %v11736_v34 = vld [vmem:[%s12914_s2 + $0x1804] ss:$16 sps:$4 sm:$0xff]  }
 0x3cd   : > { %7339 = vmatpush1.bf16.msra.mxu0 %v11643_v14  ;;  %7995 = vmatpush1.bf16.msra.mxu1 %v11646_v35  ;;  %v11739_v14 = vld [vmem:[%s12914_s2 + $0x180c] ss:$16 sps:$4 sm:$0xff]   ;;  %v658_v35 = vcombine.high %v13827_v30, %v13827_v30 }
 0x3ce   : > { %7340 = vmatprep.subr.bf16.mxu0 %v11651_v36  ;;  %7996 = vmatprep.subr.bf16.mxu1 %v11654_v27  ;;  %v731_v36 = vpack.c.bf16 %v13752_v22, %v13752_v22  ;;  %v11734_v27 = vld [vmem:[%s12914_s2 + $0x1800] ss:$16 sps:$4 sm:$0xff]  }
 0x3cf   : > { %v11740_v22 = vld [vmem:[%s12914_s2 + $0x1820] ss:$16 sps:$4 sm:$0xff]  }
 0x3d1   : > { %7341 = vmatpush1.bf16.msra.mxu0 %v11649_v37  ;;  %7997 = vmatpush1.bf16.msra.mxu1 %v11652_v38  ;;  %v11737_v37 = vld [vmem:[%s12914_s2 + $0x1808] ss:$16 sps:$4 sm:$0xff]   ;;  %v11742_v38 = vld [vmem:[%s12914_s2 + $0x1824] ss:$16 sps:$4 sm:$0xff]  }
 0x3d2   : > { %7342 = vmatprep.subr.bf16.mxu0 %v11657_v39  ;;  %7998 = vmatprep.subr.bf16.mxu1 %v11660_v40  ;;  %v11745_v39 = vld [vmem:[%s12914_s2 + $0x182c] ss:$16 sps:$4 sm:$0xff]   ;;  %v734_v40 = vpack.c.bf16 %v658_v35, %v658_v35  ;;  %v11818_v35 = vld [vmem:[%s12914_s2 + $0x19c0] ss:$16 sps:$4 sm:$0xff]  }
 0x3d5   : > { %7343 = vmatpush1.bf16.msra.mxu0 %v11655_v29  ;;  %7999 = vmatpush1.bf16.msra.mxu1 %v11658_v42  ;;  %v11743_v29 = vld [vmem:[%s12914_s2 + $0x1828] ss:$16 sps:$4 sm:$0xff]   ;;  %v11748_v42 = vld [vmem:[%s12914_s2 + $0x1844] ss:$16 sps:$4 sm:$0xff]  }
 0x3d6   : > { %7344 = vmatprep.subr.bf16.mxu0 %v11663_v45  ;;  %8000 = vmatprep.subr.bf16.mxu1 %v11666_v46  ;;  %v11751_v45 = vld [vmem:[%s12914_s2 + $0x184c] ss:$16 sps:$4 sm:$0xff]   ;;  %v11746_v46 = vld [vmem:[%s12914_s2 + $0x1840] ss:$16 sps:$4 sm:$0xff]  }
 0x3d9   : > { %7345 = vmatpush1.bf16.msra.mxu0 %v11661_v26  ;;  %8001 = vmatpush1.bf16.msra.mxu1 %v11664_v47  ;;  %v11749_v26 = vld [vmem:[%s12914_s2 + $0x1848] ss:$16 sps:$4 sm:$0xff]   ;;  %v11754_v47 = vld [vmem:[%s12914_s2 + $0x1864] ss:$16 sps:$4 sm:$0xff]  }
 0x3da   : > { %7346 = vmatprep.subr.bf16.mxu0 %v11669_v49  ;;  %8002 = vmatprep.subr.bf16.mxu1 %v11672_v51  ;;  %v11757_v49 = vld [vmem:[%s12914_s2 + $0x186c] ss:$16 sps:$4 sm:$0xff]   ;;  %v11752_v51 = vld [vmem:[%s12914_s2 + $0x1860] ss:$16 sps:$4 sm:$0xff]  }
 0x3dd   : > { %7347 = vmatpush1.bf16.msra.mxu0 %v11667_v52  ;;  %8003 = vmatpush1.bf16.msra.mxu1 %v11670_v33  ;;  %v11755_v52 = vld [vmem:[%s12914_s2 + $0x1868] ss:$16 sps:$4 sm:$0xff]   ;;  %v11760_v33 = vld [vmem:[%s12914_s2 + $0x1884] ss:$16 sps:$4 sm:$0xff]  }
 0x3de   : > { %7348 = vmatprep.subr.bf16.mxu0 %v11675_v53  ;;  %8004 = vmatprep.subr.bf16.mxu1 %v11678_v54  ;;  %v11763_v53 = vld [vmem:[%s12914_s2 + $0x188c] ss:$16 sps:$4 sm:$0xff]   ;;  %v11758_v54 = vld [vmem:[%s12914_s2 + $0x1880] ss:$16 sps:$4 sm:$0xff]  }
 0x3e1   : > { %7349 = vmatpush1.bf16.msra.mxu0 %v11673_v55  ;;  %8005 = vmatpush1.bf16.msra.mxu1 %v11676_v56  ;;  %v11761_v55 = vld [vmem:[%s12914_s2 + $0x1888] ss:$16 sps:$4 sm:$0xff]   ;;  %v11766_v56 = vld [vmem:[%s12914_s2 + $0x18a4] ss:$16 sps:$4 sm:$0xff]  }
 0x3e2   : > { %7350 = vmatprep.subr.bf16.mxu0 %v11681_v43  ;;  %8006 = vmatprep.subr.bf16.mxu1 %v11684_v58  ;;  %v11769_v43 = vld [vmem:[%s12914_s2 + $0x18ac] ss:$16 sps:$4 sm:$0xff]   ;;  %v11764_v58 = vld [vmem:[%s12914_s2 + $0x18a0] ss:$16 sps:$4 sm:$0xff]  }
 0x3e5   : > { %7351 = vmatpush1.bf16.msra.mxu0 %v11679_v41  ;;  %8007 = vmatpush1.bf16.msra.mxu1 %v11682_v60  ;;  %v11767_v41 = vld [vmem:[%s12914_s2 + $0x18a8] ss:$16 sps:$4 sm:$0xff]   ;;  %v11772_v60 = vld [vmem:[%s12914_s2 + $0x18c4] ss:$16 sps:$4 sm:$0xff]  }
 0x3e6   : > { %7352 = vmatprep.subr.bf16.mxu0 %v11687_v61  ;;  %8008 = vmatprep.subr.bf16.mxu1 %v11690_v62  ;;  %v11775_v61 = vld [vmem:[%s12914_s2 + $0x18cc] ss:$16 sps:$4 sm:$0xff]   ;;  %v11770_v62 = vld [vmem:[%s12914_s2 + $0x18c0] ss:$16 sps:$4 sm:$0xff]  }
 0x3e9   : > { %7353 = vmatpush1.bf16.msra.mxu0 %v11685_v0  ;;  %8009 = vmatpush1.bf16.msra.mxu1 %v11688_v1  ;;  %v11773_v0 = vld [vmem:[%s12914_s2 + $0x18c8] ss:$16 sps:$4 sm:$0xff]   ;;  %v11778_v1 = vld [vmem:[%s12914_s2 + $0x18e4] ss:$16 sps:$4 sm:$0xff]  }
 0x3ea   : > { %7354 = vmatprep.subr.bf16.mxu0 %v11693_v2  ;;  %8010 = vmatprep.subr.bf16.mxu1 %v11696_v48  ;;  %v11781_v2 = vld [vmem:[%s12914_s2 + $0x18ec] ss:$16 sps:$4 sm:$0xff]   ;;  %v11776_v48 = vld [vmem:[%s12914_s2 + $0x18e0] ss:$16 sps:$4 sm:$0xff]  }
 0x3ed   : > { %7355 = vmatpush1.bf16.msra.mxu0 %v11691_v3  ;;  %8011 = vmatpush1.bf16.msra.mxu1 %v11694_v4  ;;  %v11779_v3 = vld [vmem:[%s12914_s2 + $0x18e8] ss:$16 sps:$4 sm:$0xff]   ;;  %v11784_v4 = vld [vmem:[%s12914_s2 + $0x1904] ss:$16 sps:$4 sm:$0xff]  }
 0x3ee   : > { %7356 = vmatprep.subr.bf16.mxu0 %v11699_v5  ;;  %8012 = vmatprep.subr.bf16.mxu1 %v11702_v6  ;;  %v11787_v5 = vld [vmem:[%s12914_s2 + $0x190c] ss:$16 sps:$4 sm:$0xff]   ;;  %v11782_v6 = vld [vmem:[%s12914_s2 + $0x1900] ss:$16 sps:$4 sm:$0xff]  }
 0x3f1   : > { %7357 = vmatpush1.bf16.msra.mxu0 %v11697_v59  ;;  %8013 = vmatpush1.bf16.msra.mxu1 %v11700_v8  ;;  %v11785_v59 = vld [vmem:[%s12914_s2 + $0x1908] ss:$16 sps:$4 sm:$0xff]   ;;  %v11790_v8 = vld [vmem:[%s12914_s2 + $0x1924] ss:$16 sps:$4 sm:$0xff]  }
 0x3f2   : > { %7358 = vmatprep.subr.bf16.mxu0 %v11705_v57  ;;  %8014 = vmatprep.subr.bf16.mxu1 %v11708_v11  ;;  %v11793_v57 = vld [vmem:[%s12914_s2 + $0x192c] ss:$16 sps:$4 sm:$0xff]   ;;  %v11788_v11 = vld [vmem:[%s12914_s2 + $0x1920] ss:$16 sps:$4 sm:$0xff]  }
 0x3f5   : > { %7359 = vmatpush1.bf16.msra.mxu0 %v11703_v12  ;;  %8015 = vmatpush1.bf16.msra.mxu1 %v11706_v13  ;;  %v11791_v12 = vld [vmem:[%s12914_s2 + $0x1928] ss:$16 sps:$4 sm:$0xff]   ;;  %v11796_v13 = vld [vmem:[%s12914_s2 + $0x1944] ss:$16 sps:$4 sm:$0xff]  }
 0x3f6   : > { %7360 = vmatprep.subr.bf16.mxu0 %v11711_v15  ;;  %8016 = vmatprep.subr.bf16.mxu1 %v11714_v16  ;;  %v11799_v15 = vld [vmem:[%s12914_s2 + $0x194c] ss:$16 sps:$4 sm:$0xff]   ;;  %v11794_v16 = vld [vmem:[%s12914_s2 + $0x1940] ss:$16 sps:$4 sm:$0xff]  }
 0x3f9   : > { %7361 = vmatpush1.bf16.msra.mxu0 %v11709_v17  ;;  %8017 = vmatpush1.bf16.msra.mxu1 %v11712_v63  ;;  %v11797_v17 = vld [vmem:[%s12914_s2 + $0x1948] ss:$16 sps:$4 sm:$0xff]   ;;  %v11802_v63 = vld [vmem:[%s12914_s2 + $0x1964] ss:$16 sps:$4 sm:$0xff]  }
 0x3fa   : > { %7362 = vmatprep.subr.bf16.mxu0 %v11717_v18  ;;  %8018 = vmatprep.subr.bf16.mxu1 %v11720_v19  ;;  %v11805_v18 = vld [vmem:[%s12914_s2 + $0x196c] ss:$16 sps:$4 sm:$0xff]   ;;  %v11800_v19 = vld [vmem:[%s12914_s2 + $0x1960] ss:$16 sps:$4 sm:$0xff]  }
 0x3fd   : > { %7363 = vmatpush1.bf16.msra.mxu0 %v11715_v20  ;;  %8019 = vmatpush1.bf16.msra.mxu1 %v11718_v21  ;;  %v11803_v20 = vld [vmem:[%s12914_s2 + $0x1968] ss:$16 sps:$4 sm:$0xff]   ;;  %v11808_v21 = vld [vmem:[%s12914_s2 + $0x1984] ss:$16 sps:$4 sm:$0xff]  }
 0x3fe   : > { %7364 = vmatprep.subr.bf16.mxu0 %v11723_v9  ;;  %8020 = vmatprep.subr.bf16.mxu1 %v11726_v23  ;;  %v11811_v9 = vld [vmem:[%s12914_s2 + $0x198c] ss:$16 sps:$4 sm:$0xff]   ;;  %v11806_v23 = vld [vmem:[%s12914_s2 + $0x1980] ss:$16 sps:$4 sm:$0xff]  }
 0x401   : > { %7365 = vmatpush1.bf16.msra.mxu0 %v11721_v7  ;;  %8021 = vmatpush1.bf16.msra.mxu1 %v11724_v24  ;;  %v11809_v7 = vld [vmem:[%s12914_s2 + $0x1988] ss:$16 sps:$4 sm:$0xff]   ;;  %v11814_v24 = vld [vmem:[%s12914_s2 + $0x19a4] ss:$16 sps:$4 sm:$0xff]  }
 0x402   : > { %7366 = vmatprep.subr.bf16.mxu0 %v11729_v10  ;;  %8022 = vmatprep.subr.bf16.mxu1 %v11732_v28  ;;  %v11817_v10 = vld [vmem:[%s12914_s2 + $0x19ac] ss:$16 sps:$4 sm:$0xff]   ;;  %v11812_v28 = vld [vmem:[%s12914_s2 + $0x19a0] ss:$16 sps:$4 sm:$0xff]  }
 0x405   : > { %7367 = vmatpush1.bf16.msra.mxu0 %v11727_v31  ;;  %8023 = vmatpush1.bf16.msra.mxu1 %v11730_v32  ;;  %v11815_v31 = vld [vmem:[%s12914_s2 + $0x19a8] ss:$16 sps:$4 sm:$0xff]   ;;  %v11820_v32 = vld [vmem:[%s12914_s2 + $0x19c4] ss:$16 sps:$4 sm:$0xff]  }
 0x406   : > { %7377 = vmatprep.subr.bf16.mxu0 %v11736_v34  ;;  %8033 = vmatprep.subr.bf16.mxu1 %v11739_v14  ;;  %v11823_v34 = vld [vmem:[%s12914_s2 + $0x19cc] ss:$16 sps:$4 sm:$0xff]   ;;  %v643_v14 = vcombine.high %v13819_v25, %v13819_v25  ;;  %v11824_v25 = vld [vmem:[%s12914_s2 + $0x19e0] ss:$16 sps:$4 sm:$0xff]  }
 0x408   : > { %7369 = vmatmul.mubr.bf16.vlgmr.msra.gmra.mrb[0].mxu0 %v731_v36  ;;  %8025 = vmatmul.mubr.bf16.vlgmr.msra.gmra.mrb[0].mxu1 %v731_v36  ;;  %v11821_v36 = vld [vmem:[%s12914_s2 + $0x19c8] ss:$16 sps:$4 sm:$0xff]  }
 0x409   : > { %7378 = vmatpush1.bf16.msra.mxu0 %v11734_v27  ;;  %8034 = vmatpush1.bf16.msra.mxu1 %v11737_v37  ;;  %v11826_v27 = vld [vmem:[%s12914_s2 + $0x19e4] ss:$16 sps:$4 sm:$0xff]   ;;  %v11829_v37 = vld [vmem:[%s12914_s2 + $0x19ec] ss:$16 sps:$4 sm:$0xff]  }
 0x40a   : > { %7379 = vmatprep.subr.bf16.mxu0 %v11742_v38  ;;  %8035 = vmatprep.subr.bf16.mxu1 %v11745_v39  ;;  %v13900_v38 = vrot.slane %v643_v14, %v12991_v50  ;;  %v11827_v39 = vld [vmem:[%s12914_s2 + $0x19e8] ss:$16 sps:$4 sm:$0xff]  }
 0x40b   : > { %7409 = vmatprep.mubr.bf16.mxu0 %v734_v40  ;;  %8065 = vmatprep.mubr.bf16.mxu1 %v734_v40  ;;  %v11832_v40 = vld [vmem:[%s12914_s2 + $0x1a04] ss:$16 sps:$4 sm:$0xff]   ;;  %v11905_v14 = vld [vmem:[%s12914_s2 + $0x1b88] ss:$16 sps:$4 sm:$0xff]  }
 0x40d   : > { %7380 = vmatpush1.bf16.msra.mxu0 %v11740_v22  ;;  %8036 = vmatpush1.bf16.msra.mxu1 %v11743_v29  ;;  %v11835_v22 = vld [vmem:[%s12914_s2 + $0x1a0c] ss:$16 sps:$4 sm:$0xff]   ;;  %v659_v29 = vcombine.high %v13900_v38, %v13900_v38 }
 0x40e   : > { %7381 = vmatprep.subr.bf16.mxu0 %v11748_v42  ;;  %8037 = vmatprep.subr.bf16.mxu1 %v11751_v45  ;;  %v733_v42 = vpack.c.bf16 %v13827_v30, %v13827_v30  ;;  %v11830_v45 = vld [vmem:[%s12914_s2 + $0x1a00] ss:$16 sps:$4 sm:$0xff]  }
 0x40f   : > { %v11836_v30 = vld [vmem:[%s12914_s2 + $0x1a20] ss:$16 sps:$4 sm:$0xff]  }
 0x411   : > { %7382 = vmatpush1.bf16.msra.mxu0 %v11746_v46  ;;  %8038 = vmatpush1.bf16.msra.mxu1 %v11749_v26  ;;  %v11833_v46 = vld [vmem:[%s12914_s2 + $0x1a08] ss:$16 sps:$4 sm:$0xff]   ;;  %v11838_v26 = vld [vmem:[%s12914_s2 + $0x1a24] ss:$16 sps:$4 sm:$0xff]  }
 0x412   : > { %7383 = vmatprep.subr.bf16.mxu0 %v11754_v47  ;;  %8039 = vmatprep.subr.bf16.mxu1 %v11757_v49  ;;  %v11841_v47 = vld [vmem:[%s12914_s2 + $0x1a2c] ss:$16 sps:$4 sm:$0xff]   ;;  %v736_v49 = vpack.c.bf16 %v659_v29, %v659_v29  ;;  %v11917_v29 = vld [vmem:[%s12914_s2 + $0x1bc8] ss:$16 sps:$4 sm:$0xff]  }
 0x415   : > { %7384 = vmatpush1.bf16.msra.mxu0 %v11752_v51  ;;  %8040 = vmatpush1.bf16.msra.mxu1 %v11755_v52  ;;  %v11839_v51 = vld [vmem:[%s12914_s2 + $0x1a28] ss:$16 sps:$4 sm:$0xff]   ;;  %v11844_v52 = vld [vmem:[%s12914_s2 + $0x1a44] ss:$16 sps:$4 sm:$0xff]  }
 0x416   : > { %7385 = vmatprep.subr.bf16.mxu0 %v11760_v33  ;;  %8041 = vmatprep.subr.bf16.mxu1 %v11763_v53  ;;  %v11847_v33 = vld [vmem:[%s12914_s2 + $0x1a4c] ss:$16 sps:$4 sm:$0xff]   ;;  %v11842_v53 = vld [vmem:[%s12914_s2 + $0x1a40] ss:$16 sps:$4 sm:$0xff]  }
 0x419   : > { %7386 = vmatpush1.bf16.msra.mxu0 %v11758_v54  ;;  %8042 = vmatpush1.bf16.msra.mxu1 %v11761_v55  ;;  %v11845_v54 = vld [vmem:[%s12914_s2 + $0x1a48] ss:$16 sps:$4 sm:$0xff]   ;;  %v11850_v55 = vld [vmem:[%s12914_s2 + $0x1a64] ss:$16 sps:$4 sm:$0xff]  }
 0x41a   : > { %7387 = vmatprep.subr.bf16.mxu0 %v11766_v56  ;;  %8043 = vmatprep.subr.bf16.mxu1 %v11769_v43  ;;  %v11853_v56 = vld [vmem:[%s12914_s2 + $0x1a6c] ss:$16 sps:$4 sm:$0xff]   ;;  %v11848_v43 = vld [vmem:[%s12914_s2 + $0x1a60] ss:$16 sps:$4 sm:$0xff]  }
 0x41d   : > { %7388 = vmatpush1.bf16.msra.mxu0 %v11764_v58  ;;  %8044 = vmatpush1.bf16.msra.mxu1 %v11767_v41  ;;  %v11851_v58 = vld [vmem:[%s12914_s2 + $0x1a68] ss:$16 sps:$4 sm:$0xff]   ;;  %v11856_v41 = vld [vmem:[%s12914_s2 + $0x1a84] ss:$16 sps:$4 sm:$0xff]  }
 0x41e   : > { %7389 = vmatprep.subr.bf16.mxu0 %v11772_v60  ;;  %8045 = vmatprep.subr.bf16.mxu1 %v11775_v61  ;;  %v11859_v60 = vld [vmem:[%s12914_s2 + $0x1a8c] ss:$16 sps:$4 sm:$0xff]   ;;  %v11854_v61 = vld [vmem:[%s12914_s2 + $0x1a80] ss:$16 sps:$4 sm:$0xff]  }
 0x421   : > { %7390 = vmatpush1.bf16.msra.mxu0 %v11770_v62  ;;  %8046 = vmatpush1.bf16.msra.mxu1 %v11773_v0  ;;  %v11857_v62 = vld [vmem:[%s12914_s2 + $0x1a88] ss:$16 sps:$4 sm:$0xff]   ;;  %v11862_v0 = vld [vmem:[%s12914_s2 + $0x1aa4] ss:$16 sps:$4 sm:$0xff]  }
 0x422   : > { %7391 = vmatprep.subr.bf16.mxu0 %v11778_v1  ;;  %8047 = vmatprep.subr.bf16.mxu1 %v11781_v2  ;;  %v11865_v1 = vld [vmem:[%s12914_s2 + $0x1aac] ss:$16 sps:$4 sm:$0xff]   ;;  %v11860_v2 = vld [vmem:[%s12914_s2 + $0x1aa0] ss:$16 sps:$4 sm:$0xff]  }
 0x425   : > { %7392 = vmatpush1.bf16.msra.mxu0 %v11776_v48  ;;  %8048 = vmatpush1.bf16.msra.mxu1 %v11779_v3  ;;  %v11863_v48 = vld [vmem:[%s12914_s2 + $0x1aa8] ss:$16 sps:$4 sm:$0xff]   ;;  %v11868_v3 = vld [vmem:[%s12914_s2 + $0x1ac4] ss:$16 sps:$4 sm:$0xff]  }
 0x426   : > { %7393 = vmatprep.subr.bf16.mxu0 %v11784_v4  ;;  %8049 = vmatprep.subr.bf16.mxu1 %v11787_v5  ;;  %v11871_v4 = vld [vmem:[%s12914_s2 + $0x1acc] ss:$16 sps:$4 sm:$0xff]   ;;  %v11866_v5 = vld [vmem:[%s12914_s2 + $0x1ac0] ss:$16 sps:$4 sm:$0xff]  }
 0x429   : > { %7394 = vmatpush1.bf16.msra.mxu0 %v11782_v6  ;;  %8050 = vmatpush1.bf16.msra.mxu1 %v11785_v59  ;;  %v11869_v6 = vld [vmem:[%s12914_s2 + $0x1ac8] ss:$16 sps:$4 sm:$0xff]   ;;  %v11874_v59 = vld [vmem:[%s12914_s2 + $0x1ae4] ss:$16 sps:$4 sm:$0xff]  }
 0x42a   : > { %7395 = vmatprep.subr.bf16.mxu0 %v11790_v8  ;;  %8051 = vmatprep.subr.bf16.mxu1 %v11793_v57  ;;  %v11877_v8 = vld [vmem:[%s12914_s2 + $0x1aec] ss:$16 sps:$4 sm:$0xff]   ;;  %v11872_v57 = vld [vmem:[%s12914_s2 + $0x1ae0] ss:$16 sps:$4 sm:$0xff]  }
 0x42d   : > { %7396 = vmatpush1.bf16.msra.mxu0 %v11788_v11  ;;  %8052 = vmatpush1.bf16.msra.mxu1 %v11791_v12  ;;  %v11875_v11 = vld [vmem:[%s12914_s2 + $0x1ae8] ss:$16 sps:$4 sm:$0xff]   ;;  %v11880_v12 = vld [vmem:[%s12914_s2 + $0x1b04] ss:$16 sps:$4 sm:$0xff]  }
 0x42e   : > { %7397 = vmatprep.subr.bf16.mxu0 %v11796_v13  ;;  %8053 = vmatprep.subr.bf16.mxu1 %v11799_v15  ;;  %v11883_v13 = vld [vmem:[%s12914_s2 + $0x1b0c] ss:$16 sps:$4 sm:$0xff]   ;;  %v11878_v15 = vld [vmem:[%s12914_s2 + $0x1b00] ss:$16 sps:$4 sm:$0xff]  }
 0x431   : > { %7398 = vmatpush1.bf16.msra.mxu0 %v11794_v16  ;;  %8054 = vmatpush1.bf16.msra.mxu1 %v11797_v17  ;;  %v11881_v16 = vld [vmem:[%s12914_s2 + $0x1b08] ss:$16 sps:$4 sm:$0xff]   ;;  %v11886_v17 = vld [vmem:[%s12914_s2 + $0x1b24] ss:$16 sps:$4 sm:$0xff]  }
 0x432   : > { %7399 = vmatprep.subr.bf16.mxu0 %v11802_v63  ;;  %8055 = vmatprep.subr.bf16.mxu1 %v11805_v18  ;;  %v11889_v63 = vld [vmem:[%s12914_s2 + $0x1b2c] ss:$16 sps:$4 sm:$0xff]   ;;  %v11884_v18 = vld [vmem:[%s12914_s2 + $0x1b20] ss:$16 sps:$4 sm:$0xff]  }
 0x435   : > { %7400 = vmatpush1.bf16.msra.mxu0 %v11800_v19  ;;  %8056 = vmatpush1.bf16.msra.mxu1 %v11803_v20  ;;  %v11887_v19 = vld [vmem:[%s12914_s2 + $0x1b28] ss:$16 sps:$4 sm:$0xff]   ;;  %v11892_v20 = vld [vmem:[%s12914_s2 + $0x1b44] ss:$16 sps:$4 sm:$0xff]  }
 0x436   : > { %7401 = vmatprep.subr.bf16.mxu0 %v11808_v21  ;;  %8057 = vmatprep.subr.bf16.mxu1 %v11811_v9  ;;  %v11895_v21 = vld [vmem:[%s12914_s2 + $0x1b4c] ss:$16 sps:$4 sm:$0xff]   ;;  %v11890_v9 = vld [vmem:[%s12914_s2 + $0x1b40] ss:$16 sps:$4 sm:$0xff]  }
 0x439   : > { %7402 = vmatpush1.bf16.msra.mxu0 %v11806_v23  ;;  %8058 = vmatpush1.bf16.msra.mxu1 %v11809_v7  ;;  %v11893_v23 = vld [vmem:[%s12914_s2 + $0x1b48] ss:$16 sps:$4 sm:$0xff]   ;;  %v11898_v7 = vld [vmem:[%s12914_s2 + $0x1b64] ss:$16 sps:$4 sm:$0xff]  }
 0x43a   : > { %7403 = vmatprep.subr.bf16.mxu0 %v11814_v24  ;;  %8059 = vmatprep.subr.bf16.mxu1 %v11817_v10  ;;  %v11901_v24 = vld [vmem:[%s12914_s2 + $0x1b6c] ss:$16 sps:$4 sm:$0xff]   ;;  %v11896_v10 = vld [vmem:[%s12914_s2 + $0x1b60] ss:$16 sps:$4 sm:$0xff]  }
 0x43d   : > { %7404 = vmatpush1.bf16.msra.mxu0 %v11812_v28  ;;  %8060 = vmatpush1.bf16.msra.mxu1 %v11815_v31  ;;  %v11899_v28 = vld [vmem:[%s12914_s2 + $0x1b68] ss:$16 sps:$4 sm:$0xff]   ;;  %v11904_v31 = vld [vmem:[%s12914_s2 + $0x1b84] ss:$16 sps:$4 sm:$0xff]  }
 0x43e   : > { %7405 = vmatprep.subr.bf16.mxu0 %v11820_v32  ;;  %8061 = vmatprep.subr.bf16.mxu1 %v11823_v34  ;;  %v11907_v32 = vld [vmem:[%s12914_s2 + $0x1b8c] ss:$16 sps:$4 sm:$0xff]   ;;  %v11902_v34 = vld [vmem:[%s12914_s2 + $0x1b80] ss:$16 sps:$4 sm:$0xff]  }
 0x441   : > { %7406 = vmatpush1.bf16.msra.mxu0 %v11818_v35  ;;  %8062 = vmatpush1.bf16.msra.mxu1 %v11821_v36  ;;  %v11910_v35 = vld [vmem:[%s12914_s2 + $0x1ba4] ss:$16 sps:$4 sm:$0xff]   ;;  %v11913_v36 = vld [vmem:[%s12914_s2 + $0x1bac] ss:$16 sps:$4 sm:$0xff]  }
 0x442   : > { %7407 = vmatprep.subr.bf16.mxu0 %v11826_v27  ;;  %8063 = vmatprep.subr.bf16.mxu1 %v11829_v37  ;;  %v11908_v27 = vld [vmem:[%s12914_s2 + $0x1ba0] ss:$16 sps:$4 sm:$0xff]   ;;  %v11911_v37 = vld [vmem:[%s12914_s2 + $0x1ba8] ss:$16 sps:$4 sm:$0xff]  }
 0x445   : > { %7408 = vmatpush1.bf16.msra.mxu0 %v11824_v25  ;;  %8064 = vmatpush1.bf16.msra.mxu1 %v11827_v39  ;;  %v11916_v25 = vld [vmem:[%s12914_s2 + $0x1bc4] ss:$16 sps:$4 sm:$0xff]   ;;  %v11919_v39 = vld [vmem:[%s12914_s2 + $0x1bcc] ss:$16 sps:$4 sm:$0xff]  }
 0x446   : > { %7418 = vmatprep.subr.bf16.mxu0 %v11832_v40  ;;  %8074 = vmatprep.subr.bf16.mxu1 %v11835_v22  ;;  %v13967_v40 = vld [vmem:[%s12940_s15 + $0x38] sm:$0xff] }
 0x447   : > { %v11914_v22 = vld [vmem:[%s12914_s2 + $0x1bc0] ss:$16 sps:$4 sm:$0xff]  }
 0x448   : > { %7410 = vmatmul.mubr.bf16.vlgmr.msra.gmra.mrb[0].mxu0 %v733_v42  ;;  %8066 = vmatmul.mubr.bf16.vlgmr.msra.gmra.mrb[0].mxu1 %v733_v42  ;;  %v11922_v42 = vld [vmem:[%s12914_s2 + $0x1be4] ss:$16 sps:$4 sm:$0xff]  }
 0x449   : > { %7419 = vmatpush1.bf16.msra.mxu0 %v11830_v45  ;;  %8075 = vmatpush1.bf16.msra.mxu1 %v11833_v46  ;;  %v11925_v45 = vld [vmem:[%s12914_s2 + $0x1bec] ss:$16 sps:$4 sm:$0xff]   ;;  %v13975_v46 = vrot.slane %v13967_v40, %v12991_v50 }
 0x44a   : > { %7420 = vmatprep.subr.bf16.mxu0 %v11838_v26  ;;  %8076 = vmatprep.subr.bf16.mxu1 %v11841_v47  ;;  %v11920_v26 = vld [vmem:[%s12914_s2 + $0x1be0] ss:$16 sps:$4 sm:$0xff]   ;;  %v11923_v47 = vld [vmem:[%s12914_s2 + $0x1be8] ss:$16 sps:$4 sm:$0xff]  }
 0x44b   : > { %7450 = vmatprep.mubr.bf16.mxu0 %v736_v49  ;;  %8106 = vmatprep.mubr.bf16.mxu1 %v736_v49  ;;  %v11929_v49 = vld [vmem:[%s12914_s2 + $0x1c04] ss:$16 sps:$4 sm:$0xff]  }
 0x44d   : > { %7421 = vmatpush1.bf16.msra.mxu0 %v11836_v30  ;;  %8077 = vmatpush1.bf16.msra.mxu1 %v11839_v51  ;;  %v11932_v30 = vld [vmem:[%s12914_s2 + $0x1c0c] ss:$16 sps:$4 sm:$0xff]   ;;  %v675_v51 = vcombine.high %v13975_v46, %v13975_v46 }
 0x44e   : > { %7422 = vmatprep.subr.bf16.mxu0 %v11844_v52  ;;  %8078 = vmatprep.subr.bf16.mxu1 %v11847_v33  ;;  %v735_v52 = vpack.c.bf16 %v13900_v38, %v13900_v38  ;;  %v11927_v33 = vld [vmem:[%s12914_s2 + $0x1c00] ss:$16 sps:$4 sm:$0xff]  }
 0x44f   : > { %v11933_v38 = vld [vmem:[%s12914_s2 + $0x1c20] ss:$16 sps:$4 sm:$0xff]  }
 0x451   : > { %7423 = vmatpush1.bf16.msra.mxu0 %v11842_v53  ;;  %8079 = vmatpush1.bf16.msra.mxu1 %v11845_v54  ;;  %v11930_v53 = vld [vmem:[%s12914_s2 + $0x1c08] ss:$16 sps:$4 sm:$0xff]   ;;  %v11935_v54 = vld [vmem:[%s12914_s2 + $0x1c24] ss:$16 sps:$4 sm:$0xff]  }
 0x452   : > { %7424 = vmatprep.subr.bf16.mxu0 %v11850_v55  ;;  %8080 = vmatprep.subr.bf16.mxu1 %v11853_v56  ;;  %v11938_v55 = vld [vmem:[%s12914_s2 + $0x1c2c] ss:$16 sps:$4 sm:$0xff]   ;;  %v738_v56 = vpack.c.bf16 %v675_v51, %v675_v51  ;;  %v12011_v51 = vld [vmem:[%s12914_s2 + $0x1dc0] ss:$16 sps:$4 sm:$0xff]  }
 0x455   : > { %7425 = vmatpush1.bf16.msra.mxu0 %v11848_v43  ;;  %8081 = vmatpush1.bf16.msra.mxu1 %v11851_v58  ;;  %v11936_v43 = vld [vmem:[%s12914_s2 + $0x1c28] ss:$16 sps:$4 sm:$0xff]   ;;  %v11941_v58 = vld [vmem:[%s12914_s2 + $0x1c44] ss:$16 sps:$4 sm:$0xff]  }
 0x456   : > { %7426 = vmatprep.subr.bf16.mxu0 %v11856_v41  ;;  %8082 = vmatprep.subr.bf16.mxu1 %v11859_v60  ;;  %v11944_v41 = vld [vmem:[%s12914_s2 + $0x1c4c] ss:$16 sps:$4 sm:$0xff]   ;;  %v11939_v60 = vld [vmem:[%s12914_s2 + $0x1c40] ss:$16 sps:$4 sm:$0xff]  }
 0x459   : > { %7427 = vmatpush1.bf16.msra.mxu0 %v11854_v61  ;;  %8083 = vmatpush1.bf16.msra.mxu1 %v11857_v62  ;;  %v11942_v61 = vld [vmem:[%s12914_s2 + $0x1c48] ss:$16 sps:$4 sm:$0xff]   ;;  %v11947_v62 = vld [vmem:[%s12914_s2 + $0x1c64] ss:$16 sps:$4 sm:$0xff]  }
 0x45a   : > { %7428 = vmatprep.subr.bf16.mxu0 %v11862_v0  ;;  %8084 = vmatprep.subr.bf16.mxu1 %v11865_v1  ;;  %v11950_v0 = vld [vmem:[%s12914_s2 + $0x1c6c] ss:$16 sps:$4 sm:$0xff]   ;;  %v11945_v1 = vld [vmem:[%s12914_s2 + $0x1c60] ss:$16 sps:$4 sm:$0xff]  }
 0x45d   : > { %7429 = vmatpush1.bf16.msra.mxu0 %v11860_v2  ;;  %8085 = vmatpush1.bf16.msra.mxu1 %v11863_v48  ;;  %v11948_v2 = vld [vmem:[%s12914_s2 + $0x1c68] ss:$16 sps:$4 sm:$0xff]   ;;  %v11953_v48 = vld [vmem:[%s12914_s2 + $0x1c84] ss:$16 sps:$4 sm:$0xff]  }
 0x45e   : > { %7430 = vmatprep.subr.bf16.mxu0 %v11868_v3  ;;  %8086 = vmatprep.subr.bf16.mxu1 %v11871_v4  ;;  %v11956_v3 = vld [vmem:[%s12914_s2 + $0x1c8c] ss:$16 sps:$4 sm:$0xff]   ;;  %v11951_v4 = vld [vmem:[%s12914_s2 + $0x1c80] ss:$16 sps:$4 sm:$0xff]  }
 0x461   : > { %7431 = vmatpush1.bf16.msra.mxu0 %v11866_v5  ;;  %8087 = vmatpush1.bf16.msra.mxu1 %v11869_v6  ;;  %v11954_v5 = vld [vmem:[%s12914_s2 + $0x1c88] ss:$16 sps:$4 sm:$0xff]   ;;  %v11959_v6 = vld [vmem:[%s12914_s2 + $0x1ca4] ss:$16 sps:$4 sm:$0xff]  }
 0x462   : > { %7432 = vmatprep.subr.bf16.mxu0 %v11874_v59  ;;  %8088 = vmatprep.subr.bf16.mxu1 %v11877_v8  ;;  %v11962_v59 = vld [vmem:[%s12914_s2 + $0x1cac] ss:$16 sps:$4 sm:$0xff]   ;;  %v11957_v8 = vld [vmem:[%s12914_s2 + $0x1ca0] ss:$16 sps:$4 sm:$0xff]  }
 0x465   : > { %7433 = vmatpush1.bf16.msra.mxu0 %v11872_v57  ;;  %8089 = vmatpush1.bf16.msra.mxu1 %v11875_v11  ;;  %v11960_v57 = vld [vmem:[%s12914_s2 + $0x1ca8] ss:$16 sps:$4 sm:$0xff]   ;;  %v11965_v11 = vld [vmem:[%s12914_s2 + $0x1cc4] ss:$16 sps:$4 sm:$0xff]  }
 0x466   : > { %7434 = vmatprep.subr.bf16.mxu0 %v11880_v12  ;;  %8090 = vmatprep.subr.bf16.mxu1 %v11883_v13  ;;  %v11968_v12 = vld [vmem:[%s12914_s2 + $0x1ccc] ss:$16 sps:$4 sm:$0xff]   ;;  %v11963_v13 = vld [vmem:[%s12914_s2 + $0x1cc0] ss:$16 sps:$4 sm:$0xff]  }
 0x469   : > { %7435 = vmatpush1.bf16.msra.mxu0 %v11878_v15  ;;  %8091 = vmatpush1.bf16.msra.mxu1 %v11881_v16  ;;  %v11966_v15 = vld [vmem:[%s12914_s2 + $0x1cc8] ss:$16 sps:$4 sm:$0xff]   ;;  %v11971_v16 = vld [vmem:[%s12914_s2 + $0x1ce4] ss:$16 sps:$4 sm:$0xff]  }
 0x46a   : > { %7436 = vmatprep.subr.bf16.mxu0 %v11886_v17  ;;  %8092 = vmatprep.subr.bf16.mxu1 %v11889_v63  ;;  %v11974_v17 = vld [vmem:[%s12914_s2 + $0x1cec] ss:$16 sps:$4 sm:$0xff]   ;;  %v11969_v63 = vld [vmem:[%s12914_s2 + $0x1ce0] ss:$16 sps:$4 sm:$0xff]  }
 0x46d   : > { %7437 = vmatpush1.bf16.msra.mxu0 %v11884_v18  ;;  %8093 = vmatpush1.bf16.msra.mxu1 %v11887_v19  ;;  %v11972_v18 = vld [vmem:[%s12914_s2 + $0x1ce8] ss:$16 sps:$4 sm:$0xff]   ;;  %v11977_v19 = vld [vmem:[%s12914_s2 + $0x1d04] ss:$16 sps:$4 sm:$0xff]  }
 0x46e   : > { %7438 = vmatprep.subr.bf16.mxu0 %v11892_v20  ;;  %8094 = vmatprep.subr.bf16.mxu1 %v11895_v21  ;;  %v11980_v20 = vld [vmem:[%s12914_s2 + $0x1d0c] ss:$16 sps:$4 sm:$0xff]   ;;  %v11975_v21 = vld [vmem:[%s12914_s2 + $0x1d00] ss:$16 sps:$4 sm:$0xff]  }
 0x471   : > { %7439 = vmatpush1.bf16.msra.mxu0 %v11890_v9  ;;  %8095 = vmatpush1.bf16.msra.mxu1 %v11893_v23  ;;  %v11978_v9 = vld [vmem:[%s12914_s2 + $0x1d08] ss:$16 sps:$4 sm:$0xff]   ;;  %v11983_v23 = vld [vmem:[%s12914_s2 + $0x1d24] ss:$16 sps:$4 sm:$0xff]  }
 0x472   : > { %7440 = vmatprep.subr.bf16.mxu0 %v11898_v7  ;;  %8096 = vmatprep.subr.bf16.mxu1 %v11901_v24  ;;  %v11986_v7 = vld [vmem:[%s12914_s2 + $0x1d2c] ss:$16 sps:$4 sm:$0xff]   ;;  %v11981_v24 = vld [vmem:[%s12914_s2 + $0x1d20] ss:$16 sps:$4 sm:$0xff]  }
 0x475   : > { %7441 = vmatpush1.bf16.msra.mxu0 %v11896_v10  ;;  %8097 = vmatpush1.bf16.msra.mxu1 %v11899_v28  ;;  %v11984_v10 = vld [vmem:[%s12914_s2 + $0x1d28] ss:$16 sps:$4 sm:$0xff]   ;;  %v11989_v28 = vld [vmem:[%s12914_s2 + $0x1d44] ss:$16 sps:$4 sm:$0xff]  }
 0x476   : > { %7442 = vmatprep.subr.bf16.mxu0 %v11904_v31  ;;  %8098 = vmatprep.subr.bf16.mxu1 %v11907_v32  ;;  %v11992_v31 = vld [vmem:[%s12914_s2 + $0x1d4c] ss:$16 sps:$4 sm:$0xff]   ;;  %v11987_v32 = vld [vmem:[%s12914_s2 + $0x1d40] ss:$16 sps:$4 sm:$0xff]  }
 0x479   : > { %7443 = vmatpush1.bf16.msra.mxu0 %v11902_v34  ;;  %8099 = vmatpush1.bf16.msra.mxu1 %v11905_v14  ;;  %v11990_v34 = vld [vmem:[%s12914_s2 + $0x1d48] ss:$16 sps:$4 sm:$0xff]   ;;  %v11995_v14 = vld [vmem:[%s12914_s2 + $0x1d64] ss:$16 sps:$4 sm:$0xff]  }
 0x47a   : > { %7444 = vmatprep.subr.bf16.mxu0 %v11910_v35  ;;  %8100 = vmatprep.subr.bf16.mxu1 %v11913_v36  ;;  %v11998_v35 = vld [vmem:[%s12914_s2 + $0x1d6c] ss:$16 sps:$4 sm:$0xff]   ;;  %v11993_v36 = vld [vmem:[%s12914_s2 + $0x1d60] ss:$16 sps:$4 sm:$0xff]  }
 0x47d   : > { %7445 = vmatpush1.bf16.msra.mxu0 %v11908_v27  ;;  %8101 = vmatpush1.bf16.msra.mxu1 %v11911_v37  ;;  %v11996_v27 = vld [vmem:[%s12914_s2 + $0x1d68] ss:$16 sps:$4 sm:$0xff]   ;;  %v12001_v37 = vld [vmem:[%s12914_s2 + $0x1d84] ss:$16 sps:$4 sm:$0xff]  }
 0x47e   : > { %7446 = vmatprep.subr.bf16.mxu0 %v11916_v25  ;;  %8102 = vmatprep.subr.bf16.mxu1 %v11919_v39  ;;  %v12004_v25 = vld [vmem:[%s12914_s2 + $0x1d8c] ss:$16 sps:$4 sm:$0xff]   ;;  %v11999_v39 = vld [vmem:[%s12914_s2 + $0x1d80] ss:$16 sps:$4 sm:$0xff]  }
 0x481   : > { %7447 = vmatpush1.bf16.msra.mxu0 %v11914_v22  ;;  %8103 = vmatpush1.bf16.msra.mxu1 %v11917_v29  ;;  %v12002_v22 = vld [vmem:[%s12914_s2 + $0x1d88] ss:$16 sps:$4 sm:$0xff]   ;;  %v12007_v29 = vld [vmem:[%s12914_s2 + $0x1da4] ss:$16 sps:$4 sm:$0xff]  }
 0x482   : > { %7448 = vmatprep.subr.bf16.mxu0 %v11922_v42  ;;  %8104 = vmatprep.subr.bf16.mxu1 %v11925_v45  ;;  %v12010_v42 = vld [vmem:[%s12914_s2 + $0x1dac] ss:$16 sps:$4 sm:$0xff]   ;;  %v12005_v45 = vld [vmem:[%s12914_s2 + $0x1da0] ss:$16 sps:$4 sm:$0xff]  }
 0x485   : > { %7449 = vmatpush1.bf16.msra.mxu0 %v11920_v26  ;;  %8105 = vmatpush1.bf16.msra.mxu1 %v11923_v47  ;;  %v12008_v26 = vld [vmem:[%s12914_s2 + $0x1da8] ss:$16 sps:$4 sm:$0xff]   ;;  %v12013_v47 = vld [vmem:[%s12914_s2 + $0x1dc4] ss:$16 sps:$4 sm:$0xff]  }
 0x486   : > { %7459 = vmatprep.subr.bf16.mxu0 %v11929_v49  ;;  %8115 = vmatprep.subr.bf16.mxu1 %v11932_v30  ;;  %v12016_v49 = vld [vmem:[%s12914_s2 + $0x1dcc] ss:$16 sps:$4 sm:$0xff]   ;;  %v660_v30 = vcombine.high %v13967_v40, %v13967_v40  ;;  %v12017_v40 = vld [vmem:[%s12914_s2 + $0x1de0] ss:$16 sps:$4 sm:$0xff]  }
 0x488   : > { %7451 = vmatmul.mubr.bf16.vlgmr.msra.gmra.mrb[0].mxu0 %v735_v52  ;;  %8107 = vmatmul.mubr.bf16.vlgmr.msra.gmra.mrb[0].mxu1 %v735_v52  ;;  %v12014_v52 = vld [vmem:[%s12914_s2 + $0x1dc8] ss:$16 sps:$4 sm:$0xff]  }
 0x489   : > { %7460 = vmatpush1.bf16.msra.mxu0 %v11927_v33  ;;  %8116 = vmatpush1.bf16.msra.mxu1 %v11930_v53  ;;  %v12019_v33 = vld [vmem:[%s12914_s2 + $0x1de4] ss:$16 sps:$4 sm:$0xff]   ;;  %v12022_v53 = vld [vmem:[%s12914_s2 + $0x1dec] ss:$16 sps:$4 sm:$0xff]  }
 0x48a   : > { %7461 = vmatprep.subr.bf16.mxu0 %v11935_v54  ;;  %8117 = vmatprep.subr.bf16.mxu1 %v11938_v55  ;;  %v14048_v54 = vrot.slane %v660_v30, %v12991_v50  ;;  %v12020_v55 = vld [vmem:[%s12914_s2 + $0x1de8] ss:$16 sps:$4 sm:$0xff]  }
 0x48b   : > { %7491 = vmatprep.mubr.bf16.mxu0 %v738_v56  ;;  %8147 = vmatprep.mubr.bf16.mxu1 %v738_v56  ;;  %v12025_v56 = vld [vmem:[%s12914_s2 + $0x1e04] ss:$16 sps:$4 sm:$0xff]   ;;  %v12098_v30 = vld [vmem:[%s12914_s2 + $0x1f88] ss:$16 sps:$4 sm:$0xff]  }
 0x48d   : > { %7462 = vmatpush1.bf16.msra.mxu0 %v11933_v38  ;;  %8118 = vmatpush1.bf16.msra.mxu1 %v11936_v43  ;;  %v12028_v38 = vld [vmem:[%s12914_s2 + $0x1e0c] ss:$16 sps:$4 sm:$0xff]   ;;  %v676_v43 = vcombine.high %v14048_v54, %v14048_v54 }
 0x48e   : > { %7463 = vmatprep.subr.bf16.mxu0 %v11941_v58  ;;  %8119 = vmatprep.subr.bf16.mxu1 %v11944_v41  ;;  %v737_v58 = vpack.c.bf16 %v13975_v46, %v13975_v46  ;;  %v12023_v41 = vld [vmem:[%s12914_s2 + $0x1e00] ss:$16 sps:$4 sm:$0xff]  }
 0x48f   : > { %v12029_v46 = vld [vmem:[%s12914_s2 + $0x1e20] ss:$16 sps:$4 sm:$0xff]  }
 0x491   : > { %7464 = vmatpush1.bf16.msra.mxu0 %v11939_v60  ;;  %8120 = vmatpush1.bf16.msra.mxu1 %v11942_v61  ;;  %v12026_v60 = vld [vmem:[%s12914_s2 + $0x1e08] ss:$16 sps:$4 sm:$0xff]   ;;  %v12031_v61 = vld [vmem:[%s12914_s2 + $0x1e24] ss:$16 sps:$4 sm:$0xff]  }
 0x492   : > { %7465 = vmatprep.subr.bf16.mxu0 %v11947_v62  ;;  %8121 = vmatprep.subr.bf16.mxu1 %v11950_v0  ;;  %v12034_v62 = vld [vmem:[%s12914_s2 + $0x1e2c] ss:$16 sps:$4 sm:$0xff]   ;;  %v740_v0 = vpack.c.bf16 %v676_v43, %v676_v43  ;;  %v12115_v43 = vld [vmem:[%s12914_s2 + $0x1fe4] ss:$16 sps:$4 sm:$0xff]  }
 0x495   : > { %7466 = vmatpush1.bf16.msra.mxu0 %v11945_v1  ;;  %8122 = vmatpush1.bf16.msra.mxu1 %v11948_v2  ;;  %v12032_v1 = vld [vmem:[%s12914_s2 + $0x1e28] ss:$16 sps:$4 sm:$0xff]   ;;  %v12037_v2 = vld [vmem:[%s12914_s2 + $0x1e44] ss:$16 sps:$4 sm:$0xff]  }
 0x496   : > { %7467 = vmatprep.subr.bf16.mxu0 %v11953_v48  ;;  %8123 = vmatprep.subr.bf16.mxu1 %v11956_v3  ;;  %v12040_v48 = vld [vmem:[%s12914_s2 + $0x1e4c] ss:$16 sps:$4 sm:$0xff]   ;;  %v12035_v3 = vld [vmem:[%s12914_s2 + $0x1e40] ss:$16 sps:$4 sm:$0xff]  }
 0x499   : > { %7468 = vmatpush1.bf16.msra.mxu0 %v11951_v4  ;;  %8124 = vmatpush1.bf16.msra.mxu1 %v11954_v5  ;;  %v12038_v4 = vld [vmem:[%s12914_s2 + $0x1e48] ss:$16 sps:$4 sm:$0xff]   ;;  %v12043_v5 = vld [vmem:[%s12914_s2 + $0x1e64] ss:$16 sps:$4 sm:$0xff]  }
 0x49a   : > { %7469 = vmatprep.subr.bf16.mxu0 %v11959_v6  ;;  %8125 = vmatprep.subr.bf16.mxu1 %v11962_v59  ;;  %v12046_v6 = vld [vmem:[%s12914_s2 + $0x1e6c] ss:$16 sps:$4 sm:$0xff]   ;;  %v12041_v59 = vld [vmem:[%s12914_s2 + $0x1e60] ss:$16 sps:$4 sm:$0xff]  }
 0x49d   : > { %7470 = vmatpush1.bf16.msra.mxu0 %v11957_v8  ;;  %8126 = vmatpush1.bf16.msra.mxu1 %v11960_v57  ;;  %v12044_v8 = vld [vmem:[%s12914_s2 + $0x1e68] ss:$16 sps:$4 sm:$0xff]   ;;  %v12049_v57 = vld [vmem:[%s12914_s2 + $0x1e84] ss:$16 sps:$4 sm:$0xff]  }
 0x49e   : > { %7471 = vmatprep.subr.bf16.mxu0 %v11965_v11  ;;  %8127 = vmatprep.subr.bf16.mxu1 %v11968_v12  ;;  %v12052_v11 = vld [vmem:[%s12914_s2 + $0x1e8c] ss:$16 sps:$4 sm:$0xff]   ;;  %v12047_v12 = vld [vmem:[%s12914_s2 + $0x1e80] ss:$16 sps:$4 sm:$0xff]  }
 0x4a1   : > { %7472 = vmatpush1.bf16.msra.mxu0 %v11963_v13  ;;  %8128 = vmatpush1.bf16.msra.mxu1 %v11966_v15  ;;  %v12050_v13 = vld [vmem:[%s12914_s2 + $0x1e88] ss:$16 sps:$4 sm:$0xff]   ;;  %v12055_v15 = vld [vmem:[%s12914_s2 + $0x1ea4] ss:$16 sps:$4 sm:$0xff]  }
 0x4a2   : > { %7473 = vmatprep.subr.bf16.mxu0 %v11971_v16  ;;  %8129 = vmatprep.subr.bf16.mxu1 %v11974_v17  ;;  %v12058_v16 = vld [vmem:[%s12914_s2 + $0x1eac] ss:$16 sps:$4 sm:$0xff]   ;;  %v12053_v17 = vld [vmem:[%s12914_s2 + $0x1ea0] ss:$16 sps:$4 sm:$0xff]  }
 0x4a5   : > { %7474 = vmatpush1.bf16.msra.mxu0 %v11969_v63  ;;  %8130 = vmatpush1.bf16.msra.mxu1 %v11972_v18  ;;  %v12056_v63 = vld [vmem:[%s12914_s2 + $0x1ea8] ss:$16 sps:$4 sm:$0xff]   ;;  %v12061_v18 = vld [vmem:[%s12914_s2 + $0x1ec4] ss:$16 sps:$4 sm:$0xff]  }
 0x4a6   : > { %7475 = vmatprep.subr.bf16.mxu0 %v11977_v19  ;;  %8131 = vmatprep.subr.bf16.mxu1 %v11980_v20  ;;  %v12064_v19 = vld [vmem:[%s12914_s2 + $0x1ecc] ss:$16 sps:$4 sm:$0xff]   ;;  %v12059_v20 = vld [vmem:[%s12914_s2 + $0x1ec0] ss:$16 sps:$4 sm:$0xff]  }
 0x4a9   : > { %7476 = vmatpush1.bf16.msra.mxu0 %v11975_v21  ;;  %8132 = vmatpush1.bf16.msra.mxu1 %v11978_v9  ;;  %v12062_v21 = vld [vmem:[%s12914_s2 + $0x1ec8] ss:$16 sps:$4 sm:$0xff]   ;;  %v12067_v9 = vld [vmem:[%s12914_s2 + $0x1ee4] ss:$16 sps:$4 sm:$0xff]  }
 0x4aa   : > { %7477 = vmatprep.subr.bf16.mxu0 %v11983_v23  ;;  %8133 = vmatprep.subr.bf16.mxu1 %v11986_v7  ;;  %v12070_v23 = vld [vmem:[%s12914_s2 + $0x1eec] ss:$16 sps:$4 sm:$0xff]   ;;  %v12065_v7 = vld [vmem:[%s12914_s2 + $0x1ee0] ss:$16 sps:$4 sm:$0xff]  }
 0x4ad   : > { %7478 = vmatpush1.bf16.msra.mxu0 %v11981_v24  ;;  %8134 = vmatpush1.bf16.msra.mxu1 %v11984_v10  ;;  %v12068_v24 = vld [vmem:[%s12914_s2 + $0x1ee8] ss:$16 sps:$4 sm:$0xff]   ;;  %v12073_v10 = vld [vmem:[%s12914_s2 + $0x1f04] ss:$16 sps:$4 sm:$0xff]  }
 0x4ae   : > { %7479 = vmatprep.subr.bf16.mxu0 %v11989_v28  ;;  %8135 = vmatprep.subr.bf16.mxu1 %v11992_v31  ;;  %v12076_v28 = vld [vmem:[%s12914_s2 + $0x1f0c] ss:$16 sps:$4 sm:$0xff]   ;;  %v12071_v31 = vld [vmem:[%s12914_s2 + $0x1f00] ss:$16 sps:$4 sm:$0xff]  }
 0x4b1   : > { %7480 = vmatpush1.bf16.msra.mxu0 %v11987_v32  ;;  %8136 = vmatpush1.bf16.msra.mxu1 %v11990_v34  ;;  %v12074_v32 = vld [vmem:[%s12914_s2 + $0x1f08] ss:$16 sps:$4 sm:$0xff]   ;;  %v12079_v34 = vld [vmem:[%s12914_s2 + $0x1f24] ss:$16 sps:$4 sm:$0xff]  }
 0x4b2   : > { %7481 = vmatprep.subr.bf16.mxu0 %v11995_v14  ;;  %8137 = vmatprep.subr.bf16.mxu1 %v11998_v35  ;;  %v12082_v14 = vld [vmem:[%s12914_s2 + $0x1f2c] ss:$16 sps:$4 sm:$0xff]   ;;  %v12077_v35 = vld [vmem:[%s12914_s2 + $0x1f20] ss:$16 sps:$4 sm:$0xff]  }
 0x4b5   : > { %7482 = vmatpush1.bf16.msra.mxu0 %v11993_v36  ;;  %8138 = vmatpush1.bf16.msra.mxu1 %v11996_v27  ;;  %v12080_v36 = vld [vmem:[%s12914_s2 + $0x1f28] ss:$16 sps:$4 sm:$0xff]   ;;  %v12085_v27 = vld [vmem:[%s12914_s2 + $0x1f44] ss:$16 sps:$4 sm:$0xff]  }
 0x4b6   : > { %7483 = vmatprep.subr.bf16.mxu0 %v12001_v37  ;;  %8139 = vmatprep.subr.bf16.mxu1 %v12004_v25  ;;  %v12088_v37 = vld [vmem:[%s12914_s2 + $0x1f4c] ss:$16 sps:$4 sm:$0xff]   ;;  %v12083_v25 = vld [vmem:[%s12914_s2 + $0x1f40] ss:$16 sps:$4 sm:$0xff]  }
 0x4b9   : > { %7484 = vmatpush1.bf16.msra.mxu0 %v11999_v39  ;;  %8140 = vmatpush1.bf16.msra.mxu1 %v12002_v22  ;;  %v12086_v39 = vld [vmem:[%s12914_s2 + $0x1f48] ss:$16 sps:$4 sm:$0xff]   ;;  %v12091_v22 = vld [vmem:[%s12914_s2 + $0x1f64] ss:$16 sps:$4 sm:$0xff]  }
 0x4ba   : > { %7485 = vmatprep.subr.bf16.mxu0 %v12007_v29  ;;  %8141 = vmatprep.subr.bf16.mxu1 %v12010_v42  ;;  %v12094_v29 = vld [vmem:[%s12914_s2 + $0x1f6c] ss:$16 sps:$4 sm:$0xff]   ;;  %v12089_v42 = vld [vmem:[%s12914_s2 + $0x1f60] ss:$16 sps:$4 sm:$0xff]  }
 0x4bd   : > { %7486 = vmatpush1.bf16.msra.mxu0 %v12005_v45  ;;  %8142 = vmatpush1.bf16.msra.mxu1 %v12008_v26  ;;  %v12092_v45 = vld [vmem:[%s12914_s2 + $0x1f68] ss:$16 sps:$4 sm:$0xff]   ;;  %v12097_v26 = vld [vmem:[%s12914_s2 + $0x1f84] ss:$16 sps:$4 sm:$0xff]  }
 0x4be   : > { %7487 = vmatprep.subr.bf16.mxu0 %v12013_v47  ;;  %8143 = vmatprep.subr.bf16.mxu1 %v12016_v49  ;;  %v12100_v47 = vld [vmem:[%s12914_s2 + $0x1f8c] ss:$16 sps:$4 sm:$0xff]   ;;  %v12095_v49 = vld [vmem:[%s12914_s2 + $0x1f80] ss:$16 sps:$4 sm:$0xff]  }
 0x4c1   : > { %7488 = vmatpush1.bf16.msra.mxu0 %v12011_v51  ;;  %8144 = vmatpush1.bf16.msra.mxu1 %v12014_v52  ;;  %v12103_v51 = vld [vmem:[%s12914_s2 + $0x1fa4] ss:$16 sps:$4 sm:$0xff]   ;;  %v12106_v52 = vld [vmem:[%s12914_s2 + $0x1fac] ss:$16 sps:$4 sm:$0xff]  }
 0x4c2   : > { %7489 = vmatprep.subr.bf16.mxu0 %v12019_v33  ;;  %8145 = vmatprep.subr.bf16.mxu1 %v12022_v53  ;;  %v12101_v33 = vld [vmem:[%s12914_s2 + $0x1fa0] ss:$16 sps:$4 sm:$0xff]   ;;  %v12104_v53 = vld [vmem:[%s12914_s2 + $0x1fa8] ss:$16 sps:$4 sm:$0xff]  }
 0x4c5   : > { %7490 = vmatpush1.bf16.msra.mxu0 %v12017_v40  ;;  %8146 = vmatpush1.bf16.msra.mxu1 %v12020_v55  ;;  %v12109_v40 = vld [vmem:[%s12914_s2 + $0x1fc4] ss:$16 sps:$4 sm:$0xff]   ;;  %v12112_v55 = vld [vmem:[%s12914_s2 + $0x1fcc] ss:$16 sps:$4 sm:$0xff]  }
 0x4c6   : > { %7500 = vmatprep.subr.bf16.mxu0 %v12025_v56  ;;  %8156 = vmatprep.subr.bf16.mxu1 %v12028_v38  ;;  %v12107_v56 = vld [vmem:[%s12914_s2 + $0x1fc0] ss:$16 sps:$4 sm:$0xff]   ;;  %v12110_v38 = vld [vmem:[%s12914_s2 + $0x1fc8] ss:$16 sps:$4 sm:$0xff]  }
 0x4c8   : > { %7492 = vmatmul.mubr.bf16.vlgmr.msra.gmra.mrb[0].mxu0 %v737_v58  ;;  %8148 = vmatmul.mubr.bf16.vlgmr.msra.gmra.mrb[0].mxu1 %v737_v58  ;;  %v12118_v58 = vld [vmem:[%s12914_s2 + $0x1fec] ss:$16 sps:$4 sm:$0xff]  }
 0x4c9   : > { %7501 = vmatpush1.bf16.msra.mxu0 %v12023_v41  ;;  %8157 = vmatpush1.bf16.msra.mxu1 %v12026_v60  ;;  %v12113_v41 = vld [vmem:[%s12914_s2 + $0x1fe0] ss:$16 sps:$4 sm:$0xff]   ;;  %v12116_v60 = vld [vmem:[%s12914_s2 + $0x1fe8] ss:$16 sps:$4 sm:$0xff]  }
 0x4ca   : > { %7502 = vmatprep.subr.bf16.mxu0 %v12031_v61  ;;  %8158 = vmatprep.subr.bf16.mxu1 %v12034_v62  ;;  %v739_v61 = vpack.c.bf16 %v14048_v54, %v14048_v54 }
 0x4cb   : > { %7532 = vmatprep.mubr.bf16.mxu0 %v740_v0  ;;  %8188 = vmatprep.mubr.bf16.mxu1 %v740_v0 }
 0x4cd   : > { %7503 = vmatpush1.bf16.msra.mxu0 %v12029_v46  ;;  %8159 = vmatpush1.bf16.msra.mxu1 %v12032_v1 }
 0x4ce   : > { %7504 = vmatprep.subr.bf16.mxu0 %v12037_v2  ;;  %8160 = vmatprep.subr.bf16.mxu1 %v12040_v48 }
 0x4d1   : > { %7505 = vmatpush1.bf16.msra.mxu0 %v12035_v3  ;;  %8161 = vmatpush1.bf16.msra.mxu1 %v12038_v4 }
 0x4d2   : > { %7506 = vmatprep.subr.bf16.mxu0 %v12043_v5  ;;  %8162 = vmatprep.subr.bf16.mxu1 %v12046_v6 }
 0x4d5   : > { %7507 = vmatpush1.bf16.msra.mxu0 %v12041_v59  ;;  %8163 = vmatpush1.bf16.msra.mxu1 %v12044_v8 }
 0x4d6   : > { %7508 = vmatprep.subr.bf16.mxu0 %v12049_v57  ;;  %8164 = vmatprep.subr.bf16.mxu1 %v12052_v11  ;;  %v524_v57 = vld [vmem:[#allocation2] sm:$0xff] }
 0x4d9   : > { %7509 = vmatpush1.bf16.msra.mxu0 %v12047_v12  ;;  %8165 = vmatpush1.bf16.msra.mxu1 %v12050_v13  ;;  %v12120_v12 = vld [vmem:[#allocation11 + $0x4] ss:$8 sps:$4 sm:$0xff] (!%p10180_p12)  }
 0x4da   : > { %7510 = vmatprep.subr.bf16.mxu0 %v12055_v15  ;;  %8166 = vmatprep.subr.bf16.mxu1 %v12058_v16  ;;  %v12122_v13 = vld [vmem:[#allocation11 + $0x104] ss:$8 sps:$4 sm:$0xff] (!%p10180_p12)   ;;  %v12124_v15 = vld [vmem:[#allocation11] ss:$8 sps:$4 sm:$0xff] (!%p10180_p12)  }
 0x4db   : > { %v12125_v16 = vld [vmem:[#allocation11 + $0x100] ss:$8 sps:$4 sm:$0xff] (!%p10180_p12)  }
 0x4dd   : > { %7511 = vmatpush1.bf16.msra.mxu0 %v12053_v17  ;;  %8167 = vmatpush1.bf16.msra.mxu1 %v12056_v63  ;;  %v12126_v17 = vld [vmem:[#allocation11 + $0x14] ss:$8 sps:$4 sm:$0xff] (!%p10180_p12)  }
 0x4de   : > { %7512 = vmatprep.subr.bf16.mxu0 %v12061_v18  ;;  %8168 = vmatprep.subr.bf16.mxu1 %v12064_v19  ;;  %v12128_v63 = vld [vmem:[#allocation11 + $0x114] ss:$8 sps:$4 sm:$0xff] (!%p10180_p12)   ;;  %v12130_v18 = vld [vmem:[#allocation11 + $0x10] ss:$8 sps:$4 sm:$0xff] (!%p10180_p12)  }
 0x4df   : > { %v12131_v19 = vld [vmem:[#allocation11 + $0x110] ss:$8 sps:$4 sm:$0xff] (!%p10180_p12)  }
 0x4e1   : > { %7513 = vmatpush1.bf16.msra.mxu0 %v12059_v20  ;;  %8169 = vmatpush1.bf16.msra.mxu1 %v12062_v21  ;;  %v12132_v20 = vld [vmem:[#allocation11 + $0x24] ss:$8 sps:$4 sm:$0xff] (!%p10180_p12)  }
 0x4e2   : > { %7514 = vmatprep.subr.bf16.mxu0 %v12067_v9  ;;  %8170 = vmatprep.subr.bf16.mxu1 %v12070_v23  ;;  %v12134_v21 = vld [vmem:[#allocation11 + $0x124] ss:$8 sps:$4 sm:$0xff] (!%p10180_p12)   ;;  %v12136_v9 = vld [vmem:[#allocation11 + $0x20] ss:$8 sps:$4 sm:$0xff] (!%p10180_p12)  }
 0x4e3   : > { %v12137_v23 = vld [vmem:[#allocation11 + $0x120] ss:$8 sps:$4 sm:$0xff] (!%p10180_p12)  }
 0x4e5   : > { %7515 = vmatpush1.bf16.msra.mxu0 %v12065_v7  ;;  %8171 = vmatpush1.bf16.msra.mxu1 %v12068_v24  ;;  %v12138_v7 = vld [vmem:[#allocation11 + $0x34] ss:$8 sps:$4 sm:$0xff] (!%p10180_p12)  }
 0x4e6   : > { %7516 = vmatprep.subr.bf16.mxu0 %v12073_v10  ;;  %8172 = vmatprep.subr.bf16.mxu1 %v12076_v28  ;;  %v12140_v24 = vld [vmem:[#allocation11 + $0x134] ss:$8 sps:$4 sm:$0xff] (!%p10180_p12)   ;;  %v12142_v10 = vld [vmem:[#allocation11 + $0x30] ss:$8 sps:$4 sm:$0xff] (!%p10180_p12)  }
 0x4e7   : > { %v12143_v28 = vld [vmem:[#allocation11 + $0x130] ss:$8 sps:$4 sm:$0xff] (!%p10180_p12)  }
 0x4e9   : > { %7517 = vmatpush1.bf16.msra.mxu0 %v12071_v31  ;;  %8173 = vmatpush1.bf16.msra.mxu1 %v12074_v32  ;;  %v12144_v31 = vld [vmem:[#allocation11 + $0x44] ss:$8 sps:$4 sm:$0xff] (!%p10180_p12)  }
 0x4ea   : > { %7518 = vmatprep.subr.bf16.mxu0 %v12079_v34  ;;  %8174 = vmatprep.subr.bf16.mxu1 %v12082_v14  ;;  %v12146_v32 = vld [vmem:[#allocation11 + $0x144] ss:$8 sps:$4 sm:$0xff] (!%p10180_p12)   ;;  %v12148_v34 = vld [vmem:[#allocation11 + $0x40] ss:$8 sps:$4 sm:$0xff] (!%p10180_p12)  }
 0x4eb   : > { %v12149_v14 = vld [vmem:[#allocation11 + $0x140] ss:$8 sps:$4 sm:$0xff] (!%p10180_p12)  }
 0x4ed   : > { %7519 = vmatpush1.bf16.msra.mxu0 %v12077_v35  ;;  %8175 = vmatpush1.bf16.msra.mxu1 %v12080_v36  ;;  %v12150_v35 = vld [vmem:[#allocation11 + $0x54] ss:$8 sps:$4 sm:$0xff] (!%p10180_p12)  }
 0x4ee   : > { %7520 = vmatprep.subr.bf16.mxu0 %v12085_v27  ;;  %8176 = vmatprep.subr.bf16.mxu1 %v12088_v37  ;;  %v12152_v36 = vld [vmem:[#allocation11 + $0x154] ss:$8 sps:$4 sm:$0xff] (!%p10180_p12)   ;;  %v12154_v27 = vld [vmem:[#allocation11 + $0x50] ss:$8 sps:$4 sm:$0xff] (!%p10180_p12)  }
 0x4ef   : > { %v12155_v37 = vld [vmem:[#allocation11 + $0x150] ss:$8 sps:$4 sm:$0xff] (!%p10180_p12)  }
 0x4f1   : > { %7521 = vmatpush1.bf16.msra.mxu0 %v12083_v25  ;;  %8177 = vmatpush1.bf16.msra.mxu1 %v12086_v39  ;;  %v12156_v25 = vld [vmem:[#allocation11 + $0x64] ss:$8 sps:$4 sm:$0xff] (!%p10180_p12)  }
 0x4f2   : > { %7522 = vmatprep.subr.bf16.mxu0 %v12091_v22  ;;  %8178 = vmatprep.subr.bf16.mxu1 %v12094_v29  ;;  %v12158_v39 = vld [vmem:[#allocation11 + $0x164] ss:$8 sps:$4 sm:$0xff] (!%p10180_p12)   ;;  %v12160_v22 = vld [vmem:[#allocation11 + $0x60] ss:$8 sps:$4 sm:$0xff] (!%p10180_p12)  }
 0x4f3   : > { %v12161_v29 = vld [vmem:[#allocation11 + $0x160] ss:$8 sps:$4 sm:$0xff] (!%p10180_p12)  }
 0x4f5   : > { %7523 = vmatpush1.bf16.msra.mxu0 %v12089_v42  ;;  %8179 = vmatpush1.bf16.msra.mxu1 %v12092_v45  ;;  %v12162_v42 = vld [vmem:[#allocation11 + $0x74] ss:$8 sps:$4 sm:$0xff] (!%p10180_p12)  }
 0x4f6   : > { %7524 = vmatprep.subr.bf16.mxu0 %v12097_v26  ;;  %8180 = vmatprep.subr.bf16.mxu1 %v12100_v47  ;;  %v12164_v45 = vld [vmem:[#allocation11 + $0x174] ss:$8 sps:$4 sm:$0xff] (!%p10180_p12)   ;;  %v12166_v26 = vld [vmem:[#allocation11 + $0x70] ss:$8 sps:$4 sm:$0xff] (!%p10180_p12)  }
 0x4f7   : > { %v12167_v47 = vld [vmem:[#allocation11 + $0x170] ss:$8 sps:$4 sm:$0xff] (!%p10180_p12)  }
 0x4f9   : > { %7525 = vmatpush1.bf16.msra.mxu0 %v12095_v49  ;;  %8181 = vmatpush1.bf16.msra.mxu1 %v12098_v30  ;;  %v12168_v49 = vld [vmem:[#allocation11 + $0x84] ss:$8 sps:$4 sm:$0xff] (!%p10180_p12)  }
 0x4fa   : > { %7526 = vmatprep.subr.bf16.mxu0 %v12103_v51  ;;  %8182 = vmatprep.subr.bf16.mxu1 %v12106_v52  ;;  %v12170_v30 = vld [vmem:[#allocation11 + $0x184] ss:$8 sps:$4 sm:$0xff] (!%p10180_p12)   ;;  %v12172_v51 = vld [vmem:[#allocation11 + $0x80] ss:$8 sps:$4 sm:$0xff] (!%p10180_p12)  }
 0x4fb   : > { %v12173_v52 = vld [vmem:[#allocation11 + $0x180] ss:$8 sps:$4 sm:$0xff] (!%p10180_p12)  }
 0x4fd   : > { %7527 = vmatpush1.bf16.msra.mxu0 %v12101_v33  ;;  %8183 = vmatpush1.bf16.msra.mxu1 %v12104_v53  ;;  %v12174_v33 = vld [vmem:[#allocation11 + $0x94] ss:$8 sps:$4 sm:$0xff] (!%p10180_p12)  }
 0x4fe   : > { %7528 = vmatprep.subr.bf16.mxu0 %v12109_v40  ;;  %8184 = vmatprep.subr.bf16.mxu1 %v12112_v55  ;;  %v12176_v53 = vld [vmem:[#allocation11 + $0x194] ss:$8 sps:$4 sm:$0xff] (!%p10180_p12)   ;;  %v12178_v40 = vld [vmem:[#allocation11 + $0x90] ss:$8 sps:$4 sm:$0xff] (!%p10180_p12)  }
 0x4ff   : > { %v12179_v55 = vld [vmem:[#allocation11 + $0x190] ss:$8 sps:$4 sm:$0xff] (!%p10180_p12)  }
 0x501   : > { %7529 = vmatpush1.bf16.msra.mxu0 %v12107_v56  ;;  %8185 = vmatpush1.bf16.msra.mxu1 %v12110_v38  ;;  %v12180_v56 = vld [vmem:[#allocation11 + $0xa4] ss:$8 sps:$4 sm:$0xff] (!%p10180_p12)  }
 0x502   : > { %7530 = vmatprep.subr.bf16.mxu0 %v12115_v43  ;;  %8186 = vmatprep.subr.bf16.mxu1 %v12118_v58  ;;  %v12182_v38 = vld [vmem:[#allocation11 + $0x1a4] ss:$8 sps:$4 sm:$0xff] (!%p10180_p12)   ;;  %v12184_v43 = vld [vmem:[#allocation11 + $0xa0] ss:$8 sps:$4 sm:$0xff] (!%p10180_p12)  }
 0x503   : > { %v12185_v58 = vld [vmem:[#allocation11 + $0x1a0] ss:$8 sps:$4 sm:$0xff] (!%p10180_p12)  }
 0x505   : > { %7531 = vmatpush1.bf16.msra.mxu0 %v12113_v41  ;;  %8187 = vmatpush1.bf16.msra.mxu1 %v12116_v60  ;;  %v14126_v41 = vsub.s32 (!%p10180_p12), 0, %v12983_v44  ;;  %v12186_v60 = vld [vmem:[#allocation11 + $0xb4] ss:$8 sps:$4 sm:$0xff] (!%p10180_p12)  }
 0x506   : > { %8760 = vmatprep.subr.bf16.mxu1 (!%p10180_p12), %v12120_v12  ;;  %8801 = vmatprep.subr.bf16.mxu0 (!%p10180_p12), %v12122_v13 }
 0x508   : > { %7533 = vmatmul.mubr.bf16.vlgmr.msra.gmra.mrb[0].mxu0 %v739_v61  ;;  %8189 = vmatmul.mubr.bf16.vlgmr.msra.gmra.mrb[0].mxu1 %v739_v61  ;;  %v14129_v61 = vsub.s32 (!%p10180_p12), 1, %v12983_v44 }
 0x509   : > { %8761 = vmatpush1.bf16.msra.mxu1 (!%p10180_p12), %v12124_v15  ;;  %8802 = vmatpush1.bf16.msra.mxu0 (!%p10180_p12), %v12125_v16 }
 0x50a   : > { %8762 = vmatprep.subr.bf16.mxu1 (!%p10180_p12), %v12126_v17  ;;  %8803 = vmatprep.subr.bf16.mxu0 (!%p10180_p12), %v12128_v63 }
 0x50d   : > { %8763 = vmatpush1.bf16.msra.mxu1 (!%p10180_p12), %v12130_v18  ;;  %8804 = vmatpush1.bf16.msra.mxu0 (!%p10180_p12), %v12131_v19 }
 0x50e   : > { %8764 = vmatprep.subr.bf16.mxu1 (!%p10180_p12), %v12132_v20  ;;  %8805 = vmatprep.subr.bf16.mxu0 (!%p10180_p12), %v12134_v21  ;;  %v12196_v20 = vld [vmem:[#allocation11 + $0xc0] ss:$8 sps:$4 sm:$0xff] (!%p10180_p12)  }
 0x50f   : > { %v12197_v21 = vld [vmem:[#allocation11 + $0x1c0] ss:$8 sps:$4 sm:$0xff] (!%p10180_p12)  }
 0x511   : > { %8765 = vmatpush1.bf16.msra.mxu1 (!%p10180_p12), %v12136_v9  ;;  %8806 = vmatpush1.bf16.msra.mxu0 (!%p10180_p12), %v12137_v23 }
 0x512   : > { %8766 = vmatprep.subr.bf16.mxu1 (!%p10180_p12), %v12138_v7  ;;  %8807 = vmatprep.subr.bf16.mxu0 (!%p10180_p12), %v12140_v24  ;;  %v12198_v24 = vld [vmem:[#allocation11 + $0xd4] ss:$8 sps:$4 sm:$0xff] (!%p10180_p12)  }
 0x515   : > { %8767 = vmatpush1.bf16.msra.mxu1 (!%p10180_p12), %v12142_v10  ;;  %8808 = vmatpush1.bf16.msra.mxu0 (!%p10180_p12), %v12143_v28  ;;  %v12200_v10 = vld [vmem:[#allocation11 + $0x1d4] ss:$8 sps:$4 sm:$0xff] (!%p10180_p12)  }
 0x516   : > { %8768 = vmatprep.subr.bf16.mxu1 (!%p10180_p12), %v12144_v31  ;;  %8809 = vmatprep.subr.bf16.mxu0 (!%p10180_p12), %v12146_v32 }
 0x519   : > { %8769 = vmatpush1.bf16.msra.mxu1 (!%p10180_p12), %v12148_v34  ;;  %8810 = vmatpush1.bf16.msra.mxu0 (!%p10180_p12), %v12149_v14 }
 0x51a   : > { %8770 = vmatprep.subr.bf16.mxu1 (!%p10180_p12), %v12150_v35  ;;  %8811 = vmatprep.subr.bf16.mxu0 (!%p10180_p12), %v12152_v36 }
 0x51d   : > { %8771 = vmatpush1.bf16.msra.mxu1 (!%p10180_p12), %v12154_v27  ;;  %8812 = vmatpush1.bf16.msra.mxu0 (!%p10180_p12), %v12155_v37  ;;  %v12202_v37 = vld [vmem:[#allocation11 + $0xd0] ss:$8 sps:$4 sm:$0xff] (!%p10180_p12)  }
 0x51e   : > { %8772 = vmatprep.subr.bf16.mxu1 (!%p10180_p12), %v12156_v25  ;;  %8813 = vmatprep.subr.bf16.mxu0 (!%p10180_p12), %v12158_v39  ;;  %v12203_v25 = vld [vmem:[#allocation11 + $0x1d0] ss:$8 sps:$4 sm:$0xff] (!%p10180_p12)  }
 0x521   : > { %8773 = vmatpush1.bf16.msra.mxu1 (!%p10180_p12), %v12160_v22  ;;  %8814 = vmatpush1.bf16.msra.mxu0 (!%p10180_p12), %v12161_v29  ;;  %v12204_v22 = vld [vmem:[#allocation11 + $0xe4] ss:$8 sps:$4 sm:$0xff] (!%p10180_p12)  }
 0x522   : > { %8774 = vmatprep.subr.bf16.mxu1 (!%p10180_p12), %v12162_v42  ;;  %8815 = vmatprep.subr.bf16.mxu0 (!%p10180_p12), %v12164_v45  ;;  %v12206_v29 = vld [vmem:[#allocation11 + $0x1e4] ss:$8 sps:$4 sm:$0xff] (!%p10180_p12)  }
 0x525   : > { %8775 = vmatpush1.bf16.msra.mxu1 (!%p10180_p12), %v12166_v26  ;;  %8816 = vmatpush1.bf16.msra.mxu0 (!%p10180_p12), %v12167_v47 }
 0x526   : > { %8776 = vmatprep.subr.bf16.mxu1 (!%p10180_p12), %v12168_v49  ;;  %8817 = vmatprep.subr.bf16.mxu0 (!%p10180_p12), %v12170_v30  ;;  %v12208_v49 = vld [vmem:[#allocation11 + $0xe0] ss:$8 sps:$4 sm:$0xff] (!%p10180_p12)  }
 0x527   : > { %v12209_v30 = vld [vmem:[#allocation11 + $0x1e0] ss:$8 sps:$4 sm:$0xff] (!%p10180_p12)  }
 0x529   : > { %8777 = vmatpush1.bf16.msra.mxu1 (!%p10180_p12), %v12172_v51  ;;  %8818 = vmatpush1.bf16.msra.mxu0 (!%p10180_p12), %v12173_v52  ;;  %v12210_v51 = vld [vmem:[#allocation11 + $0xf4] ss:$8 sps:$4 sm:$0xff] (!%p10180_p12)  }
 0x52a   : > { %8778 = vmatprep.subr.bf16.mxu1 (!%p10180_p12), %v12174_v33  ;;  %8819 = vmatprep.subr.bf16.mxu0 (!%p10180_p12), %v12176_v53  ;;  %v12212_v52 = vld [vmem:[#allocation11 + $0x1f4] ss:$8 sps:$4 sm:$0xff] (!%p10180_p12)   ;;  %v8888_v53 = vld [vmem:[%s14321_s11 + $0x80] sm:$0xff] (!%p10180_p12) }
 0x52d   : > { %8779 = vmatpush1.bf16.msra.mxu1 (!%p10180_p12), %v12178_v40  ;;  %8820 = vmatpush1.bf16.msra.mxu0 (!%p10180_p12), %v12179_v55  ;;  %v8889_v40 = vld [vmem:[%s14321_s11 + $0x88] sm:$0xff] (!%p10180_p12) }
 0x52e   : > { %8780 = vmatprep.subr.bf16.mxu1 (!%p10180_p12), %v12180_v56  ;;  %8821 = vmatprep.subr.bf16.mxu0 (!%p10180_p12), %v12182_v38  ;;  %v12214_v56 = vld [vmem:[#allocation11 + $0xf0] ss:$8 sps:$4 sm:$0xff] (!%p10180_p12)  }
 0x52f   : > { %v12215_v38 = vld [vmem:[#allocation11 + $0x1f0] ss:$8 sps:$4 sm:$0xff] (!%p10180_p12)  }
 0x531   : > { %8781 = vmatpush1.bf16.msra.mxu1 (!%p10180_p12), %v12184_v43  ;;  %8822 = vmatpush1.bf16.msra.mxu0 (!%p10180_p12), %v12185_v58 }
 0x532   : > { %8782 = vmatprep.subr.bf16.mxu1 (!%p10180_p12), %v12186_v60  ;;  %v10287_v60 = vpack.c.bf16 (!%p10180_p12), %v8889_v40, %v8888_v53 }
 0x5db   : > { %v7534_v62 = vpop.f32.mrb[0].mxu0  ;;  %v8190_v0 = vpop.f32.mrb[0].mxu1 }
 0x5dc   : > { %v7536_v46 = vpop.f32.mrb[1].mxu0  ;;  %v8192_v1 = vpop.f32.mrb[1].mxu1 }
 0x5dd   : > { %v8201_v2 = vcombine.low %v7534_v62, %v7536_v46  ;;  %v8202_v48 = vcombine.low %v8190_v0, %v8192_v1  ;;  %v7538_v3 = vpop.f32.mrb[2].mxu0  ;;  %v8194_v4 = vpop.f32.mrb[2].mxu1  ;;  %v8238_v62 = vsub.s32 (!%p10180_p12), 2, %v12983_v44  ;;  %v12188_v0 = vld [vmem:[#allocation11 + $0x1b4] ss:$8 sps:$4 sm:$0xff] (!%p10180_p12)   ;;  %v8242_v46 = vsub.s32 (!%p10180_p12), 3, %v12983_v44 }
 0x5de   : > { %v7539_v5 = vpop.f32.mrb[3].mxu0  ;;  %v8195_v6 = vpop.f32.mrb[3].mxu1  ;;  %v8226_v1 = vld [vmem:[#allocation6] sm:$0xf] (!%p10180_p12)  ;;  %v12190_v3 = vld [vmem:[#allocation11 + $0xb0] ss:$8 sps:$4 sm:$0xff] (!%p10180_p12)   ;;  %8823 = vmatprep.subr.bf16.mxu0 (!%p10180_p12), %v12188_v0 }
 0x5df   : > { %v8209_v59 = vrot.slane %v8201_v2, %v12991_v50  ;;  %v8216_v8 = vrot.slane %v8202_v48, %v12991_v50  ;;  %8224 = sbr.rel (%p10180_p12) target bundleno = 1974 (0x7b6), region = 108  ;;  %v8264_v2 = vld [vmem:[#allocation8] sm:$0xf] (!%p10180_p12)  ;;  %v8301_v48 = vld [vmem:[#allocation9] sm:$0xf] (!%p10180_p12)  ;;  %v8231_v5 = vrot.slane (!%p10180_p12), %v8226_v1, %v14126_v41  ;;  %v8235_v6 = vrot.slane (!%p10180_p12), %v8226_v1, %v14129_v61  ;;  %8783 = vmatpush1.bf16.msra.mxu1 (!%p10180_p12), %v12190_v3 }
 0x5e0   : > { %v12191_v4 = vld [vmem:[#allocation11 + $0x1b0] ss:$8 sps:$4 sm:$0xff] (!%p10180_p12)   ;;  %v8273_v44 = vrot.slane (!%p10180_p12), %v8264_v2, %v14129_v61  ;;  %v8277_v13 = vrot.slane (!%p10180_p12), %v8264_v2, %v8238_v62  ;;  %v8281_v15 = vrot.slane (!%p10180_p12), %v8264_v2, %v8242_v46  ;;  %v8306_v16 = vrot.slane (!%p10180_p12), %v8301_v48, %v14126_v41 }
 0x5e1   : > { %v8217_v54 = vcombine.low %v8209_v59, %v8216_v8  ;;  %v8239_v59 = vrot.slane (!%p10180_p12), %v8226_v1, %v8238_v62  ;;  %v12192_v8 = vld [vmem:[#allocation11 + $0xc4] ss:$8 sps:$4 sm:$0xff] (!%p10180_p12)   ;;  %v8244_v12 = vcombine.low (!%p10180_p12), %v8231_v5, %v8235_v6  ;;  %v8310_v18 = vrot.slane (!%p10180_p12), %v8301_v48, %v14129_v61  ;;  %8824 = vmatpush1.bf16.msra.mxu0 (!%p10180_p12), %v12191_v4  ;;  %v8873_v0 = vld [vmem:[%s14321_s11 + $0x8] sm:$0xff] (!%p10180_p12) }
 0x5e2   : > { %v8314_v19 = vrot.slane (!%p10180_p12), %v8301_v48, %v8238_v62  ;;  %v8283_v23 = vcombine.low (!%p10180_p12), %v8277_v13, %v8281_v15  ;;  %v8318_v7 = vrot.slane (!%p10180_p12), %v8301_v48, %v8242_v46  ;;  %8784 = vmatprep.subr.bf16.mxu1 (!%p10180_p12), %v12192_v8  ;;  %v8872_v62 = vld [vmem:[%s14321_s11] sm:$0xff] (!%p10180_p12)  ;;  %v8891_v48 = vld [vmem:[%s14321_s11 + $0x98] sm:$0xff] (!%p10180_p12) }
 0x5e3   : > { %v8219_v11 = vadd.f32 %v8217_v54, %v524_v57  ;;  %v12194_v57 = vld [vmem:[#allocation11 + $0x1c4] ss:$8 sps:$4 sm:$0xff] (!%p10180_p12)   ;;  %v8243_v54 = vrot.slane (!%p10180_p12), %v8226_v1, %v8242_v46  ;;  %v8252_v9 = vrot.slane (!%p10180_p12), %v8244_v12, %v12991_v50  ;;  %v8319_v32 = vcombine.low (!%p10180_p12), %v8306_v16, %v8310_v18  ;;  %8785 = vmatpush1.bf16.msra.mxu1 (!%p10180_p12), %v12196_v20  ;;  %v8877_v16 = vld [vmem:[%s14321_s11 + $0x28] sm:$0xff] (!%p10180_p12)  ;;  %v8878_v20 = vld [vmem:[%s14321_s11 + $0x30] sm:$0xff] (!%p10180_p12) }
 0x5e4   : > { %8825 = vmatprep.subr.bf16.mxu0 (!%p10180_p12), %v12194_v57  ;;  %v8297_v14 = vrot.slane (!%p10180_p12), %v8283_v23, %v12991_v50  ;;  %v8320_v35 = vcombine.low (!%p10180_p12), %v8314_v19, %v8318_v7  ;;  %8786 = vmatprep.subr.bf16.mxu1 (!%p10180_p12), %v12198_v24  ;;  %v10289_v6 = vpack.c.bf16 (!%p10180_p12), %v8873_v0, %v8872_v62  ;;  %v8875_v57 = vld [vmem:[%s14321_s11 + $0x18] sm:$0xff] (!%p10180_p12)  ;;  %v8876_v15 = vld [vmem:[%s14321_s11 + $0x20] sm:$0xff] (!%p10180_p12)  ;;  %v8897_v23 = vld [vmem:[%s14321_s11 + $0xc8] sm:$0xff] (!%p10180_p12) }
 0x5e5   : > { %8220 = vst [vmem:[#allocation2] sm:$0xff] %v8219_v11  ;;  %v8269_v11 = vrot.slane (!%p10180_p12), %v8264_v2, %v14126_v41  ;;  %v8245_v17 = vcombine.low (!%p10180_p12), %v8239_v59, %v8243_v54  ;;  %v8327_v27 = vrot.slane (!%p10180_p12), %v8319_v32, %v12991_v50  ;;  %8826 = vmatpush1.bf16.msra.mxu0 (!%p10180_p12), %v12197_v21  ;;  %v8890_v2 = vld [vmem:[%s14321_s11 + $0x90] sm:$0xff] (!%p10180_p12)  ;;  %v8879_v21 = vld [vmem:[%s14321_s11 + $0x38] sm:$0xff] (!%p10180_p12) }
 0x5e6   : > { %v8334_v39 = vrot.slane %v8320_v35, %v12991_v50  ;;  %8827 = vmatprep.subr.bf16.mxu0 %v12200_v10  ;;  %v10291_v8 = vpack.c.bf16 %v8891_v48, %v8890_v2  ;;  %v10297_v18 = vpack.c.bf16 %v8877_v16, %v8876_v15  ;;  %v10301_v7 = vpack.c.bf16 %v8879_v21, %v8878_v20  ;;  %v8880_v10 = vld [vmem:[%s14321_s11 + $0x40] sm:$0xff]  ;;  %v8898_v32 = vld [vmem:[%s14321_s11 + $0xd0] sm:$0xff] }
 0x5e7   : > { %v8282_v63 = vcombine.low %v8269_v11, %v8273_v44  ;;  %v8259_v28 = vrot.slane %v8245_v17, %v12991_v50  ;;  %8787 = vmatpush1.bf16.msra.mxu1 %v12202_v37  ;;  %v8892_v11 = vld [vmem:[%s14321_s11 + $0xa0] sm:$0xff]  ;;  %v8893_v44 = vld [vmem:[%s14321_s11 + $0xa8] sm:$0xff]  ;;  %v8894_v17 = vld [vmem:[%s14321_s11 + $0xb0] sm:$0xff] }
 0x5e8   : > { %v8335_v47 = vcombine.low %v8327_v27, %v8334_v39  ;;  %8788 = vmatprep.subr.bf16.mxu1 %v12204_v22  ;;  %v10295_v13 = vpack.c.bf16 %v8893_v44, %v8892_v11  ;;  %v8882_v35 = vld [vmem:[%s14321_s11 + $0x50] sm:$0xff]  ;;  %v8900_v37 = vld [vmem:[%s14321_s11 + $0xe0] sm:$0xff] }
 0x5e9   : > { %v8290_v31 = vrot.slane %v8282_v63, %v12991_v50  ;;  %v8260_v36 = vcombine.low %v8252_v9, %v8259_v28  ;;  %8828 = vmatpush1.bf16.msra.mxu0 %v12203_v25  ;;  %v8895_v63 = vld [vmem:[%s14321_s11 + $0xb8] sm:$0xff]  ;;  %v8896_v9 = vld [vmem:[%s14321_s11 + $0xc0] sm:$0xff]  ;;  %v8881_v28 = vld [vmem:[%s14321_s11 + $0x48] sm:$0xff] }
 0x5ea   : > { %8829 = vmatprep.subr.bf16.mxu0 %v12206_v29  ;;  %v10299_v19 = vpack.c.bf16 %v8895_v63, %v8894_v17  ;;  %v10303_v24 = vpack.c.bf16 %v8897_v23, %v8896_v9  ;;  %v8901_v25 = vld [vmem:[%s14321_s11 + $0xe8] sm:$0xff]  ;;  %v8884_v22 = vld [vmem:[%s14321_s11 + $0x60] sm:$0xff] }
 0x5eb   : > { %v8298_v45 = vcombine.low %v8290_v31, %v8297_v14  ;;  %8789 = vmatpush1.bf16.msra.mxu1 %v12208_v49  ;;  %v10305_v31 = vpack.c.bf16 %v8881_v28, %v8880_v10  ;;  %v10311_v39 = vpack.c.bf16 %v8901_v25, %v8900_v37  ;;  %v8885_v29 = vld [vmem:[%s14321_s11 + $0x68] sm:$0xff]  ;;  %v8886_v49 = vld [vmem:[%s14321_s11 + $0x70] sm:$0xff] }
 0x5ec   : > { %v8225_v34 = vld [vmem:[#allocation2] sm:$0xff]  ;;  %8790 = vmatprep.subr.bf16.mxu1 %v12210_v51 }
 0x5ed   : > { %v8262_v42 = vadd.f32 %v8260_v36, %v8225_v34  ;;  %8830 = vmatpush1.bf16.msra.mxu0 %v12209_v30  ;;  %v8899_v34 = vld [vmem:[%s14321_s11 + $0xd8] sm:$0xff] }
 0x5ee   : > { %8831 = vmatprep.subr.bf16.mxu0 %v12212_v52  ;;  %v10307_v14 = vpack.c.bf16 %v8899_v34, %v8898_v32  ;;  %v8883_v36 = vld [vmem:[%s14321_s11 + $0x58] sm:$0xff]  ;;  %v8428_v52 = vld [vmem:[#allocation12] sm:$0x3] }
 0x5ef   : > { %v8263_v26 = vmax.f32 %v8262_v42, 0.0  ;;  %8791 = vmatpush1.bf16.msra.mxu1 %v12214_v56  ;;  %v10309_v27 = vpack.c.bf16 %v8883_v36, %v8882_v35  ;;  %v10313_v42 = vpack.c.bf16 %v8885_v29, %v8884_v22  ;;  %v8887_v30 = vld [vmem:[%s14321_s11 + $0x78] sm:$0xff]  ;;  %v8437_v53 = vrot.slane %v8428_v52, %v14129_v61 }
 0x5f0   : > { %10288 = vmatprep.subr.bf16.mxu1 %v10287_v60  ;;  %v10317_v51 = vpack.c.bf16 %v8887_v30, %v8886_v49 }
 0x5f1   : > { %v8300_v33 = vmul.f32 %v8298_v45, %v8263_v26  ;;  %8832 = vmatpush1.bf16.msra.mxu0 %v12215_v38  ;;  %v8902_v45 = vld [vmem:[%s14321_s11 + $0xf0] sm:$0xff]  ;;  %v8903_v26 = vld [vmem:[%s14321_s11 + $0xf8] sm:$0xff] }
 0x5f3   : > { %v8337_v55 = vadd.f32 %v8335_v47, %v8300_v33  ;;  %v10315_v47 = vpack.c.bf16 %v8903_v26, %v8902_v45  ;;  %v8433_v33 = vrot.slane %v8428_v52, %v14126_v41 }
 0x5f5   : > { %v8346_v43 = vrot.slane %v8337_v55, %v12991_v50  ;;  %v8339_v58 = vcombine.high %v8337_v55, %v8337_v55  ;;  %v8844_v55 = vld [vmem:[#allocation14] sm:$0x3] }
 0x5f6   : > { %v8849_v0 = vrot.slane %v8844_v55, %v14126_v41 }
 0x5f7   : > { %v8354_v46 = vcombine.high %v8346_v43, %v8346_v43  ;;  %v8353_v1 = vrot.slane %v8339_v58, %v12991_v50  ;;  %v8360_v3 = vpack.c.bf16 %v8346_v43, %v8346_v43  ;;  %v8874_v50 = vld [vmem:[%s14321_s11 + $0x10] sm:$0xff] }
 0x5f8   : > { %v10293_v12 = vpack.c.bf16 %v8875_v57, %v8874_v50 }
 0x5f9   : > { %v8361_v4 = vpack.c.bf16 %v8354_v46, %v8354_v46  ;;  %v8355_v5 = vcombine.high %v8353_v1, %v8353_v1  ;;  %v8362_v59 = vpack.c.bf16 %v8353_v1, %v8353_v1  ;;  %v8858_v46 = vld [vmem:[#allocation15] sm:$0x3] }
 0x5fa   : > { %v8863_v57 = vrot.slane %v8858_v46, %v14126_v41 }
 0x5fb   : > { %8792 = vmatprep.mubr.bf16.mxu1 %v8361_v4  ;;  %v8363_v54 = vpack.c.bf16 %v8355_v5, %v8355_v5 }
 0x5fc   : > { %8793 = vmatmul.mubr.bf16.vlgmr.msra.gmra.mrb[0].mxu1 %v8360_v3  ;;  %v8853_v3 = vrot.slane %v8844_v55, %v14129_v61 }
 0x5fd   : > { %8833 = vmatprep.mubr.bf16.mxu0 %v8363_v54  ;;  %10290 = vmatpush3.bf16.msra.mxu1 %v10289_v6 }
 0x5fe   : > { %8834 = vmatmul.mubr.bf16.vlgmr.msra.gmra.mrb[0].mxu0 %v8362_v59  ;;  %10292 = vmatprep.subr.bf16.mxu1 %v10291_v8  ;;  %v8867_v8 = vrot.slane %v8858_v46, %v14129_v61 }
 0x601   : > { %10294 = vmatpush3.bf16.msra.mxu1 %v10293_v12 }
 0x602   : > { %10296 = vmatprep.subr.bf16.mxu1 %v10295_v13  ;;  %v10245_v13 = vld [vmem:[#allocation17] ss:$0 sm:$0xff] }
 0x605   : > { %10298 = vmatpush3.bf16.msra.mxu1 %v10297_v18 }
 0x606   : > { %10300 = vmatprep.subr.bf16.mxu1 %v10299_v19 }
 0x609   : > { %10302 = vmatpush3.bf16.msra.mxu1 %v10301_v7 }
 0x60a   : > { %10304 = vmatprep.subr.bf16.mxu1 %v10303_v24 }
 0x60d   : > { %10306 = vmatpush3.bf16.msra.mxu1 %v10305_v31 }
 0x60e   : > { %10308 = vmatprep.subr.bf16.mxu1 %v10307_v14 }
 0x611   : > { %10310 = vmatpush3.bf16.msra.mxu1 %v10309_v27 }
 0x612   : > { %10312 = vmatprep.subr.bf16.mxu1 %v10311_v39 }
 0x615   : > { %10314 = vmatpush3.bf16.msra.mxu1 %v10313_v42 }
 0x616   : > { %10316 = vmatprep.subr.bf16.mxu1 %v10315_v47 }
 0x619   : > { %10318 = vmatpush3.bf16.msra.mxu1 %v10317_v51 }
 0x6cf   : > { %v8794_v40 = vpop.f32.mrb[0].mxu1 }
 0x6d0   : > { %v8795_v56 = vadd.f32 %v8794_v40, %v8433_v33  ;;  %v8796_v38 = vpop.f32.mrb[1].mxu1 }
 0x6d1   : > { %v8835_v43 = vpop.f32.mrb[0].mxu0  ;;  %v8797_v58 = vadd.f32 %v8796_v38, %v8437_v53  ;;  %v8798_v60 = vpop.f32.mrb[2].mxu1 }
 0x6d2   : > { %v8836_v62 = vadd.f32 %v8835_v43, %v8795_v56  ;;  %v8837_v1 = vpop.f32.mrb[1].mxu0  ;;  %v8799_v2 = vpop.f32.mrb[3].mxu1 }
 0x6d3   : > { %v8838_v48 = vadd.f32 %v8837_v1, %v8797_v58  ;;  %v8839_v4 = vpop.f32.mrb[2].mxu0 }
 0x6d4   : > { %v8842_v5 = vmax.f32 %v8836_v62, 0.0  ;;  %v8840_v6 = vpop.f32.mrb[3].mxu0 }
 0x6d5   : > { %v8843_v59 = vmax.f32 %v8838_v48, 0.0 }
 0x6d6   : > { %v8856_v50 = vmul.f32 %v8849_v0, %v8842_v5 }
 0x6d7   : > { %v8857_v54 = vmul.f32 %v8853_v3, %v8843_v59 }
 0x6d8   : > { %v8870_v44 = vadd.f32 %v8863_v57, %v8856_v50 }
 0x6d9   : > { %v8871_v11 = vadd.f32 %v8867_v8, %v8857_v54 }
 0x6db   : > { %8975 = vmatprep.mubr.f32.mxu1 %v8871_v11 }
 0x6dc   : > { %8976 = vmatmul.mubr.f32.vlgmr.msra.gmra.mrb[4].mxu1 %v8870_v44 }
 0x7af   : > { %v10284_v12 = vpop.f32.mrb[4].mxu1 }
 0x7b0   : > { %v10285_v15 = vpop.f32.mrb[5].mxu1 }
 0x7b1   : > { %v10286_v16 = vadd.f32 %v10285_v15, %v10284_v12 }
 0x7b3   : > { %v8978_v17 = vadd.f32 %v10286_v16, %v10245_v13 }
 0x7b5   : > { %8982 = vst.msk [vmem:[#allocation18] sm:$0x3] %vm8981_vm0, %v8978_v17 }
 0x7b6 PF: > { %p10527_p8 = scmp.eq.s32.totalorder %s12649_s23, 3  ;;  %s12567_s20 = smov [#allocation18]  }
 0x7b7   : > { %s8990_s21 = sshll.u32 %s12567_s20, 4  ;;  %s8991_s21 = int_to_ptr.vmem [resolvable:$true] %s8990_s21 }
 0x7b8   : > { %s12470_s16 = scalar_lea.vmem %s8991_s21, 32  ;;  %p12477_p6 = scmp.lt.s32.totalorder %s8991_s21, %s8991_s21 }
 0x7b9   : > { %p12471_p13 = scmp.ne.s32.totalorder %s8991_s21, %s12470_s16  ;;  %p12478_p0 = scmp.lt.s32.totalorder %s12470_s16, %s12470_s16 }
 0x7bb   : > { %p12472_p10 = pnand %p12471_p13, %p10527_p8  ;;  %p12479_p1 = por %p12478_p0, %p12477_p6 }
 0x7bd   : > { %p12473_p11 = pneg %p12472_p10 }
 0x7bf   : > { %p12480_p4 = pnand %p12479_p1, %p12473_p11 }
 0x7c1   : > { %12483 = shalt.err (!%p12480_p4)
}
 0x7c2   : > { %s14322_s17 = sld [smem:[#allocation27_spill]] }
 0x7c8   : > { %s14323_s28 = smov %s14322_s17  ;;  %s12484_s9 = scalar_lea.hbm %s14322_s17, 32 }
 0x7c9   : > { %p12485_p2 = scmp.ne.s32.totalorder %s14323_s28, %s12484_s9  ;;  %p12490_p9 = scmp.lt.u32.totalorder %s12484_s9, %s14323_s28 }
 0x7cb   : > { %p12486_p7 = pnand %p12485_p2, %p10527_p8 }
 0x7cd   : > { %p12487_p5 = pneg %p12486_p7 }
 0x7cf   : > { %p12492_p3 = pnand %p12490_p9, %p12487_p5 }
 0x7d1   : > { %12495 = shalt.err (!%p12492_p3)
}
 0x7d2   : > { %10478 = dma.vmem_to_hbm [thread:$0]  (%p10527_p8), %s8991_s21, 32, %s14323_s28, [#allocation5]  }
 0x7d3   : > { %12533 = dma.done.wait (%p10527_p8), [#allocation5], 32  }
 0x7d4   : > { %12535 = vsyncadd (%p10527_p8), [#allocation5], 4294967264 }
 0x7d5 PF: > { %p26_p12 = scmp.ge.s32.totalorder %s12850_s25, 6   ;;  %s14324_s17 = smov %s12542_s18 }
 0x7d6   : > { %s14325_s18 = smov %s12546_s19  ;;  %s14326_s19 = smov %s12862_s12 }
 0x7d7   : > { %s14327_s20 = smov %s12850_s25  ;;  %28 = sbr.rel (!%p26_p12) target bundleno = 12 (0xc), region = 144 }
 0x7de   :  { %9003 = vsyncpa [#allocation4], 1 }
 0x7df   :  { %9005 = vsyncpa [#allocation4 + $0x1], 1 }
 0x7e0   :  { %9006 = vsyncpa [#allocation7], 1 }
 0x7e1   :  { %9007 = vsyncpa [#allocation10], 1 }
 0x7e2   :  { %9008 = vsyncpa [#allocation13], 1 }
 0x7e3   :  { %9009 = vsyncpa [#allocation16], 1 }
 0x7e4   :  { %9010 = vsyncpa [#allocation5], 1 }
 0x7e5   :  { %9012 = vsyncpa [#allocation5 + $0x1], 1 }

</bundles_post_ra>
